<compile_context>
chip_gen: v7x
topology: tpu7x:2x2x1
jax: 0.10.0
libtpu: 0.0.40
codegen_flags: <defaults>
</compile_context>

<pallas_src>
import numpy as np
import jax
import jax.numpy as jnp
from jax import lax
from jax.experimental import pallas as pl
from jax.experimental.pallas import tpu as pltpu

LOG_NORM_CONST = float(-0.5 * np.log(2.0 * np.pi))

# ---- config (SeGMVAE defaults, small batch/sample sizes) ----------------------
INPUT_DIM = 1024
HIDDEN = 64
LAST_HIDDEN = 2 * 2 * HIDDEN        # 256
LATENT = 64                         # == hidden_size in the reference defaults
COMPONENTS = 20
KP = 128                            # lane-padded component axis (20 -> 128)
MC = 10                             # train_mc_sample_size
EM_ITERS = 5                        # unsupervised_em_iters
BATCH = 2
SAMPLE = 8
DEC_CHUNK = 256                     # decoder output-column chunk (4 chunks of 1024)


# ------------------------------ fused Pallas kernel -----------------------------
def _fused_kernel(sel_ref,                       # SMEM (B, COMPONENTS) scalar prefetch
                  x_ref, eps_ref,                # per-batch blocks (S,Din), (MC*S,L)
                  wf_ref, bf_ref, dw_ref, db_ref,  # resident weights
                  rec_ref, kld_ref, kl_ref,      # per-batch scalar partials (1,1)
                  z_sc, mean_sc):                # VMEM scratch (MC*S,L), (KP,L)
    b = pl.program_id(0)
    s, din = x_ref.shape
    n, d = eps_ref.shape                         # n = MC*S, d = LATENT
    mc = n // s
    kp = mean_sc.shape[0]

    # ---- folded encoder + q_z_given_x: q_mean = X @ W_fused + b_fused (bf16 MXU)
    xb = x_ref[...]                                                  # (S, Din) f32
    qm = jnp.dot(xb.astype(jnp.bfloat16), wf_ref[...],
                 preferred_element_type=jnp.float32) + bf_ref[...]   # (S, L) f32

    # KLD epilogue (reference applies the same Sequential twice => logvar == mean)
    kld_ref[...] = (-0.5 * jnp.sum(1.0 + qm - qm * qm - jnp.exp(qm))).reshape(1, 1)

    # ---- reparametrize (mc-major rows: row = mc*S + s) -------------------------
    eps3 = eps_ref[...].reshape(mc, s, d)
    z3 = eps3 * jnp.exp(0.5 * qm)[None, :, :] + qm[None, :, :]       # (MC, S, L)
    z = z3.reshape(n, d)                                             # (N, L) f32
    z_sc[...] = z                                                    # for dynamic gather

    # ---- decoder + sum-of-squared-errors, chunked over output columns ----------
    zb = z.astype(jnp.bfloat16)
    nchunk = din // DEC_CHUNK
    sse = jnp.float32(0.0)
    for c in range(nchunk):                      # 4 static chunks; each ends in a scalar
        lo, hi = c * DEC_CHUNK, (c + 1) * DEC_CHUNK
        xr = jnp.dot(zb, dw_ref[:, lo:hi],
                     preferred_element_type=jnp.float32) + db_ref[:, lo:hi]
        diff = xr.reshape(mc, s, DEC_CHUNK) - xb[:, lo:hi][None, :, :]
        sse = sse + jnp.sum(diff * diff)
    rec_ref[...] = sse.reshape(1, 1)

    # ---- initial GMM means: gather 20 prefetched rows of z (in VMEM) -----------
    mean_sc[...] = jnp.zeros_like(mean_sc)       # pad slots stay exactly zero
    for k in range(COMPONENTS):
        idx = sel_ref[b, k]
        mean_sc[k:k + 1, :] = z_sc[pl.ds(idx, 1), :]

    lane = lax.broadcasted_iota(jnp.int32, (1, kp), 1)
    valid = lane < COMPONENTS
    pi = jnp.where(valid, 1.0 / COMPONENTS, 0.0).astype(jnp.float32)  # (1, KP)
    mean = mean_sc[...]                                               # (KP, L)
    z2 = jnp.sum(z * z, axis=-1, keepdims=True)                       # (N, 1) invariant

    def log_like(pi_, mean_):
        log_pi = jnp.where(valid, jnp.log(jnp.maximum(pi_, 1e-30)), -1e30)
        m2 = jnp.sum(mean_ * mean_, axis=-1, keepdims=True)           # (KP, 1)
        zm = lax.dot_general(z, mean_, (((1,), (1,)), ((), ())),
                             preferred_element_type=jnp.float32)      # (N, KP)
        return -0.5 * (z2 + m2.T - 2.0 * zm) + d * LOG_NORM_CONST + log_pi

    # ---- 5 EM iterations, statically unrolled, f32, divides on the EUP ---------
    for _ in range(EM_ITERS):
        ll = log_like(pi, mean)
        mx = jnp.max(ll, axis=-1, keepdims=True)
        p = jnp.exp(ll - mx)
        post = p * pl.reciprocal(jnp.sum(p, axis=-1, keepdims=True), approx=True)
        nk = jnp.sum(post, axis=0, keepdims=True)                     # (1, KP)
        pi = nk * pl.reciprocal(jnp.sum(nk, keepdims=True), approx=True)   # fix_pi=False
        psum = lax.dot_general(post, z, (((0,), (0,)), ((), ())),
                               preferred_element_type=jnp.float32)    # (KP, L)
        mean = psum * pl.reciprocal(nk.T + 1e-10, approx=True)        # eps: no NaN means

    # ---- kl epilogue: sum(log_qz - log_pz) for this batch (logvar == q_mean) ----
    qm_b = qm[None, :, :]
    diffq = z3 - qm_b
    log_qz_sum = (jnp.sum(-0.5 * (qm_b + diffq * diffq * jnp.exp(-qm_b)))
                  + n * d * LOG_NORM_CONST)
    ll = log_like(pi, mean)
    mx = jnp.max(ll, axis=-1, keepdims=True)
    log_pz = mx + jnp.log(jnp.sum(jnp.exp(ll - mx), axis=-1, keepdims=True))  # (N, 1)
    kl_ref[...] = (log_qz_sum - jnp.sum(log_pz)).reshape(1, 1)


def fused_forward_pallas(X, eps, sel, fp):
    B, S, Din = X.shape
    N, L = eps.shape[1], eps.shape[2]
    grid_spec = pltpu.PrefetchScalarGridSpec(
        num_scalar_prefetch=1,
        grid=(B,),
        in_specs=[
            pl.BlockSpec((None, S, Din), lambda i, _s: (i, 0, 0)),   # X per batch
            pl.BlockSpec((None, N, L), lambda i, _s: (i, 0, 0)),     # eps per batch
            pl.BlockSpec((Din, L), lambda i, _s: (0, 0)),            # w_fused (resident)
            pl.BlockSpec((1, L), lambda i, _s: (0, 0)),              # b_fused
            pl.BlockSpec((L, Din), lambda i, _s: (0, 0)),            # dec_w (resident)
            pl.BlockSpec((1, Din), lambda i, _s: (0, 0)),            # dec_b
        ],
        out_specs=(
            pl.BlockSpec((None, 1, 1), lambda i, _s: (i, 0, 0)),     # rec partial
            pl.BlockSpec((None, 1, 1), lambda i, _s: (i, 0, 0)),     # KLD partial
            pl.BlockSpec((None, 1, 1), lambda i, _s: (i, 0, 0)),     # kl partial
        ),
        scratch_shapes=[pltpu.VMEM((N, L), jnp.float32),
                        pltpu.VMEM((KP, L), jnp.float32)],
    )
    return pl.pallas_call(
        _fused_kernel,
        grid_spec=grid_spec,
        out_shape=(jax.ShapeDtypeStruct((B, 1, 1), jnp.float32),) * 3,
        compiler_params=pltpu.CompilerParams(dimension_semantics=("parallel",)),
    )(sel, X, eps, fp["w_fused"], fp["b_fused"], fp["dec_w"], fp["dec_b"])


# ---------------------------- parameters & forward -----------------------------
def _linear_init(key, fan_in, fan_out):
    # PyTorch nn.Linear default: U(-1/sqrt(fan_in), 1/sqrt(fan_in)); weight stored (in, out)
    k1, k2 = jax.random.split(key)
    bound = 1.0 / np.sqrt(fan_in)
    w = jax.random.uniform(k1, (fan_in, fan_out), jnp.float32, -bound, bound)
    b = jax.random.uniform(k2, (fan_out,), jnp.float32, -bound, bound)
    return w, b


def init_params(key):
    k = jax.random.split(key, 3)
    # TODO(synk): Encoder/Decoder class definitions are not in the provided source;
    # modeled deterministically as single Linear layers with the implied in/out dims.
    enc_w, enc_b = _linear_init(k[0], INPUT_DIM, LAST_HIDDEN)
    qz_w, qz_b = _linear_init(k[1], LAST_HIDDEN, HIDDEN)
    dec_w, dec_b = _linear_init(k[2], LATENT, INPUT_DIM)
    return dict(enc_w=enc_w, enc_b=enc_b, qz_w=qz_w, qz_b=qz_b,
                dec_w=dec_w, dec_b=dec_b)


def prepare_fused(params):
    # Pre-fold encoder Linear and q_z_given_x Linear (valid only while the encoder is
    # modeled as a bare Linear, see TODO above); feed the MXU bf16 weights.
    w_fused = params["enc_w"] @ params["qz_w"]                         # (Din, L)
    b_fused = params["enc_b"] @ params["qz_w"] + params["qz_b"]        # (L,)
    return dict(
        w_fused=w_fused.astype(jnp.bfloat16),
        b_fused=b_fused.reshape(1, -1).astype(jnp.float32),
        dec_w=params["dec_w"].astype(jnp.bfloat16),
        dec_b=params["dec_b"].reshape(1, -1).astype(jnp.float32),
    )


def forward(fused_params, X, key):
    B, S, Din = X.shape

    # plain-JAX RNG glue: reparametrization noise (mc-major rows) and, per batch,
    # 20 distinct row indices into the N = MC*S latent samples for the GMM init means
    k_eps, k_sel = jax.random.split(key)
    eps = jax.random.normal(k_eps, (B, MC * S, LATENT), jnp.float32)
    sel = jax.vmap(lambda k: jax.random.permutation(k, MC * S)[:COMPONENTS])(
        jax.random.split(k_sel, B)).astype(jnp.int32)                  # (B, 20)

    rec, kld, kl = fused_forward_pallas(X, eps, sel, fused_params)     # each (B,1,1)

    rec_loss = jnp.sum(rec)
    KLD = jnp.sum(kld)
    kl_loss = jnp.sum(kl) / (B * S * MC)
    return rec_loss, 0.005 * KLD - kl_loss


# ------------------------------------ main --------------------------------------
if __name__ == "__main__":
    root = jax.random.PRNGKey(0)
    k_param, k_data, k_fwd = jax.random.split(root, 3)

    params = init_params(k_param)
    fused_params = prepare_fused(params)
    X = jax.random.normal(k_data, (BATCH, SAMPLE, INPUT_DIM), jnp.float32)

    rec_loss, kl_term = jax.jit(forward)(fused_params, X, k_fwd)
    jax.block_until_ready((rec_loss, kl_term))
    assert np.isfinite(float(rec_loss)) and np.isfinite(float(kl_term))
    print("KERNEL_OK")
</pallas_src>

<mosaic_0001>
module attributes {stable_mosaic.version = 11 : i64} {
  func.func @_fused_kernel(%arg0: i32, %arg1: memref<2x20xi32, #tpu.memory_space<smem>>, %arg2: memref<1x8x1024xf32, #tpu.memory_space<vmem>>, %arg3: memref<1x80x64xf32, #tpu.memory_space<vmem>>, %arg4: memref<1024x64xbf16, #tpu.memory_space<vmem>>, %arg5: memref<1x64xf32, #tpu.memory_space<vmem>>, %arg6: memref<64x1024xbf16, #tpu.memory_space<vmem>>, %arg7: memref<1x1024xf32, #tpu.memory_space<vmem>>, %arg8: memref<1x1x1xf32, #tpu.memory_space<vmem>>, %arg9: memref<1x1x1xf32, #tpu.memory_space<vmem>>, %arg10: memref<1x1x1xf32, #tpu.memory_space<vmem>>, %arg11: memref<80x64xf32, #tpu.memory_space<vmem>>, %arg12: memref<128x64xf32, #tpu.memory_space<vmem>>) attributes {dimension_semantics = [#tpu.dimension_semantics<parallel>], iteration_bounds = array<i64: 2>, scalar_prefetch = 1 : i64, scratch_operands = 2 : i64, tpu.core_type = #tpu.core_type<tc>, window_params = [{transform_indices = @transform_0, window_bounds = array<i64: 1, 8, 1024>}, {transform_indices = @transform_1, window_bounds = array<i64: 1, 80, 64>}, {pipeline_mode = #tpu.pipeline_mode<synchronous>, transform_indices = @transform_2, window_bounds = array<i64: 1024, 64>}, {pipeline_mode = #tpu.pipeline_mode<synchronous>, transform_indices = @transform_3, window_bounds = array<i64: 1, 64>}, {pipeline_mode = #tpu.pipeline_mode<synchronous>, transform_indices = @transform_4, window_bounds = array<i64: 64, 1024>}, {pipeline_mode = #tpu.pipeline_mode<synchronous>, transform_indices = @transform_5, window_bounds = array<i64: 1, 1024>}, {transform_indices = @transform_6, window_bounds = array<i64: 1, 1, 1>}, {transform_indices = @transform_7, window_bounds = array<i64: 1, 1, 1>}, {transform_indices = @transform_8, window_bounds = array<i64: 1, 1, 1>}]} {
    %c0 = arith.constant 0 : index
    %c0_0 = arith.constant 0 : index
    %c0_1 = arith.constant 0 : index
    %0 = vector.load %arg2[%c0, %c0_0, %c0_1] : memref<1x8x1024xf32, #tpu.memory_space<vmem>>, vector<1x8x1024xf32>
    %1 = vector.shape_cast %0 : vector<1x8x1024xf32> to vector<8x1024xf32>
    %2 = arith.truncf %1 : vector<8x1024xf32> to vector<8x1024xbf16>
    %c0_2 = arith.constant 0 : index
    %c0_3 = arith.constant 0 : index
    %3 = vector.load %arg4[%c0_2, %c0_3] : memref<1024x64xbf16, #tpu.memory_space<vmem>>, vector<1024x64xbf16>
    %cst = arith.constant dense<0.000000e+00> : vector<8x64xf32>
    %4 = tpu.matmul %2, %3, %cst {dimension_numbers = #tpu.dot_dimension_numbers<[1], [0], [0], [1], [0, 0, 1, 1], [], []>} : vector<8x1024xbf16>, vector<1024x64xbf16>, vector<8x64xf32> -> vector<8x64xf32>
    %c0_4 = arith.constant 0 : index
    %c0_5 = arith.constant 0 : index
    %5 = vector.load %arg5[%c0_4, %c0_5] : memref<1x64xf32, #tpu.memory_space<vmem>>, vector<1x64xf32>
    %6 = vector.broadcast %5 : vector<1x64xf32> to vector<8x64xf32>
    %7 = arith.addf %4, %6 : vector<8x64xf32>
    %cst_6 = arith.constant 1.000000e+00 : f32
    %8 = vector.broadcast %cst_6 : f32 to vector<8x64xf32>
    %9 = arith.addf %8, %7 : vector<8x64xf32>
    %10 = arith.mulf %7, %7 : vector<8x64xf32>
    %11 = arith.subf %9, %10 : vector<8x64xf32>
    %12 = math.exp %7 : vector<8x64xf32>
    %13 = arith.subf %11, %12 : vector<8x64xf32>
    %14 = vector.shape_cast %13 : vector<8x64xf32> to vector<1x8x64xf32>
    %cst_7 = arith.constant dense<0.000000e+00> : vector<1xf32>
    %15 = vector.multi_reduction <add>, %14, %cst_7 [1, 2] : vector<1x8x64xf32> to vector<1xf32>
    %16 = vector.shape_cast %15 : vector<1xf32> to vector<1x1x1xf32>
    %17 = vector.extract %16[0, 0, 0] : f32 from vector<1x1x1xf32>
    %cst_8 = arith.constant -5.000000e-01 : f32
    %18 = arith.mulf %cst_8, %17 : f32
    %19 = vector.broadcast %18 : f32 to vector<1x1xf32>
    %c0_9 = arith.constant 0 : index
    %c0_10 = arith.constant 0 : index
    %c0_11 = arith.constant 0 : index
    %20 = vector.load %arg9[%c0_9, %c0_10, %c0_11] : memref<1x1x1xf32, #tpu.memory_space<vmem>>, vector<1x1x1xf32>
    %21 = vector.shape_cast %20 : vector<1x1x1xf32> to vector<1x1xf32>
    %22 = vector.shape_cast %19 : vector<1x1xf32> to vector<1x1x1xf32>
    tpu.vector_store %arg9[%c0_9, %c0_10, %c0_11], %22 {strides = array<i32>} : memref<1x1x1xf32, #tpu.memory_space<vmem>>, vector<1x1x1xf32>,
    %c0_12 = arith.constant 0 : index
    %c0_13 = arith.constant 0 : index
    %c0_14 = arith.constant 0 : index
    %23 = vector.load %arg3[%c0_12, %c0_13, %c0_14] : memref<1x80x64xf32, #tpu.memory_space<vmem>>, vector<1x80x64xf32>
    %24 = vector.shape_cast %23 : vector<1x80x64xf32> to vector<80x64xf32>
    %25 = vector.shape_cast %24 : vector<80x64xf32> to vector<10x8x64xf32>
    %cst_15 = arith.constant 5.000000e-01 : f32
    %26 = vector.broadcast %cst_15 : f32 to vector<8x64xf32>
    %27 = arith.mulf %26, %7 : vector<8x64xf32>
    %28 = math.exp %27 : vector<8x64xf32>
    %29 = vector.shape_cast %28 : vector<8x64xf32> to vector<1x8x64xf32>
    %30 = vector.broadcast %29 : vector<1x8x64xf32> to vector<10x8x64xf32>
    %31 = arith.mulf %25, %30 : vector<10x8x64xf32>
    %32 = vector.shape_cast %7 : vector<8x64xf32> to vector<1x8x64xf32>
    %33 = vector.broadcast %32 : vector<1x8x64xf32> to vector<10x8x64xf32>
    %34 = arith.addf %31, %33 : vector<10x8x64xf32>
    %35 = vector.shape_cast %34 : vector<10x8x64xf32> to vector<80x64xf32>
    %c0_16 = arith.constant 0 : index
    %c0_17 = arith.constant 0 : index
    %36 = vector.load %arg11[%c0_16, %c0_17] : memref<80x64xf32, #tpu.memory_space<vmem>>, vector<80x64xf32>
    tpu.vector_store %arg11[%c0_16, %c0_17], %35 {strides = array<i32>} : memref<80x64xf32, #tpu.memory_space<vmem>>, vector<80x64xf32>,
    %37 = arith.truncf %35 : vector<80x64xf32> to vector<80x64xbf16>
    %c0_18 = arith.constant 0 : index
    %c0_19 = arith.constant 0 : index
    %38 = vector.load %arg6[%c0_18, %c0_19] : memref<64x1024xbf16, #tpu.memory_space<vmem>>, vector<64x256xbf16>
    %cst_20 = arith.constant dense<0.000000e+00> : vector<80x256xf32>
    %39 = tpu.matmul %37, %38, %cst_20 {dimension_numbers = #tpu.dot_dimension_numbers<[1], [0], [0], [1], [0, 0, 1, 1], [], []>} : vector<80x64xbf16>, vector<64x256xbf16>, vector<80x256xf32> -> vector<80x256xf32>
    %c0_21 = arith.constant 0 : index
    %c0_22 = arith.constant 0 : index
    %40 = vector.load %arg7[%c0_21, %c0_22] : memref<1x1024xf32, #tpu.memory_space<vmem>>, vector<1x256xf32>
    %41 = vector.broadcast %40 : vector<1x256xf32> to vector<80x256xf32>
    %42 = arith.addf %39, %41 : vector<80x256xf32>
    %43 = vector.shape_cast %42 : vector<80x256xf32> to vector<10x8x256xf32>
    %44 = vector.extract_strided_slice %1 {offsets = [0, 0], sizes = [8, 256], strides = [1, 1]} : vector<8x1024xf32> to vector<8x256xf32>
    %45 = vector.shape_cast %44 : vector<8x256xf32> to vector<1x8x256xf32>
    %46 = vector.broadcast %45 : vector<1x8x256xf32> to vector<10x8x256xf32>
    %47 = arith.subf %43, %46 : vector<10x8x256xf32>
    %48 = arith.mulf %47, %47 : vector<10x8x256xf32>
    %49 = vector.shape_cast %48 : vector<10x8x256xf32> to vector<1x10x8x256xf32>
    %cst_23 = arith.constant dense<0.000000e+00> : vector<1xf32>
    %50 = vector.multi_reduction <add>, %49, %cst_23 [1, 2, 3] : vector<1x10x8x256xf32> to vector<1xf32>
    %51 = vector.shape_cast %50 : vector<1xf32> to vector<1x1x1x1xf32>
    %52 = vector.extract %51[0, 0, 0, 0] : f32 from vector<1x1x1x1xf32>
    %cst_24 = arith.constant 0.000000e+00 : f32
    %53 = arith.addf %cst_24, %52 : f32
    %c0_25 = arith.constant 0 : index
    %c256 = arith.constant 256 : index
    %54 = vector.load %arg6[%c0_25, %c256] : memref<64x1024xbf16, #tpu.memory_space<vmem>>, vector<64x256xbf16>
    %cst_26 = arith.constant dense<0.000000e+00> : vector<80x256xf32>
    %55 = tpu.matmul %37, %54, %cst_26 {dimension_numbers = #tpu.dot_dimension_numbers<[1], [0], [0], [1], [0, 0, 1, 1], [], []>} : vector<80x64xbf16>, vector<64x256xbf16>, vector<80x256xf32> -> vector<80x256xf32>
    %c0_27 = arith.constant 0 : index
    %c256_28 = arith.constant 256 : index
    %56 = vector.load %arg7[%c0_27, %c256_28] : memref<1x1024xf32, #tpu.memory_space<vmem>>, vector<1x256xf32>
    %57 = vector.broadcast %56 : vector<1x256xf32> to vector<80x256xf32>
    %58 = arith.addf %55, %57 : vector<80x256xf32>
    %59 = vector.shape_cast %58 : vector<80x256xf32> to vector<10x8x256xf32>
    %60 = vector.extract_strided_slice %1 {offsets = [0, 256], sizes = [8, 256], strides = [1, 1]} : vector<8x1024xf32> to vector<8x256xf32>
    %61 = vector.shape_cast %60 : vector<8x256xf32> to vector<1x8x256xf32>
    %62 = vector.broadcast %61 : vector<1x8x256xf32> to vector<10x8x256xf32>
    %63 = arith.subf %59, %62 : vector<10x8x256xf32>
    %64 = arith.mulf %63, %63 : vector<10x8x256xf32>
    %65 = vector.shape_cast %64 : vector<10x8x256xf32> to vector<1x10x8x256xf32>
    %cst_29 = arith.constant dense<0.000000e+00> : vector<1xf32>
    %66 = vector.multi_reduction <add>, %65, %cst_29 [1, 2, 3] : vector<1x10x8x256xf32> to vector<1xf32>
    %67 = vector.shape_cast %66 : vector<1xf32> to vector<1x1x1x1xf32>
    %68 = vector.extract %67[0, 0, 0, 0] : f32 from vector<1x1x1x1xf32>
    %69 = arith.addf %53, %68 : f32
    %c0_30 = arith.constant 0 : index
    %c512 = arith.constant 512 : index
    %70 = vector.load %arg6[%c0_30, %c512] : memref<64x1024xbf16, #tpu.memory_space<vmem>>, vector<64x256xbf16>
    %cst_31 = arith.constant dense<0.000000e+00> : vector<80x256xf32>
    %71 = tpu.matmul %37, %70, %cst_31 {dimension_numbers = #tpu.dot_dimension_numbers<[1], [0], [0], [1], [0, 0, 1, 1], [], []>} : vector<80x64xbf16>, vector<64x256xbf16>, vector<80x256xf32> -> vector<80x256xf32>
    %c0_32 = arith.constant 0 : index
    %c512_33 = arith.constant 512 : index
    %72 = vector.load %arg7[%c0_32, %c512_33] : memref<1x1024xf32, #tpu.memory_space<vmem>>, vector<1x256xf32>
    %73 = vector.broadcast %72 : vector<1x256xf32> to vector<80x256xf32>
    %74 = arith.addf %71, %73 : vector<80x256xf32>
    %75 = vector.shape_cast %74 : vector<80x256xf32> to vector<10x8x256xf32>
    %76 = vector.extract_strided_slice %1 {offsets = [0, 512], sizes = [8, 256], strides = [1, 1]} : vector<8x1024xf32> to vector<8x256xf32>
    %77 = vector.shape_cast %76 : vector<8x256xf32> to vector<1x8x256xf32>
    %78 = vector.broadcast %77 : vector<1x8x256xf32> to vector<10x8x256xf32>
    %79 = arith.subf %75, %78 : vector<10x8x256xf32>
    %80 = arith.mulf %79, %79 : vector<10x8x256xf32>
    %81 = vector.shape_cast %80 : vector<10x8x256xf32> to vector<1x10x8x256xf32>
    %cst_34 = arith.constant dense<0.000000e+00> : vector<1xf32>
    %82 = vector.multi_reduction <add>, %81, %cst_34 [1, 2, 3] : vector<1x10x8x256xf32> to vector<1xf32>
    %83 = vector.shape_cast %82 : vector<1xf32> to vector<1x1x1x1xf32>
    %84 = vector.extract %83[0, 0, 0, 0] : f32 from vector<1x1x1x1xf32>
    %85 = arith.addf %69, %84 : f32
    %c0_35 = arith.constant 0 : index
    %c768 = arith.constant 768 : index
    %86 = vector.load %arg6[%c0_35, %c768] : memref<64x1024xbf16, #tpu.memory_space<vmem>>, vector<64x256xbf16>
    %cst_36 = arith.constant dense<0.000000e+00> : vector<80x256xf32>
    %87 = tpu.matmul %37, %86, %cst_36 {dimension_numbers = #tpu.dot_dimension_numbers<[1], [0], [0], [1], [0, 0, 1, 1], [], []>} : vector<80x64xbf16>, vector<64x256xbf16>, vector<80x256xf32> -> vector<80x256xf32>
    %c0_37 = arith.constant 0 : index
    %c768_38 = arith.constant 768 : index
    %88 = vector.load %arg7[%c0_37, %c768_38] : memref<1x1024xf32, #tpu.memory_space<vmem>>, vector<1x256xf32>
    %89 = vector.broadcast %88 : vector<1x256xf32> to vector<80x256xf32>
    %90 = arith.addf %87, %89 : vector<80x256xf32>
    %91 = vector.shape_cast %90 : vector<80x256xf32> to vector<10x8x256xf32>
    %92 = vector.extract_strided_slice %1 {offsets = [0, 768], sizes = [8, 256], strides = [1, 1]} : vector<8x1024xf32> to vector<8x256xf32>
    %93 = vector.shape_cast %92 : vector<8x256xf32> to vector<1x8x256xf32>
    %94 = vector.broadcast %93 : vector<1x8x256xf32> to vector<10x8x256xf32>
    %95 = arith.subf %91, %94 : vector<10x8x256xf32>
    %96 = arith.mulf %95, %95 : vector<10x8x256xf32>
    %97 = vector.shape_cast %96 : vector<10x8x256xf32> to vector<1x10x8x256xf32>
    %cst_39 = arith.constant dense<0.000000e+00> : vector<1xf32>
    %98 = vector.multi_reduction <add>, %97, %cst_39 [1, 2, 3] : vector<1x10x8x256xf32> to vector<1xf32>
    %99 = vector.shape_cast %98 : vector<1xf32> to vector<1x1x1x1xf32>
    %100 = vector.extract %99[0, 0, 0, 0] : f32 from vector<1x1x1x1xf32>
    %101 = arith.addf %85, %100 : f32
    %102 = vector.broadcast %101 : f32 to vector<1x1xf32>
    %c0_40 = arith.constant 0 : index
    %c0_41 = arith.constant 0 : index
    %c0_42 = arith.constant 0 : index
    %103 = vector.load %arg8[%c0_40, %c0_41, %c0_42] : memref<1x1x1xf32, #tpu.memory_space<vmem>>, vector<1x1x1xf32>
    %104 = vector.shape_cast %103 : vector<1x1x1xf32> to vector<1x1xf32>
    %105 = vector.shape_cast %102 : vector<1x1xf32> to vector<1x1x1xf32>
    tpu.vector_store %arg8[%c0_40, %c0_41, %c0_42], %105 {strides = array<i32>} : memref<1x1x1xf32, #tpu.memory_space<vmem>>, vector<1x1x1xf32>,
    %cst_43 = arith.constant 0.000000e+00 : f32
    %106 = vector.broadcast %cst_43 : f32 to vector<128x64xf32>
    %c0_44 = arith.constant 0 : index
    %c0_45 = arith.constant 0 : index
    %107 = vector.load %arg12[%c0_44, %c0_45] : memref<128x64xf32, #tpu.memory_space<vmem>>, vector<128x64xf32>
    tpu.vector_store %arg12[%c0_44, %c0_45], %106 {strides = array<i32>} : memref<128x64xf32, #tpu.memory_space<vmem>>, vector<128x64xf32>,
    %108 = arith.index_cast %arg0 : i32 to index
    %c0_46 = arith.constant 0 : index
    %109 = memref.load %arg1[%108, %c0_46] : memref<2x20xi32, #tpu.memory_space<smem>>
    %110 = arith.index_cast %109 : i32 to index
    %c0_47 = arith.constant 0 : index
    %111 = vector.load %arg11[%110, %c0_47] : memref<80x64xf32, #tpu.memory_space<vmem>>, vector<1x64xf32>
    %c0_48 = arith.constant 0 : index
    %c0_49 = arith.constant 0 : index
    %112 = vector.load %arg12[%c0_48, %c0_49] : memref<128x64xf32, #tpu.memory_space<vmem>>, vector<1x64xf32>
    tpu.vector_store %arg12[%c0_48, %c0_49], %111 {strides = array<i32>} : memref<128x64xf32, #tpu.memory_space<vmem>>, vector<1x64xf32>,
    %113 = arith.index_cast %arg0 : i32 to index
    %c1 = arith.constant 1 : index
    %114 = memref.load %arg1[%113, %c1] : memref<2x20xi32, #tpu.memory_space<smem>>
    %115 = arith.index_cast %114 : i32 to index
    %c0_50 = arith.constant 0 : index
    %116 = vector.load %arg11[%115, %c0_50] : memref<80x64xf32, #tpu.memory_space<vmem>>, vector<1x64xf32>
    %c1_51 = arith.constant 1 : index
    %c0_52 = arith.constant 0 : index
    %117 = vector.load %arg12[%c1_51, %c0_52] : memref<128x64xf32, #tpu.memory_space<vmem>>, vector<1x64xf32>
    tpu.vector_store %arg12[%c1_51, %c0_52], %116 {strides = array<i32>} : memref<128x64xf32, #tpu.memory_space<vmem>>, vector<1x64xf32>,
    %118 = arith.index_cast %arg0 : i32 to index
    %c2 = arith.constant 2 : index
    %119 = memref.load %arg1[%118, %c2] : memref<2x20xi32, #tpu.memory_space<smem>>
    %120 = arith.index_cast %119 : i32 to index
    %c0_53 = arith.constant 0 : index
    %121 = vector.load %arg11[%120, %c0_53] : memref<80x64xf32, #tpu.memory_space<vmem>>, vector<1x64xf32>
    %c2_54 = arith.constant 2 : index
    %c0_55 = arith.constant 0 : index
    %122 = vector.load %arg12[%c2_54, %c0_55] : memref<128x64xf32, #tpu.memory_space<vmem>>, vector<1x64xf32>
    tpu.vector_store %arg12[%c2_54, %c0_55], %121 {strides = array<i32>} : memref<128x64xf32, #tpu.memory_space<vmem>>, vector<1x64xf32>,
    %123 = arith.index_cast %arg0 : i32 to index
    %c3 = arith.constant 3 : index
    %124 = memref.load %arg1[%123, %c3] : memref<2x20xi32, #tpu.memory_space<smem>>
    %125 = arith.index_cast %124 : i32 to index
    %c0_56 = arith.constant 0 : index
    %126 = vector.load %arg11[%125, %c0_56] : memref<80x64xf32, #tpu.memory_space<vmem>>, vector<1x64xf32>
    %c3_57 = arith.constant 3 : index
    %c0_58 = arith.constant 0 : index
    %127 = vector.load %arg12[%c3_57, %c0_58] : memref<128x64xf32, #tpu.memory_space<vmem>>, vector<1x64xf32>
    tpu.vector_store %arg12[%c3_57, %c0_58], %126 {strides = array<i32>} : memref<128x64xf32, #tpu.memory_space<vmem>>, vector<1x64xf32>,
    %128 = arith.index_cast %arg0 : i32 to index
    %c4 = arith.constant 4 : index
    %129 = memref.load %arg1[%128, %c4] : memref<2x20xi32, #tpu.memory_space<smem>>
    %130 = arith.index_cast %129 : i32 to index
    %c0_59 = arith.constant 0 : index
    %131 = vector.load %arg11[%130, %c0_59] : memref<80x64xf32, #tpu.memory_space<vmem>>, vector<1x64xf32>
    %c4_60 = arith.constant 4 : index
    %c0_61 = arith.constant 0 : index
    %132 = vector.load %arg12[%c4_60, %c0_61] : memref<128x64xf32, #tpu.memory_space<vmem>>, vector<1x64xf32>
    tpu.vector_store %arg12[%c4_60, %c0_61], %131 {strides = array<i32>} : memref<128x64xf32, #tpu.memory_space<vmem>>, vector<1x64xf32>,
    %133 = arith.index_cast %arg0 : i32 to index
    %c5 = arith.constant 5 : index
    %134 = memref.load %arg1[%133, %c5] : memref<2x20xi32, #tpu.memory_space<smem>>
    %135 = arith.index_cast %134 : i32 to index
    %c0_62 = arith.constant 0 : index
    %136 = vector.load %arg11[%135, %c0_62] : memref<80x64xf32, #tpu.memory_space<vmem>>, vector<1x64xf32>
    %c5_63 = arith.constant 5 : index
    %c0_64 = arith.constant 0 : index
    %137 = vector.load %arg12[%c5_63, %c0_64] : memref<128x64xf32, #tpu.memory_space<vmem>>, vector<1x64xf32>
    tpu.vector_store %arg12[%c5_63, %c0_64], %136 {strides = array<i32>} : memref<128x64xf32, #tpu.memory_space<vmem>>, vector<1x64xf32>,
    %138 = arith.index_cast %arg0 : i32 to index
    %c6 = arith.constant 6 : index
    %139 = memref.load %arg1[%138, %c6] : memref<2x20xi32, #tpu.memory_space<smem>>
    %140 = arith.index_cast %139 : i32 to index
    %c0_65 = arith.constant 0 : index
    %141 = vector.load %arg11[%140, %c0_65] : memref<80x64xf32, #tpu.memory_space<vmem>>, vector<1x64xf32>
    %c6_66 = arith.constant 6 : index
    %c0_67 = arith.constant 0 : index
    %142 = vector.load %arg12[%c6_66, %c0_67] : memref<128x64xf32, #tpu.memory_space<vmem>>, vector<1x64xf32>
    tpu.vector_store %arg12[%c6_66, %c0_67], %141 {strides = array<i32>} : memref<128x64xf32, #tpu.memory_space<vmem>>, vector<1x64xf32>,
    %143 = arith.index_cast %arg0 : i32 to index
    %c7 = arith.constant 7 : index
    %144 = memref.load %arg1[%143, %c7] : memref<2x20xi32, #tpu.memory_space<smem>>
    %145 = arith.index_cast %144 : i32 to index
    %c0_68 = arith.constant 0 : index
    %146 = vector.load %arg11[%145, %c0_68] : memref<80x64xf32, #tpu.memory_space<vmem>>, vector<1x64xf32>
    %c7_69 = arith.constant 7 : index
    %c0_70 = arith.constant 0 : index
    %147 = vector.load %arg12[%c7_69, %c0_70] : memref<128x64xf32, #tpu.memory_space<vmem>>, vector<1x64xf32>
    tpu.vector_store %arg12[%c7_69, %c0_70], %146 {strides = array<i32>} : memref<128x64xf32, #tpu.memory_space<vmem>>, vector<1x64xf32>,
    %148 = arith.index_cast %arg0 : i32 to index
    %c8 = arith.constant 8 : index
    %149 = memref.load %arg1[%148, %c8] : memref<2x20xi32, #tpu.memory_space<smem>>
    %150 = arith.index_cast %149 : i32 to index
    %c0_71 = arith.constant 0 : index
    %151 = vector.load %arg11[%150, %c0_71] : memref<80x64xf32, #tpu.memory_space<vmem>>, vector<1x64xf32>
    %c8_72 = arith.constant 8 : index
    %c0_73 = arith.constant 0 : index
    %152 = vector.load %arg12[%c8_72, %c0_73] : memref<128x64xf32, #tpu.memory_space<vmem>>, vector<1x64xf32>
    tpu.vector_store %arg12[%c8_72, %c0_73], %151 {strides = array<i32>} : memref<128x64xf32, #tpu.memory_space<vmem>>, vector<1x64xf32>,
    %153 = arith.index_cast %arg0 : i32 to index
    %c9 = arith.constant 9 : index
    %154 = memref.load %arg1[%153, %c9] : memref<2x20xi32, #tpu.memory_space<smem>>
    %155 = arith.index_cast %154 : i32 to index
    %c0_74 = arith.constant 0 : index
    %156 = vector.load %arg11[%155, %c0_74] : memref<80x64xf32, #tpu.memory_space<vmem>>, vector<1x64xf32>
    %c9_75 = arith.constant 9 : index
    %c0_76 = arith.constant 0 : index
    %157 = vector.load %arg12[%c9_75, %c0_76] : memref<128x64xf32, #tpu.memory_space<vmem>>, vector<1x64xf32>
    tpu.vector_store %arg12[%c9_75, %c0_76], %156 {strides = array<i32>} : memref<128x64xf32, #tpu.memory_space<vmem>>, vector<1x64xf32>,
    %158 = arith.index_cast %arg0 : i32 to index
    %c10 = arith.constant 10 : index
    %159 = memref.load %arg1[%158, %c10] : memref<2x20xi32, #tpu.memory_space<smem>>
    %160 = arith.index_cast %159 : i32 to index
    %c0_77 = arith.constant 0 : index
    %161 = vector.load %arg11[%160, %c0_77] : memref<80x64xf32, #tpu.memory_space<vmem>>, vector<1x64xf32>
    %c10_78 = arith.constant 10 : index
    %c0_79 = arith.constant 0 : index
    %162 = vector.load %arg12[%c10_78, %c0_79] : memref<128x64xf32, #tpu.memory_space<vmem>>, vector<1x64xf32>
    tpu.vector_store %arg12[%c10_78, %c0_79], %161 {strides = array<i32>} : memref<128x64xf32, #tpu.memory_space<vmem>>, vector<1x64xf32>,
    %163 = arith.index_cast %arg0 : i32 to index
    %c11 = arith.constant 11 : index
    %164 = memref.load %arg1[%163, %c11] : memref<2x20xi32, #tpu.memory_space<smem>>
    %165 = arith.index_cast %164 : i32 to index
    %c0_80 = arith.constant 0 : index
    %166 = vector.load %arg11[%165, %c0_80] : memref<80x64xf32, #tpu.memory_space<vmem>>, vector<1x64xf32>
    %c11_81 = arith.constant 11 : index
    %c0_82 = arith.constant 0 : index
    %167 = vector.load %arg12[%c11_81, %c0_82] : memref<128x64xf32, #tpu.memory_space<vmem>>, vector<1x64xf32>
    tpu.vector_store %arg12[%c11_81, %c0_82], %166 {strides = array<i32>} : memref<128x64xf32, #tpu.memory_space<vmem>>, vector<1x64xf32>,
    %168 = arith.index_cast %arg0 : i32 to index
    %c12 = arith.constant 12 : index
    %169 = memref.load %arg1[%168, %c12] : memref<2x20xi32, #tpu.memory_space<smem>>
    %170 = arith.index_cast %169 : i32 to index
    %c0_83 = arith.constant 0 : index
    %171 = vector.load %arg11[%170, %c0_83] : memref<80x64xf32, #tpu.memory_space<vmem>>, vector<1x64xf32>
    %c12_84 = arith.constant 12 : index
    %c0_85 = arith.constant 0 : index
    %172 = vector.load %arg12[%c12_84, %c0_85] : memref<128x64xf32, #tpu.memory_space<vmem>>, vector<1x64xf32>
    tpu.vector_store %arg12[%c12_84, %c0_85], %171 {strides = array<i32>} : memref<128x64xf32, #tpu.memory_space<vmem>>, vector<1x64xf32>,
    %173 = arith.index_cast %arg0 : i32 to index
    %c13 = arith.constant 13 : index
    %174 = memref.load %arg1[%173, %c13] : memref<2x20xi32, #tpu.memory_space<smem>>
    %175 = arith.index_cast %174 : i32 to index
    %c0_86 = arith.constant 0 : index
    %176 = vector.load %arg11[%175, %c0_86] : memref<80x64xf32, #tpu.memory_space<vmem>>, vector<1x64xf32>
    %c13_87 = arith.constant 13 : index
    %c0_88 = arith.constant 0 : index
    %177 = vector.load %arg12[%c13_87, %c0_88] : memref<128x64xf32, #tpu.memory_space<vmem>>, vector<1x64xf32>
    tpu.vector_store %arg12[%c13_87, %c0_88], %176 {strides = array<i32>} : memref<128x64xf32, #tpu.memory_space<vmem>>, vector<1x64xf32>,
    %178 = arith.index_cast %arg0 : i32 to index
    %c14 = arith.constant 14 : index
    %179 = memref.load %arg1[%178, %c14] : memref<2x20xi32, #tpu.memory_space<smem>>
    %180 = arith.index_cast %179 : i32 to index
    %c0_89 = arith.constant 0 : index
    %181 = vector.load %arg11[%180, %c0_89] : memref<80x64xf32, #tpu.memory_space<vmem>>, vector<1x64xf32>
    %c14_90 = arith.constant 14 : index
    %c0_91 = arith.constant 0 : index
    %182 = vector.load %arg12[%c14_90, %c0_91] : memref<128x64xf32, #tpu.memory_space<vmem>>, vector<1x64xf32>
    tpu.vector_store %arg12[%c14_90, %c0_91], %181 {strides = array<i32>} : memref<128x64xf32, #tpu.memory_space<vmem>>, vector<1x64xf32>,
    %183 = arith.index_cast %arg0 : i32 to index
    %c15 = arith.constant 15 : index
    %184 = memref.load %arg1[%183, %c15] : memref<2x20xi32, #tpu.memory_space<smem>>
    %185 = arith.index_cast %184 : i32 to index
    %c0_92 = arith.constant 0 : index
    %186 = vector.load %arg11[%185, %c0_92] : memref<80x64xf32, #tpu.memory_space<vmem>>, vector<1x64xf32>
    %c15_93 = arith.constant 15 : index
    %c0_94 = arith.constant 0 : index
    %187 = vector.load %arg12[%c15_93, %c0_94] : memref<128x64xf32, #tpu.memory_space<vmem>>, vector<1x64xf32>
    tpu.vector_store %arg12[%c15_93, %c0_94], %186 {strides = array<i32>} : memref<128x64xf32, #tpu.memory_space<vmem>>, vector<1x64xf32>,
    %188 = arith.index_cast %arg0 : i32 to index
    %c16 = arith.constant 16 : index
    %189 = memref.load %arg1[%188, %c16] : memref<2x20xi32, #tpu.memory_space<smem>>
    %190 = arith.index_cast %189 : i32 to index
    %c0_95 = arith.constant 0 : index
    %191 = vector.load %arg11[%190, %c0_95] : memref<80x64xf32, #tpu.memory_space<vmem>>, vector<1x64xf32>
    %c16_96 = arith.constant 16 : index
    %c0_97 = arith.constant 0 : index
    %192 = vector.load %arg12[%c16_96, %c0_97] : memref<128x64xf32, #tpu.memory_space<vmem>>, vector<1x64xf32>
    tpu.vector_store %arg12[%c16_96, %c0_97], %191 {strides = array<i32>} : memref<128x64xf32, #tpu.memory_space<vmem>>, vector<1x64xf32>,
    %193 = arith.index_cast %arg0 : i32 to index
    %c17 = arith.constant 17 : index
    %194 = memref.load %arg1[%193, %c17] : memref<2x20xi32, #tpu.memory_space<smem>>
    %195 = arith.index_cast %194 : i32 to index
    %c0_98 = arith.constant 0 : index
    %196 = vector.load %arg11[%195, %c0_98] : memref<80x64xf32, #tpu.memory_space<vmem>>, vector<1x64xf32>
    %c17_99 = arith.constant 17 : index
    %c0_100 = arith.constant 0 : index
    %197 = vector.load %arg12[%c17_99, %c0_100] : memref<128x64xf32, #tpu.memory_space<vmem>>, vector<1x64xf32>
    tpu.vector_store %arg12[%c17_99, %c0_100], %196 {strides = array<i32>} : memref<128x64xf32, #tpu.memory_space<vmem>>, vector<1x64xf32>,
    %198 = arith.index_cast %arg0 : i32 to index
    %c18 = arith.constant 18 : index
    %199 = memref.load %arg1[%198, %c18] : memref<2x20xi32, #tpu.memory_space<smem>>
    %200 = arith.index_cast %199 : i32 to index
    %c0_101 = arith.constant 0 : index
    %201 = vector.load %arg11[%200, %c0_101] : memref<80x64xf32, #tpu.memory_space<vmem>>, vector<1x64xf32>
    %c18_102 = arith.constant 18 : index
    %c0_103 = arith.constant 0 : index
    %202 = vector.load %arg12[%c18_102, %c0_103] : memref<128x64xf32, #tpu.memory_space<vmem>>, vector<1x64xf32>
    tpu.vector_store %arg12[%c18_102, %c0_103], %201 {strides = array<i32>} : memref<128x64xf32, #tpu.memory_space<vmem>>, vector<1x64xf32>,
    %203 = arith.index_cast %arg0 : i32 to index
    %c19 = arith.constant 19 : index
    %204 = memref.load %arg1[%203, %c19] : memref<2x20xi32, #tpu.memory_space<smem>>
    %205 = arith.index_cast %204 : i32 to index
    %c0_104 = arith.constant 0 : index
    %206 = vector.load %arg11[%205, %c0_104] : memref<80x64xf32, #tpu.memory_space<vmem>>, vector<1x64xf32>
    %c19_105 = arith.constant 19 : index
    %c0_106 = arith.constant 0 : index
    %207 = vector.load %arg12[%c19_105, %c0_106] : memref<128x64xf32, #tpu.memory_space<vmem>>, vector<1x64xf32>
    tpu.vector_store %arg12[%c19_105, %c0_106], %206 {strides = array<i32>} : memref<128x64xf32, #tpu.memory_space<vmem>>, vector<1x64xf32>,
    %208 = tpu.iota {dimensions = array<i32: 1>} : vector<1x128xi32>
    %c20_i32 = arith.constant 20 : i32
    %209 = vector.broadcast %c20_i32 : i32 to vector<1x128xi32>
    %210 = arith.cmpi slt, %208, %209 : vector<1x128xi32>
    %cst_107 = arith.constant 5.000000e-02 : f32
    %cst_108 = arith.constant 0.000000e+00 : f32
    %211 = vector.broadcast %cst_107 : f32 to vector<1x128xf32>
    %212 = vector.broadcast %cst_108 : f32 to vector<1x128xf32>
    %213 = arith.select %210, %211, %212 : vector<1x128xi1>, vector<1x128xf32>
    %c0_109 = arith.constant 0 : index
    %c0_110 = arith.constant 0 : index
    %214 = vector.load %arg12[%c0_109, %c0_110] : memref<128x64xf32, #tpu.memory_space<vmem>>, vector<128x64xf32>
    %215 = arith.mulf %35, %35 : vector<80x64xf32>
    %cst_111 = arith.constant dense<0.000000e+00> : vector<80xf32>
    %216 = vector.multi_reduction <add>, %215, %cst_111 [1] : vector<80x64xf32> to vector<80xf32>
    %217 = vector.shape_cast %216 : vector<80xf32> to vector<80x1xf32>
    %cst_112 = arith.constant 1.000000e-30 : f32
    %218 = vector.broadcast %cst_112 : f32 to vector<1x128xf32>
    %219 = arith.maximumf %213, %218 : vector<1x128xf32>
    %220 = math.log %219 : vector<1x128xf32>
    %cst_113 = arith.constant -1.000000e+30 : f32
    %221 = vector.broadcast %cst_113 : f32 to vector<1x128xf32>
    %222 = arith.select %210, %220, %221 : vector<1x128xi1>, vector<1x128xf32>
    %223 = arith.mulf %214, %214 : vector<128x64xf32>
    %cst_114 = arith.constant dense<0.000000e+00> : vector<128xf32>
    %224 = vector.multi_reduction <add>, %223, %cst_114 [1] : vector<128x64xf32> to vector<128xf32>
    %225 = vector.shape_cast %224 : vector<128xf32> to vector<128x1xf32>
    %cst_115 = arith.constant dense<0.000000e+00> : vector<80x128xf32>
    %226 = tpu.matmul %35, %214, %cst_115 {dimension_numbers = #tpu.dot_dimension_numbers<[1], [1], [0], [0], [0, 0, 1, 0], [], []>} : vector<80x64xf32>, vector<128x64xf32>, vector<80x128xf32> -> vector<80x128xf32>
    %227 = tpu.transpose %225, [1, 0] : vector<128x1xf32> -> vector<1x128xf32>
    %228 = vector.broadcast %217 : vector<80x1xf32> to vector<80x128xf32>
    %229 = vector.broadcast %227 : vector<1x128xf32> to vector<80x128xf32>
    %230 = arith.addf %228, %229 : vector<80x128xf32>
    %cst_116 = arith.constant 2.000000e+00 : f32
    %231 = vector.broadcast %cst_116 : f32 to vector<80x128xf32>
    %232 = arith.mulf %231, %226 : vector<80x128xf32>
    %233 = arith.subf %230, %232 : vector<80x128xf32>
    %cst_117 = arith.constant -5.000000e-01 : f32
    %234 = vector.broadcast %cst_117 : f32 to vector<80x128xf32>
    %235 = arith.mulf %234, %233 : vector<80x128xf32>
    %cst_118 = arith.constant -58.8120651 : f32
    %236 = vector.broadcast %cst_118 : f32 to vector<80x128xf32>
    %237 = arith.addf %235, %236 : vector<80x128xf32>
    %238 = vector.broadcast %222 : vector<1x128xf32> to vector<80x128xf32>
    %239 = arith.addf %237, %238 : vector<80x128xf32>
    %cst_119 = arith.constant dense<0xFF800000> : vector<80xf32>
    %240 = vector.multi_reduction <maximumf>, %239, %cst_119 [1] : vector<80x128xf32> to vector<80xf32>
    %241 = vector.shape_cast %240 : vector<80xf32> to vector<80x1xf32>
    %242 = vector.broadcast %241 : vector<80x1xf32> to vector<80x128xf32>
    %243 = arith.subf %239, %242 : vector<80x128xf32>
    %244 = math.exp %243 : vector<80x128xf32>
    %cst_120 = arith.constant dense<0.000000e+00> : vector<80xf32>
    %245 = vector.multi_reduction <add>, %244, %cst_120 [1] : vector<80x128xf32> to vector<80xf32>
    %246 = vector.shape_cast %245 : vector<80xf32> to vector<80x1xf32>
    %247 = tpu.reciprocal %246 {approx = true} : vector<80x1xf32> -> vector<80x1xf32>
    %248 = vector.broadcast %247 : vector<80x1xf32> to vector<80x128xf32>
    %249 = arith.mulf %244, %248 : vector<80x128xf32>
    %cst_121 = arith.constant dense<0.000000e+00> : vector<128xf32>
    %250 = vector.multi_reduction <add>, %249, %cst_121 [0] : vector<80x128xf32> to vector<128xf32>
    %251 = vector.shape_cast %250 : vector<128xf32> to vector<1x128xf32>
    %252 = vector.shape_cast %251 : vector<1x128xf32> to vector<1x1x128xf32>
    %cst_122 = arith.constant dense<0.000000e+00> : vector<1xf32>
    %253 = vector.multi_reduction <add>, %252, %cst_122 [1, 2] : vector<1x1x128xf32> to vector<1xf32>
    %254 = vector.shape_cast %253 : vector<1xf32> to vector<1x1x1xf32>
    %255 = vector.extract %254[0, 0, 0] : f32 from vector<1x1x1xf32>
    %256 = vector.broadcast %255 : f32 to vector<1x1xf32>
    %257 = tpu.reciprocal %256 {approx = true} : vector<1x1xf32> -> vector<1x1xf32>
    %258 = vector.broadcast %257 : vector<1x1xf32> to vector<1x128xf32>
    %259 = arith.mulf %251, %258 : vector<1x128xf32>
    %cst_123 = arith.constant dense<0.000000e+00> : vector<128x64xf32>
    %260 = tpu.matmul %249, %35, %cst_123 {dimension_numbers = #tpu.dot_dimension_numbers<[0], [0], [1], [1], [0, 1, 1, 1], [], []>} : vector<80x128xf32>, vector<80x64xf32>, vector<128x64xf32> -> vector<128x64xf32>
    %261 = tpu.transpose %251, [1, 0] : vector<1x128xf32> -> vector<128x1xf32>
    %cst_124 = arith.constant 1.000000e-10 : f32
    %262 = vector.broadcast %cst_124 : f32 to vector<128x1xf32>
    %263 = arith.addf %261, %262 : vector<128x1xf32>
    %264 = tpu.reciprocal %263 {approx = true} : vector<128x1xf32> -> vector<128x1xf32>
    %265 = vector.broadcast %264 : vector<128x1xf32> to vector<128x64xf32>
    %266 = arith.mulf %260, %265 : vector<128x64xf32>
    %cst_125 = arith.constant 1.000000e-30 : f32
    %267 = vector.broadcast %cst_125 : f32 to vector<1x128xf32>
    %268 = arith.maximumf %259, %267 : vector<1x128xf32>
    %269 = math.log %268 : vector<1x128xf32>
    %cst_126 = arith.constant -1.000000e+30 : f32
    %270 = vector.broadcast %cst_126 : f32 to vector<1x128xf32>
    %271 = arith.select %210, %269, %270 : vector<1x128xi1>, vector<1x128xf32>
    %272 = arith.mulf %266, %266 : vector<128x64xf32>
    %cst_127 = arith.constant dense<0.000000e+00> : vector<128xf32>
    %273 = vector.multi_reduction <add>, %272, %cst_127 [1] : vector<128x64xf32> to vector<128xf32>
    %274 = vector.shape_cast %273 : vector<128xf32> to vector<128x1xf32>
    %cst_128 = arith.constant dense<0.000000e+00> : vector<80x128xf32>
    %275 = tpu.matmul %35, %266, %cst_128 {dimension_numbers = #tpu.dot_dimension_numbers<[1], [1], [0], [0], [0, 0, 1, 0], [], []>} : vector<80x64xf32>, vector<128x64xf32>, vector<80x128xf32> -> vector<80x128xf32>
    %276 = tpu.transpose %274, [1, 0] : vector<128x1xf32> -> vector<1x128xf32>
    %277 = vector.broadcast %217 : vector<80x1xf32> to vector<80x128xf32>
    %278 = vector.broadcast %276 : vector<1x128xf32> to vector<80x128xf32>
    %279 = arith.addf %277, %278 : vector<80x128xf32>
    %cst_129 = arith.constant 2.000000e+00 : f32
    %280 = vector.broadcast %cst_129 : f32 to vector<80x128xf32>
    %281 = arith.mulf %280, %275 : vector<80x128xf32>
    %282 = arith.subf %279, %281 : vector<80x128xf32>
    %cst_130 = arith.constant -5.000000e-01 : f32
    %283 = vector.broadcast %cst_130 : f32 to vector<80x128xf32>
    %284 = arith.mulf %283, %282 : vector<80x128xf32>
    %cst_131 = arith.constant -58.8120651 : f32
    %285 = vector.broadcast %cst_131 : f32 to vector<80x128xf32>
    %286 = arith.addf %284, %285 : vector<80x128xf32>
    %287 = vector.broadcast %271 : vector<1x128xf32> to vector<80x128xf32>
    %288 = arith.addf %286, %287 : vector<80x128xf32>
    %cst_132 = arith.constant dense<0xFF800000> : vector<80xf32>
    %289 = vector.multi_reduction <maximumf>, %288, %cst_132 [1] : vector<80x128xf32> to vector<80xf32>
    %290 = vector.shape_cast %289 : vector<80xf32> to vector<80x1xf32>
    %291 = vector.broadcast %290 : vector<80x1xf32> to vector<80x128xf32>
    %292 = arith.subf %288, %291 : vector<80x128xf32>
    %293 = math.exp %292 : vector<80x128xf32>
    %cst_133 = arith.constant dense<0.000000e+00> : vector<80xf32>
    %294 = vector.multi_reduction <add>, %293, %cst_133 [1] : vector<80x128xf32> to vector<80xf32>
    %295 = vector.shape_cast %294 : vector<80xf32> to vector<80x1xf32>
    %296 = tpu.reciprocal %295 {approx = true} : vector<80x1xf32> -> vector<80x1xf32>
    %297 = vector.broadcast %296 : vector<80x1xf32> to vector<80x128xf32>
    %298 = arith.mulf %293, %297 : vector<80x128xf32>
    %cst_134 = arith.constant dense<0.000000e+00> : vector<128xf32>
    %299 = vector.multi_reduction <add>, %298, %cst_134 [0] : vector<80x128xf32> to vector<128xf32>
    %300 = vector.shape_cast %299 : vector<128xf32> to vector<1x128xf32>
    %301 = vector.shape_cast %300 : vector<1x128xf32> to vector<1x1x128xf32>
    %cst_135 = arith.constant dense<0.000000e+00> : vector<1xf32>
    %302 = vector.multi_reduction <add>, %301, %cst_135 [1, 2] : vector<1x1x128xf32> to vector<1xf32>
    %303 = vector.shape_cast %302 : vector<1xf32> to vector<1x1x1xf32>
    %304 = vector.extract %303[0, 0, 0] : f32 from vector<1x1x1xf32>
    %305 = vector.broadcast %304 : f32 to vector<1x1xf32>
    %306 = tpu.reciprocal %305 {approx = true} : vector<1x1xf32> -> vector<1x1xf32>
    %307 = vector.broadcast %306 : vector<1x1xf32> to vector<1x128xf32>
    %308 = arith.mulf %300, %307 : vector<1x128xf32>
    %cst_136 = arith.constant dense<0.000000e+00> : vector<128x64xf32>
    %309 = tpu.matmul %298, %35, %cst_136 {dimension_numbers = #tpu.dot_dimension_numbers<[0], [0], [1], [1], [0, 1, 1, 1], [], []>} : vector<80x128xf32>, vector<80x64xf32>, vector<128x64xf32> -> vector<128x64xf32>
    %310 = tpu.transpose %300, [1, 0] : vector<1x128xf32> -> vector<128x1xf32>
    %cst_137 = arith.constant 1.000000e-10 : f32
    %311 = vector.broadcast %cst_137 : f32 to vector<128x1xf32>
    %312 = arith.addf %310, %311 : vector<128x1xf32>
    %313 = tpu.reciprocal %312 {approx = true} : vector<128x1xf32> -> vector<128x1xf32>
    %314 = vector.broadcast %313 : vector<128x1xf32> to vector<128x64xf32>
    %315 = arith.mulf %309, %314 : vector<128x64xf32>
    %cst_138 = arith.constant 1.000000e-30 : f32
    %316 = vector.broadcast %cst_138 : f32 to vector<1x128xf32>
    %317 = arith.maximumf %308, %316 : vector<1x128xf32>
    %318 = math.log %317 : vector<1x128xf32>
    %cst_139 = arith.constant -1.000000e+30 : f32
    %319 = vector.broadcast %cst_139 : f32 to vector<1x128xf32>
    %320 = arith.select %210, %318, %319 : vector<1x128xi1>, vector<1x128xf32>
    %321 = arith.mulf %315, %315 : vector<128x64xf32>
    %cst_140 = arith.constant dense<0.000000e+00> : vector<128xf32>
    %322 = vector.multi_reduction <add>, %321, %cst_140 [1] : vector<128x64xf32> to vector<128xf32>
    %323 = vector.shape_cast %322 : vector<128xf32> to vector<128x1xf32>
    %cst_141 = arith.constant dense<0.000000e+00> : vector<80x128xf32>
    %324 = tpu.matmul %35, %315, %cst_141 {dimension_numbers = #tpu.dot_dimension_numbers<[1], [1], [0], [0], [0, 0, 1, 0], [], []>} : vector<80x64xf32>, vector<128x64xf32>, vector<80x128xf32> -> vector<80x128xf32>
    %325 = tpu.transpose %323, [1, 0] : vector<128x1xf32> -> vector<1x128xf32>
    %326 = vector.broadcast %217 : vector<80x1xf32> to vector<80x128xf32>
    %327 = vector.broadcast %325 : vector<1x128xf32> to vector<80x128xf32>
    %328 = arith.addf %326, %327 : vector<80x128xf32>
    %cst_142 = arith.constant 2.000000e+00 : f32
    %329 = vector.broadcast %cst_142 : f32 to vector<80x128xf32>
    %330 = arith.mulf %329, %324 : vector<80x128xf32>
    %331 = arith.subf %328, %330 : vector<80x128xf32>
    %cst_143 = arith.constant -5.000000e-01 : f32
    %332 = vector.broadcast %cst_143 : f32 to vector<80x128xf32>
    %333 = arith.mulf %332, %331 : vector<80x128xf32>
    %cst_144 = arith.constant -58.8120651 : f32
    %334 = vector.broadcast %cst_144 : f32 to vector<80x128xf32>
    %335 = arith.addf %333, %334 : vector<80x128xf32>
    %336 = vector.broadcast %320 : vector<1x128xf32> to vector<80x128xf32>
    %337 = arith.addf %335, %336 : vector<80x128xf32>
    %cst_145 = arith.constant dense<0xFF800000> : vector<80xf32>
    %338 = vector.multi_reduction <maximumf>, %337, %cst_145 [1] : vector<80x128xf32> to vector<80xf32>
    %339 = vector.shape_cast %338 : vector<80xf32> to vector<80x1xf32>
    %340 = vector.broadcast %339 : vector<80x1xf32> to vector<80x128xf32>
    %341 = arith.subf %337, %340 : vector<80x128xf32>
    %342 = math.exp %341 : vector<80x128xf32>
    %cst_146 = arith.constant dense<0.000000e+00> : vector<80xf32>
    %343 = vector.multi_reduction <add>, %342, %cst_146 [1] : vector<80x128xf32> to vector<80xf32>
    %344 = vector.shape_cast %343 : vector<80xf32> to vector<80x1xf32>
    %345 = tpu.reciprocal %344 {approx = true} : vector<80x1xf32> -> vector<80x1xf32>
    %346 = vector.broadcast %345 : vector<80x1xf32> to vector<80x128xf32>
    %347 = arith.mulf %342, %346 : vector<80x128xf32>
    %cst_147 = arith.constant dense<0.000000e+00> : vector<128xf32>
    %348 = vector.multi_reduction <add>, %347, %cst_147 [0] : vector<80x128xf32> to vector<128xf32>
    %349 = vector.shape_cast %348 : vector<128xf32> to vector<1x128xf32>
    %350 = vector.shape_cast %349 : vector<1x128xf32> to vector<1x1x128xf32>
    %cst_148 = arith.constant dense<0.000000e+00> : vector<1xf32>
    %351 = vector.multi_reduction <add>, %350, %cst_148 [1, 2] : vector<1x1x128xf32> to vector<1xf32>
    %352 = vector.shape_cast %351 : vector<1xf32> to vector<1x1x1xf32>
    %353 = vector.extract %352[0, 0, 0] : f32 from vector<1x1x1xf32>
    %354 = vector.broadcast %353 : f32 to vector<1x1xf32>
    %355 = tpu.reciprocal %354 {approx = true} : vector<1x1xf32> -> vector<1x1xf32>
    %356 = vector.broadcast %355 : vector<1x1xf32> to vector<1x128xf32>
    %357 = arith.mulf %349, %356 : vector<1x128xf32>
    %cst_149 = arith.constant dense<0.000000e+00> : vector<128x64xf32>
    %358 = tpu.matmul %347, %35, %cst_149 {dimension_numbers = #tpu.dot_dimension_numbers<[0], [0], [1], [1], [0, 1, 1, 1], [], []>} : vector<80x128xf32>, vector<80x64xf32>, vector<128x64xf32> -> vector<128x64xf32>
    %359 = tpu.transpose %349, [1, 0] : vector<1x128xf32> -> vector<128x1xf32>
    %cst_150 = arith.constant 1.000000e-10 : f32
    %360 = vector.broadcast %cst_150 : f32 to vector<128x1xf32>
    %361 = arith.addf %359, %360 : vector<128x1xf32>
    %362 = tpu.reciprocal %361 {approx = true} : vector<128x1xf32> -> vector<128x1xf32>
    %363 = vector.broadcast %362 : vector<128x1xf32> to vector<128x64xf32>
    %364 = arith.mulf %358, %363 : vector<128x64xf32>
    %cst_151 = arith.constant 1.000000e-30 : f32
    %365 = vector.broadcast %cst_151 : f32 to vector<1x128xf32>
    %366 = arith.maximumf %357, %365 : vector<1x128xf32>
    %367 = math.log %366 : vector<1x128xf32>
    %cst_152 = arith.constant -1.000000e+30 : f32
    %368 = vector.broadcast %cst_152 : f32 to vector<1x128xf32>
    %369 = arith.select %210, %367, %368 : vector<1x128xi1>, vector<1x128xf32>
    %370 = arith.mulf %364, %364 : vector<128x64xf32>
    %cst_153 = arith.constant dense<0.000000e+00> : vector<128xf32>
    %371 = vector.multi_reduction <add>, %370, %cst_153 [1] : vector<128x64xf32> to vector<128xf32>
    %372 = vector.shape_cast %371 : vector<128xf32> to vector<128x1xf32>
    %cst_154 = arith.constant dense<0.000000e+00> : vector<80x128xf32>
    %373 = tpu.matmul %35, %364, %cst_154 {dimension_numbers = #tpu.dot_dimension_numbers<[1], [1], [0], [0], [0, 0, 1, 0], [], []>} : vector<80x64xf32>, vector<128x64xf32>, vector<80x128xf32> -> vector<80x128xf32>
    %374 = tpu.transpose %372, [1, 0] : vector<128x1xf32> -> vector<1x128xf32>
    %375 = vector.broadcast %217 : vector<80x1xf32> to vector<80x128xf32>
    %376 = vector.broadcast %374 : vector<1x128xf32> to vector<80x128xf32>
    %377 = arith.addf %375, %376 : vector<80x128xf32>
    %cst_155 = arith.constant 2.000000e+00 : f32
    %378 = vector.broadcast %cst_155 : f32 to vector<80x128xf32>
    %379 = arith.mulf %378, %373 : vector<80x128xf32>
    %380 = arith.subf %377, %379 : vector<80x128xf32>
    %cst_156 = arith.constant -5.000000e-01 : f32
    %381 = vector.broadcast %cst_156 : f32 to vector<80x128xf32>
    %382 = arith.mulf %381, %380 : vector<80x128xf32>
    %cst_157 = arith.constant -58.8120651 : f32
    %383 = vector.broadcast %cst_157 : f32 to vector<80x128xf32>
    %384 = arith.addf %382, %383 : vector<80x128xf32>
    %385 = vector.broadcast %369 : vector<1x128xf32> to vector<80x128xf32>
    %386 = arith.addf %384, %385 : vector<80x128xf32>
    %cst_158 = arith.constant dense<0xFF800000> : vector<80xf32>
    %387 = vector.multi_reduction <maximumf>, %386, %cst_158 [1] : vector<80x128xf32> to vector<80xf32>
    %388 = vector.shape_cast %387 : vector<80xf32> to vector<80x1xf32>
    %389 = vector.broadcast %388 : vector<80x1xf32> to vector<80x128xf32>
    %390 = arith.subf %386, %389 : vector<80x128xf32>
    %391 = math.exp %390 : vector<80x128xf32>
    %cst_159 = arith.constant dense<0.000000e+00> : vector<80xf32>
    %392 = vector.multi_reduction <add>, %391, %cst_159 [1] : vector<80x128xf32> to vector<80xf32>
    %393 = vector.shape_cast %392 : vector<80xf32> to vector<80x1xf32>
    %394 = tpu.reciprocal %393 {approx = true} : vector<80x1xf32> -> vector<80x1xf32>
    %395 = vector.broadcast %394 : vector<80x1xf32> to vector<80x128xf32>
    %396 = arith.mulf %391, %395 : vector<80x128xf32>
    %cst_160 = arith.constant dense<0.000000e+00> : vector<128xf32>
    %397 = vector.multi_reduction <add>, %396, %cst_160 [0] : vector<80x128xf32> to vector<128xf32>
    %398 = vector.shape_cast %397 : vector<128xf32> to vector<1x128xf32>
    %399 = vector.shape_cast %398 : vector<1x128xf32> to vector<1x1x128xf32>
    %cst_161 = arith.constant dense<0.000000e+00> : vector<1xf32>
    %400 = vector.multi_reduction <add>, %399, %cst_161 [1, 2] : vector<1x1x128xf32> to vector<1xf32>
    %401 = vector.shape_cast %400 : vector<1xf32> to vector<1x1x1xf32>
    %402 = vector.extract %401[0, 0, 0] : f32 from vector<1x1x1xf32>
    %403 = vector.broadcast %402 : f32 to vector<1x1xf32>
    %404 = tpu.reciprocal %403 {approx = true} : vector<1x1xf32> -> vector<1x1xf32>
    %405 = vector.broadcast %404 : vector<1x1xf32> to vector<1x128xf32>
    %406 = arith.mulf %398, %405 : vector<1x128xf32>
    %cst_162 = arith.constant dense<0.000000e+00> : vector<128x64xf32>
    %407 = tpu.matmul %396, %35, %cst_162 {dimension_numbers = #tpu.dot_dimension_numbers<[0], [0], [1], [1], [0, 1, 1, 1], [], []>} : vector<80x128xf32>, vector<80x64xf32>, vector<128x64xf32> -> vector<128x64xf32>
    %408 = tpu.transpose %398, [1, 0] : vector<1x128xf32> -> vector<128x1xf32>
    %cst_163 = arith.constant 1.000000e-10 : f32
    %409 = vector.broadcast %cst_163 : f32 to vector<128x1xf32>
    %410 = arith.addf %408, %409 : vector<128x1xf32>
    %411 = tpu.reciprocal %410 {approx = true} : vector<128x1xf32> -> vector<128x1xf32>
    %412 = vector.broadcast %411 : vector<128x1xf32> to vector<128x64xf32>
    %413 = arith.mulf %407, %412 : vector<128x64xf32>
    %cst_164 = arith.constant 1.000000e-30 : f32
    %414 = vector.broadcast %cst_164 : f32 to vector<1x128xf32>
    %415 = arith.maximumf %406, %414 : vector<1x128xf32>
    %416 = math.log %415 : vector<1x128xf32>
    %cst_165 = arith.constant -1.000000e+30 : f32
    %417 = vector.broadcast %cst_165 : f32 to vector<1x128xf32>
    %418 = arith.select %210, %416, %417 : vector<1x128xi1>, vector<1x128xf32>
    %419 = arith.mulf %413, %413 : vector<128x64xf32>
    %cst_166 = arith.constant dense<0.000000e+00> : vector<128xf32>
    %420 = vector.multi_reduction <add>, %419, %cst_166 [1] : vector<128x64xf32> to vector<128xf32>
    %421 = vector.shape_cast %420 : vector<128xf32> to vector<128x1xf32>
    %cst_167 = arith.constant dense<0.000000e+00> : vector<80x128xf32>
    %422 = tpu.matmul %35, %413, %cst_167 {dimension_numbers = #tpu.dot_dimension_numbers<[1], [1], [0], [0], [0, 0, 1, 0], [], []>} : vector<80x64xf32>, vector<128x64xf32>, vector<80x128xf32> -> vector<80x128xf32>
    %423 = tpu.transpose %421, [1, 0] : vector<128x1xf32> -> vector<1x128xf32>
    %424 = vector.broadcast %217 : vector<80x1xf32> to vector<80x128xf32>
    %425 = vector.broadcast %423 : vector<1x128xf32> to vector<80x128xf32>
    %426 = arith.addf %424, %425 : vector<80x128xf32>
    %cst_168 = arith.constant 2.000000e+00 : f32
    %427 = vector.broadcast %cst_168 : f32 to vector<80x128xf32>
    %428 = arith.mulf %427, %422 : vector<80x128xf32>
    %429 = arith.subf %426, %428 : vector<80x128xf32>
    %cst_169 = arith.constant -5.000000e-01 : f32
    %430 = vector.broadcast %cst_169 : f32 to vector<80x128xf32>
    %431 = arith.mulf %430, %429 : vector<80x128xf32>
    %cst_170 = arith.constant -58.8120651 : f32
    %432 = vector.broadcast %cst_170 : f32 to vector<80x128xf32>
    %433 = arith.addf %431, %432 : vector<80x128xf32>
    %434 = vector.broadcast %418 : vector<1x128xf32> to vector<80x128xf32>
    %435 = arith.addf %433, %434 : vector<80x128xf32>
    %cst_171 = arith.constant dense<0xFF800000> : vector<80xf32>
    %436 = vector.multi_reduction <maximumf>, %435, %cst_171 [1] : vector<80x128xf32> to vector<80xf32>
    %437 = vector.shape_cast %436 : vector<80xf32> to vector<80x1xf32>
    %438 = vector.broadcast %437 : vector<80x1xf32> to vector<80x128xf32>
    %439 = arith.subf %435, %438 : vector<80x128xf32>
    %440 = math.exp %439 : vector<80x128xf32>
    %cst_172 = arith.constant dense<0.000000e+00> : vector<80xf32>
    %441 = vector.multi_reduction <add>, %440, %cst_172 [1] : vector<80x128xf32> to vector<80xf32>
    %442 = vector.shape_cast %441 : vector<80xf32> to vector<80x1xf32>
    %443 = tpu.reciprocal %442 {approx = true} : vector<80x1xf32> -> vector<80x1xf32>
    %444 = vector.broadcast %443 : vector<80x1xf32> to vector<80x128xf32>
    %445 = arith.mulf %440, %444 : vector<80x128xf32>
    %cst_173 = arith.constant dense<0.000000e+00> : vector<128xf32>
    %446 = vector.multi_reduction <add>, %445, %cst_173 [0] : vector<80x128xf32> to vector<128xf32>
    %447 = vector.shape_cast %446 : vector<128xf32> to vector<1x128xf32>
    %448 = vector.shape_cast %447 : vector<1x128xf32> to vector<1x1x128xf32>
    %cst_174 = arith.constant dense<0.000000e+00> : vector<1xf32>
    %449 = vector.multi_reduction <add>, %448, %cst_174 [1, 2] : vector<1x1x128xf32> to vector<1xf32>
    %450 = vector.shape_cast %449 : vector<1xf32> to vector<1x1x1xf32>
    %451 = vector.extract %450[0, 0, 0] : f32 from vector<1x1x1xf32>
    %452 = vector.broadcast %451 : f32 to vector<1x1xf32>
    %453 = tpu.reciprocal %452 {approx = true} : vector<1x1xf32> -> vector<1x1xf32>
    %454 = vector.broadcast %453 : vector<1x1xf32> to vector<1x128xf32>
    %455 = arith.mulf %447, %454 : vector<1x128xf32>
    %cst_175 = arith.constant dense<0.000000e+00> : vector<128x64xf32>
    %456 = tpu.matmul %445, %35, %cst_175 {dimension_numbers = #tpu.dot_dimension_numbers<[0], [0], [1], [1], [0, 1, 1, 1], [], []>} : vector<80x128xf32>, vector<80x64xf32>, vector<128x64xf32> -> vector<128x64xf32>
    %457 = tpu.transpose %447, [1, 0] : vector<1x128xf32> -> vector<128x1xf32>
    %cst_176 = arith.constant 1.000000e-10 : f32
    %458 = vector.broadcast %cst_176 : f32 to vector<128x1xf32>
    %459 = arith.addf %457, %458 : vector<128x1xf32>
    %460 = tpu.reciprocal %459 {approx = true} : vector<128x1xf32> -> vector<128x1xf32>
    %461 = vector.broadcast %460 : vector<128x1xf32> to vector<128x64xf32>
    %462 = arith.mulf %456, %461 : vector<128x64xf32>
    %463 = vector.shape_cast %7 : vector<8x64xf32> to vector<1x8x64xf32>
    %464 = vector.broadcast %463 : vector<1x8x64xf32> to vector<10x8x64xf32>
    %465 = arith.subf %34, %464 : vector<10x8x64xf32>
    %466 = arith.mulf %465, %465 : vector<10x8x64xf32>
    %cst_177 = arith.constant 0.000000e+00 : f32
    %467 = vector.broadcast %cst_177 : f32 to vector<1x8x64xf32>
    %468 = arith.subf %467, %463 : vector<1x8x64xf32>
    %469 = math.exp %468 : vector<1x8x64xf32>
    %470 = vector.broadcast %469 : vector<1x8x64xf32> to vector<10x8x64xf32>
    %471 = arith.mulf %466, %470 : vector<10x8x64xf32>
    %472 = vector.broadcast %463 : vector<1x8x64xf32> to vector<10x8x64xf32>
    %473 = arith.addf %472, %471 : vector<10x8x64xf32>
    %cst_178 = arith.constant -5.000000e-01 : f32
    %474 = vector.broadcast %cst_178 : f32 to vector<10x8x64xf32>
    %475 = arith.mulf %474, %473 : vector<10x8x64xf32>
    %476 = vector.shape_cast %475 : vector<10x8x64xf32> to vector<1x10x8x64xf32>
    %cst_179 = arith.constant dense<0.000000e+00> : vector<1xf32>
    %477 = vector.multi_reduction <add>, %476, %cst_179 [1, 2, 3] : vector<1x10x8x64xf32> to vector<1xf32>
    %478 = vector.shape_cast %477 : vector<1xf32> to vector<1x1x1x1xf32>
    %479 = vector.extract %478[0, 0, 0, 0] : f32 from vector<1x1x1x1xf32>
    %cst_180 = arith.constant -4704.96533 : f32
    %480 = arith.addf %479, %cst_180 : f32
    %cst_181 = arith.constant 1.000000e-30 : f32
    %481 = vector.broadcast %cst_181 : f32 to vector<1x128xf32>
    %482 = arith.maximumf %455, %481 : vector<1x128xf32>
    %483 = math.log %482 : vector<1x128xf32>
    %cst_182 = arith.constant -1.000000e+30 : f32
    %484 = vector.broadcast %cst_182 : f32 to vector<1x128xf32>
    %485 = arith.select %210, %483, %484 : vector<1x128xi1>, vector<1x128xf32>
    %486 = arith.mulf %462, %462 : vector<128x64xf32>
    %cst_183 = arith.constant dense<0.000000e+00> : vector<128xf32>
    %487 = vector.multi_reduction <add>, %486, %cst_183 [1] : vector<128x64xf32> to vector<128xf32>
    %488 = vector.shape_cast %487 : vector<128xf32> to vector<128x1xf32>
    %cst_184 = arith.constant dense<0.000000e+00> : vector<80x128xf32>
    %489 = tpu.matmul %35, %462, %cst_184 {dimension_numbers = #tpu.dot_dimension_numbers<[1], [1], [0], [0], [0, 0, 1, 0], [], []>} : vector<80x64xf32>, vector<128x64xf32>, vector<80x128xf32> -> vector<80x128xf32>
    %490 = tpu.transpose %488, [1, 0] : vector<128x1xf32> -> vector<1x128xf32>
    %491 = vector.broadcast %217 : vector<80x1xf32> to vector<80x128xf32>
    %492 = vector.broadcast %490 : vector<1x128xf32> to vector<80x128xf32>
    %493 = arith.addf %491, %492 : vector<80x128xf32>
    %cst_185 = arith.constant 2.000000e+00 : f32
    %494 = vector.broadcast %cst_185 : f32 to vector<80x128xf32>
    %495 = arith.mulf %494, %489 : vector<80x128xf32>
    %496 = arith.subf %493, %495 : vector<80x128xf32>
    %cst_186 = arith.constant -5.000000e-01 : f32
    %497 = vector.broadcast %cst_186 : f32 to vector<80x128xf32>
    %498 = arith.mulf %497, %496 : vector<80x128xf32>
    %cst_187 = arith.constant -58.8120651 : f32
    %499 = vector.broadcast %cst_187 : f32 to vector<80x128xf32>
    %500 = arith.addf %498, %499 : vector<80x128xf32>
    %501 = vector.broadcast %485 : vector<1x128xf32> to vector<80x128xf32>
    %502 = arith.addf %500, %501 : vector<80x128xf32>
    %cst_188 = arith.constant dense<0xFF800000> : vector<80xf32>
    %503 = vector.multi_reduction <maximumf>, %502, %cst_188 [1] : vector<80x128xf32> to vector<80xf32>
    %504 = vector.shape_cast %503 : vector<80xf32> to vector<80x1xf32>
    %505 = vector.broadcast %504 : vector<80x1xf32> to vector<80x128xf32>
    %506 = arith.subf %502, %505 : vector<80x128xf32>
    %507 = math.exp %506 : vector<80x128xf32>
    %cst_189 = arith.constant dense<0.000000e+00> : vector<80xf32>
    %508 = vector.multi_reduction <add>, %507, %cst_189 [1] : vector<80x128xf32> to vector<80xf32>
    %509 = vector.shape_cast %508 : vector<80xf32> to vector<80x1xf32>
    %510 = math.log %509 : vector<80x1xf32>
    %511 = arith.addf %504, %510 : vector<80x1xf32>
    %512 = vector.shape_cast %511 : vector<80x1xf32> to vector<1x80x1xf32>
    %cst_190 = arith.constant dense<0.000000e+00> : vector<1xf32>
    %513 = vector.multi_reduction <add>, %512, %cst_190 [1, 2] : vector<1x80x1xf32> to vector<1xf32>
    %514 = vector.shape_cast %513 : vector<1xf32> to vector<1x1x1xf32>
    %515 = vector.extract %514[0, 0, 0] : f32 from vector<1x1x1xf32>
    %516 = arith.subf %480, %515 : f32
    %517 = vector.broadcast %516 : f32 to vector<1x1xf32>
    %c0_191 = arith.constant 0 : index
    %c0_192 = arith.constant 0 : index
    %c0_193 = arith.constant 0 : index
    %518 = vector.load %arg10[%c0_191, %c0_192, %c0_193] : memref<1x1x1xf32, #tpu.memory_space<vmem>>, vector<1x1x1xf32>
    %519 = vector.shape_cast %518 : vector<1x1x1xf32> to vector<1x1xf32>
    %520 = vector.shape_cast %517 : vector<1x1xf32> to vector<1x1x1xf32>
    tpu.vector_store %arg10[%c0_191, %c0_192, %c0_193], %520 {strides = array<i32>} : memref<1x1x1xf32, #tpu.memory_space<vmem>>, vector<1x1x1xf32>,
    return
  }
  func.func @transform_0(%arg0: i32, %arg1: memref<2x20xi32, #tpu.memory_space<smem>>) -> (i32, i32, i32) {
    %c0_i32 = arith.constant 0 : i32
    %c0_i32_0 = arith.constant 0 : i32
    %c0_i32_1 = arith.constant 0 : i32
    return %arg0, %c0_i32, %c0_i32_0 : i32, i32, i32
  }
  func.func @transform_1(%arg0: i32, %arg1: memref<2x20xi32, #tpu.memory_space<smem>>) -> (i32, i32, i32) {
    %c0_i32 = arith.constant 0 : i32
    %c0_i32_0 = arith.constant 0 : i32
    %c0_i32_1 = arith.constant 0 : i32
    return %arg0, %c0_i32, %c0_i32_0 : i32, i32, i32
  }
  func.func @transform_2(%arg0: i32, %arg1: memref<2x20xi32, #tpu.memory_space<smem>>) -> (i32, i32) {
    %c0_i32 = arith.constant 0 : i32
    %c0_i32_0 = arith.constant 0 : i32
    %c0_i32_1 = arith.constant 0 : i32
    return %c0_i32, %c0_i32_0 : i32, i32
  }
  func.func @transform_3(%arg0: i32, %arg1: memref<2x20xi32, #tpu.memory_space<smem>>) -> (i32, i32) {
    %c0_i32 = arith.constant 0 : i32
    %c0_i32_0 = arith.constant 0 : i32
    %c0_i32_1 = arith.constant 0 : i32
    return %c0_i32, %c0_i32_0 : i32, i32
  }
  func.func @transform_4(%arg0: i32, %arg1: memref<2x20xi32, #tpu.memory_space<smem>>) -> (i32, i32) {
    %c0_i32 = arith.constant 0 : i32
    %c0_i32_0 = arith.constant 0 : i32
    %c0_i32_1 = arith.constant 0 : i32
    return %c0_i32, %c0_i32_0 : i32, i32
  }
  func.func @transform_5(%arg0: i32, %arg1: memref<2x20xi32, #tpu.memory_space<smem>>) -> (i32, i32) {
    %c0_i32 = arith.constant 0 : i32
    %c0_i32_0 = arith.constant 0 : i32
    %c0_i32_1 = arith.constant 0 : i32
    return %c0_i32, %c0_i32_0 : i32, i32
  }
  func.func @transform_6(%arg0: i32, %arg1: memref<2x20xi32, #tpu.memory_space<smem>>) -> (i32, i32, i32) {
    %c0_i32 = arith.constant 0 : i32
    %c0_i32_0 = arith.constant 0 : i32
    %c0_i32_1 = arith.constant 0 : i32
    return %arg0, %c0_i32, %c0_i32_0 : i32, i32, i32
  }
  func.func @transform_7(%arg0: i32, %arg1: memref<2x20xi32, #tpu.memory_space<smem>>) -> (i32, i32, i32) {
    %c0_i32 = arith.constant 0 : i32
    %c0_i32_0 = arith.constant 0 : i32
    %c0_i32_1 = arith.constant 0 : i32
    return %arg0, %c0_i32, %c0_i32_0 : i32, i32, i32
  }
  func.func @transform_8(%arg0: i32, %arg1: memref<2x20xi32, #tpu.memory_space<smem>>) -> (i32, i32, i32) {
    %c0_i32 = arith.constant 0 : i32
    %c0_i32_0 = arith.constant 0 : i32
    %c0_i32_1 = arith.constant 0 : i32
    return %arg0, %c0_i32, %c0_i32_0 : i32, i32, i32
  }
}

</mosaic_0001>

<bundles_post_ra>
// kernel: forward.1
= control target key start
LH: loop header
LB: loop body
LE: loop exit
PB: predicated region body
PF: predicated region fallthrough
CT: control target
= control target key end

     0   :  { %s11206_s0 = inlined_call_operand.vmem [shape: s32[2,20], index: 0, kind: input, shape index: {}]   ;;  %s11207_s1 = inlined_call_operand.vmem [shape: f32[2,8,1024], index: 1, kind: input, shape index: {}]   ;;  %s11208_s2 = inlined_call_operand.vmem [shape: f32[2,80,64], index: 2, kind: input, shape index: {}]   ;;  %s11209_s3 = inlined_call_operand.vmem [shape: bf16[1024,64], index: 3, kind: input, shape index: {}]   ;;  %s11210_s4 = inlined_call_operand.vmem [shape: f32[1,64], index: 4, kind: input, shape index: {}]   ;;  %s11211_s5 = inlined_call_operand.vmem [shape: bf16[64,1024], index: 5, kind: input, shape index: {}]   ;;  %s11212_s6 = inlined_call_operand.vmem [shape: f32[1,1024], index: 6, kind: input, shape index: {}]   ;;  %s11213_s7 = inlined_call_operand.vmem [shape: f32[2,1,1], index: 7, kind: output, shape index: {0}]   ;;  %s11214_s8 = inlined_call_operand.vmem [shape: f32[2,1,1], index: 8, kind: output, shape index: {1}]   ;;  %s11215_s9 = inlined_call_operand.vmem [shape: f32[2,1,1], index: 9, kind: output, shape index: {2}]  }
   0x1   :  { %11220 = sst [smem:[#allocation8_spill]] %s11207_s1  ;;  %s15_s11 = sshll.u32 %s11206_s0, 4  ;;  %s16_s11 = int_to_ptr.vmem [resolvable:$true] %s15_s11 }
   0x2   :  { %11221 = sst [smem:[#allocation9_spill]] %s11208_s2  ;;  %s9180_s12 = scalar_lea.vmem %s16_s11, 32 }
   0x3   :  { %11222 = sst [smem:[#allocation10_spill]] %s11209_s3  ;;  %p9181_p0 = scmp.ne.s32.totalorder %s16_s11, %s9180_s12 }
   0x4   :  { %11223 = sst [smem:[#allocation11_spill]] %s11210_s4  ;;  %p9185_p1 = scmp.lt.s32.totalorder %s16_s11, %s16_s11 }
   0x5   :  { %11224 = sst [smem:[#allocation12_spill]] %s11213_s7  ;;  %p9186_p2 = scmp.lt.s32.totalorder %s9180_s12, %s9180_s12 }
   0x6   :  { %11225 = sst [smem:[#allocation13_spill]] %s11215_s9 }
   0x7   :  { %p9187_p3 = por %p9186_p2, %p9185_p1 }
   0x9   :  { %p9188_p4 = pnand %p9187_p3, %p9181_p0 }
   0xb   :  { %9191 = shalt.err (!%p9188_p4)  }
   0xc   :  { %s9202_s13 = smov [#allocation5]  }
   0xd   :  { %18 = dma.vmem_to_smem %s16_s11, 32, %s9202_s13, [#allocation4] }
   0xe   :  { %9196 = dma.done.wait [#allocation4], 32 }
   0xf   :  { %9197 = vsyncadd [#allocation4], 4294967264 }
  0x10   :  { %20 = sfence }
  0x11   :  { %s9258_s14 = smov 0  }
  0x12 LB: > { %11226 = sst [smem:[#allocation7_spill]] %s9200_s14  ;;  %s9264_s0 = sadd.s32 4294967295, %s9200_s14   ;;  %s9200_s14 = sphi %s9258_s14, %s26_s14  }
  0x13   : > { %p7009_p5 = scmp.ge.s32.totalorder %s9200_s14, 1  ;;  %p284_p6 = scmp.lt.s32.totalorder %s9200_s14, 3 }
  0x15   : > { %p285_p7 = pnand %p7009_p5, %p284_p6 }
  0x16   : > { %s11227_s3 = sld [smem:[#allocation10_spill]] (!%p285_p7)  ;;  %p327_p8 = scmp.lt.s32.totalorder (!%p285_p7), %s9264_s0, 1  ;;  %vm1048_vm0 = vcmask (!%p285_p7), 523264   ;;  %vm1996_vm1 = vcmask (!%p285_p7), 516096   ;;  %vm2661_vm4 = vcmask (!%p285_p7), 654336   ;;  %vm2615_vm5 = vcmask (!%p285_p7), 1040384  }
  0x17   : > { %288 = sbr.rel (%p285_p7) target bundleno = 6020 (0x1784), region = 44  ;;  %s11228_s1 = sld [smem:[#allocation8_spill]] (!%p285_p7)  ;;  %vm9989_vm2 = vmpackc.low (!%p285_p7), %vm1048_vm0, %vm1048_vm0  ;;  %vm1061_vm6 = vcmask (!%p285_p7), 0   ;;  %vm6844_vm7 = vcmask (!%p285_p7), 7168  }
  0x18   : > { %s11229_s4 = sld [smem:[#allocation11_spill]] (!%p285_p7)  ;;  %s9607_s17 = sshll.u32 (!%p285_p7), %s9264_s0, 7 }
  0x19   : > { %s2073_s18 = sadd.s32 (!%p285_p7), 16, %s9607_s17  ;;  %s2078_s20 = sadd.s32 (!%p285_p7), 17, %s9607_s17 }
  0x1a   : > { %s9612_s22 = sld [smem:[#allocation5 + %s2073_s18]] (!%p285_p7)  ;;  %s2088_s23 = sadd.s32 (!%p285_p7), 19, %s9607_s17 }
  0x1b   : > { %s9617_s24 = sld [smem:[#allocation5 + %s2078_s20]] (!%p285_p7)  ;;  %s1998_s28 = sadd.s32 (!%p285_p7), 1, %s9607_s17 }
  0x1c   : > { %v8680_v0 = vld [vmem:[%s11227_s3 + $0x40] sm:$0xff] (!%p285_p7)   ;;  %v8684_v4 = vld [vmem:[%s11227_s3 + $0x48] sm:$0xff] (!%p285_p7)   ;;  %v8688_v8 = vld [vmem:[%s11227_s3 + $0x50] sm:$0xff] (!%p285_p7)   ;;  %s9623_s27 = sld [smem:[#allocation5 + %s2088_s23]] (!%p285_p7)  ;;  %s2003_s29 = sadd.s32 (!%p285_p7), 2, %s9607_s17 }
  0x1d   : > { %v8681_v1 = vld [vmem:[%s11227_s3 + $0xc0] sm:$0xff] (!%p285_p7)   ;;  %7370 = vmatprep.subr.bf16.mxu0 (!%p285_p7), %v8680_v0  ;;  %v8685_v5 = vld [vmem:[%s11227_s3 + $0xc8] sm:$0xff] (!%p285_p7)   ;;  %v8689_v9 = vld [vmem:[%s11227_s3 + $0xd0] sm:$0xff] (!%p285_p7)   ;;  %s11230_s2 = sld [smem:[#allocation9_spill]] (!%p285_p7)  ;;  %s2008_s12 = sadd.s32 (!%p285_p7), 3, %s9607_s17 }
  0x1e   : > { %v8682_v2 = vld [vmem:[%s11227_s3] sm:$0xff]   ;;  %7392 = vmatprep.subr.bf16.mxu1 %v8681_v1  ;;  %v8686_v6 = vld [vmem:[%s11227_s3 + $0x8] sm:$0xff]   ;;  %v8690_v10 = vld [vmem:[%s11227_s3 + $0x10] sm:$0xff]   ;;  %s9339_s21 = scalar_select %p327_p8, %s9264_s0, 1 }
  0x1f   : > { %v8683_v3 = vld [vmem:[%s11227_s3 + $0x80] sm:$0xff]   ;;  %7371 = vmatpush3.bf16.msra.mxu0 %v8682_v2  ;;  %v8687_v7 = vld [vmem:[%s11227_s3 + $0x88] sm:$0xff]   ;;  %v8691_v11 = vld [vmem:[%s11227_s3 + $0x90] sm:$0xff]   ;;  %s2083_s0 = sadd.s32 18, %s9607_s17  ;;  %s9632_s13 = sld [smem:[#allocation5 + %s9607_s17]] }
  0x20   : > { %7393 = vmatpush3.bf16.msra.mxu1 %v8683_v3  ;;  %7372 = vmatprep.subr.bf16.mxu0 %v8684_v4  ;;  %v8692_v12 = vld [vmem:[%s11227_s3 + $0x58] sm:$0xff]   ;;  %v8696_v16 = vld [vmem:[%s11227_s3 + $0x60] sm:$0xff]   ;;  %v8700_v20 = vld [vmem:[%s11227_s3 + $0x68] sm:$0xff]   ;;  %s7369_s30 = sshll.u32 %s9339_s21, 6  ;;  %s8642_s25 = smul.u32 80, %s9339_s21 }
  0x21   : > { %7394 = vmatprep.subr.bf16.mxu1 %v8685_v5  ;;  %v8693_v13 = vld [vmem:[%s11227_s3 + $0xd8] sm:$0xff]   ;;  %v8697_v17 = vld [vmem:[%s11227_s3 + $0xe0] sm:$0xff]   ;;  %v8701_v21 = vld [vmem:[%s11227_s3 + $0xe8] sm:$0xff]   ;;  %s9366_s19 = scalar_lea.vmem %s11228_s1, %s7369_s30  ;;  %s9620_s26 = sld [smem:[#allocation5 + %s2083_s0]] }
  0x22   : > { %v8694_v14 = vld [vmem:[%s11227_s3 + $0x18] sm:$0xff]   ;;  %v8698_v18 = vld [vmem:[%s11227_s3 + $0x20] sm:$0xff]   ;;  %v8702_v22 = vld [vmem:[%s11227_s3 + $0x28] sm:$0xff]   ;;  %s9634_s15 = sld [smem:[#allocation5 + %s1998_s28]]  ;;  %s2013_s20 = sadd.s32 4, %s9607_s17 }
  0x23   : > { %7373 = vmatpush3.bf16.msra.mxu0 %v8686_v6  ;;  %v8695_v15 = vld [vmem:[%s11227_s3 + $0x98] sm:$0xff]   ;;  %v8699_v19 = vld [vmem:[%s11227_s3 + $0xa0] sm:$0xff]   ;;  %v8703_v23 = vld [vmem:[%s11227_s3 + $0xa8] sm:$0xff]   ;;  %s336_s11 = scalar_lea.vmem %s11230_s2, %s8642_s25  ;;  %s9636_s16 = sld [smem:[#allocation5 + %s2003_s29]] }
  0x24   : > { %7395 = vmatpush3.bf16.msra.mxu1 %v8687_v7  ;;  %7374 = vmatprep.subr.bf16.mxu0 %v8688_v8  ;;  %v8704_v24 = vld [vmem:[%s11227_s3 + $0x70] sm:$0xff]   ;;  %v8708_v28 = vld [vmem:[%s11227_s3 + $0x78] sm:$0xff]   ;;  %v348_v32 = vld [vmem:[%s9366_s19 + $0x8] sm:$0xff]  ;;  %s9638_s18 = sld [smem:[#allocation5 + %s2008_s12]]  ;;  %s2018_s0 = sadd.s32 5, %s9607_s17 }
  0x25   : > { %7396 = vmatprep.subr.bf16.mxu1 %v8689_v9  ;;  %v8705_v25 = vld [vmem:[%s11227_s3 + $0xf0] sm:$0xff]   ;;  %v8709_v29 = vld [vmem:[%s11227_s3 + $0xf8] sm:$0xff]   ;;  %v356_v33 = vpack.c.bf16 %v348_v32, %v348_v32  ;;  %v347_v36 = vld [vmem:[%s9366_s19] sm:$0xff]  ;;  %s2023_s23 = sadd.s32 6, %s9607_s17  ;;  %s2028_s1 = sadd.s32 7, %s9607_s17 }
  0x26   : > { %v8706_v26 = vld [vmem:[%s11227_s3 + $0x30] sm:$0xff]   ;;  %v8710_v30 = vld [vmem:[%s11227_s3 + $0x38] sm:$0xff]   ;;  %v355_v38 = vpack.c.bf16 %v347_v36, %v347_v36  ;;  %v8712_v40 = vld [vmem:[%s11227_s3 + $0x140] sm:$0xff]   ;;  %s2033_s30 = sadd.s32 8, %s9607_s17  ;;  %s9647_s25 = sld [smem:[#allocation5 + %s2018_s0]] }
  0x27   : > { %7375 = vmatpush3.bf16.msra.mxu0 %v8690_v10  ;;  %v8707_v27 = vld [vmem:[%s11227_s3 + $0xb0] sm:$0xff]   ;;  %v8711_v31 = vld [vmem:[%s11227_s3 + $0xb8] sm:$0xff]   ;;  %914 = vmatprep.mubr.bf16.mxu0 %v356_v33  ;;  %v8713_v41 = vld [vmem:[%s11227_s3 + $0x1c0] sm:$0xff]   ;;  %s2038_s10 = sadd.s32 9, %s9607_s17  ;;  %s9650_s28 = sld [smem:[#allocation5 + %s2023_s23]] }
  0x28   : > { %7397 = vmatpush3.bf16.msra.mxu1 %v8691_v11  ;;  %7376 = vmatprep.subr.bf16.mxu0 %v8692_v12  ;;  %v350_v34 = vld [vmem:[%s9366_s19 + $0x18] sm:$0xff]  ;;  %v349_v37 = vld [vmem:[%s9366_s19 + $0x10] sm:$0xff]  ;;  %v8714_v42 = vld [vmem:[%s11227_s3 + $0x100] sm:$0xff]   ;;  %s9652_s29 = sld [smem:[#allocation5 + %s2028_s1]]  ;;  %s2048_s2 = sadd.s32 11, %s9607_s17 }
  0x29   : > { %7398 = vmatprep.subr.bf16.mxu1 %v8693_v13  ;;  %v358_v35 = vpack.c.bf16 %v350_v34, %v350_v34  ;;  %v357_v39 = vpack.c.bf16 %v349_v37, %v349_v37  ;;  %v8715_v43 = vld [vmem:[%s11227_s3 + $0x180] sm:$0xff]   ;;  %v8716_v44 = vld [vmem:[%s11227_s3 + $0x148] sm:$0xff]   ;;  %v8720_v48 = vld [vmem:[%s11227_s3 + $0x150] sm:$0xff]   ;;  %s9654_s12 = sld [smem:[#allocation5 + %s2033_s30]]  ;;  %s2053_s1 = sadd.s32 12, %s9607_s17 }
  0x2a   : > { %v8717_v45 = vld [vmem:[%s11227_s3 + $0x1c8] sm:$0xff]   ;;  %v8721_v49 = vld [vmem:[%s11227_s3 + $0x1d0] sm:$0xff]   ;;  %v8724_v52 = vld [vmem:[%s11227_s3 + $0x158] sm:$0xff]   ;;  %s9657_s0 = sld [smem:[#allocation5 + %s2038_s10]]  ;;  %s2058_s23 = sadd.s32 13, %s9607_s17 }
  0x2b   : > { %7377 = vmatpush3.bf16.msra.mxu0 %v8694_v14  ;;  %954 = vmatprep.mubr.bf16.mxu1 %v358_v35  ;;  %v8718_v46 = vld [vmem:[%s11227_s3 + $0x108] sm:$0xff]   ;;  %v8722_v50 = vld [vmem:[%s11227_s3 + $0x110] sm:$0xff]   ;;  %v8725_v53 = vld [vmem:[%s11227_s3 + $0x1d8] sm:$0xff]   ;;  %s2063_s30 = sadd.s32 14, %s9607_s17  ;;  %s9672_s10 = sld [smem:[#allocation5 + %s2048_s2]] }
  0x2c   : > { %7399 = vmatpush3.bf16.msra.mxu1 %v8695_v15  ;;  %7378 = vmatprep.subr.bf16.mxu0 %v8696_v16  ;;  %v8719_v47 = vld [vmem:[%s11227_s3 + $0x188] sm:$0xff]   ;;  %v8723_v51 = vld [vmem:[%s11227_s3 + $0x190] sm:$0xff]   ;;  %v8726_v54 = vld [vmem:[%s11227_s3 + $0x118] sm:$0xff]   ;;  %s9692_s2 = sld [smem:[#allocation5 + %s2053_s1]] }
  0x2d   : > { %7400 = vmatprep.subr.bf16.mxu1 %v8697_v17  ;;  %v8727_v55 = vld [vmem:[%s11227_s3 + $0x198] sm:$0xff]   ;;  %v8728_v56 = vld [vmem:[%s11227_s3 + $0x160] sm:$0xff]   ;;  %v8732_v60 = vld [vmem:[%s11227_s3 + $0x168] sm:$0xff]   ;;  %s9694_s7 = sld [smem:[#allocation5 + %s2058_s23]]  ;;  %s2075_s23 = scalar_lea.vmem [#allocation2], %s9612_s22 }
  0x2e   : > { %v8729_v57 = vld [vmem:[%s11227_s3 + $0x1e0] sm:$0xff]   ;;  %v8733_v61 = vld [vmem:[%s11227_s3 + $0x1e8] sm:$0xff]   ;;  %v8736_v0 = vld [vmem:[%s11227_s3 + $0x170] sm:$0xff]   ;;  %s9712_s9 = sld [smem:[#allocation5 + %s2063_s30]]  ;;  %s2080_s30 = scalar_lea.vmem [#allocation2], %s9617_s24 }
  0x2f   : > { %7379 = vmatpush3.bf16.msra.mxu0 %v8698_v18  ;;  %v8730_v58 = vld [vmem:[%s11227_s3 + $0x120] sm:$0xff]   ;;  %v8734_v62 = vld [vmem:[%s11227_s3 + $0x128] sm:$0xff]   ;;  %v8737_v1 = vld [vmem:[%s11227_s3 + $0x1f0] sm:$0xff]   ;;  %s2090_s22 = scalar_lea.vmem [#allocation2], %s9623_s27  ;;  %s1994_s24 = scalar_lea.vmem [#allocation2], %s9632_s13 }
  0x30   : > { %7401 = vmatpush3.bf16.msra.mxu1 %v8699_v19  ;;  %7380 = vmatprep.subr.bf16.mxu0 %v8700_v20  ;;  %v8731_v59 = vld [vmem:[%s11227_s3 + $0x1a0] sm:$0xff]   ;;  %v8735_v63 = vld [vmem:[%s11227_s3 + $0x1a8] sm:$0xff]   ;;  %v8738_v2 = vld [vmem:[%s11227_s3 + $0x130] sm:$0xff]   ;;  %s2005_s27 = scalar_lea.vmem [#allocation2], %s9636_s16  ;;  %s2010_s13 = scalar_lea.vmem [#allocation2], %s9638_s18 }
  0x31   : > { %7402 = vmatprep.subr.bf16.mxu1 %v8701_v21  ;;  %v8739_v3 = vld [vmem:[%s11227_s3 + $0x1b0] sm:$0xff]   ;;  %v8740_v4 = vld [vmem:[%s11227_s3 + $0x178] sm:$0xff]   ;;  %v352_v8 = vld [vmem:[%s9366_s19 + $0x28] sm:$0xff]  ;;  %s2025_s16 = scalar_lea.vmem [#allocation2], %s9650_s28  ;;  %s2035_s18 = scalar_lea.vmem [#allocation2], %s9654_s12 }
  0x32   : > { %v8741_v5 = vld [vmem:[%s11227_s3 + $0x1f8] sm:$0xff]   ;;  %v360_v9 = vpack.c.bf16 %v352_v8, %v352_v8  ;;  %v351_v11 = vld [vmem:[%s9366_s19 + $0x20] sm:$0xff]  ;;  %v353_v12 = vld [vmem:[%s9366_s19 + $0x30] sm:$0xff] }
  0x33   : > { %7381 = vmatpush3.bf16.msra.mxu0 %v8702_v22  ;;  %v8742_v6 = vld [vmem:[%s11227_s3 + $0x138] sm:$0xff]   ;;  %v359_v14 = vpack.c.bf16 %v351_v11, %v351_v11  ;;  %v361_v15 = vpack.c.bf16 %v353_v12, %v353_v12  ;;  %v1338_v16 = vld [vmem:[%s11211_s5 + $0x8] sm:$0xff]  ;;  %v1111_v18 = vld [vmem:[%s11211_s5] sm:$0xff]  ;;  %s2060_s12 = scalar_lea.vmem [#allocation2], %s9694_s7 }
  0x34   : > { %7403 = vmatpush3.bf16.msra.mxu1 %v8703_v23  ;;  %7382 = vmatprep.subr.bf16.mxu0 %v8704_v24  ;;  %v8743_v7 = vld [vmem:[%s11227_s3 + $0x1b8] sm:$0xff]   ;;  %v1339_v17 = vld [vmem:[%s11211_s5 + $0x28] sm:$0xff]  ;;  %v1112_v19 = vld [vmem:[%s11211_s5 + $0x20] sm:$0xff]  ;;  %s9644_s3 = sld [smem:[#allocation5 + %s2013_s20]]  ;;  %s2043_s20 = sadd.s32 10, %s9607_s17 }
  0x35   : > { %7404 = vmatprep.subr.bf16.mxu1 %v8705_v25  ;;  %v354_v10 = vld [vmem:[%s9366_s19 + $0x38] sm:$0xff]  ;;  %v7092_v20 = vcombine.high %v1338_v16, %v1339_v17  ;;  %v7079_v21 = vcombine.high %v1111_v18, %v1112_v19  ;;  %v9490_v22 = vcombine.low %v1338_v16, %v1339_v17  ;;  %v7078_v23 = vcombine.low %v1111_v18, %v1112_v19  ;;  %v1340_v24 = vld [vmem:[%s11211_s5 + $0x48] sm:$0xff]  ;;  %v1115_v34 = vld [vmem:[%s11211_s5 + $0x80] sm:$0xff] }
  0x36   : > { %v362_v13 = vpack.c.bf16 %v354_v10, %v354_v10  ;;  %v1341_v25 = vld [vmem:[%s11211_s5 + $0x68] sm:$0xff]  ;;  %v1116_v35 = vld [vmem:[%s11211_s5 + $0xa0] sm:$0xff] }
  0x37   : > { %7383 = vmatpush3.bf16.msra.mxu0 %v8706_v26  ;;  %v1113_v26 = vld [vmem:[%s11211_s5 + $0x40] sm:$0xff]  ;;  %v1342_v32 = vld [vmem:[%s11211_s5 + $0x88] sm:$0xff]  ;;  %v7083_v37 = vcombine.high %v1115_v34, %v1116_v35 }
  0x38   : > { %7405 = vmatpush3.bf16.msra.mxu1 %v8707_v27  ;;  %7384 = vmatprep.subr.bf16.mxu0 %v8708_v28  ;;  %v1114_v27 = vld [vmem:[%s11211_s5 + $0x60] sm:$0xff]  ;;  %v9505_v28 = vcombine.high %v1340_v24, %v1341_v25  ;;  %v1343_v33 = vld [vmem:[%s11211_s5 + $0xa8] sm:$0xff] }
  0x39   : > { %7406 = vmatprep.subr.bf16.mxu1 %v8709_v29  ;;  %v7081_v29 = vcombine.high %v1113_v26, %v1114_v27  ;;  %v9523_v36 = vcombine.high %v1342_v32, %v1343_v33 }
  0x3b   : > { %7385 = vmatpush3.bf16.msra.mxu0 %v8710_v30  ;;  %v9507_v30 = vcombine.low %v1340_v24, %v1341_v25  ;;  %v1066_v24 = vld [vmem:[%s336_s11 + $0x18] sm:$0xff]  ;;  %v1067_v25 = vld [vmem:[%s336_s11 + $0x20] sm:$0xff] }
  0x3c   : > { %7407 = vmatpush3.bf16.msra.mxu1 %v8711_v31  ;;  %7414 = vmatprep.subr.bf16.mxu0 %v8712_v40  ;;  %v7080_v31 = vcombine.low %v1113_v26, %v1114_v27  ;;  %v1344_v40 = vld [vmem:[%s11211_s5 + $0xc8] sm:$0xff]  ;;  %v1069_v27 = vld [vmem:[%s336_s11 + $0x30] sm:$0xff] }
  0x3d   : > { %7436 = vmatprep.subr.bf16.mxu1 %v8713_v41  ;;  %v1345_v41 = vld [vmem:[%s11211_s5 + $0xe8] sm:$0xff] }
  0x3e   : > { %915 = vmatmul.mubr.bf16.vlgmr.msra.gmra.mrb[0].mxu0 %v355_v38  ;;  %v9525_v38 = vcombine.low %v1342_v32, %v1343_v33  ;;  %v1068_v26 = vld [vmem:[%s336_s11 + $0x28] sm:$0xff]  ;;  %v1071_v32 = vld [vmem:[%s336_s11 + $0x40] sm:$0xff] }
  0x3f   : > { %955 = vmatmul.mubr.bf16.vlgmr.msra.gmra.mrb[0].mxu1 %v357_v39  ;;  %7415 = vmatpush3.bf16.msra.mxu0 %v8714_v42  ;;  %v7082_v39 = vcombine.low %v1115_v34, %v1116_v35  ;;  %v1117_v42 = vld [vmem:[%s11211_s5 + $0xc0] sm:$0xff]  ;;  %v1072_v33 = vld [vmem:[%s336_s11 + $0x48] sm:$0xff] }
  0x40   : > { %7437 = vmatpush3.bf16.msra.mxu1 %v8715_v43  ;;  %7416 = vmatprep.subr.bf16.mxu0 %v8716_v44  ;;  %v1118_v43 = vld [vmem:[%s11211_s5 + $0xe0] sm:$0xff]  ;;  %v9541_v44 = vcombine.high %v1344_v40, %v1345_v41 }
  0x41   : > { %7438 = vmatprep.subr.bf16.mxu1 %v8717_v45  ;;  %994 = vmatprep.mubr.bf16.mxu0 %v360_v9  ;;  %v7085_v45 = vcombine.high %v1117_v42, %v1118_v43 }
  0x42   : > { %1034 = vmatprep.mubr.bf16.mxu1 %v362_v13 }
  0x43   : > { %7417 = vmatpush3.bf16.msra.mxu0 %v8718_v46  ;;  %v9543_v46 = vcombine.low %v1344_v40, %v1345_v41 }
  0x44   : > { %7439 = vmatpush3.bf16.msra.mxu1 %v8719_v47  ;;  %7418 = vmatprep.subr.bf16.mxu0 %v8720_v48  ;;  %v7084_v47 = vcombine.low %v1117_v42, %v1118_v43  ;;  %v9550_v48 = vld [vmem:[%s11211_s5 + $0x18] sm:$0xff] }
  0x45   : > { %7440 = vmatprep.subr.bf16.mxu1 %v8721_v49  ;;  %v9555_v49 = vld [vmem:[%s11211_s5 + $0x38] sm:$0xff] }
  0x47   : > { %7419 = vmatpush3.bf16.msra.mxu0 %v8722_v50  ;;  %v11217_v50 = vmov 0  }
  0x48   : > { %7441 = vmatpush3.bf16.msra.mxu1 %v8723_v51  ;;  %7420 = vmatprep.subr.bf16.mxu0 %v8724_v52  ;;  %v7117_v51 = vcombine.low %v9550_v48, %v9555_v49  ;;  %v7118_v52 = vcombine.high %v9550_v48, %v9555_v49  ;;  %v9765_v48 = vld [vmem:[%s11211_s5 + $0xf8] sm:$0xff] }
  0x49   : > { %7442 = vmatprep.subr.bf16.mxu1 %v8725_v53  ;;  %v11219_v53 = vmov 0.0  }
  0x4a   : > { %1978 = vst.msk [vmem:[#allocation3 + $0x10] sm:$0xff] %vm1048_vm0, %v11219_v53  ;;  %1976 = vst.msk [vmem:[#allocation3] sm:$0xff] %vm1048_vm0, %v11219_v53 }
  0x4b   : > { %7421 = vmatpush3.bf16.msra.mxu0 %v8726_v54  ;;  %1977 = vst.msk [vmem:[#allocation3 + $0x8] sm:$0xff] %vm1048_vm0, %v11219_v53  ;;  %1979 = vst.msk [vmem:[#allocation3 + $0x18] sm:$0xff] %vm1048_vm0, %v11219_v53 }
  0x4c   : > { %7443 = vmatpush3.bf16.msra.mxu1 %v8727_v55  ;;  %7422 = vmatprep.subr.bf16.mxu0 %v8728_v56  ;;  %1980 = vst.msk [vmem:[#allocation3 + $0x20] sm:$0xff] %vm1048_vm0, %v11219_v53  ;;  %1981 = vst.msk [vmem:[#allocation3 + $0x28] sm:$0xff] %vm1048_vm0, %v11219_v53 }
  0x4d   : > { %7444 = vmatprep.subr.bf16.mxu1 %v8729_v57  ;;  %1982 = vst.msk [vmem:[#allocation3 + $0x30] sm:$0xff] %vm1048_vm0, %v11219_v53  ;;  %1983 = vst.msk [vmem:[#allocation3 + $0x38] sm:$0xff] %vm1048_vm0, %v11219_v53 }
  0x4e   : > { %1984 = vst.msk [vmem:[#allocation3 + $0x40] sm:$0xff] %vm1048_vm0, %v11219_v53  ;;  %1985 = vst.msk [vmem:[#allocation3 + $0x48] sm:$0xff] %vm1048_vm0, %v11219_v53 }
  0x4f   : > { %7423 = vmatpush3.bf16.msra.mxu0 %v8730_v58  ;;  %1986 = vst.msk [vmem:[#allocation3 + $0x50] sm:$0xff] %vm1048_vm0, %v11219_v53  ;;  %1987 = vst.msk [vmem:[#allocation3 + $0x58] sm:$0xff] %vm1048_vm0, %v11219_v53 }
  0x50   : > { %7445 = vmatpush3.bf16.msra.mxu1 %v8731_v59  ;;  %7424 = vmatprep.subr.bf16.mxu0 %v8732_v60  ;;  %1988 = vst.msk [vmem:[#allocation3 + $0x60] sm:$0xff] %vm1048_vm0, %v11219_v53  ;;  %1989 = vst.msk [vmem:[#allocation3 + $0x68] sm:$0xff] %vm1048_vm0, %v11219_v53  ;;  %v7013_v59 = vld [vmem:[%s11229_s4] ss:$0 sm:$0xff]  ;;  %s2068_s4 = sadd.s32 15, %s9607_s17  ;;  %s2085_s17 = scalar_lea.vmem [#allocation2], %s9620_s26 }
  0x51   : > { %7446 = vmatprep.subr.bf16.mxu1 %v8733_v61  ;;  %1990 = vst.msk [vmem:[#allocation3 + $0x70] sm:$0xff] %vm1048_vm0, %v11219_v53  ;;  %1991 = vst.msk [vmem:[#allocation3 + $0x78] sm:$0xff] %vm1048_vm0, %v11219_v53  ;;  %s9714_s14 = sld [smem:[#allocation5 + %s2068_s4]]  ;;  %s2000_s26 = scalar_lea.vmem [#allocation2], %s9634_s15 }
  0x52   : > { %s2015_s15 = scalar_lea.vmem [#allocation2], %s9644_s3  ;;  %s2030_s3 = scalar_lea.vmem [#allocation2], %s9652_s29 }
  0x53   : > { %7425 = vmatpush3.bf16.msra.mxu0 %v8734_v62  ;;  %s2050_s29 = scalar_lea.vmem [#allocation2], %s9672_s10 }
  0x54   : > { %7447 = vmatpush3.bf16.msra.mxu1 %v8735_v63  ;;  %7426 = vmatprep.subr.bf16.mxu0 %v8736_v0 }
  0x55   : > { %7448 = vmatprep.subr.bf16.mxu1 %v8737_v1 }
  0x57   : > { %7427 = vmatpush3.bf16.msra.mxu0 %v8738_v2 }
  0x58   : > { %7449 = vmatpush3.bf16.msra.mxu1 %v8739_v3  ;;  %7428 = vmatprep.subr.bf16.mxu0 %v8740_v4  ;;  %v9595_v54 = vld [vmem:[#allocation3 + $0x78] sm:$0xff]  ;;  %v9597_v55 = vld [vmem:[#allocation3 + $0x70] sm:$0xff] }
  0x59   : > { %7450 = vmatprep.subr.bf16.mxu1 %v8741_v5  ;;  %v9601_v56 = vpack.c.bf16 %v9595_v54, %v9597_v55 }
  0x5b   : > { %7429 = vmatpush3.bf16.msra.mxu0 %v8742_v6 }
  0x5c   : > { %7451 = vmatpush3.bf16.msra.mxu1 %v8743_v7  ;;  %1186 = vmatprep.subr.bf16.mxu0 %v7079_v21  ;;  %v1064_v21 = vld [vmem:[%s336_s11 + $0x8] sm:$0xff] }
  0x5d   : > { %8634 = vmatprep.subr.bf16.mxu1 %v7092_v20 }
  0x5e   : > { %995 = vmatmul.mubr.bf16.vlgmr.msra.gmra.mrb[4].mxu0 %v359_v14 }
  0x5f   : > { %1035 = vmatmul.mubr.bf16.vlgmr.msra.gmra.mrb[4].mxu1 %v361_v15  ;;  %1187 = vmatpush1.bf16.msra.mxu0 %v7078_v23  ;;  %v1065_v23 = vld [vmem:[%s336_s11 + $0x10] sm:$0xff] }
  0x60   : > { %8638 = vmatpush1.bf16.msra.mxu1 %v9490_v22  ;;  %1188 = vmatprep.subr.bf16.mxu0 %v7081_v29  ;;  %v1070_v29 = vld [vmem:[%s336_s11 + $0x38] sm:$0xff] }
  0x61   : > { %8635 = vmatprep.subr.bf16.mxu1 %v9505_v28  ;;  %1218 = vmatprep.mubr.bf16.mxu0 %v11217_v50 }
  0x62   : > { %1460 = vmatprep.mubr.bf16.mxu1 %v11217_v50 }
  0x63   : > { %1189 = vmatpush1.bf16.msra.mxu0 %v7080_v31 }
  0x64   : > { %8639 = vmatpush1.bf16.msra.mxu1 %v9507_v30  ;;  %1190 = vmatprep.subr.bf16.mxu0 %v7083_v37 }
  0x65   : > { %8636 = vmatprep.subr.bf16.mxu1 %v9523_v36 }
  0x67   : > { %1191 = vmatpush1.bf16.msra.mxu0 %v7082_v39 }
  0x68   : > { %8640 = vmatpush1.bf16.msra.mxu1 %v9525_v38  ;;  %1192 = vmatprep.subr.bf16.mxu0 %v7085_v45 }
  0x69   : > { %8637 = vmatprep.subr.bf16.mxu1 %v9541_v44 }
  0x6b   : > { %1193 = vmatpush1.bf16.msra.mxu0 %v7084_v47 }
  0x6c   : > { %8641 = vmatpush1.bf16.msra.mxu1 %v9543_v46  ;;  %1398 = vmatprep.subr.bf16.mxu0 %v7092_v20  ;;  %v1063_v20 = vld [vmem:[%s336_s11] sm:$0xff]  ;;  %s9670_s11 = sld [smem:[#allocation5 + %s2043_s20]] }
  0x6d   : > { %1822 = vmatprep.subr.bf16.mxu1 %v7118_v52 }
  0x72   : > { %s2045_s28 = scalar_lea.vmem [#allocation2], %s9670_s11  ;;  %s2070_s11 = scalar_lea.vmem [#allocation2], %s9714_s14 }
 0x111   : > { %v7386_v57 = vpop.f32.mrb[0].mxu0 }
 0x112   : > { %v7408_v58 = vpop.f32.mrb[0].mxu1  ;;  %v7387_v60 = vpop.f32.mrb[1].mxu0 }
 0x113   : > { %v7409_v61 = vpop.f32.mrb[1].mxu1  ;;  %v7388_v62 = vadd.f32 %v7387_v60, %v7386_v57  ;;  %v7389_v0 = vpop.f32.mrb[2].mxu0 }
 0x114   : > { %v7410_v63 = vadd.f32 %v7409_v61, %v7408_v58  ;;  %v7411_v1 = vpop.f32.mrb[2].mxu1  ;;  %v7390_v2 = vpop.f32.mrb[3].mxu0 }
 0x115   : > { %v7412_v3 = vpop.f32.mrb[3].mxu1  ;;  %v917_v4 = vadd.f32 %v7388_v62, %v7013_v59  ;;  %v1764_v62 = vld [vmem:[%s11211_s5 + $0x58] sm:$0xff] }
 0x117   : > { %v957_v5 = vadd.f32 %v7410_v63, %v917_v4  ;;  %v1765_v63 = vld [vmem:[%s11211_s5 + $0x78] sm:$0xff] }
 0x131   : > { %v7430_v6 = vpop.f32.mrb[4].mxu0 }
 0x132   : > { %v7452_v7 = vpop.f32.mrb[4].mxu1  ;;  %v7431_v8 = vpop.f32.mrb[5].mxu0 }
 0x133   : > { %v7432_v9 = vadd.f32 %v7431_v8, %v7430_v6  ;;  %v7453_v10 = vpop.f32.mrb[5].mxu1  ;;  %v7433_v11 = vpop.f32.mrb[6].mxu0  ;;  %v7120_v6 = vcombine.high %v1764_v62, %v1765_v63  ;;  %v1767_v8 = vld [vmem:[%s11211_s5 + $0xb8] sm:$0xff] }
 0x134   : > { %v7454_v12 = vadd.f32 %v7453_v10, %v7452_v7  ;;  %v7455_v13 = vpop.f32.mrb[6].mxu1  ;;  %v7434_v14 = vpop.f32.mrb[7].mxu0  ;;  %v1766_v7 = vld [vmem:[%s11211_s5 + $0x98] sm:$0xff] }
 0x135   : > { %v997_v15 = vadd.f32 %v7432_v9, %v957_v5  ;;  %v7456_v16 = vpop.f32.mrb[7].mxu1  ;;  %v7119_v9 = vcombine.low %v1764_v62, %v1765_v63  ;;  %v7122_v10 = vcombine.high %v1766_v7, %v1767_v8  ;;  %v7121_v49 = vcombine.low %v1766_v7, %v1767_v8  ;;  %v9870_v62 = vld [vmem:[#allocation3 + $0x20] sm:$0xff] }
 0x136   : > { %v9791_v16 = vld [vmem:[%s11211_s5 + $0x10] sm:$0xff] }
 0x137   : > { %v9615_v17 = vadd.f32 %v7454_v12, %v997_v15 }
 0x139   : > { %v1073_v18 = vmul.f32 0.5, %v9615_v17 }
 0x13b   : > { %v1074_v19 = vmul.f32 1.442695, %v1073_v18  ;;  %v9796_v18 = vld [vmem:[%s11211_s5 + $0x30] sm:$0xff] }
 0x13d   : > { %8744 = vpow2.f32 %v1074_v19 }
 0x147   : > { %v8745_v31 = vpop.eup %8744 }
 0x148   : > { %v1076_v34 = vmul.f32 %v8745_v31, %v1063_v20  ;;  %v1077_v35 = vmul.f32 %v8745_v31, %v1064_v21  ;;  %v1078_v37 = vmul.f32 %v8745_v31, %v1065_v23  ;;  %v1079_v39 = vmul.f32 %v8745_v31, %v1066_v24 }
 0x149   : > { %v1080_v40 = vmul.f32 %v8745_v31, %v1067_v25  ;;  %v1081_v41 = vmul.f32 %v8745_v31, %v1068_v26  ;;  %v1082_v42 = vmul.f32 %v8745_v31, %v1069_v27  ;;  %v1083_v43 = vmul.f32 %v8745_v31, %v1070_v29 }
 0x14a   : > { %v1084_v45 = vmul.f32 %v8745_v31, %v1071_v32  ;;  %v1085_v47 = vmul.f32 %v8745_v31, %v1072_v33  ;;  %v9665_v52 = vadd.f32 %v1076_v34, %v9615_v17  ;;  %v9668_v57 = vadd.f32 %v1077_v35, %v9615_v17 }
 0x14b   : > { %v9675_v58 = vadd.f32 %v1078_v37, %v9615_v17  ;;  %v9678_v59 = vadd.f32 %v1079_v39, %v9615_v17  ;;  %v9681_v60 = vadd.f32 %v1080_v40, %v9615_v17  ;;  %v9684_v61 = vadd.f32 %v1081_v41, %v9615_v17  ;;  %v9848_v41 = vld [vmem:[#allocation3 + $0x18] sm:$0xff] }
 0x14c   : > { %v9697_v0 = vadd.f32 %v1082_v42, %v9615_v17  ;;  %v9700_v1 = vadd.f32 %v1083_v43, %v9615_v17  ;;  %v9703_v2 = vadd.f32 %v1084_v45, %v9615_v17  ;;  %v9706_v3 = vadd.f32 %v1085_v47, %v9615_v17  ;;  %1096 = vst.msk [vmem:[#allocation2] sm:$0xff] %vm1048_vm0, %v9665_v52  ;;  %v9862_v45 = vld [vmem:[#allocation3 + $0x28] sm:$0xff] }
 0x14d   : > { %1097 = vst.msk [vmem:[#allocation2 + $0x8] sm:$0xff] %vm1048_vm0, %v9668_v57  ;;  %v9718_v4 = vpack.c.bf16 %v9668_v57, %v9665_v52  ;;  %1098 = vst.msk [vmem:[#allocation2 + $0x10] sm:$0xff] %vm1048_vm0, %v9675_v58  ;;  %v7105_v37 = vcombine.high %v9791_v16, %v9796_v18  ;;  %v9843_v39 = vpack.c.bf16 %v9684_v61, %v9681_v60 }
 0x14e   : > { %1099 = vst.msk [vmem:[#allocation2 + $0x18] sm:$0xff] %vm1048_vm0, %v9678_v59  ;;  %1100 = vst.msk [vmem:[#allocation2 + $0x20] sm:$0xff] %vm1048_vm0, %v9681_v60  ;;  %v9738_v5 = vpack.c.bf16 %v9700_v1, %v9697_v0  ;;  %v2160_v42 = vmul.f32 %v9848_v41, %v9848_v41  ;;  %v2162_v8 = vmul.f32 %v9862_v45, %v9862_v45 }
 0x14f   : > { %1101 = vst.msk [vmem:[#allocation2 + $0x28] sm:$0xff] %vm1048_vm0, %v9684_v61  ;;  %1102 = vst.msk [vmem:[#allocation2 + $0x30] sm:$0xff] %vm1048_vm0, %v9697_v0  ;;  %7086 = vmatmul.mubr.msk.bf16.vlgmr.msra.gmra.mrb[8].mxu0 %vm1048_vm0, %v9718_v4 }
 0x150   : > { %1103 = vst.msk [vmem:[#allocation2 + $0x38] sm:$0xff] %vm1048_vm0, %v9700_v1  ;;  %1104 = vst.msk [vmem:[#allocation2 + $0x40] sm:$0xff] %vm1048_vm0, %v9703_v2  ;;  %1399 = vmatpush1.bf16.msra.mxu0 %v9490_v22  ;;  %7102 = vmatmul.mubr.msk.bf16.vlgmr.msra.gmra.mrb[8].mxu1 %vm1048_vm0, %v9738_v5  ;;  %v9760_v22 = vld [vmem:[%s11211_s5 + $0xd8] sm:$0xff] }
 0x151   : > { %1105 = vst.msk [vmem:[#allocation2 + $0x48] sm:$0xff] %vm1048_vm0, %v9706_v3  ;;  %1823 = vmatpush1.bf16.msra.mxu1 %v7117_v51  ;;  %1228 = vmatprep.mubr.bf16.mxu0 %v11217_v50  ;;  %v9770_v51 = vpack.c.bf16 %v9678_v59, %v9675_v58  ;;  %v7124_v13 = vcombine.high %v9760_v22, %v9765_v48 }
 0x152   : > { %1824 = vmatprep.subr.bf16.mxu1 %v7120_v6  ;;  %1470 = vmatprep.mubr.bf16.mxu1 %v11217_v50  ;;  %v7123_v26 = vcombine.low %v9760_v22, %v9765_v48  ;;  %v2182_v6 = vsel %vm1048_vm0, %v2160_v42, 0.0  ;;  %v2161_v22 = vmul.f32 %v9870_v62, %v9870_v62  ;;  %v9886_v48 = vld [vmem:[#allocation3 + $0x30] sm:$0xff] }
 0x153   : > { %1400 = vmatprep.subr.bf16.mxu0 %v9505_v28 }
 0x154   : > { %1401 = vmatpush1.bf16.msra.mxu0 %v9507_v30  ;;  %v9778_v30 = vpack.c.bf16 %v9706_v3, %v9703_v2 }
 0x155   : > { %1825 = vmatpush1.bf16.msra.mxu1 %v7119_v9  ;;  %1402 = vmatprep.subr.bf16.mxu0 %v9523_v36 }
 0x156   : > { %1826 = vmatprep.subr.bf16.mxu1 %v7122_v10  ;;  %v9880_v10 = vld [vmem:[#allocation3 + $0x38] sm:$0xff] }
 0x157   : > { %7087 = vmatmul.mubr.msk.bf16.gmra.mrb[12].mxu0 %vm1048_vm0, %v9770_v51 }
 0x158   : > { %v2076_v28 = vld [vmem:[%s2075_s23] sm:$0x1]  ;;  %7103 = vmatmul.mubr.msk.bf16.gmra.mrb[12].mxu1 %vm1048_vm0, %v9778_v30  ;;  %1238 = vmatprep.mubr.bf16.mxu0 %v11217_v50 }
 0x159   : > { %v2081_v11 = vld [vmem:[%s2080_s30] sm:$0x1]  ;;  %2077 = vst.msk [vmem:[#allocation3 + $0x10] sm:$0x1] %vm1996_vm1, %v2076_v28  ;;  %s2020_s30 = scalar_lea.vmem [#allocation2], %s9647_s25  ;;  %1827 = vmatpush1.bf16.msra.mxu1 %v7121_v49  ;;  %1854 = vmatprep.mubr.bf16.mxu1 %v11217_v50  ;;  %s2040_s25 = scalar_lea.vmem [#allocation2], %s9657_s0 }
 0x15a   : > { %v2086_v12 = vld [vmem:[%s2085_s17] sm:$0x1]  ;;  %2082 = vst.msk [vmem:[#allocation3 + $0x11] sm:$0x1] %vm1996_vm1, %v2081_v11  ;;  %1828 = vmatprep.subr.bf16.mxu1 %v7124_v13  ;;  %1403 = vmatpush1.bf16.msra.mxu0 %v9525_v38  ;;  %s2055_s17 = scalar_lea.vmem [#allocation2], %s9692_s2  ;;  %s2065_s0 = scalar_lea.vmem [#allocation2], %s9712_s9  ;;  %v2164_v11 = vmul.f32 %v9880_v10, %v9880_v10 }
 0x15b   : > { %2087 = vst.msk [vmem:[#allocation3 + $0x12] sm:$0x1] %vm1996_vm1, %v2086_v12  ;;  %v2091_v14 = vld [vmem:[%s2090_s22] sm:$0x1]  ;;  %1404 = vmatprep.subr.bf16.mxu0 %v9541_v44  ;;  %v2188_v28 = vsel %vm1048_vm0, %v2162_v8, 0.0  ;;  %v9896_v12 = vld [vmem:[#allocation3 + $0x48] sm:$0xff] }
 0x15c   : > { %v1995_v36 = vld [vmem:[%s1994_s24] sm:$0x1]  ;;  %2092 = vst.msk [vmem:[#allocation3 + $0x13] sm:$0x1] %vm1996_vm1, %v2091_v14  ;;  %v2185_v13 = vsel %vm1048_vm0, %v2161_v22, 0.0  ;;  %v2163_v14 = vmul.f32 %v9886_v48, %v9886_v48  ;;  %s11235_s24 = sld [smem:[#allocation12_spill]] }
 0x15d   : > { %v2001_v15 = vld [vmem:[%s2000_s26] sm:$0x1]  ;;  %1997 = vst.msk [vmem:[#allocation3] sm:$0x1] %vm1996_vm1, %v1995_v36  ;;  %1829 = vmatpush1.bf16.msra.mxu1 %v7123_v26  ;;  %v9904_v36 = vld [vmem:[#allocation3 + $0x40] sm:$0xff] }
 0x15e   : > { %2002 = vst.msk [vmem:[#allocation3 + $0x1] sm:$0x1] %vm1996_vm1, %v2001_v15  ;;  %v2006_v19 = vld [vmem:[%s2005_s27] sm:$0x1]  ;;  %8295 = vmatprep.subr.bf16.mxu1 %v9718_v4  ;;  %1405 = vmatpush1.bf16.msra.mxu0 %v9543_v46  ;;  %v2194_v15 = vsel %vm1048_vm0, %v2164_v11, 0.0 }
 0x15f   : > { %v2011_v20 = vld [vmem:[%s2010_s13] sm:$0x1]  ;;  %2007 = vst.msk [vmem:[#allocation3 + $0x2] sm:$0x1] %vm1996_vm1, %v2006_v19  ;;  %7088 = vmatmul.mubr.msk.bf16.gmra.mrb[16].mxu0 %vm1048_vm0, %v9843_v39  ;;  %1610 = vmatprep.subr.bf16.mxu0 %v7105_v37  ;;  %v2166_v19 = vmul.f32 %v9896_v12, %v9896_v12  ;;  %v7104_v37 = vcombine.low %v9791_v16, %v9796_v18 }
 0x160   : > { %v2016_v21 = vld [vmem:[%s2015_s15] sm:$0x1]  ;;  %2012 = vst.msk [vmem:[#allocation3 + $0x3] sm:$0x1] %vm1996_vm1, %v2011_v20  ;;  %7125 = vmatmul.mubr.msk.bf16.vlgmr.msra.gmra.mrb[16].mxu1 %vm1048_vm0, %v9718_v4  ;;  %1248 = vmatprep.mubr.bf16.mxu0 %v11217_v50  ;;  %v9910_v20 = vld [vmem:[#allocation3 + $0x58] sm:$0xff]  ;;  %v2172_v18 = vmul.f32 %v9595_v54, %v9595_v54  ;;  %v1556_v54 = vld [vmem:[%s11211_s5 + $0xd0] sm:$0xff] }
 0x161   : > { %2017 = vst.msk [vmem:[#allocation3 + $0x4] sm:$0x1] %vm1996_vm1, %v2016_v21  ;;  %v2021_v23 = vld [vmem:[%s2020_s30] sm:$0x1]  ;;  %8297 = vmatpush3.bf16.msra.mxu1 %v9718_v4  ;;  %1864 = vmatprep.mubr.bf16.mxu1 %v11217_v50  ;;  %v2191_v21 = vsel %vm1048_vm0, %v2163_v14, 0.0  ;;  %v2168_v26 = vmul.f32 %v9910_v20, %v9910_v20 }
 0x162   : > { %v2026_v24 = vld [vmem:[%s2025_s16] sm:$0x1]  ;;  %2022 = vst.msk [vmem:[#allocation3 + $0x5] sm:$0x1] %vm1996_vm1, %v2021_v23  ;;  %8299 = vmatprep.subr.bf16.mxu1 %v9770_v51  ;;  %v2165_v23 = vmul.f32 %v9904_v36, %v9904_v36  ;;  %s339_s26 = scalar_lea.vmem %s11235_s24, %s9339_s21 }
 0x163   : > { %v2031_v25 = vld [vmem:[%s2030_s3] sm:$0x1]  ;;  %2027 = vst.msk [vmem:[#allocation3 + $0x6] sm:$0x1] %vm1996_vm1, %v2026_v24 }
 0x164   : > { %2032 = vst.msk [vmem:[#allocation3 + $0x7] sm:$0x1] %vm1996_vm1, %v2031_v25  ;;  %v2036_v27 = vld [vmem:[%s2035_s18] sm:$0x1]  ;;  %v2200_v25 = vsel %vm1048_vm0, %v2166_v19, 0.0 }
 0x165   : > { %v2041_v29 = vld [vmem:[%s2040_s25] sm:$0x1]  ;;  %2037 = vst.msk [vmem:[#allocation3 + $0x8] sm:$0x1] %vm1996_vm1, %v2036_v27  ;;  %8301 = vmatpush3.bf16.msra.mxu1 %v9770_v51  ;;  %v9926_v27 = vld [vmem:[#allocation3 + $0x68] sm:$0xff]  ;;  %s11236_s25 = sld [smem:[#allocation13_spill]] }
 0x166   : > { %v2046_v31 = vld [vmem:[%s2045_s28] sm:$0x1]  ;;  %2042 = vst.msk [vmem:[#allocation3 + $0x9] sm:$0x1] %vm1996_vm1, %v2041_v29  ;;  %8303 = vmatprep.subr.bf16.mxu1 %v9843_v39  ;;  %v2197_v29 = vsel %vm1048_vm0, %v2165_v23, 0.0  ;;  %v2116_v23 = vmul.f32 %v9678_v59, %v9678_v59 }
 0x167   : > { %2047 = vst.msk [vmem:[#allocation3 + $0xa] sm:$0x1] %vm1996_vm1, %v2046_v31  ;;  %v2051_v32 = vld [vmem:[%s2050_s29] sm:$0x1]  ;;  %7089 = vmatmul.mubr.msk.bf16.gmra.mrb[20].mxu0 %vm1048_vm0, %v9738_v5 }
 0x168   : > { %v2056_v33 = vld [vmem:[%s2055_s17] sm:$0x1]  ;;  %2052 = vst.msk [vmem:[#allocation3 + $0xb] sm:$0x1] %vm1996_vm1, %v2051_v32  ;;  %7126 = vmatmul.mubr.msk.bf16.gmra.mrb[20].mxu1 %vm1048_vm0, %v9770_v51  ;;  %1258 = vmatprep.mubr.bf16.mxu0 %v11217_v50  ;;  %v9934_v32 = vld [vmem:[#allocation3 + $0x60] sm:$0xff]  ;;  %s342_s17 = scalar_lea.vmem %s11214_s8, %s9339_s21 }
 0x169   : > { %v2061_v34 = vld [vmem:[%s2060_s12] sm:$0x1]  ;;  %2057 = vst.msk [vmem:[#allocation3 + $0xc] sm:$0x1] %vm1996_vm1, %v2056_v33  ;;  %8305 = vmatpush3.bf16.msra.mxu1 %v9843_v39  ;;  %1874 = vmatprep.mubr.bf16.mxu1 %v11217_v50  ;;  %v1552_v33 = vld [vmem:[%s11211_s5 + $0x50] sm:$0xff]  ;;  %v2169_v42 = vmul.f32 %v9934_v32, %v9934_v32 }
 0x16a   : > { %2062 = vst.msk [vmem:[#allocation3 + $0xd] sm:$0x1] %vm1996_vm1, %v2061_v34  ;;  %v2066_v38 = vld [vmem:[%s2065_s0] sm:$0x1]  ;;  %8307 = vmatprep.subr.bf16.mxu1 %v9738_v5  ;;  %v1553_v34 = vld [vmem:[%s11211_s5 + $0x70] sm:$0xff] }
 0x16b   : > { %v2071_v35 = vld [vmem:[%s2070_s11] sm:$0x1]  ;;  %2067 = vst.msk [vmem:[#allocation3 + $0xe] sm:$0x1] %vm1996_vm1, %v2066_v38  ;;  %v9859_v43 = vld [vmem:[#allocation3] sm:$0xff]  ;;  %v2206_v38 = vsel %vm1048_vm0, %v2168_v26, 0.0 }
 0x16c   : > { %2072 = vst.msk [vmem:[#allocation3 + $0xf] sm:$0x1] %vm1996_vm1, %v2071_v35  ;;  %v9846_v40 = vld [vmem:[#allocation3 + $0x10] sm:$0xff]  ;;  %v2157_v47 = vmul.f32 %v9859_v43, %v9859_v43  ;;  %v2170_v35 = vmul.f32 %v9926_v27, %v9926_v27  ;;  %v2209_v8 = vsel %vm1048_vm0, %v2169_v42, 0.0 }
 0x16d   : > { %v2159_v44 = vmul.f32 %v9846_v40, %v9846_v40  ;;  %8309 = vmatpush3.bf16.msra.mxu1 %v9738_v5  ;;  %v9917_v24 = vld [vmem:[#allocation3 + $0x50] sm:$0xff] }
 0x16e   : > { %v2173_v63 = vsel %vm1048_vm0, %v2157_v47, 0.0  ;;  %8311 = vmatprep.subr.bf16.mxu1 %v9778_v30  ;;  %v2167_v31 = vmul.f32 %v9917_v24, %v9917_v24  ;;  %v1554_v47 = vld [vmem:[%s11211_s5 + $0x90] sm:$0xff]  ;;  %v2212_v16 = vsel %vm1048_vm0, %v2170_v35, 0.0  ;;  %v2120_v35 = vmul.f32 %v9700_v1, %v9700_v1 }
 0x16f   : > { %v2179_v46 = vsel %vm1048_vm0, %v2159_v44, 0.0  ;;  %2174 = vadd.xlane.f32.xlu0 %v2173_v63  ;;  %7090 = vmatmul.mubr.msk.bf16.gmra.mrb[24].mxu0 %vm1048_vm0, %v9778_v30  ;;  %v1555_v63 = vld [vmem:[%s11211_s5 + $0xb0] sm:$0xff] }
 0x170   : > { %2180 = vadd.xlane.f32.xlu1 %v2179_v46  ;;  %7127 = vmatmul.mubr.msk.bf16.gmra.mrb[24].mxu1 %vm1048_vm0, %v9843_v39  ;;  %v2203_v44 = vsel %vm1048_vm0, %v2167_v31, 0.0  ;;  %v7107_v46 = vcombine.high %v1552_v33, %v1553_v34  ;;  %v7109_v22 = vcombine.high %v1554_v47, %v1555_v63  ;;  %v7108_v11 = vcombine.low %v1554_v47, %v1555_v63 }
 0x171   : > { %8313 = vmatpush3.bf16.msra.mxu1 %v9778_v30  ;;  %1430 = vmatprep.mubr.bf16.mxu0 %v11217_v50  ;;  %v2115_v31 = vmul.f32 %v9675_v58, %v9675_v58  ;;  %v2144_v42 = vsel %vm1048_vm0, %v2120_v35, 0.0  ;;  %v8252_v47 = vpack.c.bf16 %v9848_v41, %v9846_v40  ;;  %v8258_v41 = vpack.c.bf16 %v9862_v45, %v9870_v62  ;;  %v10140_v35 = vld [vmem:[%s9366_s19] sm:$0xff] }
 0x172   : > { %1884 = vmatprep.mubr.bf16.mxu1 %v11217_v50  ;;  %v8270_v45 = vpack.c.bf16 %v9896_v12, %v9904_v36  ;;  %v8276_v62 = vpack.c.bf16 %v9910_v20, %v9917_v24 }
 0x173   : > { %v9874_v7 = vld [vmem:[#allocation3 + $0x8] sm:$0xff] }
 0x174   : > { %v2158_v9 = vmul.f32 %v9874_v7, %v9874_v7  ;;  %2183 = vadd.xlane.f32.xlu1 %v2182_v6  ;;  %v7106_v6 = vcombine.low %v1552_v33, %v1553_v34  ;;  %v8246_v26 = vpack.c.bf16 %v9874_v7, %v9859_v43  ;;  %v2132_v33 = vsel %vm1048_vm0, %v2116_v23, 0.0 }
 0x175   : > { %v2118_v34 = vmul.f32 %v9684_v61, %v9684_v61  ;;  %v2117_v43 = vmul.f32 %v9681_v60, %v9681_v60 }
 0x176   : > { %v2176_v49 = vsel %vm1048_vm0, %v2158_v9, 0.0  ;;  %v2171_v9 = vmul.f32 %v9597_v55, %v9597_v55 }
 0x177   : > { %2177 = vadd.xlane.f32.xlu0 %v2176_v49  ;;  %7099 = vmatmul.mubr.msk.bf16.vlgmr.msra.gmra.mrb[28].mxu0 %vm1048_vm0, %v9718_v4  ;;  %v1557_v49 = vld [vmem:[%s11211_s5 + $0xf0] sm:$0xff]  ;;  %v2138_v7 = vsel %vm1048_vm0, %v2118_v34, 0.0 }
 0x178   : > { %2189 = vadd.xlane.f32.xlu1 %v2188_v28  ;;  %1611 = vmatpush1.bf16.msra.mxu0 %v7104_v37  ;;  %v2218_v28 = vsel %vm1048_vm0, %v2172_v18, 0.0  ;;  %v2215_v55 = vsel %vm1048_vm0, %v2171_v9, 0.0  ;;  %v7111_v14 = vcombine.high %v1556_v54, %v1557_v49  ;;  %v7110_v19 = vcombine.low %v1556_v54, %v1557_v49 }
 0x179   : > { %7128 = vmatmul.mubr.msk.bf16.gmra.mrb[28].mxu1 %vm1048_vm0, %v9738_v5  ;;  %1612 = vmatprep.subr.bf16.mxu0 %v7107_v46  ;;  %v2135_v37 = vsel %vm1048_vm0, %v2117_v43, 0.0  ;;  %v2122_v46 = vmul.f32 %v9706_v3, %v9706_v3  ;;  %v1121_v9 = vlaneseq }
 0x17a   : > { %1440 = vmatprep.mubr.bf16.mxu0 %v11217_v50  ;;  %1894 = vmatprep.mubr.bf16.mxu1 %v11217_v50 }
 0x17b   : > { %2186 = vadd.xlane.f32.xlu0 %v2185_v13  ;;  %v2114_v13 = vmul.f32 %v9668_v57, %v9668_v57  ;;  %v2150_v18 = vsel %vm1048_vm0, %v2122_v46, 0.0  ;;  %v1122_v54 = vshrl.u32 %v1121_v9, 7 }
 0x17c   : > { %2195 = vadd.xlane.f32.xlu1 %v2194_v15  ;;  %1613 = vmatpush1.bf16.msra.mxu0 %v7106_v6  ;;  %v2113_v15 = vmul.f32 %v9665_v52, %v9665_v52  ;;  %v8264_v6 = vpack.c.bf16 %v9880_v10, %v9886_v48  ;;  %v8282_v10 = vpack.c.bf16 %v9926_v27, %v9934_v32 }
 0x17d   : > { %1614 = vmatprep.subr.bf16.mxu0 %v7109_v22 }
 0x17f   : > { %2192 = vadd.xlane.f32.xlu0 %v2191_v21  ;;  %7100 = vmatmul.mubr.msk.bf16.gmra.mrb[32].mxu0 %vm1048_vm0, %v9770_v51  ;;  %v2126_v21 = vsel %vm1048_vm0, %v2114_v13, 0.0  ;;  %v10118_v13 = vsub.s32 1, %v1122_v54 }
 0x180   : > { %2201 = vadd.xlane.f32.xlu1 %v2200_v25  ;;  %1615 = vmatpush1.bf16.msra.mxu0 %v7108_v11 }
 0x181   : > { %7129 = vmatmul.mubr.msk.bf16.gmra.mrb[32].mxu1 %vm1048_vm0, %v9778_v30  ;;  %1616 = vmatprep.subr.bf16.mxu0 %v7111_v14  ;;  %v10123_v14 = vld [vmem:[%s11212_s6 + $0x2] sm:$0x3] }
 0x182   : > { %1450 = vmatprep.mubr.bf16.mxu0 %v11217_v50  ;;  %v10133_v23 = vrot.slane %v10123_v14, %v10118_v13 }
 0x183   : > { %2198 = vadd.xlane.f32.xlu0 %v2197_v29  ;;  %v2123_v29 = vsel %vm1048_vm0, %v2113_v15, 0.0 }
 0x184   : > { %2207 = vadd.xlane.f32.xlu1 %v2206_v38  ;;  %1617 = vmatpush1.bf16.msra.mxu0 %v7110_v19  ;;  %v2129_v38 = vsel %vm1048_vm0, %v2115_v31, 0.0 }
 0x185   : > { %8248 = vmatprep.subr.msk.bf16.mxu0 %vm9989_vm2, %v8246_v26 }
 0x187   : > { %2204 = vadd.xlane.f32.xlu0 %v2203_v44  ;;  %7101 = vmatmul.mubr.msk.bf16.gmra.mrb[36].mxu0 %vm1048_vm0, %v9843_v39  ;;  %v2119_v44 = vmul.f32 %v9697_v0, %v9697_v0 }
 0x188   : > { %2213 = vadd.xlane.f32.xlu1 %v2212_v16  ;;  %1642 = vmatprep.mubr.bf16.mxu0 %v11217_v50  ;;  %v2121_v16 = vmul.f32 %v9703_v2, %v9703_v2 }
 0x189   : > { %v2141_v63 = vsel %vm1048_vm0, %v2119_v44, 0.0 }
 0x18a   : > { %v2147_v40 = vsel %vm1048_vm0, %v2121_v16, 0.0 }
 0x18b   : > { %2210 = vadd.xlane.f32.xlu0 %v2209_v8 }
 0x18c   : > { %2219 = vadd.xlane.f32.xlu1 %v2218_v28  ;;  %v10113_v28 = vsub.s32 0, %v1122_v54 }
 0x18f   : > { %2216 = vadd.xlane.f32.xlu0 %v2215_v55  ;;  %7112 = vmatmul.mubr.msk.bf16.vlgmr.msra.gmra.mrb[40].mxu0 %vm1048_vm0, %v9718_v4  ;;  %v1119_v55 = vld [vmem:[%s11212_s6] sm:$0x3] }
 0x190   : > { %2127 = vadd.xlane.f32.xlu1 %v2126_v21  ;;  %8251 = vmatpush3.bf16.xpose.msk.msra.mxu0 %vm9989_vm2, %v8246_v26  ;;  %v10126_v15 = vrot.slane %v1119_v55, %v10113_v28  ;;  %v10129_v19 = vrot.slane %v1119_v55, %v10118_v13 }
 0x191   : > { %8254 = vmatprep.subr.msk.bf16.mxu0 %vm9989_vm2, %v8252_v47  ;;  %1652 = vmatprep.mubr.bf16.mxu0 %v11217_v50 }
 0x193   : > { %2124 = vadd.xlane.f32.xlu0 %v2123_v29 }
 0x194   : > { %2133 = vadd.xlane.f32.xlu1 %v2132_v33 }
 0x197   : > { %2130 = vadd.xlane.f32.xlu0 %v2129_v38  ;;  %7113 = vmatmul.mubr.msk.bf16.gmra.mrb[44].mxu0 %vm1048_vm0, %v9770_v51 }
 0x198   : > { %2139 = vadd.xlane.f32.xlu1 %v2138_v7  ;;  %8257 = vmatpush3.bf16.xpose.msk.msra.mxu0 %vm9989_vm2, %v8252_v47 }
 0x199   : > { %1662 = vmatprep.mubr.bf16.mxu0 %v11217_v50  ;;  %8260 = vmatprep.subr.msk.bf16.mxu0 %vm9989_vm2, %v8258_v41 }
 0x19b   : > { %2136 = vadd.xlane.f32.xlu0 %v2135_v37 }
 0x19c   : > { %2145 = vadd.xlane.f32.xlu1 %v2144_v42 }
 0x19f   : > { %2142 = vadd.xlane.f32.xlu0 %v2141_v63  ;;  %7114 = vmatmul.mubr.msk.bf16.gmra.mrb[48].mxu0 %vm1048_vm0, %v9843_v39  ;;  %v10150_v63 = vld [vmem:[%s9366_s19 + $0x8] sm:$0xff] }
 0x1a0   : > { %2151 = vadd.xlane.f32.xlu1 %v2150_v18  ;;  %8263 = vmatpush3.bf16.xpose.msk.msra.mxu0 %vm9989_vm2, %v8258_v41 }
 0x1a1   : > { %1672 = vmatprep.mubr.bf16.mxu0 %v11217_v50  ;;  %8266 = vmatprep.subr.msk.bf16.mxu0 %vm9989_vm2, %v8264_v6 }
 0x1a3   : > { %2148 = vadd.xlane.f32.xlu0 %v2147_v40 }
 0x1a7   : > { %7115 = vmatmul.mubr.msk.bf16.gmra.mrb[52].mxu0 %vm1048_vm0, %v9738_v5 }
 0x1a8   : > { %8269 = vmatpush3.bf16.xpose.msk.msra.mxu0 %vm9989_vm2, %v8264_v6  ;;  %1682 = vmatprep.mubr.bf16.mxu0 %v11217_v50 }
 0x1a9   : > { %8272 = vmatprep.subr.msk.bf16.mxu0 %vm9989_vm2, %v8270_v45 }
 0x1af   : > { %7116 = vmatmul.mubr.msk.bf16.gmra.mrb[56].mxu0 %vm1048_vm0, %v9778_v30 }
 0x1b0   : > { %8275 = vmatpush3.bf16.xpose.msk.msra.mxu0 %vm9989_vm2, %v8270_v45  ;;  %7776 = vmatprep.mubr.msk.f32.mxu0 %vm1048_vm0, %v9665_v52 }
 0x1b1   : > { %8278 = vmatprep.subr.msk.bf16.mxu0 %vm9989_vm2, %v8276_v62 }
 0x1b8   : > { %8281 = vmatpush3.bf16.xpose.msk.msra.mxu0 %vm9989_vm2, %v8276_v62 }
 0x1b9   : > { %8284 = vmatprep.subr.msk.bf16.mxu0 %vm9989_vm2, %v8282_v10 }
 0x1c0   : > { %8287 = vmatpush3.bf16.xpose.msk.msra.mxu0 %vm9989_vm2, %v8282_v10 }
 0x1c1   : > { %8290 = vmatprep.subr.msk.bf16.mxu0 %vm9989_vm2, %v9601_v56 }
 0x1c8   : > { %8293 = vmatpush3.bf16.xpose.msk.msra.mxu0 %vm9989_vm2, %v9601_v56 }
 0x1c9   : > { %8363 = vmatprep.subr.bf16.mxu0 %v9718_v4 }
 0x1cf   : > { %7777 = vmatmul.mubr.msk.f32.vlgmr.msra.gmra.mrb[60].mxu0 %vm1048_vm0, %v9668_v57 }
 0x1d0   : > { %7779 = vmatprep.mubr.msk.f32.mxu0 %vm1048_vm0, %v9675_v58  ;;  %8365 = vmatpush3.bf16.msra.mxu0 %v9718_v4 }
 0x1d1   : > { %8367 = vmatprep.subr.bf16.mxu0 %v9770_v51 }
 0x1d3   : > { %7780 = vmatmul.mubr.msk.f32.gmra.mrb[62].mxu0 %vm1048_vm0, %v9678_v59 }
 0x1d4   : > { %7782 = vmatprep.mubr.msk.f32.mxu0 %vm1048_vm0, %v9681_v60  ;;  %8369 = vmatpush3.bf16.msra.mxu0 %v9770_v51 }
 0x1d5   : > { %8371 = vmatprep.subr.bf16.mxu0 %v9843_v39 }
 0x1d7   : > { %7783 = vmatmul.mubr.msk.f32.gmra.mrb[64].mxu0 %vm1048_vm0, %v9684_v61 }
 0x1d8   : > { %7785 = vmatprep.mubr.msk.f32.mxu0 %vm1048_vm0, %v9697_v0  ;;  %8373 = vmatpush3.bf16.msra.mxu0 %v9843_v39 }
 0x1d9   : > { %8375 = vmatprep.subr.bf16.mxu0 %v9738_v5 }
 0x1db   : > { %7786 = vmatmul.mubr.msk.f32.gmra.mrb[66].mxu0 %vm1048_vm0, %v9700_v1 }
 0x1dc   : > { %7788 = vmatprep.mubr.msk.f32.mxu0 %vm1048_vm0, %v9703_v2  ;;  %8377 = vmatpush3.bf16.msra.mxu0 %v9738_v5 }
 0x1dd   : > { %8379 = vmatprep.subr.bf16.mxu0 %v9778_v30 }
 0x1df   : > { %7789 = vmatmul.mubr.msk.f32.gmra.mrb[68].mxu0 %vm1048_vm0, %v9706_v3 }
 0x1e0   : > { %8381 = vmatpush3.bf16.msra.mxu0 %v9778_v30 }
 0x1fc   : > { %v2175_v56 = vpop.xlane.xlu0 %2174 }
 0x1fd   : > { %2414 = vxpose.xlu0.b32.start [1/16] (narrow) %v2175_v56, 8  ;;  %v2181_v12 = vpop.xlane.xlu1 %2180 }
 0x201   : > { %v2184_v36 = vpop.xlane.xlu1 %2183 }
 0x204   : > { %v2178_v48 = vpop.xlane.xlu0 %2177 }
 0x205   : > { %2415 = vxpose.xlu0.b32.cont [2/16] (narrow) %v2178_v48, 8  ;;  %v2190_v24 = vpop.xlane.xlu1 %2189 }
 0x208   : > { %v2187_v20 = vpop.xlane.xlu0 %2186 }
 0x209   : > { %2416 = vxpose.xlu0.b32.cont [3/16] (narrow) %v2181_v12, 8  ;;  %v2196_v32 = vpop.xlane.xlu1 %2195 }
 0x20c   : > { %v2193_v27 = vpop.xlane.xlu0 %2192 }
 0x20d   : > { %2417 = vxpose.xlu0.b32.cont [4/16] (narrow) %v2184_v36, 8  ;;  %v2202_v22 = vpop.xlane.xlu1 %2201 }
 0x210   : > { %v2199_v8 = vpop.xlane.xlu0 %2198 }
 0x211   : > { %2418 = vxpose.xlu0.b32.cont [5/16] (narrow) %v2187_v20, 8  ;;  %v2208_v11 = vpop.xlane.xlu1 %2207 }
 0x214   : > { %v2205_v49 = vpop.xlane.xlu0 %2204 }
 0x215   : > { %2419 = vxpose.xlu0.b32.cont [6/16] (narrow) %v2190_v24, 8  ;;  %v2214_v26 = vpop.xlane.xlu1 %2213 }
 0x218   : > { %v2211_v21 = vpop.xlane.xlu0 %2210 }
 0x219   : > { %2420 = vxpose.xlu0.b32.cont [7/16] (narrow) %v2193_v27, 8  ;;  %v2220_v12 = vpop.xlane.xlu1 %2219 }
 0x21c   : > { %v2217_v56 = vpop.xlane.xlu0 %2216 }
 0x21d   : > { %2421 = vxpose.xlu0.b32.cont [8/16] (narrow) %v2196_v32, 8 }
 0x221   : > { %2422 = vxpose.xlu0.b32.cont [9/16] (narrow) %v2199_v8, 8 }
 0x222   : > { %v1220_v29 = vpop.f32.mrb[8].mxu0 }
 0x223   : > { %v1221_v31 = vadd.f32 %v1220_v29, %v10126_v15  ;;  %v10136_v33 = vpop.f32.mrb[8].mxu1  ;;  %v1222_v34 = vpop.f32.mrb[9].mxu0 }
 0x224   : > { %v1223_v38 = vadd.f32 %v1222_v34, %v10129_v19  ;;  %v1464_v43 = vpop.f32.mrb[9].mxu1  ;;  %v1224_v7 = vpop.f32.mrb[10].mxu0  ;;  %v1770_v34 = vld [vmem:[%s11212_s6 + $0x6] sm:$0x3] }
 0x225   : > { %2423 = vxpose.xlu0.b32.cont [10/16] (narrow) %v2202_v22, 8  ;;  %v1269_v37 = vsub.f32 %v1221_v31, %v10140_v35  ;;  %v10144_v44 = vadd.f32 %v1464_v43, %v10133_v23  ;;  %v1225_v42 = vadd.f32 %v1224_v7, %v10126_v15  ;;  %v10147_v46 = vpop.f32.mrb[10].mxu1  ;;  %v1226_v47 = vpop.f32.mrb[11].mxu0 }
 0x226   : > { %v1270_v16 = vsub.f32 %v1223_v38, %v10150_v63  ;;  %v1227_v18 = vadd.f32 %v1226_v47, %v10129_v19  ;;  %v1468_v40 = vpop.f32.mrb[11].mxu1 }
 0x227   : > { %v1289_v41 = vmul.f32 %v1269_v37, %v1269_v37  ;;  %v1271_v6 = vsub.f32 %v1225_v42, %v10140_v35  ;;  %v10156_v45 = vadd.f32 %v1468_v40, %v10133_v23  ;;  %v10180_v40 = vrot.slane %v1770_v34, %v10113_v28 }
 0x228   : > { %v1290_v62 = vmul.f32 %v1270_v16, %v1270_v16  ;;  %v1272_v10 = vsub.f32 %v1227_v18, %v10150_v63 }
 0x229   : > { %2424 = vxpose.xlu0.b32.cont [11/16] (narrow) %v2205_v49, 8  ;;  %v1291_v48 = vmul.f32 %v1271_v6, %v1271_v6 }
 0x22a   : > { %v1309_v36 = vadd.f32 %v1290_v62, %v1289_v41  ;;  %v1230_v20 = vpop.f32.mrb[12].mxu0  ;;  %v1292_v22 = vmul.f32 %v1272_v10, %v1272_v10  ;;  %v10184_v62 = vrot.slane %v1770_v34, %v10118_v13 }
 0x22b   : > { %v1231_v24 = vadd.f32 %v1230_v20, %v10126_v15  ;;  %v10160_v27 = vpop.f32.mrb[12].mxu1  ;;  %v1232_v32 = vpop.f32.mrb[13].mxu0 }
 0x22c   : > { %v1310_v8 = vadd.f32 %v1309_v36, %v1291_v48  ;;  %v1233_v54 = vadd.f32 %v1232_v32, %v10129_v19  ;;  %v1474_v49 = vpop.f32.mrb[13].mxu1 }
 0x22d   : > { %2425 = vxpose.xlu0.b32.cont [12/16] (narrow) %v2208_v11, 8  ;;  %v1234_v11 = vpop.f32.mrb[14].mxu0  ;;  %v1273_v55 = vsub.f32 %v1231_v24, %v10140_v35  ;;  %v10168_v29 = vpop.f32.mrb[14].mxu1 }
 0x22e   : > { %v1236_v31 = vpop.f32.mrb[15].mxu0  ;;  %v1311_v38 = vadd.f32 %v1310_v8, %v1292_v22  ;;  %v1274_v43 = vsub.f32 %v1233_v54, %v10150_v63  ;;  %v1478_v7 = vpop.f32.mrb[15].mxu1 }
 0x22f   : > { %v1293_v37 = vmul.f32 %v1273_v55, %v1273_v55  ;;  %v1237_v47 = vadd.f32 %v1236_v31, %v10129_v19  ;;  %v10177_v18 = vadd.f32 %v1478_v7, %v10133_v23 }
 0x230   : > { %v1294_v16 = vmul.f32 %v1274_v43, %v1274_v43 }
 0x231   : > { %2426 = vxpose.xlu0.b32.cont [13/16] (narrow) %v2211_v21, 8  ;;  %v10165_v21 = vadd.f32 %v1474_v49, %v10133_v23  ;;  %v1312_v41 = vadd.f32 %v1311_v38, %v1293_v37  ;;  %v1276_v6 = vsub.f32 %v1237_v47, %v10150_v63  ;;  %v10193_v38 = vld [vmem:[%s9366_s19 + $0x30] sm:$0xff] }
 0x232   : > { %v1240_v10 = vpop.f32.mrb[16].mxu0 }
 0x233   : > { %v1856_v36 = vpop.f32.mrb[16].mxu1  ;;  %v1242_v20 = vpop.f32.mrb[17].mxu0  ;;  %v1296_v24 = vmul.f32 %v1276_v6, %v1276_v6  ;;  %v10200_v6 = vld [vmem:[%s9366_s19 + $0x38] sm:$0xff] }
 0x234   : > { %v1857_v32 = vadd.f32 %v1856_v36, %v10180_v40  ;;  %v1243_v8 = vadd.f32 %v1242_v20, %v10129_v19  ;;  %v1858_v22 = vpop.f32.mrb[17].mxu1  ;;  %v1244_v54 = vpop.f32.mrb[18].mxu0 }
 0x235   : > { %2427 = vxpose.xlu0.b32.cont [14/16] (narrow) %v2214_v26, 8  ;;  %v1235_v26 = vadd.f32 %v1234_v11, %v10126_v15  ;;  %v1859_v55 = vadd.f32 %v1858_v22, %v10184_v62  ;;  %v1860_v31 = vpop.f32.mrb[18].mxu1  ;;  %v1246_v34 = vpop.f32.mrb[19].mxu0 }
 0x236   : > { %v1905_v43 = vsub.f32 %v1857_v32, %v10193_v38  ;;  %v1278_v7 = vsub.f32 %v1243_v8, %v10150_v63  ;;  %v1861_v37 = vadd.f32 %v1860_v31, %v10180_v40  ;;  %v1862_v47 = vpop.f32.mrb[19].mxu1 }
 0x237   : > { %v1275_v42 = vsub.f32 %v1235_v26, %v10140_v35  ;;  %v1245_v26 = vadd.f32 %v1244_v54, %v10126_v15  ;;  %v1863_v22 = vadd.f32 %v1862_v47, %v10184_v62 }
 0x238   : > { %v1907_v36 = vsub.f32 %v1861_v37, %v10193_v38 }
 0x239   : > { %2428 = vxpose.xlu0.b32.cont [15/16] (narrow) %v2217_v56, 8  ;;  %v1313_v56 = vadd.f32 %v1312_v41, %v1294_v16  ;;  %v1295_v48 = vmul.f32 %v1275_v42, %v1275_v42  ;;  %v1247_v42 = vadd.f32 %v1246_v34, %v10129_v19  ;;  %v1908_v34 = vsub.f32 %v1863_v22, %v10200_v6 }
 0x23a   : > { %v1927_v31 = vmul.f32 %v1907_v36, %v1907_v36 }
 0x23b   : > { %v1314_v49 = vadd.f32 %v1313_v56, %v1295_v48  ;;  %v1279_v56 = vsub.f32 %v1245_v26, %v10140_v35  ;;  %v1925_v48 = vmul.f32 %v1905_v43, %v1905_v43  ;;  %v1280_v20 = vsub.f32 %v1247_v42, %v10150_v63  ;;  %v1866_v26 = vpop.f32.mrb[20].mxu1 }
 0x23c   : > { %v1867_v37 = vadd.f32 %v1866_v26, %v10180_v40 }
 0x23d   : > { %2429 = vxpose.xlu0.b32.end [16/16] (narrow) %v2220_v12, 8  ;;  %v1241_v12 = vadd.f32 %v1240_v10, %v10126_v15  ;;  %v1315_v16 = vadd.f32 %v1314_v49, %v1296_v24  ;;  %v1906_v10 = vsub.f32 %v1859_v55, %v10200_v6  ;;  %v1299_v54 = vmul.f32 %v1279_v56, %v1279_v56  ;;  %v1250_v24 = vpop.f32.mrb[20].mxu0 }
 0x23e   : > { %v1251_v55 = vadd.f32 %v1250_v24, %v10126_v15  ;;  %v1252_v43 = vpop.f32.mrb[21].mxu0  ;;  %v1928_v56 = vmul.f32 %v1908_v34, %v1908_v34 }
 0x23f   : > { %v1277_v11 = vsub.f32 %v1241_v12, %v10140_v35  ;;  %v1298_v12 = vmul.f32 %v1278_v7, %v1278_v7  ;;  %v1926_v8 = vmul.f32 %v1906_v10, %v1906_v10  ;;  %v1300_v7 = vmul.f32 %v1280_v20, %v1280_v20 }
 0x240   : > { %v1253_v42 = vadd.f32 %v1252_v43, %v10129_v19  ;;  %v1281_v36 = vsub.f32 %v1251_v55, %v10140_v35 }
 0x241   : > { %v1297_v41 = vmul.f32 %v1277_v11, %v1277_v11  ;;  %v1945_v11 = vadd.f32 %v1926_v8, %v1925_v48 }
 0x242   : > { %v1282_v8 = vsub.f32 %v1253_v42, %v10150_v63  ;;  %v1301_v50 = vmul.f32 %v1281_v36, %v1281_v36 }
 0x243   : > { %v1316_v32 = vadd.f32 %v1315_v16, %v1297_v41  ;;  %v1868_v16 = vpop.f32.mrb[21].mxu1  ;;  %v1254_v41 = vpop.f32.mrb[22].mxu0  ;;  %v1946_v47 = vadd.f32 %v1945_v11, %v1927_v31 }
 0x244   : > { %v1256_v48 = vpop.f32.mrb[23].mxu0  ;;  %v1869_v22 = vadd.f32 %v1868_v16, %v10184_v62  ;;  %v1255_v20 = vadd.f32 %v1254_v41, %v10126_v15 }
 0x245   : > { %v1317_v49 = vadd.f32 %v1316_v32, %v1298_v12  ;;  %v1870_v12 = vpop.f32.mrb[22].mxu1  ;;  %v1909_v32 = vsub.f32 %v1867_v37, %v10193_v38  ;;  %v1947_v43 = vadd.f32 %v1946_v47, %v1928_v56  ;;  %v1257_v42 = vadd.f32 %v1256_v48, %v10129_v19  ;;  %v1260_v56 = vpop.f32.mrb[24].mxu0 }
 0x246   : > { %v1872_v24 = vpop.f32.mrb[23].mxu1  ;;  %v1910_v11 = vsub.f32 %v1869_v22, %v10200_v6  ;;  %v1283_v34 = vsub.f32 %v1255_v20, %v10140_v35  ;;  %v1262_v22 = vpop.f32.mrb[25].mxu0  ;;  %v1261_v48 = vadd.f32 %v1260_v56, %v10126_v15 }
 0x247   : > { %v1318_v10 = vadd.f32 %v1317_v49, %v1299_v54  ;;  %v1871_v54 = vadd.f32 %v1870_v12, %v10180_v40  ;;  %v1929_v31 = vmul.f32 %v1909_v32, %v1909_v32  ;;  %v1302_v49 = vmul.f32 %v1282_v8, %v1282_v8  ;;  %v1876_v8 = vpop.f32.mrb[24].mxu1 }
 0x248   : > { %v1873_v16 = vadd.f32 %v1872_v24, %v10184_v62  ;;  %v1303_v47 = vmul.f32 %v1283_v34, %v1283_v34  ;;  %v1284_v32 = vsub.f32 %v1257_v42, %v10150_v63  ;;  %v1877_v24 = vadd.f32 %v1876_v8, %v10180_v40 }
 0x249   : > { %v1319_v26 = vadd.f32 %v1318_v10, %v1300_v7  ;;  %v1911_v37 = vsub.f32 %v1871_v54, %v10193_v38  ;;  %v10224_v7 = vrot.slane %v10123_v14, %v10113_v28  ;;  %v1948_v41 = vadd.f32 %v1947_v43, %v1929_v31  ;;  %v1264_v43 = vpop.f32.mrb[26].mxu0 }
 0x24a   : > { %v1930_v10 = vmul.f32 %v1910_v11, %v1910_v11  ;;  %v1263_v14 = vadd.f32 %v1262_v22, %v10129_v19  ;;  %v1304_v31 = vmul.f32 %v1284_v32, %v1284_v32  ;;  %v1285_v42 = vsub.f32 %v1261_v48, %v10140_v35 }
 0x24b   : > { %v1320_v55 = vadd.f32 %v1319_v26, %v1301_v50  ;;  %v1931_v12 = vmul.f32 %v1911_v37, %v1911_v37  ;;  %v1912_v50 = vsub.f32 %v1873_v16, %v10200_v6  ;;  %v1878_v26 = vpop.f32.mrb[25].mxu1  ;;  %v1913_v16 = vsub.f32 %v1877_v24, %v10193_v38 }
 0x24c   : > { %v1949_v20 = vadd.f32 %v1948_v41, %v1930_v10  ;;  %v1880_v34 = vpop.f32.mrb[26].mxu1  ;;  %v1286_v41 = vsub.f32 %v1263_v14, %v10150_v63  ;;  %v1265_v22 = vadd.f32 %v1264_v43, %v10126_v15  ;;  %v1305_v32 = vmul.f32 %v1285_v42, %v1285_v42 }
 0x24d   : > { %v1321_v36 = vadd.f32 %v1320_v55, %v1302_v49  ;;  %v1932_v11 = vmul.f32 %v1912_v50, %v1912_v50  ;;  %v1879_v49 = vadd.f32 %v1878_v26, %v10184_v62  ;;  %v1266_v55 = vpop.f32.mrb[27].mxu0  ;;  %v1882_v10 = vpop.f32.mrb[27].mxu1  ;;  %v1933_v50 = vmul.f32 %v1913_v16, %v1913_v16 }
 0x24e   : > { %v1950_v37 = vadd.f32 %v1949_v20, %v1931_v12  ;;  %v1306_v26 = vmul.f32 %v1286_v41, %v1286_v41  ;;  %v1287_v12 = vsub.f32 %v1265_v22, %v10140_v35  ;;  %v1267_v48 = vadd.f32 %v1266_v55, %v10129_v19  ;;  %v1886_v16 = vpop.f32.mrb[28].mxu1 }
 0x24f   : > { %v1322_v54 = vadd.f32 %v1321_v36, %v1303_v47  ;;  %v1914_v8 = vsub.f32 %v1879_v49, %v10200_v6  ;;  %v1881_v47 = vadd.f32 %v1880_v34, %v10180_v40 }
 0x250   : > { %v1951_v36 = vadd.f32 %v1950_v37, %v1932_v11  ;;  %v1307_v15 = vmul.f32 %v1287_v12, %v1287_v12  ;;  %v1288_v11 = vsub.f32 %v1267_v48, %v10150_v63  ;;  %v1888_v63 = vpop.f32.mrb[29].mxu1 }
 0x251   : > { %v1323_v56 = vadd.f32 %v1322_v54, %v1304_v31  ;;  %v1934_v53 = vmul.f32 %v1914_v8, %v1914_v8  ;;  %v1915_v20 = vsub.f32 %v1881_v47, %v10193_v38  ;;  %v1883_v54 = vadd.f32 %v1882_v10, %v10184_v62  ;;  %v1432_v31 = vpop.f32.mrb[28].mxu0  ;;  %v1890_v12 = vpop.f32.mrb[30].mxu1 }
 0x252   : > { %v1952_v14 = vadd.f32 %v1951_v36, %v1933_v50  ;;  %v1433_v49 = vadd.f32 %v1432_v31, %v10224_v7  ;;  %v1434_v34 = vpop.f32.mrb[29].mxu0  ;;  %v1308_v41 = vmul.f32 %v1288_v11, %v1288_v11  ;;  %v1887_v8 = vadd.f32 %v1886_v16, %v10180_v40  ;;  %v10253_v50 = vld [vmem:[%s9366_s19 + $0x18] sm:$0xff] }
 0x253   : > { %v1324_v24 = vadd.f32 %v1323_v56, %v1305_v32  ;;  %v1935_v43 = vmul.f32 %v1915_v20, %v1915_v20  ;;  %v1916_v42 = vsub.f32 %v1883_v54, %v10200_v6  ;;  %v1435_v19 = vadd.f32 %v1434_v34, %v10133_v23  ;;  %v1436_v55 = vpop.f32.mrb[30].mxu0  ;;  %v10247_v56 = vld [vmem:[%s9366_s19 + $0x10] sm:$0xff]  ;;  %v1892_v54 = vpop.f32.mrb[31].mxu1 }
 0x254   : > { %v1953_v35 = vadd.f32 %v1952_v14, %v1934_v53  ;;  %v1481_v10 = vsub.f32 %v1433_v49, %v10247_v56  ;;  %v1437_v22 = vadd.f32 %v1436_v55, %v10224_v7  ;;  %v1438_v47 = vpop.f32.mrb[31].mxu0  ;;  %v1917_v48 = vsub.f32 %v1887_v8, %v10193_v38 }
 0x255   : > { %v1325_v37 = vadd.f32 %v1324_v24, %v1306_v26  ;;  %v1936_v53 = vmul.f32 %v1916_v42, %v1916_v42  ;;  %v1482_v26 = vsub.f32 %v1435_v19, %v10253_v50  ;;  %v1889_v24 = vadd.f32 %v1888_v63, %v10184_v62  ;;  %v1442_v55 = vpop.f32.mrb[32].mxu0 }
 0x256   : > { %v1954_v32 = vadd.f32 %v1953_v35, %v1935_v43  ;;  %v1501_v20 = vmul.f32 %v1481_v10, %v1481_v10  ;;  %v1483_v14 = vsub.f32 %v1437_v22, %v10247_v56  ;;  %v1891_v49 = vadd.f32 %v1890_v12, %v10180_v40 }
 0x257   : > { %v1326_v36 = vadd.f32 %v1325_v37, %v1307_v15  ;;  %v1502_v11 = vmul.f32 %v1482_v26, %v1482_v26  ;;  %v1439_v15 = vadd.f32 %v1438_v47, %v10133_v23  ;;  %v1937_v43 = vmul.f32 %v1917_v48, %v1917_v48  ;;  %v1896_v48 = vpop.f32.mrb[32].mxu1 }
 0x258   : > { %v1955_v31 = vadd.f32 %v1954_v32, %v1936_v53  ;;  %v1918_v34 = vsub.f32 %v1889_v24, %v10200_v6  ;;  %v1503_v37 = vmul.f32 %v1483_v14, %v1483_v14  ;;  %v1893_v35 = vadd.f32 %v1892_v54, %v10184_v62  ;;  %v1444_v32 = vpop.f32.mrb[33].mxu0 }
 0x259   : > { %v1521_v42 = vadd.f32 %v1502_v11, %v1501_v20  ;;  %v1919_v16 = vsub.f32 %v1891_v49, %v10193_v38  ;;  %v1484_v19 = vsub.f32 %v1439_v15, %v10253_v50  ;;  %v10265_v10 = vadd.f32 %v1326_v36, %v1308_v41  ;;  %v1446_v24 = vpop.f32.mrb[34].mxu0  ;;  %v1898_v36 = vpop.f32.mrb[33].mxu1 }
 0x25a   : > { %v1956_v8 = vadd.f32 %v1955_v31, %v1937_v43  ;;  %v1938_v63 = vmul.f32 %v1918_v34, %v1918_v34  ;;  %v1920_v22 = vsub.f32 %v1893_v35, %v10200_v6  ;;  %v1443_v47 = vadd.f32 %v1442_v55, %v10224_v7  ;;  %v1448_v31 = vpop.f32.mrb[35].mxu0 }
 0x25b   : > { %v1522_v53 = vadd.f32 %v1521_v42, %v1503_v37  ;;  %v1939_v26 = vmul.f32 %v1919_v16, %v1919_v16  ;;  %v1504_v12 = vmul.f32 %v1484_v19, %v1484_v19  ;;  %v1445_v20 = vadd.f32 %v1444_v32, %v10133_v23  ;;  %v1900_v37 = vpop.f32.mrb[34].mxu1 }
 0x25c   : > { %v1957_v14 = vadd.f32 %v1956_v8, %v1938_v63  ;;  %v1940_v54 = vmul.f32 %v1920_v22, %v1920_v22  ;;  %v1485_v11 = vsub.f32 %v1443_v47, %v10247_v56  ;;  %v1897_v41 = vadd.f32 %v1896_v48, %v10180_v40  ;;  %v1902_v55 = vpop.f32.mrb[35].mxu1  ;;  %v1558_v8 = vld [vmem:[%s11212_s6 + $0x4] sm:$0x3] }
 0x25d   : > { %v1523_v49 = vadd.f32 %v1522_v53, %v1504_v12  ;;  %v1486_v15 = vsub.f32 %v1445_v20, %v10253_v50  ;;  %v1899_v43 = vadd.f32 %v1898_v36, %v10184_v62  ;;  %v1447_v34 = vadd.f32 %v1446_v24, %v10224_v7 }
 0x25e   : > { %v1958_v35 = vadd.f32 %v1957_v14, %v1939_v26  ;;  %v1505_v42 = vmul.f32 %v1485_v11, %v1485_v11  ;;  %v1921_v16 = vsub.f32 %v1897_v41, %v10193_v38  ;;  %v1901_v19 = vadd.f32 %v1900_v37, %v10180_v40  ;;  %v1452_v14 = vpop.f32.mrb[36].mxu0 }
 0x25f   : > { %v1506_v63 = vmul.f32 %v1486_v15, %v1486_v15  ;;  %v1922_v22 = vsub.f32 %v1899_v43, %v10200_v6  ;;  %v1487_v47 = vsub.f32 %v1447_v34, %v10247_v56  ;;  %v1449_v32 = vadd.f32 %v1448_v31, %v10133_v23  ;;  %v1454_v31 = vpop.f32.mrb[37].mxu0 }
 0x260   : > { %v1959_v53 = vadd.f32 %v1958_v35, %v1940_v54  ;;  %v1524_v12 = vadd.f32 %v1523_v49, %v1505_v42  ;;  %v1941_v26 = vmul.f32 %v1921_v16, %v1921_v16  ;;  %v1923_v48 = vsub.f32 %v1901_v19, %v10193_v38  ;;  %v1456_v37 = vpop.f32.mrb[38].mxu0 }
 0x261   : > { %v1942_v20 = vmul.f32 %v1922_v22, %v1922_v22  ;;  %v1488_v40 = vsub.f32 %v1449_v32, %v10253_v50  ;;  %v1903_v24 = vadd.f32 %v1902_v55, %v10184_v62  ;;  %v10287_v11 = vrot.slane %v1558_v8, %v10113_v28  ;;  %v1458_v19 = vpop.f32.mrb[39].mxu0 }
 0x262   : > { %v1960_v41 = vadd.f32 %v1959_v53, %v1941_v26  ;;  %v1525_v36 = vadd.f32 %v1524_v12, %v1506_v63  ;;  %v1507_v15 = vmul.f32 %v1487_v47, %v1487_v47  ;;  %v1453_v43 = vadd.f32 %v1452_v14, %v10224_v7  ;;  %v1644_v14 = vpop.f32.mrb[40].mxu0 }
 0x263   : > { %v1943_v54 = vmul.f32 %v1923_v48, %v1923_v48  ;;  %v1508_v49 = vmul.f32 %v1488_v40, %v1488_v40  ;;  %v1924_v34 = vsub.f32 %v1903_v24, %v10200_v6  ;;  %v1455_v38 = vadd.f32 %v1454_v31, %v10133_v23 }
 0x264   : > { %v1961_v35 = vadd.f32 %v1960_v41, %v1942_v20  ;;  %v1526_v42 = vadd.f32 %v1525_v36, %v1507_v15  ;;  %v1489_v62 = vsub.f32 %v1453_v43, %v10247_v56  ;;  %v1457_v16 = vadd.f32 %v1456_v37, %v10224_v7  ;;  %v1646_v43 = vpop.f32.mrb[41].mxu0 }
 0x265   : > { %v1463_v55 = vadd.f32 %v10136_v33, %v10224_v7  ;;  %v1944_v63 = vmul.f32 %v1924_v34, %v1924_v34  ;;  %v1490_v22 = vsub.f32 %v1455_v38, %v10253_v50  ;;  %v1459_v47 = vadd.f32 %v1458_v19, %v10133_v23  ;;  %v1648_v31 = vpop.f32.mrb[42].mxu0  ;;  %v10313_v34 = vld [vmem:[%s9366_s19 + $0x20] sm:$0xff] }
 0x266   : > { %v1527_v32 = vadd.f32 %v1526_v42, %v1508_v49  ;;  %v1509_v6 = vmul.f32 %v1489_v62, %v1489_v62  ;;  %v1491_v53 = vsub.f32 %v1457_v16, %v10247_v56  ;;  %v1962_v12 = vadd.f32 %v1961_v35, %v1943_v54  ;;  %v1650_v37 = vpop.f32.mrb[43].mxu0  ;;  %v10319_v62 = vld [vmem:[%s9366_s19 + $0x28] sm:$0xff] }
 0x267   : > { %v1510_v26 = vmul.f32 %v1490_v22, %v1490_v22  ;;  %v10300_v48 = vrot.slane %v1558_v8, %v10118_v13  ;;  %v1492_v40 = vsub.f32 %v1459_v47, %v10253_v50  ;;  %v1493_v33 = vsub.f32 %v1463_v55, %v10247_v56 }
 0x268   : > { %v1528_v20 = vadd.f32 %v1527_v32, %v1509_v6  ;;  %v10303_v24 = vadd.f32 %v1962_v12, %v1944_v63  ;;  %v1467_v23 = vadd.f32 %v10147_v46, %v10224_v7  ;;  %v1511_v36 = vmul.f32 %v1491_v53, %v1491_v53 }
 0x269   : > { %v1645_v15 = vadd.f32 %v1644_v14, %v10287_v11  ;;  %v1494_v13 = vsub.f32 %v10144_v44, %v10253_v50  ;;  %v1647_v8 = vadd.f32 %v1646_v43, %v10300_v48  ;;  %v1512_v49 = vmul.f32 %v1492_v40, %v1492_v40 }
 0x26a   : > { %v1529_v41 = vadd.f32 %v1528_v20, %v1510_v26  ;;  %v1649_v46 = vadd.f32 %v1648_v31, %v10287_v11  ;;  %v1513_v35 = vmul.f32 %v1493_v33, %v1493_v33  ;;  %v1495_v42 = vsub.f32 %v1467_v23, %v10247_v56  ;;  %v1654_v40 = vpop.f32.mrb[44].mxu0 }
 0x26b   : > { %v1693_v38 = vsub.f32 %v1645_v15, %v10313_v34  ;;  %v1694_v16 = vsub.f32 %v1647_v8, %v10319_v62  ;;  %v1651_v44 = vadd.f32 %v1650_v37, %v10300_v48  ;;  %v1473_v19 = vadd.f32 %v10160_v27, %v10224_v7 }
 0x26c   : > { %v1530_v54 = vadd.f32 %v1529_v41, %v1511_v36  ;;  %v1695_v22 = vsub.f32 %v1649_v46, %v10313_v34  ;;  %v1496_v47 = vsub.f32 %v10156_v45, %v10253_v50  ;;  %v1514_v53 = vmul.f32 %v1494_v13, %v1494_v13  ;;  %v1656_v41 = vpop.f32.mrb[45].mxu0 }
 0x26d   : > { %v1713_v63 = vmul.f32 %v1693_v38, %v1693_v38  ;;  %v1714_v32 = vmul.f32 %v1694_v16, %v1694_v16  ;;  %v1696_v6 = vsub.f32 %v1651_v44, %v10319_v62  ;;  %v1515_v33 = vmul.f32 %v1495_v42, %v1495_v42  ;;  %v1658_v8 = vpop.f32.mrb[46].mxu0 }
 0x26e   : > { %v1531_v55 = vadd.f32 %v1530_v54, %v1512_v49  ;;  %v1715_v26 = vmul.f32 %v1695_v22, %v1695_v22  ;;  %v1497_v23 = vsub.f32 %v1473_v19, %v10247_v56  ;;  %v1655_v27 = vadd.f32 %v1654_v40, %v10287_v11  ;;  %v1660_v38 = vpop.f32.mrb[47].mxu0 }
 0x26f   : > { %v1733_v20 = vadd.f32 %v1714_v32, %v1713_v63  ;;  %v1516_v36 = vmul.f32 %v1496_v47, %v1496_v47  ;;  %v1716_v43 = vmul.f32 %v1696_v6, %v1696_v6  ;;  %v1657_v45 = vadd.f32 %v1656_v41, %v10300_v48 }
 0x270   : > { %v1532_v12 = vadd.f32 %v1531_v55, %v1513_v35  ;;  %v1498_v13 = vsub.f32 %v10165_v21, %v10253_v50  ;;  %v1697_v54 = vsub.f32 %v1655_v27, %v10313_v34  ;;  %v1659_v49 = vadd.f32 %v1658_v8, %v10287_v11 }
 0x271   : > { %v1734_v15 = vadd.f32 %v1733_v20, %v1715_v26  ;;  %v1698_v37 = vsub.f32 %v1657_v45, %v10319_v62  ;;  %v1661_v35 = vadd.f32 %v1660_v38, %v10300_v48  ;;  %v1517_v42 = vmul.f32 %v1497_v23, %v1497_v23 }
 0x272   : > { %v1533_v14 = vadd.f32 %v1532_v12, %v1514_v53  ;;  %v1717_v16 = vmul.f32 %v1697_v54, %v1697_v54  ;;  %v1699_v44 = vsub.f32 %v1659_v49, %v10313_v34  ;;  %v1477_v55 = vadd.f32 %v10168_v29, %v10224_v7  ;;  %v1664_v6 = vpop.f32.mrb[48].mxu0 }
 0x273   : > { %v1735_v46 = vadd.f32 %v1734_v15, %v1716_v43  ;;  %v1718_v21 = vmul.f32 %v1698_v37, %v1698_v37  ;;  %v1518_v63 = vmul.f32 %v1498_v13, %v1498_v13  ;;  %v1700_v47 = vsub.f32 %v1661_v35, %v10319_v62  ;;  %v1666_v20 = vpop.f32.mrb[49].mxu0 }
 0x274   : > { %v1534_v31 = vadd.f32 %v1533_v14, %v1515_v33  ;;  %v1719_v12 = vmul.f32 %v1699_v44, %v1699_v44  ;;  %v1665_v26 = vadd.f32 %v1664_v6, %v10287_v11  ;;  %v1499_v33 = vsub.f32 %v1477_v55, %v10247_v56  ;;  %v1668_v14 = vpop.f32.mrb[50].mxu0 }
 0x275   : > { %v1736_v22 = vadd.f32 %v1735_v46, %v1717_v16  ;;  %v1667_v23 = vadd.f32 %v1666_v20, %v10300_v48  ;;  %v1720_v29 = vmul.f32 %v1700_v47, %v1700_v47  ;;  %v1669_v41 = vadd.f32 %v1668_v14, %v10287_v11 }
 0x276   : > { %v1535_v19 = vadd.f32 %v1534_v31, %v1516_v36  ;;  %v1701_v7 = vsub.f32 %v1665_v26, %v10313_v34  ;;  %v1670_v36 = vpop.f32.mrb[51].mxu0  ;;  %v1500_v15 = vsub.f32 %v10177_v18, %v10253_v50  ;;  %v1519_v31 = vmul.f32 %v1499_v33, %v1499_v33 }
 0x277   : > { %v1737_v53 = vadd.f32 %v1736_v22, %v1718_v21  ;;  %v1702_v43 = vsub.f32 %v1667_v23, %v10319_v62  ;;  %v1671_v45 = vadd.f32 %v1670_v36, %v10300_v48  ;;  %v1703_v56 = vsub.f32 %v1669_v41, %v10313_v34 }
 0x278   : > { %v1536_v32 = vadd.f32 %v1535_v19, %v1517_v42  ;;  %v1721_v13 = vmul.f32 %v1701_v7, %v1701_v7  ;;  %v1520_v46 = vmul.f32 %v1500_v15, %v1500_v15 }
 0x279   : > { %v1738_v27 = vadd.f32 %v1737_v53, %v1719_v12  ;;  %v1722_v54 = vmul.f32 %v1702_v43, %v1702_v43  ;;  %v1704_v38 = vsub.f32 %v1671_v45, %v10319_v62  ;;  %v1723_v16 = vmul.f32 %v1703_v56, %v1703_v56 }
 0x27a   : > { %v1537_v40 = vadd.f32 %v1536_v32, %v1518_v63  ;;  %v1674_v37 = vpop.f32.mrb[52].mxu0 }
 0x27b   : > { %v1739_v8 = vadd.f32 %v1738_v27, %v1720_v29  ;;  %v1675_v18 = vadd.f32 %v1674_v37, %v10287_v11  ;;  %v1676_v50 = vpop.f32.mrb[53].mxu0  ;;  %v1724_v63 = vmul.f32 %v1704_v38, %v1704_v38 }
 0x27c   : > { %v1538_v35 = vadd.f32 %v1537_v40, %v1519_v31  ;;  %v1677_v44 = vadd.f32 %v1676_v50, %v10300_v48  ;;  %v1678_v19 = vpop.f32.mrb[54].mxu0  ;;  %v10362_v40 = vpop.xlane.xlu0 %2124  ;;  %v10376_v50 = vand.u32 127, %v1121_v9 }
 0x27d   : > { %v1740_v49 = vadd.f32 %v1739_v8, %v1721_v13  ;;  %v1705_v22 = vsub.f32 %v1675_v18, %v10313_v34  ;;  %v1679_v47 = vadd.f32 %v1678_v19, %v10287_v11  ;;  %v1680_v32 = vpop.f32.mrb[55].mxu0 }
 0x27e   : > { %v10355_v55 = vadd.f32 %v1538_v35, %v1520_v46  ;;  %v1706_v6 = vsub.f32 %v1677_v44, %v10319_v62  ;;  %v1681_v53 = vadd.f32 %v1680_v32, %v10300_v48  ;;  %vm2095_vm3 = vcmp.lt.s32.totalorder %v10376_v50, 20 }
 0x27f   : > { %v1741_v42 = vadd.f32 %v1740_v49, %v1722_v54  ;;  %v1725_v26 = vmul.f32 %v1705_v22, %v1705_v22  ;;  %v1707_v20 = vsub.f32 %v1679_v47, %v10313_v34  ;;  %v11233_v22 = vmov 0.0  }
 0x280   : > { %v1726_v33 = vmul.f32 %v1706_v6, %v1706_v6  ;;  %v1708_v14 = vsub.f32 %v1681_v53, %v10319_v62  ;;  %v10369_v54 = vpop.xlane.xlu0 %2130  ;;  %v10393_v53 = vpop.xlane.xlu1 %2127 }
 0x281   : > { %v1742_v21 = vadd.f32 %v1741_v42, %v1723_v16  ;;  %v1727_v7 = vmul.f32 %v1707_v20, %v1707_v20 }
 0x282   : > { %v1684_v27 = vpop.f32.mrb[56].mxu0  ;;  %v1728_v8 = vmul.f32 %v1708_v14, %v1708_v14 }
 0x283   : > { %v1743_v12 = vadd.f32 %v1742_v21, %v1724_v63  ;;  %v1685_v41 = vadd.f32 %v1684_v27, %v10287_v11  ;;  %v1686_v36 = vpop.f32.mrb[57].mxu0 }
 0x284   : > { %v1687_v15 = vadd.f32 %v1686_v36, %v10300_v48  ;;  %v1688_v43 = vpop.f32.mrb[58].mxu0  ;;  %v10378_v19 = vpop.xlane.xlu0 %2136 }
 0x285   : > { %v1744_v23 = vadd.f32 %v1743_v12, %v1725_v26  ;;  %v1709_v13 = vsub.f32 %v1685_v41, %v10313_v34  ;;  %v1689_v56 = vadd.f32 %v1688_v43, %v10287_v11  ;;  %v1690_v31 = vpop.f32.mrb[59].mxu0  ;;  %v10399_v41 = vpop.xlane.xlu1 %2133 }
 0x286   : > { %v1710_v49 = vsub.f32 %v1687_v15, %v10319_v62  ;;  %v1691_v38 = vadd.f32 %v1690_v31, %v10300_v48 }
 0x287   : > { %v1745_v29 = vadd.f32 %v1744_v23, %v1726_v33  ;;  %v1729_v37 = vmul.f32 %v1709_v13, %v1709_v13  ;;  %v1711_v35 = vsub.f32 %v1689_v56, %v10313_v34  ;;  %v2096_v34 = vsel %vm2095_vm3, 0.05, %v11233_v22 }
 0x288   : > { %v1730_v42 = vmul.f32 %v1710_v49, %v1710_v49  ;;  %v1712_v18 = vsub.f32 %v1691_v38, %v10319_v62  ;;  %v10386_v47 = vpop.xlane.xlu0 %2142  ;;  %v2153_v62 = vmax.f32 %v2096_v34, 1e-30 }
 0x289   : > { %v1746_v45 = vadd.f32 %v1745_v29, %v1727_v7  ;;  %v1731_v11 = vmul.f32 %v1711_v35, %v1711_v35 }
 0x28a   : > { %v1732_v21 = vmul.f32 %v1712_v18, %v1712_v18  ;;  %8746 = vlog2.f32 %v2153_v62 }
 0x28b   : > { %v1747_v46 = vadd.f32 %v1746_v45, %v1728_v8 }
 0x28c   : > { %v10388_v9 = vpop.xlane.xlu0 %2148 }
 0x28d   : > { %v1748_v16 = vadd.f32 %v1747_v46, %v1729_v37 }
 0x28f   : > { %v1749_v44 = vadd.f32 %v1748_v16, %v1730_v42 }
 0x290   : > { %v2430_v32 = vpop.trf.xlu0 }
 0x291   : > { %v1750_v63 = vadd.f32 %v1749_v44, %v1731_v11  ;;  %v10391_v6 = vrot.slane %v2430_v32, %v10113_v28 }
 0x293   : > { %v10381_v48 = vadd.f32 %v1750_v63, %v1732_v21  ;;  %v2451_v20 = vadd.f32 %v10391_v6, %v10393_v53  ;;  %v2450_v14 = vadd.f32 %v10391_v6, %v10362_v40  ;;  %v2453_v45 = vadd.f32 %v10391_v6, %v10399_v41  ;;  %v10410_v63 = vpop.xlane.xlu1 %2139 }
 0x294   : > { %v8747_v12 = vpop.eup %8746  ;;  %v2452_v31 = vadd.f32 %v10391_v6, %v10369_v54  ;;  %v2455_v22 = vadd.f32 %v10391_v6, %v10410_v63 }
 0x295   : > { %v2155_v29 = vmul.f32 0.6931472, %v8747_v12 }
 0x297   : > { %v10407_v38 = vsel %vm2095_vm3, %v2155_v29, -1e+30 }
 0x2a2   : > { %v7778_v26 = vpop.f32.mrb[60].mxu0 }
 0x2a3   : > { %v2461_v33 = vmul.f32 2.0, %v7778_v26  ;;  %v2365_v23 = vpop.f32.mrb[61].mxu0 }
 0x2a4   : > { %v2460_v27 = vmul.f32 2.0, %v2365_v23  ;;  %v2454_v23 = vadd.f32 %v10391_v6, %v10378_v19 }
 0x2a5   : > { %v2471_v7 = vsub.f32 %v2451_v20, %v2461_v33 }
 0x2a6   : > { %v2470_v36 = vsub.f32 %v2450_v14, %v2460_v27  ;;  %v7781_v15 = vpop.f32.mrb[62].mxu0 }
 0x2a7   : > { %v2481_v43 = vmul.f32 -0.5, %v2471_v7  ;;  %v2463_v8 = vmul.f32 2.0, %v7781_v15  ;;  %v2375_v13 = vpop.f32.mrb[63].mxu0 }
 0x2a8   : > { %v2480_v56 = vmul.f32 -0.5, %v2470_v36  ;;  %v2462_v49 = vmul.f32 2.0, %v2375_v13 }
 0x2a9   : > { %v2473_v46 = vsub.f32 %v2453_v45, %v2463_v8  ;;  %v2491_v37 = vadd.f32 -58.812065, %v2481_v43  ;;  %v10418_v45 = vpop.xlane.xlu1 %2145 }
 0x2aa   : > { %v2472_v35 = vsub.f32 %v2452_v31, %v2462_v49  ;;  %v7784_v42 = vpop.f32.mrb[64].mxu0  ;;  %v2490_v21 = vadd.f32 -58.812065, %v2480_v56  ;;  %v2457_v8 = vadd.f32 %v10391_v6, %v10418_v45 }
 0x2ab   : > { %v2483_v16 = vmul.f32 -0.5, %v2473_v46  ;;  %v2465_v18 = vmul.f32 2.0, %v7784_v42  ;;  %v2385_v44 = vpop.f32.mrb[65].mxu0  ;;  %v2501_v11 = vadd.f32 %v2491_v37, %v10407_v38  ;;  %v2456_v37 = vadd.f32 %v10391_v6, %v10386_v47 }
 0x2ac   : > { %v2464_v34 = vmul.f32 2.0, %v2385_v44  ;;  %v2482_v32 = vmul.f32 -0.5, %v2472_v35  ;;  %v2500_v20 = vadd.f32 %v2490_v21, %v10407_v38  ;;  %v2458_v21 = vadd.f32 %v10391_v6, %v10388_v9 }
 0x2ad   : > { %2512 = vmax.xlane.f32.xlu1 %v2501_v11  ;;  %v2475_v12 = vsub.f32 %v2455_v22, %v2465_v18  ;;  %v2493_v33 = vadd.f32 -58.812065, %v2483_v16 }
 0x2ae   : > { %v7787_v62 = vpop.f32.mrb[66].mxu0  ;;  %v2474_v14 = vsub.f32 %v2454_v23, %v2464_v34  ;;  %v2492_v43 = vadd.f32 -58.812065, %v2482_v32 }
 0x2af   : > { %v2395_v26 = vpop.f32.mrb[67].mxu0  ;;  %v2485_v29 = vmul.f32 -0.5, %v2475_v12  ;;  %v2467_v7 = vmul.f32 2.0, %v7787_v62  ;;  %v2503_v15 = vadd.f32 %v2493_v33, %v10407_v38 }
 0x2b0   : > { %v2466_v13 = vmul.f32 2.0, %v2395_v26  ;;  %v2484_v56 = vmul.f32 -0.5, %v2474_v14  ;;  %v2502_v49 = vadd.f32 %v2492_v43, %v10407_v38  ;;  %v10429_v26 = vpop.xlane.xlu1 %2151 }
 0x2b1   : > { %2510 = vmax.xlane.f32.xlu1 %v2500_v20  ;;  %v2477_v31 = vsub.f32 %v2457_v8, %v2467_v7  ;;  %v2495_v46 = vadd.f32 -58.812065, %v2485_v29  ;;  %v2459_v33 = vadd.f32 %v10391_v6, %v10429_v26 }
 0x2b2   : > { %v7790_v27 = vpop.f32.mrb[68].mxu0  ;;  %v2476_v35 = vsub.f32 %v2456_v37, %v2466_v13  ;;  %v2494_v44 = vadd.f32 -58.812065, %v2484_v56 }
 0x2b3   : > { %v2405_v36 = vpop.f32.mrb[69].mxu0  ;;  %v2487_v42 = vmul.f32 -0.5, %v2477_v31  ;;  %v2505_v18 = vadd.f32 %v2495_v46, %v10407_v38  ;;  %v2469_v22 = vmul.f32 2.0, %v7790_v27 }
 0x2b4   : > { %v2468_v16 = vmul.f32 2.0, %v2405_v36  ;;  %v2486_v34 = vmul.f32 -0.5, %v2476_v35  ;;  %v2504_v32 = vadd.f32 %v2494_v44, %v10407_v38 }
 0x2b5   : > { %2516 = vmax.xlane.f32.xlu1 %v2503_v15  ;;  %v2497_v12 = vadd.f32 -58.812065, %v2487_v42  ;;  %v2479_v23 = vsub.f32 %v2459_v33, %v2469_v22 }
 0x2b6   : > { %v2478_v62 = vsub.f32 %v2458_v21, %v2468_v16  ;;  %v2496_v7 = vadd.f32 -58.812065, %v2486_v34 }
 0x2b7   : > { %v2507_v29 = vadd.f32 %v2497_v12, %v10407_v38  ;;  %v2489_v36 = vmul.f32 -0.5, %v2479_v23 }
 0x2b8   : > { %v2488_v14 = vmul.f32 -0.5, %v2478_v62  ;;  %v2506_v27 = vadd.f32 %v2496_v7, %v10407_v38 }
 0x2b9   : > { %2514 = vmax.xlane.f32.xlu1 %v2502_v49  ;;  %v2499_v13 = vadd.f32 -58.812065, %v2489_v36 }
 0x2ba   : > { %v2498_v43 = vadd.f32 -58.812065, %v2488_v14 }
 0x2bb   : > { %v2509_v56 = vadd.f32 %v2499_v13, %v10407_v38 }
 0x2bc   : > { %v2508_v8 = vadd.f32 %v2498_v43, %v10407_v38 }
 0x2bd   : > { %2520 = vmax.xlane.f32.xlu1 %v2505_v18 }
 0x2c1   : > { %2518 = vmax.xlane.f32.xlu1 %v2504_v32 }
 0x2c5   : > { %2524 = vmax.xlane.f32.xlu1 %v2507_v29 }
 0x2c9   : > { %2522 = vmax.xlane.f32.xlu1 %v2506_v27 }
 0x2cd   : > { %2526 = vmax.xlane.f32.xlu1 %v2508_v8 }
 0x2d1   : > { %2528 = vmax.xlane.f32.xlu1 %v2509_v56 }
 0x33a   : > { %v2513_v6 = vpop.xlane.xlu1 %2512 }
 0x33b   : > { %v2531_v31 = vsub.f32 %v2501_v11, %v2513_v6 }
 0x33d   : > { %v2542_v46 = vmul.f32 1.442695, %v2531_v31 }
 0x33e   : > { %v2511_v37 = vpop.xlane.xlu1 %2510 }
 0x33f   : > { %8748 = vpow2.f32 %v2542_v46  ;;  %v2530_v35 = vsub.f32 %v2500_v20, %v2511_v37 }
 0x341   : > { %v2540_v42 = vmul.f32 1.442695, %v2530_v35 }
 0x342   : > { %v2517_v16 = vpop.xlane.xlu1 %2516 }
 0x343   : > { %8750 = vpow2.f32 %v2540_v42  ;;  %v2533_v44 = vsub.f32 %v2503_v15, %v2517_v16 }
 0x345   : > { %v2546_v21 = vmul.f32 1.442695, %v2533_v44 }
 0x346   : > { %v2515_v22 = vpop.xlane.xlu1 %2514 }
 0x347   : > { %8752 = vpow2.f32 %v2546_v21  ;;  %v2532_v34 = vsub.f32 %v2502_v49, %v2515_v22 }
 0x349   : > { %v8749_v62 = vpop.eup %8748  ;;  %v2544_v12 = vmul.f32 1.442695, %v2532_v34 }
 0x34a   : > { %2562 = vadd.xlane.f32.xlu1 %v8749_v62  ;;  %v2521_v33 = vpop.xlane.xlu1 %2520 }
 0x34b   : > { %8754 = vpow2.f32 %v2544_v12  ;;  %v2535_v38 = vsub.f32 %v2505_v18, %v2521_v33 }
 0x34d   : > { %v8751_v23 = vpop.eup %8750  ;;  %v2550_v11 = vmul.f32 1.442695, %v2535_v38 }
 0x34e   : > { %2560 = vadd.xlane.f32.xlu1 %v8751_v23  ;;  %v2519_v14 = vpop.xlane.xlu1 %2518 }
 0x34f   : > { %8756 = vpow2.f32 %v2550_v11  ;;  %v2534_v20 = vsub.f32 %v2504_v32, %v2519_v14 }
 0x351   : > { %v8753_v7 = vpop.eup %8752  ;;  %v2548_v36 = vmul.f32 1.442695, %v2534_v20 }
 0x352   : > { %2566 = vadd.xlane.f32.xlu1 %v8753_v7  ;;  %v2525_v15 = vpop.xlane.xlu1 %2524 }
 0x353   : > { %8758 = vpow2.f32 %v2548_v36  ;;  %v2537_v43 = vsub.f32 %v2507_v29, %v2525_v15 }
 0x355   : > { %v8755_v13 = vpop.eup %8754  ;;  %v2554_v49 = vmul.f32 1.442695, %v2537_v43 }
 0x356   : > { %2564 = vadd.xlane.f32.xlu1 %v8755_v13  ;;  %v2523_v6 = vpop.xlane.xlu1 %2522 }
 0x357   : > { %8760 = vpow2.f32 %v2554_v49  ;;  %v2536_v31 = vsub.f32 %v2506_v27, %v2523_v6 }
 0x359   : > { %v8757_v46 = vpop.eup %8756  ;;  %v2552_v18 = vmul.f32 1.442695, %v2536_v31 }
 0x35a   : > { %2570 = vadd.xlane.f32.xlu1 %v8757_v46  ;;  %v2527_v37 = vpop.xlane.xlu1 %2526 }
 0x35b   : > { %8762 = vpow2.f32 %v2552_v18  ;;  %v2538_v42 = vsub.f32 %v2508_v8, %v2527_v37 }
 0x35d   : > { %v8759_v35 = vpop.eup %8758  ;;  %v2556_v29 = vmul.f32 1.442695, %v2538_v42 }
 0x35e   : > { %2568 = vadd.xlane.f32.xlu1 %v8759_v35  ;;  %v2529_v32 = vpop.xlane.xlu1 %2528 }
 0x35f   : > { %v2539_v16 = vsub.f32 %v2509_v56, %v2529_v32 }
 0x361   : > { %v8761_v44 = vpop.eup %8760  ;;  %v2558_v21 = vmul.f32 1.442695, %v2539_v16 }
 0x362   : > { %2574 = vadd.xlane.f32.xlu1 %v8761_v44 }
 0x363   : > { %8764 = vpow2.f32 %v2558_v21 }
 0x364   : > { %8766 = vpow2.f32 %v2556_v29 }
 0x365   : > { %v8763_v22 = vpop.eup %8762 }
 0x366   : > { %2572 = vadd.xlane.f32.xlu1 %v8763_v22 }
 0x36d   : > { %v8765_v34 = vpop.eup %8764 }
 0x36e   : > { %2578 = vadd.xlane.f32.xlu1 %v8765_v34  ;;  %v8767_v27 = vpop.eup %8766 }
 0x372   : > { %2576 = vadd.xlane.f32.xlu1 %v8767_v27 }
 0x3d7   : > { %v2563_v12 = vpop.xlane.xlu1 %2562 }
 0x3db   : > { %v2561_v33 = vpop.xlane.xlu1 %2560 }
 0x3dc   : > { %8768 = vrcp.f32 %v2561_v33 }
 0x3dd   : > { %8770 = vrcp.f32 %v2563_v12 }
 0x3df   : > { %v2567_v38 = vpop.xlane.xlu1 %2566 }
 0x3e3   : > { %v2565_v11 = vpop.xlane.xlu1 %2564 }
 0x3e4   : > { %8772 = vrcp.f32 %v2565_v11 }
 0x3e5   : > { %8774 = vrcp.f32 %v2567_v38 }
 0x3e6   : > { %v8769_v8 = vpop.eup %8768 }
 0x3e7   : > { %v2571_v56 = vpop.xlane.xlu1 %2570  ;;  %v2590_v14 = vmul.f32 %v8769_v8, %v8751_v23  ;;  %v8771_v20 = vpop.eup %8770 }
 0x3e8   : > { %v2591_v36 = vmul.f32 %v8771_v20, %v8749_v62 }
 0x3e9   : > { %2629 = vxpose.xlu1.b32.start [1/10] (short) %v2590_v14, 128 }
 0x3ea   : > { %v2600_v16 = vadd.f32 %v2591_v36, %v2590_v14 }
 0x3eb   : > { %v2569_v15 = vpop.xlane.xlu1 %2568 }
 0x3ec   : > { %8776 = vrcp.f32 %v2569_v15 }
 0x3ed   : > { %2630 = vxpose.xlu1.b32.cont [2/10] (short) %v2591_v36, 128  ;;  %8778 = vrcp.f32 %v2571_v56 }
 0x3ee   : > { %v8773_v43 = vpop.eup %8772 }
 0x3ef   : > { %v2575_v49 = vpop.xlane.xlu1 %2574  ;;  %v2592_v6 = vmul.f32 %v8773_v43, %v8755_v13  ;;  %v8775_v31 = vpop.eup %8774 }
 0x3f0   : > { %v2593_v37 = vmul.f32 %v8775_v31, %v8753_v7 }
 0x3f1   : > { %2631 = vxpose.xlu1.b32.cont [3/10] (short) %v2592_v6, 128  ;;  %v2601_v62 = vadd.f32 %v2600_v16, %v2592_v6 }
 0x3f3   : > { %v2573_v18 = vpop.xlane.xlu1 %2572  ;;  %v2602_v33 = vadd.f32 %v2601_v62, %v2593_v37 }
 0x3f4   : > { %8780 = vrcp.f32 %v2573_v18 }
 0x3f5   : > { %2632 = vxpose.xlu1.b32.cont [4/10] (short) %v2593_v37, 128  ;;  %8782 = vrcp.f32 %v2575_v49 }
 0x3f6   : > { %v8777_v32 = vpop.eup %8776 }
 0x3f7   : > { %v2594_v42 = vmul.f32 %v8777_v32, %v8759_v35  ;;  %v8779_v23 = vpop.eup %8778 }
 0x3f8   : > { %v2595_v29 = vmul.f32 %v8779_v23, %v8757_v46 }
 0x3f9   : > { %2633 = vxpose.xlu1.b32.cont [5/10] (short) %v2594_v42, 128  ;;  %v2603_v7 = vadd.f32 %v2602_v33, %v2594_v42 }
 0x3fb   : > { %v2579_v21 = vpop.xlane.xlu1 %2578  ;;  %v2604_v56 = vadd.f32 %v2603_v7, %v2595_v29 }
 0x3fc   : > { %8784 = vrcp.f32 %v2579_v21 }
 0x3fd   : > { %2634 = vxpose.xlu1.b32.cont [6/10] (short) %v2595_v29, 128 }
 0x3fe   : > { %v8781_v12 = vpop.eup %8780 }
 0x3ff   : > { %v2577_v13 = vpop.xlane.xlu1 %2576  ;;  %v2596_v38 = vmul.f32 %v8781_v12, %v8763_v22  ;;  %v8783_v11 = vpop.eup %8782 }
 0x400   : > { %8786 = vrcp.f32 %v2577_v13  ;;  %v2597_v8 = vmul.f32 %v8783_v11, %v8761_v44  ;;  %v11234_v44 = vmov 0  }
 0x401   : > { %2635 = vxpose.xlu1.b32.cont [7/10] (short) %v2596_v38, 128  ;;  %v2605_v35 = vadd.f32 %v2604_v56, %v2596_v38 }
 0x403   : > { %v2606_v36 = vadd.f32 %v2605_v35, %v2597_v8 }
 0x405   : > { %2636 = vxpose.xlu1.b32.cont [8/10] (short) %v2597_v8, 128 }
 0x406   : > { %v8785_v20 = vpop.eup %8784 }
 0x407   : > { %v2599_v43 = vmul.f32 %v8785_v20, %v8765_v34 }
 0x40a   : > { %v8787_v14 = vpop.eup %8786 }
 0x40b   : > { %v2598_v15 = vmul.f32 %v8787_v14, %v8767_v27 }
 0x40d   : > { %2637 = vxpose.xlu1.b32.cont [9/10] (short) %v2598_v15, 128  ;;  %v2607_v46 = vadd.f32 %v2606_v36, %v2598_v15 }
 0x40f   : > { %v2608_v49 = vadd.f32 %v2607_v46, %v2599_v43 }
 0x411   : > { %2638 = vxpose.xlu1.b32.end [10/10] (short) %v2599_v43, 128  ;;  %v2609_v6 = vrot.slane %v2608_v49, 4 }
 0x413   : > { %v2610_v31 = vadd.f32 %v2609_v6, %v2608_v49 }
 0x415   : > { %v2611_v22 = vrot.slane %v2610_v31, 2 }
 0x417   : > { %v2612_v18 = vadd.f32 %v2611_v22, %v2610_v31 }
 0x419   : > { %v2613_v37 = vrot.slane %v2612_v18, 1 }
 0x41b   : > { %v10437_v32 = vadd.f32 %v2613_v37, %v2612_v18 }
 0x41d   : > { %2855 = vxpose.xlu0.b32.start.end [1/1] (short) %v10437_v32, 128 }
 0x42f   : > { %8679 = vset.pattern.permute.xlu1 %v11234_v44 }
 0x446   : > { %8678 = vset.pattern.permute.xlu0 %v11234_v44 }
 0x46d   : > { %v2645_v27 = vpop.trf.xlu1 }
 0x46e   : > { %7811 = vmatprep.mubr.msk.f32.mxu1 %vm2661_vm4, %v2645_v27 }
 0x471   : > { %v2646_v34 = vpop.trf.xlu1 }
 0x472   : > { %7812 = vmatmul.mubr.msk.f32.vlgmr.msra.gmra.mrb[36].mxu1 %vm2661_vm4, %v2646_v34 }
 0x475   : > { %v2647_v42 = vpop.trf.xlu1 }
 0x476   : > { %7814 = vmatprep.mubr.msk.f32.mxu1 %vm2661_vm4, %v2647_v42 }
 0x479   : > { %v2648_v23 = vpop.trf.xlu1 }
 0x47a   : > { %7815 = vmatmul.mubr.msk.f32.gmra.mrb[38].mxu1 %vm2661_vm4, %v2648_v23 }
 0x47d   : > { %v2649_v16 = vpop.trf.xlu1 }
 0x47e   : > { %7817 = vmatprep.mubr.msk.f32.mxu1 %vm2661_vm4, %v2649_v16 }
 0x481   : > { %v2650_v62 = vpop.trf.xlu1 }
 0x482   : > { %7818 = vmatmul.mubr.msk.f32.gmra.mrb[40].mxu1 %vm2661_vm4, %v2650_v62 }
 0x485   : > { %v2651_v21 = vpop.trf.xlu1 }
 0x486   : > { %7820 = vmatprep.mubr.msk.f32.mxu1 %vm2661_vm4, %v2651_v21 }
 0x489   : > { %v2652_v29 = vpop.trf.xlu1 }
 0x48a   : > { %7821 = vmatmul.mubr.msk.f32.gmra.mrb[42].mxu1 %vm2661_vm4, %v2652_v29 }
 0x48d   : > { %v2653_v12 = vpop.trf.xlu1 }
 0x48e   : > { %7823 = vmatprep.mubr.msk.f32.mxu1 %vm2661_vm4, %v2653_v12 }
 0x491   : > { %v2654_v33 = vpop.trf.xlu1 }
 0x492   : > { %7824 = vmatmul.mubr.msk.f32.gmra.mrb[44].mxu1 %vm2661_vm4, %v2654_v33 }
 0x495   : > { %v2655_v13 = vpop.trf.xlu1 }
 0x496   : > { %7826 = vmatprep.mubr.msk.f32.mxu1 %vm2661_vm4, %v2655_v13 }
 0x499   : > { %v2656_v38 = vpop.trf.xlu1 }
 0x49a   : > { %7827 = vmatmul.mubr.msk.f32.gmra.mrb[46].mxu1 %vm2661_vm4, %v2656_v38 }
 0x49d   : > { %v2657_v11 = vpop.trf.xlu1  ;;  %v2871_v7 = vpop.trf.xlu0 }
 0x49e   : > { %v2887_v8 = vadd.f32 1e-10, %v2871_v7  ;;  %7829 = vmatprep.mubr.msk.f32.mxu1 %vm2661_vm4, %v2657_v11 }
 0x4a0   : > { %8788 = vrcp.f32 %v2887_v8 }
 0x4a1   : > { %v2658_v56 = vpop.trf.xlu1  ;;  %v2872_v35 = vpop.trf.xlu0 }
 0x4a2   : > { %v2888_v20 = vadd.f32 1e-10, %v2872_v35  ;;  %7830 = vmatmul.mubr.msk.f32.gmra.mrb[48].mxu1 %vm2661_vm4, %v2658_v56 }
 0x4a4   : > { %8790 = vrcp.f32 %v2888_v20 }
 0x4a5   : > { %v2659_v14 = vpop.trf.xlu1  ;;  %v2873_v36 = vpop.trf.xlu0 }
 0x4a6   : > { %v2889_v15 = vadd.f32 1e-10, %v2873_v36  ;;  %7832 = vmatprep.mubr.msk.f32.mxu1 %vm2661_vm4, %v2659_v14 }
 0x4a8   : > { %8792 = vrcp.f32 %v2889_v15 }
 0x4a9   : > { %v2660_v46 = vpop.trf.xlu1  ;;  %v2874_v43 = vpop.trf.xlu0 }
 0x4aa   : > { %v8789_v49 = vpop.eup %8788  ;;  %v2890_v6 = vadd.f32 1e-10, %v2874_v43  ;;  %7833 = vmatmul.mubr.msk.f32.gmra.mrb[50].mxu1 %vm2661_vm4, %v2660_v46 }
 0x4ab   : > { %7867 = vmatprep.mubr.msk.f32.mxu1 %vm1048_vm0, %v9665_v52  ;;  %2921 = vperm.xlu0 %8678, %v8789_v49  }
 0x4ac   : > { %8794 = vrcp.f32 %v2890_v6 }
 0x4ad   : > { %v2875_v31 = vpop.trf.xlu0 }
 0x4ae   : > { %v8791_v22 = vpop.eup %8790  ;;  %v2891_v18 = vadd.f32 1e-10, %v2875_v31 }
 0x4af   : > { %2926 = vperm.xlu1 %8679, %v8791_v22  }
 0x4b0   : > { %8796 = vrcp.f32 %v2891_v18 }
 0x4b1   : > { %v2876_v37 = vpop.trf.xlu0 }
 0x4b2   : > { %v8793_v44 = vpop.eup %8792  ;;  %v2892_v27 = vadd.f32 1e-10, %v2876_v37 }
 0x4b3   : > { %2931 = vperm.xlu0 %8678, %v8793_v44  }
 0x4b4   : > { %8798 = vrcp.f32 %v2892_v27 }
 0x4b5   : > { %v2877_v34 = vpop.trf.xlu0 }
 0x4b6   : > { %v8795_v42 = vpop.eup %8794  ;;  %v2893_v23 = vadd.f32 1e-10, %v2877_v34 }
 0x4b7   : > { %2936 = vperm.xlu0 %8678, %v8795_v42  }
 0x4b8   : > { %8800 = vrcp.f32 %v2893_v23 }
 0x4b9   : > { %v2878_v16 = vpop.trf.xlu0 }
 0x4ba   : > { %v8797_v62 = vpop.eup %8796  ;;  %v2894_v21 = vadd.f32 1e-10, %v2878_v16  ;;  %v1045_v16 = vmul.f32 1.442695, %v9615_v17 }
 0x4bb   : > { %2941 = vperm.xlu0 %8678, %v8797_v62   ;;  %v1042_v62 = vadd.f32 1.0, %v9615_v17 }
 0x4bc   : > { %8802 = vrcp.f32 %v2894_v21  ;;  %v1043_v21 = vmul.f32 %v9615_v17, %v9615_v17 }
 0x4bd   : > { %v2879_v29 = vpop.trf.xlu0 }
 0x4be   : > { %v8799_v12 = vpop.eup %8798  ;;  %v2895_v33 = vadd.f32 1e-10, %v2879_v29 }
 0x4bf   : > { %2946 = vperm.xlu1 %8679, %v8799_v12   ;;  %v1044_v12 = vsub.f32 %v1042_v62, %v1043_v21 }
 0x4c0   : > { %8804 = vrcp.f32 %v2895_v33 }
 0x4c1   : > { %v2880_v13 = vpop.trf.xlu0 }
 0x4c2   : > { %v8801_v38 = vpop.eup %8800  ;;  %v2896_v11 = vadd.f32 1e-10, %v2880_v13 }
 0x4c3   : > { %2951 = vperm.xlu0 %8678, %v8801_v38   ;;  %v2616_v38 = vsel %vm2615_vm5, %v10437_v32, 0.0 }
 0x4c4   : > { %8806 = vrcp.f32 %v2896_v11 }
 0x4c5   : > { %v2881_v7 = vpop.trf.xlu0 }
 0x4c6   : > { %v8803_v8 = vpop.eup %8802  ;;  %v2897_v56 = vadd.f32 1e-10, %v2881_v7 }
 0x4c7   : > { %2956 = vperm.xlu1 %8679, %v8803_v8  }
 0x4c8   : > { %8808 = vrcp.f32 %v2897_v56 }
 0x4c9   : > { %v2882_v35 = vpop.trf.xlu0 }
 0x4ca   : > { %v8805_v20 = vpop.eup %8804  ;;  %v2898_v14 = vadd.f32 1e-10, %v2882_v35 }
 0x4cb   : > { %2961 = vperm.xlu0 %8678, %v8805_v20  }
 0x4cc   : > { %8810 = vrcp.f32 %v2898_v14 }
 0x4cd   : > { %v2883_v36 = vpop.trf.xlu0 }
 0x4ce   : > { %v8807_v15 = vpop.eup %8806  ;;  %v2899_v46 = vadd.f32 1e-10, %v2883_v36 }
 0x4cf   : > { %2966 = vperm.xlu1 %8679, %v8807_v15  }
 0x4d0   : > { %8812 = vrcp.f32 %v2899_v46 }
 0x4d1   : > { %v2884_v43 = vpop.trf.xlu0 }
 0x4d2   : > { %v8809_v49 = vpop.eup %8808  ;;  %v2900_v6 = vadd.f32 1e-10, %v2884_v43 }
 0x4d3   : > { %2971 = vperm.xlu0 %8678, %v8809_v49  }
 0x4d4   : > { %8814 = vrcp.f32 %v2900_v6 }
 0x4d5   : > { %v2885_v31 = vpop.trf.xlu0 }
 0x4d6   : > { %v8811_v22 = vpop.eup %8810  ;;  %v2901_v18 = vadd.f32 1e-10, %v2885_v31 }
 0x4d7   : > { %2976 = vperm.xlu1 %8679, %v8811_v22  }
 0x4d8   : > { %8816 = vrcp.f32 %v2901_v18 }
 0x4d9   : > { %v2886_v37 = vpop.trf.xlu0 }
 0x4da   : > { %v8813_v44 = vpop.eup %8812  ;;  %v2902_v27 = vadd.f32 1e-10, %v2886_v37 }
 0x4db   : > { %2981 = vperm.xlu0 %8678, %v8813_v44  }
 0x4dc   : > { %8818 = vrcp.f32 %v2902_v27 }
 0x4dd   : > { %8820 = vpow2.f32 %v1045_v16 }
 0x4de   : > { %v8815_v34 = vpop.eup %8814 }
 0x4df   : > { %2986 = vperm.xlu1 %8679, %v8815_v34  }
 0x4e2   : > { %v8817_v42 = vpop.eup %8816 }
 0x4e3   : > { %2991 = vperm.xlu0 %8678, %v8817_v42  }
 0x4e6   : > { %v8819_v23 = vpop.eup %8818 }
 0x4e7   : > { %2996 = vperm.xlu1 %8679, %v8819_v23   ;;  %v8821_v29 = vpop.eup %8820 }
 0x4e8   : > { %v1047_v33 = vsub.f32 %v1044_v12, %v8821_v29 }
 0x4ea   : > { %v1049_v13 = vsel %vm1048_vm0, %v1047_v33, 0.0 }
 0x502   : > { %1050 = vadd.xlane.f32.xlu0 %v1049_v13 }
 0x506   : > { %1540 = vadd.xlane.f32.xlu0 %v10355_v55 }
 0x50a   : > { %1752 = vadd.xlane.f32.xlu0 %v10381_v48 }
 0x50b   : > { %1328 = vadd.xlane.f32.xlu1 %v10265_v10 }
 0x50e   : > { %1964 = vadd.xlane.f32.xlu0 %v10303_v24 }
 0x50f   : > { %2617 = vadd.xlane.f32.xlu1 %v2616_v38 }
 0x52a   : > { %v2922_v11 = vpop.permute.xlu0 %2921 }
 0x52e   : > { %v2927_v7 = vpop.permute.xlu1 %2926 }
 0x532   : > { %v2932_v20 = vpop.permute.xlu0 %2931 }
 0x536   : > { %v2937_v24 = vpop.permute.xlu0 %2936 }
 0x53a   : > { %v2942_v42 = vpop.permute.xlu0 %2941 }
 0x53e   : > { %v2947_v27 = vpop.permute.xlu1 %2946 }
 0x545   : > { %v7813_v8 = vpop.f32.mrb[36].mxu1 }
 0x546   : > { %v3000_v56 = vmul.f32 %v7813_v8, %v2927_v7  ;;  %v2776_v35 = vpop.f32.mrb[37].mxu1  ;;  %v2957_v38 = vpop.permute.xlu1 %2956 }
 0x547   : > { %v2999_v14 = vmul.f32 %v2922_v11, %v2776_v35  ;;  %v2952_v7 = vpop.permute.xlu0 %2951 }
 0x548   : > { %v3020_v36 = vmul.f32 %v3000_v56, %v3000_v56 }
 0x549   : > { %v8314_v55 = vpack.c.bf16 %v3000_v56, %v2999_v14  ;;  %v3019_v15 = vmul.f32 %v2999_v14, %v2999_v14 }
 0x54a   : > { %v3038_v48 = vsel %vm1048_vm0, %v3020_v36, 0.0 }
 0x54b   : > { %8316 = vmatprep.subr.msk.bf16.mxu1 %vm9989_vm2, %v8314_v55  ;;  %3039 = vadd.xlane.f32.xlu1 %v3038_v48  ;;  %v3035_v10 = vsel %vm1048_vm0, %v3019_v15, 0.0 }
 0x54c   : > { %8319 = vmatpush3.bf16.xpose.msk.msra.mxu1 %vm9989_vm2, %v8314_v55  ;;  %3036 = vadd.xlane.f32.xlu0 %v3035_v10 }
 0x54d   : > { %v7816_v46 = vpop.f32.mrb[38].mxu1 }
 0x54e   : > { %v3002_v43 = vmul.f32 %v7816_v46, %v2937_v24  ;;  %v2786_v49 = vpop.f32.mrb[39].mxu1  ;;  %v2967_v48 = vpop.permute.xlu1 %2966 }
 0x54f   : > { %v3001_v6 = vmul.f32 %v2932_v20, %v2786_v49  ;;  %v2962_v24 = vpop.permute.xlu0 %2961 }
 0x550   : > { %v3022_v31 = vmul.f32 %v3002_v43, %v3002_v43 }
 0x551   : > { %v8320_v22 = vpack.c.bf16 %v3002_v43, %v3001_v6  ;;  %v3021_v18 = vmul.f32 %v3001_v6, %v3001_v6 }
 0x552   : > { %v3044_v37 = vsel %vm1048_vm0, %v3022_v31, 0.0 }
 0x553   : > { %8322 = vmatprep.subr.msk.bf16.mxu1 %vm9989_vm2, %v8320_v22  ;;  %3045 = vadd.xlane.f32.xlu1 %v3044_v37  ;;  %v3041_v44 = vsel %vm1048_vm0, %v3021_v18, 0.0 }
 0x554   : > { %8325 = vmatpush3.bf16.xpose.msk.msra.mxu1 %vm9989_vm2, %v8320_v22  ;;  %3042 = vadd.xlane.f32.xlu0 %v3041_v44 }
 0x555   : > { %v7819_v34 = vpop.f32.mrb[40].mxu1 }
 0x556   : > { %v3004_v23 = vmul.f32 %v7819_v34, %v2947_v27  ;;  %v2796_v16 = vpop.f32.mrb[41].mxu1  ;;  %v2977_v44 = vpop.permute.xlu1 %2976 }
 0x557   : > { %v3003_v62 = vmul.f32 %v2942_v42, %v2796_v16  ;;  %v2972_v34 = vpop.permute.xlu0 %2971 }
 0x558   : > { %v3024_v21 = vmul.f32 %v3004_v23, %v3004_v23 }
 0x559   : > { %v8326_v29 = vpack.c.bf16 %v3004_v23, %v3003_v62  ;;  %v3023_v12 = vmul.f32 %v3003_v62, %v3003_v62 }
 0x55a   : > { %v3050_v33 = vsel %vm1048_vm0, %v3024_v21, 0.0 }
 0x55b   : > { %8328 = vmatprep.subr.msk.bf16.mxu1 %vm9989_vm2, %v8326_v29  ;;  %3051 = vadd.xlane.f32.xlu1 %v3050_v33  ;;  %v3047_v13 = vsel %vm1048_vm0, %v3023_v12, 0.0 }
 0x55c   : > { %8331 = vmatpush3.bf16.xpose.msk.msra.mxu1 %vm9989_vm2, %v8326_v29  ;;  %3048 = vadd.xlane.f32.xlu0 %v3047_v13 }
 0x55d   : > { %v7822_v11 = vpop.f32.mrb[42].mxu1 }
 0x55e   : > { %v3006_v8 = vmul.f32 %v7822_v11, %v2957_v38  ;;  %v2806_v56 = vpop.f32.mrb[43].mxu1  ;;  %v2987_v13 = vpop.permute.xlu1 %2986 }
 0x55f   : > { %v3005_v35 = vmul.f32 %v2952_v7, %v2806_v56  ;;  %v2982_v11 = vpop.permute.xlu0 %2981 }
 0x560   : > { %v3026_v20 = vmul.f32 %v3006_v8, %v3006_v8 }
 0x561   : > { %v8332_v14 = vpack.c.bf16 %v3006_v8, %v3005_v35  ;;  %v3025_v36 = vmul.f32 %v3005_v35, %v3005_v35 }
 0x562   : > { %v3056_v55 = vsel %vm1048_vm0, %v3026_v20, 0.0 }
 0x563   : > { %8334 = vmatprep.subr.msk.bf16.mxu1 %vm9989_vm2, %v8332_v14  ;;  %3057 = vadd.xlane.f32.xlu1 %v3056_v55  ;;  %v3053_v15 = vsel %vm1048_vm0, %v3025_v36, 0.0 }
 0x564   : > { %8337 = vmatpush3.bf16.xpose.msk.msra.mxu1 %vm9989_vm2, %v8332_v14  ;;  %3054 = vadd.xlane.f32.xlu0 %v3053_v15 }
 0x565   : > { %v7825_v10 = vpop.f32.mrb[44].mxu1 }
 0x566   : > { %v3008_v46 = vmul.f32 %v7825_v10, %v2967_v48  ;;  %v2816_v43 = vpop.f32.mrb[45].mxu1  ;;  %v2997_v15 = vpop.permute.xlu1 %2996 }
 0x567   : > { %v3007_v49 = vmul.f32 %v2962_v24, %v2816_v43  ;;  %v2992_v10 = vpop.permute.xlu0 %2991 }
 0x568   : > { %v3028_v6 = vmul.f32 %v3008_v46, %v3008_v46 }
 0x569   : > { %v8338_v31 = vpack.c.bf16 %v3008_v46, %v3007_v49  ;;  %v3027_v22 = vmul.f32 %v3007_v49, %v3007_v49 }
 0x56a   : > { %v3062_v18 = vsel %vm1048_vm0, %v3028_v6, 0.0 }
 0x56b   : > { %8340 = vmatprep.subr.msk.bf16.mxu1 %vm9989_vm2, %v8338_v31  ;;  %3063 = vadd.xlane.f32.xlu1 %v3062_v18  ;;  %v3059_v37 = vsel %vm1048_vm0, %v3027_v22, 0.0 }
 0x56c   : > { %8343 = vmatpush3.bf16.xpose.msk.msra.mxu1 %vm9989_vm2, %v8338_v31  ;;  %3060 = vadd.xlane.f32.xlu0 %v3059_v37 }
 0x56d   : > { %v7828_v27 = vpop.f32.mrb[46].mxu1 }
 0x56e   : > { %v3010_v42 = vmul.f32 %v7828_v27, %v2977_v44  ;;  %v2826_v23 = vpop.f32.mrb[47].mxu1 }
 0x56f   : > { %v3009_v16 = vmul.f32 %v2972_v34, %v2826_v23 }
 0x570   : > { %v3030_v62 = vmul.f32 %v3010_v42, %v3010_v42 }
 0x571   : > { %v8344_v21 = vpack.c.bf16 %v3010_v42, %v3009_v16  ;;  %v3029_v29 = vmul.f32 %v3009_v16, %v3009_v16 }
 0x572   : > { %v3068_v12 = vsel %vm1048_vm0, %v3030_v62, 0.0 }
 0x573   : > { %8346 = vmatprep.subr.msk.bf16.mxu1 %vm9989_vm2, %v8344_v21  ;;  %3069 = vadd.xlane.f32.xlu1 %v3068_v12  ;;  %v3065_v33 = vsel %vm1048_vm0, %v3029_v29, 0.0 }
 0x574   : > { %8349 = vmatpush3.bf16.xpose.msk.msra.mxu1 %vm9989_vm2, %v8344_v21  ;;  %3066 = vadd.xlane.f32.xlu0 %v3065_v33 }
 0x575   : > { %v7831_v38 = vpop.f32.mrb[48].mxu1 }
 0x576   : > { %v3012_v7 = vmul.f32 %v7831_v38, %v2987_v13  ;;  %v2836_v8 = vpop.f32.mrb[49].mxu1 }
 0x577   : > { %v3011_v56 = vmul.f32 %v2982_v11, %v2836_v8 }
 0x578   : > { %v3032_v35 = vmul.f32 %v3012_v7, %v3012_v7 }
 0x579   : > { %v3031_v20 = vmul.f32 %v3011_v56, %v3011_v56  ;;  %v8350_v14 = vpack.c.bf16 %v3012_v7, %v3011_v56 }
 0x57a   : > { %v3074_v36 = vsel %vm1048_vm0, %v3032_v35, 0.0 }
 0x57b   : > { %8352 = vmatprep.subr.msk.bf16.mxu1 %vm9989_vm2, %v8350_v14  ;;  %3075 = vadd.xlane.f32.xlu1 %v3074_v36  ;;  %v3071_v55 = vsel %vm1048_vm0, %v3031_v20, 0.0 }
 0x57c   : > { %8355 = vmatpush3.bf16.xpose.msk.msra.mxu1 %vm9989_vm2, %v8350_v14  ;;  %3072 = vadd.xlane.f32.xlu0 %v3071_v55 }
 0x57d   : > { %v7834_v48 = vpop.f32.mrb[50].mxu1 }
 0x57e   : > { %v3014_v24 = vmul.f32 %v7834_v48, %v2997_v15  ;;  %v2846_v46 = vpop.f32.mrb[51].mxu1 }
 0x57f   : > { %v3013_v43 = vmul.f32 %v2992_v10, %v2846_v46 }
 0x580   : > { %v3034_v49 = vmul.f32 %v3014_v24, %v3014_v24 }
 0x581   : > { %v3033_v6 = vmul.f32 %v3013_v43, %v3013_v43  ;;  %v8356_v31 = vpack.c.bf16 %v3014_v24, %v3013_v43 }
 0x582   : > { %v3080_v22 = vsel %vm1048_vm0, %v3034_v49, 0.0 }
 0x583   : > { %8358 = vmatprep.subr.msk.bf16.mxu1 %vm9989_vm2, %v8356_v31  ;;  %3081 = vadd.xlane.f32.xlu1 %v3080_v22  ;;  %v3077_v18 = vsel %vm1048_vm0, %v3033_v6, 0.0 }
 0x584   : > { %8361 = vmatpush3.bf16.xpose.msk.msra.mxu1 %vm9989_vm2, %v8356_v31  ;;  %3078 = vadd.xlane.f32.xlu0 %v3077_v18 }
 0x585   : > { %8431 = vmatprep.subr.bf16.mxu1 %v9718_v4 }
 0x58b   : > { %7868 = vmatmul.mubr.msk.f32.vlgmr.msra.gmra.mrb[52].mxu1 %vm1048_vm0, %v9668_v57 }
 0x58c   : > { %7870 = vmatprep.mubr.msk.f32.mxu1 %vm1048_vm0, %v9675_v58  ;;  %8433 = vmatpush3.bf16.msra.mxu1 %v9718_v4 }
 0x58d   : > { %8435 = vmatprep.subr.bf16.mxu1 %v9770_v51 }
 0x58f   : > { %7871 = vmatmul.mubr.msk.f32.gmra.mrb[54].mxu1 %vm1048_vm0, %v9678_v59  ;;  %v1051_v37 = vpop.xlane.xlu0 %1050 }
 0x590   : > { %v1052_v44 = vrot.slane %v1051_v37, 4  ;;  %7873 = vmatprep.mubr.msk.f32.mxu1 %vm1048_vm0, %v9681_v60  ;;  %8437 = vmatpush3.bf16.msra.mxu1 %v9770_v51 }
 0x591   : > { %8439 = vmatprep.subr.bf16.mxu1 %v9843_v39 }
 0x592   : > { %v1053_v27 = vadd.f32 %v1052_v44, %v1051_v37 }
 0x593   : > { %7874 = vmatmul.mubr.msk.f32.gmra.mrb[56].mxu1 %vm1048_vm0, %v9684_v61  ;;  %v1541_v34 = vpop.xlane.xlu0 %1540 }
 0x594   : > { %v1542_v42 = vrot.slane %v1541_v34, 4  ;;  %7876 = vmatprep.mubr.msk.f32.mxu1 %vm1048_vm0, %v9697_v0  ;;  %8441 = vmatpush3.bf16.msra.mxu1 %v9843_v39  ;;  %v1054_v23 = vrot.slane %v1053_v27, 2 }
 0x595   : > { %8443 = vmatprep.subr.bf16.mxu1 %v9738_v5 }
 0x596   : > { %v1543_v16 = vadd.f32 %v1542_v42, %v1541_v34  ;;  %v1055_v62 = vadd.f32 %v1054_v23, %v1053_v27 }
 0x597   : > { %7877 = vmatmul.mubr.msk.f32.gmra.mrb[58].mxu1 %vm1048_vm0, %v9700_v1  ;;  %v1753_v21 = vpop.xlane.xlu0 %1752 }
 0x598   : > { %v1754_v29 = vrot.slane %v1753_v21, 4  ;;  %v1329_v12 = vpop.xlane.xlu1 %1328  ;;  %7879 = vmatprep.mubr.msk.f32.mxu1 %vm1048_vm0, %v9703_v2  ;;  %8445 = vmatpush3.bf16.msra.mxu1 %v9738_v5  ;;  %v1056_v33 = vrot.slane %v1055_v62, 1  ;;  %v1544_v13 = vrot.slane %v1543_v16, 2 }
 0x599   : > { %v1330_v38 = vrot.slane %v1329_v12, 4  ;;  %8447 = vmatprep.subr.bf16.mxu1 %v9778_v30 }
 0x59a   : > { %v1755_v11 = vadd.f32 %v1754_v29, %v1753_v21  ;;  %v1057_v7 = vadd.f32 %v1056_v33, %v1055_v62  ;;  %v1545_v14 = vadd.f32 %v1544_v13, %v1543_v16 }
 0x59b   : > { %v1331_v8 = vadd.f32 %v1330_v38, %v1329_v12  ;;  %7880 = vmatmul.mubr.msk.f32.gmra.mrb[60].mxu1 %vm1048_vm0, %v9706_v3  ;;  %v1965_v56 = vpop.xlane.xlu0 %1964 }
 0x59c   : > { %v1966_v35 = vrot.slane %v1965_v56, 4  ;;  %8449 = vmatpush3.bf16.msra.mxu1 %v9778_v30  ;;  %v2618_v20 = vpop.xlane.xlu1 %2617  ;;  %8643 = vpush %v1057_v7  ;;  %v1756_v36 = vrot.slane %v1755_v11, 2  ;;  %v1546_v43 = vrot.slane %v1545_v14, 1 }
 0x59d   : > { %v2619_v55 = vrot.slane %v2618_v20, 4  ;;  %v1332_v15 = vrot.slane %v1331_v8, 2 }
 0x59e   : > { %v1967_v48 = vadd.f32 %v1966_v35, %v1965_v56  ;;  %v1757_v10 = vadd.f32 %v1756_v36, %v1755_v11  ;;  %v1547_v34 = vadd.f32 %v1546_v43, %v1545_v14 }
 0x59f   : > { %v2620_v24 = vadd.f32 %v2619_v55, %v2618_v20  ;;  %v1333_v46 = vadd.f32 %v1332_v15, %v1331_v8 }
 0x5a0   : > { %v1758_v49 = vrot.slane %v1757_v10, 1  ;;  %v1968_v6 = vrot.slane %v1967_v48, 2 }
 0x5a1   : > { %v1334_v31 = vrot.slane %v1333_v46, 1  ;;  %v2621_v22 = vrot.slane %v2620_v24, 2 }
 0x5a2   : > { %v1969_v18 = vadd.f32 %v1968_v6, %v1967_v48  ;;  %v1759_v44 = vadd.f32 %v1758_v49, %v1757_v10 }
 0x5a3   : > { %v1335_v37 = vadd.f32 %v1334_v31, %v1333_v46  ;;  %v2622_v27 = vadd.f32 %v2621_v22, %v2620_v24 }
 0x5a4   : > { %v1970_v42 = vrot.slane %v1969_v18, 1 }
 0x5a5   : > { %8645 = vpush %v1335_v37  ;;  %v2623_v23 = vrot.slane %v2622_v27, 1 }
 0x5a6   : > { %8647 = vpush %v1547_v34  ;;  %v1971_v16 = vadd.f32 %v1970_v42, %v1969_v18 }
 0x5a7   : > { %8649 = vpush %v1759_v44  ;;  %v2624_v62 = vadd.f32 %v2623_v23, %v2622_v27 }
 0x5a8   : > { %8651 = vpush %v1971_v16 }
 0x5a9   : > { %8653 = vpush %v2624_v62 }
 0x5cd   : > { %s8644_s19 = spop %8643 }
 0x5ce   : > { %s1059_s12 = smul.f32 -0.5, %s8644_s19  ;;  %s345_s19 = scalar_lea.vmem %s11236_s25, %s9339_s21 }
 0x5d0   : > { %v1060_v21 = vstv %s1059_s12 }
 0x5d1   : > { %1062 = vst.msk [vmem:[%s342_s17] sm:$0x1] %vm1061_vm6, %v1060_v21 }
 0x5d6   : > { %s8646_s0 = spop %8645 }
 0x5d7   : > { %s8648_s11 = spop %8647 }
 0x5d8   : > { %s1549_s7 = sadd.f32 %s8648_s11, %s8646_s0  ;;  %s8650_s10 = spop %8649  ;;  %v3040_v12 = vpop.xlane.xlu1 %3039 }
 0x5d9   : > { %s8652_s2 = spop %8651  ;;  %v3037_v29 = vpop.xlane.xlu0 %3036 }
 0x5da   : > { %s1761_s9 = sadd.f32 %s8650_s10, %s1549_s7  ;;  %3246 = vxpose.xlu0.b32.start [1/16] (narrow) %v3037_v29, 8  ;;  %s8654_s4 = spop %8653 }
 0x5db   : > { %v2626_v24 = vstv %s8654_s4 }
 0x5dc   : > { %s1973_s20 = sadd.f32 %s8652_s2, %s1761_s9  ;;  %8822 = vrcp.f32 %v2626_v24 }
 0x5de   : > { %v1974_v33 = vstv %s1973_s20  ;;  %3247 = vxpose.xlu0.b32.cont [2/16] (narrow) %v3040_v12, 8 }
 0x5df   : > { %1975 = vst.msk [vmem:[%s339_s26] sm:$0x1] %vm1061_vm6, %v1974_v33 }
 0x5e0   : > { %v3046_v38 = vpop.xlane.xlu1 %3045 }
 0x5e1   : > { %v3043_v13 = vpop.xlane.xlu0 %3042 }
 0x5e2   : > { %3248 = vxpose.xlu0.b32.cont [3/16] (narrow) %v3043_v13, 8 }
 0x5e6   : > { %3249 = vxpose.xlu0.b32.cont [4/16] (narrow) %v3046_v38, 8  ;;  %v8823_v46 = vpop.eup %8822 }
 0x5e7   : > { %v2628_v43 = vmul.f32 %v8823_v46, %v10437_v32 }
 0x5e8   : > { %v3052_v7 = vpop.xlane.xlu1 %3051 }
 0x5e9   : > { %v3049_v11 = vpop.xlane.xlu0 %3048  ;;  %v3015_v49 = vmax.f32 %v2628_v43, 1e-30 }
 0x5ea   : > { %3250 = vxpose.xlu0.b32.cont [5/16] (narrow) %v3049_v11, 8 }
 0x5eb   : > { %8824 = vlog2.f32 %v3015_v49 }
 0x5ee   : > { %3251 = vxpose.xlu0.b32.cont [6/16] (narrow) %v3052_v7, 8 }
 0x5f0   : > { %v3058_v56 = vpop.xlane.xlu1 %3057 }
 0x5f1   : > { %v3055_v8 = vpop.xlane.xlu0 %3054 }
 0x5f2   : > { %3252 = vxpose.xlu0.b32.cont [7/16] (narrow) %v3055_v8, 8 }
 0x5f5   : > { %v8825_v18 = vpop.eup %8824 }
 0x5f6   : > { %3253 = vxpose.xlu0.b32.cont [8/16] (narrow) %v3058_v56, 8  ;;  %v3017_v16 = vmul.f32 0.6931472, %v8825_v18 }
 0x5f8   : > { %v3064_v20 = vpop.xlane.xlu1 %3063  ;;  %v3018_v56 = vsel %vm2095_vm3, %v3017_v16, -1e+30 }
 0x5f9   : > { %v3061_v35 = vpop.xlane.xlu0 %3060 }
 0x5fa   : > { %3254 = vxpose.xlu0.b32.cont [9/16] (narrow) %v3061_v35, 8 }
 0x5fe   : > { %3255 = vxpose.xlu0.b32.cont [10/16] (narrow) %v3064_v20, 8 }
 0x600   : > { %v3070_v36 = vpop.xlane.xlu1 %3069 }
 0x601   : > { %v3067_v14 = vpop.xlane.xlu0 %3066 }
 0x602   : > { %3256 = vxpose.xlu0.b32.cont [11/16] (narrow) %v3067_v14, 8 }
 0x606   : > { %3257 = vxpose.xlu0.b32.cont [12/16] (narrow) %v3070_v36, 8 }
 0x608   : > { %v3076_v15 = vpop.xlane.xlu1 %3075 }
 0x609   : > { %v3073_v55 = vpop.xlane.xlu0 %3072 }
 0x60a   : > { %3258 = vxpose.xlu0.b32.cont [13/16] (narrow) %v3073_v55, 8 }
 0x60e   : > { %3259 = vxpose.xlu0.b32.cont [14/16] (narrow) %v3076_v15, 8 }
 0x610   : > { %v3082_v10 = vpop.xlane.xlu1 %3081 }
 0x611   : > { %v3079_v48 = vpop.xlane.xlu0 %3078 }
 0x612   : > { %3260 = vxpose.xlu0.b32.cont [15/16] (narrow) %v3079_v48, 8 }
 0x616   : > { %3261 = vxpose.xlu0.b32.end [16/16] (narrow) %v3082_v10, 8 }
 0x65a   : > { %v3262_v6 = vpop.trf.xlu0 }
 0x65b   : > { %v10559_v31 = vrot.slane %v3262_v6, %v10113_v28 }
 0x65d   : > { %v3283_v37 = vadd.f32 %v10559_v31, %v10393_v53  ;;  %v3282_v34 = vadd.f32 %v10559_v31, %v10362_v40  ;;  %v3285_v29 = vadd.f32 %v10559_v31, %v10399_v41  ;;  %v3284_v8 = vadd.f32 %v10559_v31, %v10369_v54 }
 0x65e   : > { %v7869_v22 = vpop.f32.mrb[52].mxu1  ;;  %v3287_v10 = vadd.f32 %v10559_v31, %v10410_v63 }
 0x65f   : > { %v3293_v44 = vmul.f32 2.0, %v7869_v22  ;;  %v3197_v27 = vpop.f32.mrb[53].mxu1 }
 0x660   : > { %v3292_v42 = vmul.f32 2.0, %v3197_v27 }
 0x661   : > { %v3303_v23 = vsub.f32 %v3283_v37, %v3293_v44  ;;  %v3286_v37 = vadd.f32 %v10559_v31, %v10378_v19 }
 0x662   : > { %v3302_v32 = vsub.f32 %v3282_v34, %v3292_v42  ;;  %v7872_v62 = vpop.f32.mrb[54].mxu1 }
 0x663   : > { %v3313_v21 = vmul.f32 -0.5, %v3303_v23  ;;  %v3295_v12 = vmul.f32 2.0, %v7872_v62  ;;  %v3207_v33 = vpop.f32.mrb[55].mxu1  ;;  %v3289_v62 = vadd.f32 %v10559_v31, %v10418_v45 }
 0x664   : > { %v3312_v13 = vmul.f32 -0.5, %v3302_v32  ;;  %v3294_v38 = vmul.f32 2.0, %v3207_v33 }
 0x665   : > { %v3323_v11 = vadd.f32 -58.812065, %v3313_v21  ;;  %v3305_v7 = vsub.f32 %v3285_v29, %v3295_v12 }
 0x666   : > { %v3322_v35 = vadd.f32 -58.812065, %v3312_v13  ;;  %v7875_v20 = vpop.f32.mrb[56].mxu1  ;;  %v3304_v36 = vsub.f32 %v3284_v8, %v3294_v38  ;;  %v3288_v38 = vadd.f32 %v10559_v31, %v10386_v47 }
 0x667   : > { %v3315_v14 = vmul.f32 -0.5, %v3305_v7  ;;  %v3297_v55 = vmul.f32 2.0, %v7875_v20  ;;  %v3217_v15 = vpop.f32.mrb[57].mxu1  ;;  %v3333_v48 = vadd.f32 %v3323_v11, %v3018_v56 }
 0x668   : > { %v3296_v24 = vmul.f32 2.0, %v3217_v15  ;;  %v3314_v49 = vmul.f32 -0.5, %v3304_v36  ;;  %v3332_v18 = vadd.f32 %v3322_v35, %v3018_v56 }
 0x669   : > { %3344 = vmax.xlane.f32.xlu1 %v3333_v48  ;;  %v3325_v43 = vadd.f32 -58.812065, %v3315_v14  ;;  %v3307_v6 = vsub.f32 %v3287_v10, %v3297_v55  ;;  %v3290_v14 = vadd.f32 %v10559_v31, %v10388_v9 }
 0x66a   : > { %v7878_v46 = vpop.f32.mrb[58].mxu1  ;;  %v3306_v44 = vsub.f32 %v3286_v37, %v3296_v24  ;;  %v3324_v34 = vadd.f32 -58.812065, %v3314_v49 }
 0x66b   : > { %v3227_v22 = vpop.f32.mrb[59].mxu1  ;;  %v3317_v42 = vmul.f32 -0.5, %v3307_v6  ;;  %v3299_v23 = vmul.f32 2.0, %v7878_v46  ;;  %v3335_v32 = vadd.f32 %v3325_v43, %v3018_v56  ;;  %v3291_v46 = vadd.f32 %v10559_v31, %v10429_v26 }
 0x66c   : > { %v3316_v21 = vmul.f32 -0.5, %v3306_v44  ;;  %v3298_v33 = vmul.f32 2.0, %v3227_v22  ;;  %v3334_v13 = vadd.f32 %v3324_v34, %v3018_v56 }
 0x66d   : > { %3342 = vmax.xlane.f32.xlu1 %v3332_v18  ;;  %v3327_v29 = vadd.f32 -58.812065, %v3317_v42  ;;  %v3309_v12 = vsub.f32 %v3289_v62, %v3299_v23 }
 0x66e   : > { %v7881_v27 = vpop.f32.mrb[60].mxu1  ;;  %v3326_v11 = vadd.f32 -58.812065, %v3316_v21  ;;  %v3308_v8 = vsub.f32 %v3288_v38, %v3298_v33 }
 0x66f   : > { %v3237_v16 = vpop.f32.mrb[61].mxu1  ;;  %v3319_v7 = vmul.f32 -0.5, %v3309_v12  ;;  %v3337_v20 = vadd.f32 %v3327_v29, %v3018_v56  ;;  %v3301_v36 = vmul.f32 2.0, %v7881_v27 }
 0x670   : > { %v3300_v35 = vmul.f32 2.0, %v3237_v16  ;;  %v3318_v15 = vmul.f32 -0.5, %v3308_v8  ;;  %v3336_v24 = vadd.f32 %v3326_v11, %v3018_v56 }
 0x671   : > { %3348 = vmax.xlane.f32.xlu1 %v3335_v32  ;;  %v3329_v55 = vadd.f32 -58.812065, %v3319_v7  ;;  %v3311_v49 = vsub.f32 %v3291_v46, %v3301_v36 }
 0x672   : > { %v3310_v10 = vsub.f32 %v3290_v14, %v3300_v35  ;;  %v3328_v43 = vadd.f32 -58.812065, %v3318_v15 }
 0x673   : > { %v3339_v22 = vadd.f32 %v3329_v55, %v3018_v56  ;;  %v3321_v37 = vmul.f32 -0.5, %v3311_v49 }
 0x674   : > { %v3320_v6 = vmul.f32 -0.5, %v3310_v10  ;;  %v3338_v34 = vadd.f32 %v3328_v43, %v3018_v56 }
 0x675   : > { %3346 = vmax.xlane.f32.xlu1 %v3334_v13  ;;  %v3331_v42 = vadd.f32 -58.812065, %v3321_v37 }
 0x676   : > { %v3330_v44 = vadd.f32 -58.812065, %v3320_v6 }
 0x677   : > { %v3341_v27 = vadd.f32 %v3331_v42, %v3018_v56 }
 0x678   : > { %v3340_v23 = vadd.f32 %v3330_v44, %v3018_v56 }
 0x679   : > { %3352 = vmax.xlane.f32.xlu1 %v3337_v20 }
 0x67d   : > { %3350 = vmax.xlane.f32.xlu1 %v3336_v24 }
 0x681   : > { %3356 = vmax.xlane.f32.xlu1 %v3339_v22 }
 0x685   : > { %3354 = vmax.xlane.f32.xlu1 %v3338_v34 }
 0x689   : > { %3358 = vmax.xlane.f32.xlu1 %v3340_v23 }
 0x68d   : > { %3360 = vmax.xlane.f32.xlu1 %v3341_v27 }
 0x6f6   : > { %v3345_v16 = vpop.xlane.xlu1 %3344 }
 0x6f7   : > { %v3363_v62 = vsub.f32 %v3333_v48, %v3345_v16 }
 0x6f9   : > { %v3374_v21 = vmul.f32 1.442695, %v3363_v62 }
 0x6fa   : > { %v3343_v29 = vpop.xlane.xlu1 %3342 }
 0x6fb   : > { %8826 = vpow2.f32 %v3374_v21  ;;  %v3362_v31 = vsub.f32 %v3332_v18, %v3343_v29 }
 0x6fd   : > { %v3372_v12 = vmul.f32 1.442695, %v3362_v31 }
 0x6fe   : > { %v3349_v33 = vpop.xlane.xlu1 %3348 }
 0x6ff   : > { %8828 = vpow2.f32 %v3372_v12  ;;  %v3365_v38 = vsub.f32 %v3335_v32, %v3349_v33 }
 0x701   : > { %v3378_v11 = vmul.f32 1.442695, %v3365_v38 }
 0x702   : > { %v3347_v7 = vpop.xlane.xlu1 %3346 }
 0x703   : > { %8830 = vpow2.f32 %v3378_v11  ;;  %v3364_v8 = vsub.f32 %v3334_v13, %v3347_v7 }
 0x705   : > { %v8827_v35 = vpop.eup %8826  ;;  %v3376_v14 = vmul.f32 1.442695, %v3364_v8 }
 0x706   : > { %3394 = vadd.xlane.f32.xlu1 %v8827_v35  ;;  %v3353_v36 = vpop.xlane.xlu1 %3352 }
 0x707   : > { %8832 = vpow2.f32 %v3376_v14  ;;  %v3367_v56 = vsub.f32 %v3337_v20, %v3353_v36 }
 0x709   : > { %v8829_v55 = vpop.eup %8828  ;;  %v3382_v48 = vmul.f32 1.442695, %v3367_v56 }
 0x70a   : > { %3392 = vadd.xlane.f32.xlu1 %v8829_v55  ;;  %v3351_v15 = vpop.xlane.xlu1 %3350 }
 0x70b   : > { %8834 = vpow2.f32 %v3382_v48  ;;  %v3366_v18 = vsub.f32 %v3336_v24, %v3351_v15 }
 0x70d   : > { %v8831_v10 = vpop.eup %8830  ;;  %v3380_v46 = vmul.f32 1.442695, %v3366_v18 }
 0x70e   : > { %3398 = vadd.xlane.f32.xlu1 %v8831_v10  ;;  %v3357_v32 = vpop.xlane.xlu1 %3356 }
 0x70f   : > { %8836 = vpow2.f32 %v3380_v46  ;;  %v3369_v43 = vsub.f32 %v3339_v22, %v3357_v32 }
 0x711   : > { %v8833_v49 = vpop.eup %8832  ;;  %v3386_v13 = vmul.f32 1.442695, %v3369_v43 }
 0x712   : > { %3396 = vadd.xlane.f32.xlu1 %v8833_v49  ;;  %v3355_v6 = vpop.xlane.xlu1 %3354 }
 0x713   : > { %8838 = vpow2.f32 %v3386_v13  ;;  %v3368_v37 = vsub.f32 %v3338_v34, %v3355_v6 }
 0x715   : > { %v8835_v44 = vpop.eup %8834  ;;  %v3384_v20 = vmul.f32 1.442695, %v3368_v37 }
 0x716   : > { %3402 = vadd.xlane.f32.xlu1 %v8835_v44  ;;  %v3359_v42 = vpop.xlane.xlu1 %3358 }
 0x717   : > { %8840 = vpow2.f32 %v3384_v20  ;;  %v3370_v62 = vsub.f32 %v3340_v23, %v3359_v42 }
 0x719   : > { %v8837_v16 = vpop.eup %8836  ;;  %v3388_v22 = vmul.f32 1.442695, %v3370_v62 }
 0x71a   : > { %3400 = vadd.xlane.f32.xlu1 %v8837_v16  ;;  %v3361_v24 = vpop.xlane.xlu1 %3360 }
 0x71b   : > { %v3371_v21 = vsub.f32 %v3341_v27, %v3361_v24 }
 0x71d   : > { %v8839_v29 = vpop.eup %8838  ;;  %v3390_v31 = vmul.f32 1.442695, %v3371_v21 }
 0x71e   : > { %3406 = vadd.xlane.f32.xlu1 %v8839_v29 }
 0x71f   : > { %8842 = vpow2.f32 %v3390_v31 }
 0x720   : > { %8844 = vpow2.f32 %v3388_v22 }
 0x721   : > { %v8841_v12 = vpop.eup %8840 }
 0x722   : > { %3404 = vadd.xlane.f32.xlu1 %v8841_v12 }
 0x729   : > { %v8843_v33 = vpop.eup %8842 }
 0x72a   : > { %3410 = vadd.xlane.f32.xlu1 %v8843_v33  ;;  %v8845_v34 = vpop.eup %8844 }
 0x72e   : > { %3408 = vadd.xlane.f32.xlu1 %v8845_v34 }
 0x793   : > { %v3395_v38 = vpop.xlane.xlu1 %3394 }
 0x797   : > { %v3393_v11 = vpop.xlane.xlu1 %3392 }
 0x798   : > { %8846 = vrcp.f32 %v3393_v11 }
 0x799   : > { %8848 = vrcp.f32 %v3395_v38 }
 0x79b   : > { %v3399_v7 = vpop.xlane.xlu1 %3398 }
 0x79f   : > { %v3397_v8 = vpop.xlane.xlu1 %3396 }
 0x7a0   : > { %8850 = vrcp.f32 %v3397_v8 }
 0x7a1   : > { %8852 = vrcp.f32 %v3399_v7 }
 0x7a2   : > { %v8847_v23 = vpop.eup %8846 }
 0x7a3   : > { %v3422_v27 = vmul.f32 %v8847_v23, %v8829_v55  ;;  %v3403_v14 = vpop.xlane.xlu1 %3402  ;;  %v8849_v36 = vpop.eup %8848 }
 0x7a4   : > { %v3423_v56 = vmul.f32 %v8849_v36, %v8827_v35 }
 0x7a5   : > { %3460 = vxpose.xlu1.b32.start [1/10] (short) %v3422_v27, 128 }
 0x7a6   : > { %v3432_v20 = vadd.f32 %v3423_v56, %v3422_v27 }
 0x7a7   : > { %v3401_v48 = vpop.xlane.xlu1 %3400 }
 0x7a8   : > { %8854 = vrcp.f32 %v3401_v48 }
 0x7a9   : > { %3461 = vxpose.xlu1.b32.cont [2/10] (short) %v3423_v56, 128  ;;  %8856 = vrcp.f32 %v3403_v14 }
 0x7aa   : > { %v8851_v15 = vpop.eup %8850 }
 0x7ab   : > { %v3424_v18 = vmul.f32 %v8851_v15, %v8833_v49  ;;  %v3407_v46 = vpop.xlane.xlu1 %3406  ;;  %v8853_v32 = vpop.eup %8852 }
 0x7ac   : > { %v3425_v43 = vmul.f32 %v8853_v32, %v8831_v10 }
 0x7ad   : > { %3462 = vxpose.xlu1.b32.cont [3/10] (short) %v3424_v18, 128  ;;  %v3433_v35 = vadd.f32 %v3432_v20, %v3424_v18 }
 0x7af   : > { %v3405_v13 = vpop.xlane.xlu1 %3404  ;;  %v3434_v21 = vadd.f32 %v3433_v35, %v3425_v43 }
 0x7b0   : > { %8858 = vrcp.f32 %v3405_v13 }
 0x7b1   : > { %3463 = vxpose.xlu1.b32.cont [4/10] (short) %v3425_v43, 128  ;;  %8860 = vrcp.f32 %v3407_v46 }
 0x7b2   : > { %v8855_v6 = vpop.eup %8854 }
 0x7b3   : > { %v3426_v55 = vmul.f32 %v8855_v6, %v8837_v16  ;;  %v8857_v37 = vpop.eup %8856 }
 0x7b4   : > { %v3427_v42 = vmul.f32 %v8857_v37, %v8835_v44 }
 0x7b5   : > { %3464 = vxpose.xlu1.b32.cont [5/10] (short) %v3426_v55, 128  ;;  %v3435_v10 = vadd.f32 %v3434_v21, %v3426_v55 }
 0x7b7   : > { %v3411_v24 = vpop.xlane.xlu1 %3410  ;;  %v3436_v11 = vadd.f32 %v3435_v10, %v3427_v42 }
 0x7b8   : > { %8862 = vrcp.f32 %v3411_v24 }
 0x7b9   : > { %3465 = vxpose.xlu1.b32.cont [6/10] (short) %v3427_v42, 128 }
 0x7ba   : > { %v8859_v62 = vpop.eup %8858 }
 0x7bb   : > { %v3409_v49 = vpop.xlane.xlu1 %3408  ;;  %v3428_v31 = vmul.f32 %v8859_v62, %v8841_v12  ;;  %v8861_v22 = vpop.eup %8860 }
 0x7bc   : > { %8864 = vrcp.f32 %v3409_v49  ;;  %v3429_v38 = vmul.f32 %v8861_v22, %v8839_v29 }
 0x7bd   : > { %3466 = vxpose.xlu1.b32.cont [7/10] (short) %v3428_v31, 128  ;;  %v3437_v16 = vadd.f32 %v3436_v11, %v3428_v31 }
 0x7bf   : > { %v3438_v27 = vadd.f32 %v3437_v16, %v3429_v38 }
 0x7c1   : > { %3467 = vxpose.xlu1.b32.cont [8/10] (short) %v3429_v38, 128 }
 0x7c2   : > { %v8863_v7 = vpop.eup %8862 }
 0x7c3   : > { %v3431_v14 = vmul.f32 %v8863_v7, %v8843_v33 }
 0x7c6   : > { %v8865_v8 = vpop.eup %8864 }
 0x7c7   : > { %v3430_v23 = vmul.f32 %v8865_v8, %v8845_v34 }
 0x7c9   : > { %3468 = vxpose.xlu1.b32.cont [9/10] (short) %v3430_v23, 128  ;;  %v3439_v44 = vadd.f32 %v3438_v27, %v3430_v23 }
 0x7cb   : > { %v3440_v36 = vadd.f32 %v3439_v44, %v3431_v14 }
 0x7cd   : > { %3469 = vxpose.xlu1.b32.end [10/10] (short) %v3431_v14, 128  ;;  %v3441_v56 = vrot.slane %v3440_v36, 4 }
 0x7cf   : > { %v3442_v48 = vadd.f32 %v3441_v56, %v3440_v36 }
 0x7d1   : > { %v3443_v12 = vrot.slane %v3442_v48, 2 }
 0x7d3   : > { %v3444_v15 = vadd.f32 %v3443_v12, %v3442_v48 }
 0x7d5   : > { %v3445_v18 = vrot.slane %v3444_v15, 1 }
 0x7d7   : > { %v10583_v46 = vadd.f32 %v3445_v18, %v3444_v15 }
 0x7d9   : > { %3685 = vxpose.xlu0.b32.start.end [1/1] (short) %v10583_v46, 128 }
 0x829   : > { %v3476_v29 = vpop.trf.xlu1 }
 0x82a   : > { %7902 = vmatprep.mubr.msk.f32.mxu0 %vm2661_vm4, %v3476_v29 }
 0x82d   : > { %v3477_v32 = vpop.trf.xlu1 }
 0x82e   : > { %7903 = vmatmul.mubr.msk.f32.vlgmr.msra.gmra.mrb[70].mxu0 %vm2661_vm4, %v3477_v32 }
 0x831   : > { %v3478_v34 = vpop.trf.xlu1 }
 0x832   : > { %7905 = vmatprep.mubr.msk.f32.mxu0 %vm2661_vm4, %v3478_v34 }
 0x835   : > { %v3479_v33 = vpop.trf.xlu1 }
 0x836   : > { %7906 = vmatmul.mubr.msk.f32.gmra.mrb[72].mxu0 %vm2661_vm4, %v3479_v33 }
 0x839   : > { %v3480_v43 = vpop.trf.xlu1 }
 0x83a   : > { %7908 = vmatprep.mubr.msk.f32.mxu0 %vm2661_vm4, %v3480_v43 }
 0x83d   : > { %v3481_v13 = vpop.trf.xlu1 }
 0x83e   : > { %7909 = vmatmul.mubr.msk.f32.gmra.mrb[74].mxu0 %vm2661_vm4, %v3481_v13 }
 0x841   : > { %v3482_v6 = vpop.trf.xlu1 }
 0x842   : > { %7911 = vmatprep.mubr.msk.f32.mxu0 %vm2661_vm4, %v3482_v6 }
 0x845   : > { %v3483_v55 = vpop.trf.xlu1 }
 0x846   : > { %7912 = vmatmul.mubr.msk.f32.gmra.mrb[76].mxu0 %vm2661_vm4, %v3483_v55 }
 0x849   : > { %v3484_v37 = vpop.trf.xlu1 }
 0x84a   : > { %7914 = vmatprep.mubr.msk.f32.mxu0 %vm2661_vm4, %v3484_v37 }
 0x84d   : > { %v3485_v20 = vpop.trf.xlu1 }
 0x84e   : > { %7915 = vmatmul.mubr.msk.f32.gmra.mrb[78].mxu0 %vm2661_vm4, %v3485_v20 }
 0x851   : > { %v3486_v35 = vpop.trf.xlu1 }
 0x852   : > { %7917 = vmatprep.mubr.msk.f32.mxu0 %vm2661_vm4, %v3486_v35 }
 0x855   : > { %v3487_v42 = vpop.trf.xlu1 }
 0x856   : > { %7918 = vmatmul.mubr.msk.f32.gmra.mrb[80].mxu0 %vm2661_vm4, %v3487_v42 }
 0x859   : > { %v3488_v24 = vpop.trf.xlu1  ;;  %v3701_v62 = vpop.trf.xlu0 }
 0x85a   : > { %v3717_v21 = vadd.f32 1e-10, %v3701_v62  ;;  %7920 = vmatprep.mubr.msk.f32.mxu0 %vm2661_vm4, %v3488_v24 }
 0x85c   : > { %8866 = vrcp.f32 %v3717_v21 }
 0x85d   : > { %v3489_v49 = vpop.trf.xlu1  ;;  %v3702_v31 = vpop.trf.xlu0 }
 0x85e   : > { %v3718_v22 = vadd.f32 1e-10, %v3702_v31  ;;  %7921 = vmatmul.mubr.msk.f32.gmra.mrb[82].mxu0 %vm2661_vm4, %v3489_v49 }
 0x860   : > { %8868 = vrcp.f32 %v3718_v22 }
 0x861   : > { %v3490_v10 = vpop.trf.xlu1  ;;  %v3703_v38 = vpop.trf.xlu0 }
 0x862   : > { %v3719_v11 = vadd.f32 1e-10, %v3703_v38  ;;  %7923 = vmatprep.mubr.msk.f32.mxu0 %vm2661_vm4, %v3490_v10 }
 0x864   : > { %8870 = vrcp.f32 %v3719_v11 }
 0x865   : > { %v3491_v16 = vpop.trf.xlu1  ;;  %v3704_v7 = vpop.trf.xlu0 }
 0x866   : > { %v8867_v8 = vpop.eup %8866  ;;  %v3720_v23 = vadd.f32 1e-10, %v3704_v7  ;;  %7924 = vmatmul.mubr.msk.f32.gmra.mrb[84].mxu0 %vm2661_vm4, %v3491_v16 }
 0x867   : > { %7958 = vmatprep.mubr.msk.f32.mxu0 %vm1048_vm0, %v9665_v52  ;;  %3751 = vperm.xlu0 %8678, %v8867_v8  }
 0x868   : > { %8872 = vrcp.f32 %v3720_v23 }
 0x869   : > { %v3705_v27 = vpop.trf.xlu0 }
 0x86a   : > { %v8869_v44 = vpop.eup %8868  ;;  %v3721_v14 = vadd.f32 1e-10, %v3705_v27 }
 0x86b   : > { %3756 = vperm.xlu1 %8679, %v8869_v44  }
 0x86c   : > { %8874 = vrcp.f32 %v3721_v14 }
 0x86d   : > { %v3706_v36 = vpop.trf.xlu0 }
 0x86e   : > { %v8871_v56 = vpop.eup %8870  ;;  %v3722_v48 = vadd.f32 1e-10, %v3706_v36 }
 0x86f   : > { %3761 = vperm.xlu0 %8678, %v8871_v56  }
 0x870   : > { %8876 = vrcp.f32 %v3722_v48  ;;  %v3447_v48 = vsel %vm2615_vm5, %v10583_v46, 0.0 }
 0x871   : > { %v3707_v12 = vpop.trf.xlu0 }
 0x872   : > { %v8873_v15 = vpop.eup %8872  ;;  %v3723_v18 = vadd.f32 1e-10, %v3707_v12 }
 0x873   : > { %3766 = vperm.xlu0 %8678, %v8873_v15  }
 0x874   : > { %8878 = vrcp.f32 %v3723_v18 }
 0x875   : > { %v3708_v29 = vpop.trf.xlu0 }
 0x876   : > { %v8875_v32 = vpop.eup %8874  ;;  %v3724_v34 = vadd.f32 1e-10, %v3708_v29 }
 0x877   : > { %3771 = vperm.xlu0 %8678, %v8875_v32  }
 0x878   : > { %8880 = vrcp.f32 %v3724_v34 }
 0x879   : > { %v3709_v33 = vpop.trf.xlu0 }
 0x87a   : > { %v8877_v43 = vpop.eup %8876  ;;  %v3725_v13 = vadd.f32 1e-10, %v3709_v33 }
 0x87b   : > { %3776 = vperm.xlu1 %8679, %v8877_v43  }
 0x87c   : > { %8882 = vrcp.f32 %v3725_v13 }
 0x87d   : > { %v3710_v6 = vpop.trf.xlu0 }
 0x87e   : > { %v8879_v55 = vpop.eup %8878  ;;  %v3726_v37 = vadd.f32 1e-10, %v3710_v6 }
 0x87f   : > { %3781 = vperm.xlu0 %8678, %v8879_v55  }
 0x880   : > { %8884 = vrcp.f32 %v3726_v37 }
 0x881   : > { %v3711_v20 = vpop.trf.xlu0 }
 0x882   : > { %v8881_v35 = vpop.eup %8880  ;;  %v3727_v42 = vadd.f32 1e-10, %v3711_v20 }
 0x883   : > { %3786 = vperm.xlu1 %8679, %v8881_v35  }
 0x884   : > { %8886 = vrcp.f32 %v3727_v42 }
 0x885   : > { %v3712_v24 = vpop.trf.xlu0 }
 0x886   : > { %v8883_v62 = vpop.eup %8882  ;;  %v3728_v21 = vadd.f32 1e-10, %v3712_v24 }
 0x887   : > { %3791 = vperm.xlu0 %8678, %v8883_v62  }
 0x888   : > { %8888 = vrcp.f32 %v3728_v21 }
 0x889   : > { %v3713_v49 = vpop.trf.xlu0 }
 0x88a   : > { %v8885_v31 = vpop.eup %8884  ;;  %v3729_v22 = vadd.f32 1e-10, %v3713_v49 }
 0x88b   : > { %3796 = vperm.xlu1 %8679, %v8885_v31  }
 0x88c   : > { %8890 = vrcp.f32 %v3729_v22 }
 0x88d   : > { %v3714_v10 = vpop.trf.xlu0 }
 0x88e   : > { %v8887_v38 = vpop.eup %8886  ;;  %v3730_v11 = vadd.f32 1e-10, %v3714_v10 }
 0x88f   : > { %3801 = vperm.xlu0 %8678, %v8887_v38  }
 0x890   : > { %8892 = vrcp.f32 %v3730_v11 }
 0x891   : > { %v3715_v16 = vpop.trf.xlu0 }
 0x892   : > { %v8889_v7 = vpop.eup %8888  ;;  %v3731_v8 = vadd.f32 1e-10, %v3715_v16 }
 0x893   : > { %3806 = vperm.xlu1 %8679, %v8889_v7  }
 0x894   : > { %8894 = vrcp.f32 %v3731_v8 }
 0x895   : > { %v3716_v23 = vpop.trf.xlu0 }
 0x896   : > { %v8891_v27 = vpop.eup %8890  ;;  %v3732_v44 = vadd.f32 1e-10, %v3716_v23 }
 0x897   : > { %3811 = vperm.xlu0 %8678, %v8891_v27  }
 0x898   : > { %8896 = vrcp.f32 %v3732_v44 }
 0x89a   : > { %v8893_v14 = vpop.eup %8892 }
 0x89b   : > { %3816 = vperm.xlu1 %8679, %v8893_v14  }
 0x89e   : > { %v8895_v36 = vpop.eup %8894 }
 0x89f   : > { %3821 = vperm.xlu0 %8678, %v8895_v36  }
 0x8a2   : > { %v8897_v56 = vpop.eup %8896 }
 0x8a3   : > { %3826 = vperm.xlu1 %8679, %v8897_v56  }
 0x8be   : > { %3448 = vadd.xlane.f32.xlu0 %v3447_v48 }
 0x8e6   : > { %v3752_v12 = vpop.permute.xlu0 %3751 }
 0x8ea   : > { %v3757_v15 = vpop.permute.xlu1 %3756 }
 0x8ee   : > { %v3762_v34 = vpop.permute.xlu0 %3761 }
 0x8f2   : > { %v3767_v20 = vpop.permute.xlu0 %3766 }
 0x8f6   : > { %v3772_v11 = vpop.permute.xlu0 %3771 }
 0x8fa   : > { %v3777_v10 = vpop.permute.xlu1 %3776 }
 0x901   : > { %v7904_v18 = vpop.f32.mrb[70].mxu0 }
 0x902   : > { %v3830_v29 = vmul.f32 %v7904_v18, %v3757_v15  ;;  %v3606_v32 = vpop.f32.mrb[71].mxu0  ;;  %v3787_v48 = vpop.permute.xlu1 %3786 }
 0x903   : > { %v3829_v33 = vmul.f32 %v3752_v12, %v3606_v32  ;;  %v3782_v15 = vpop.permute.xlu0 %3781 }
 0x904   : > { %v3850_v43 = vmul.f32 %v3830_v29, %v3830_v29 }
 0x905   : > { %v3849_v13 = vmul.f32 %v3829_v33, %v3829_v33  ;;  %v8382_v6 = vpack.c.bf16 %v3830_v29, %v3829_v33 }
 0x906   : > { %v3868_v55 = vsel %vm1048_vm0, %v3850_v43, 0.0 }
 0x907   : > { %8384 = vmatprep.subr.msk.bf16.mxu0 %vm9989_vm2, %v8382_v6  ;;  %3869 = vadd.xlane.f32.xlu0 %v3868_v55  ;;  %v3865_v37 = vsel %vm1048_vm0, %v3849_v13, 0.0 }
 0x908   : > { %8387 = vmatpush3.bf16.xpose.msk.msra.mxu0 %vm9989_vm2, %v8382_v6  ;;  %3866 = vadd.xlane.f32.xlu1 %v3865_v37 }
 0x909   : > { %v7907_v35 = vpop.f32.mrb[72].mxu0 }
 0x90a   : > { %v3832_v42 = vmul.f32 %v7907_v35, %v3767_v20  ;;  %v3616_v24 = vpop.f32.mrb[73].mxu0  ;;  %v3797_v55 = vpop.permute.xlu1 %3796 }
 0x90b   : > { %v3831_v62 = vmul.f32 %v3762_v34, %v3616_v24  ;;  %v3792_v20 = vpop.permute.xlu0 %3791 }
 0x90c   : > { %v3852_v31 = vmul.f32 %v3832_v42, %v3832_v42 }
 0x90d   : > { %v3851_v21 = vmul.f32 %v3831_v62, %v3831_v62  ;;  %v8388_v49 = vpack.c.bf16 %v3832_v42, %v3831_v62 }
 0x90e   : > { %v3874_v23 = vsel %vm1048_vm0, %v3852_v31, 0.0 }
 0x90f   : > { %8390 = vmatprep.subr.msk.bf16.mxu0 %vm9989_vm2, %v8388_v49  ;;  %v3871_v22 = vsel %vm1048_vm0, %v3851_v21, 0.0 }
 0x910   : > { %8393 = vmatpush3.bf16.xpose.msk.msra.mxu0 %vm9989_vm2, %v8388_v49  ;;  %3872 = vadd.xlane.f32.xlu0 %v3871_v22 }
 0x911   : > { %v7910_v38 = vpop.f32.mrb[74].mxu0 }
 0x912   : > { %v3834_v16 = vmul.f32 %v7910_v38, %v3777_v10  ;;  %v3626_v7 = vpop.f32.mrb[75].mxu0  ;;  %v3807_v10 = vpop.permute.xlu1 %3806 }
 0x913   : > { %v3833_v8 = vmul.f32 %v3772_v11, %v3626_v7  ;;  %v3802_v11 = vpop.permute.xlu0 %3801 }
 0x914   : > { %v3854_v27 = vmul.f32 %v3834_v16, %v3834_v16  ;;  %3875 = vadd.xlane.f32.xlu0 %v3874_v23 }
 0x915   : > { %v3853_v44 = vmul.f32 %v3833_v8, %v3833_v8  ;;  %v8394_v14 = vpack.c.bf16 %v3834_v16, %v3833_v8 }
 0x916   : > { %v3880_v36 = vsel %vm1048_vm0, %v3854_v27, 0.0 }
 0x917   : > { %8396 = vmatprep.subr.msk.bf16.mxu0 %vm9989_vm2, %v8394_v14  ;;  %v3877_v56 = vsel %vm1048_vm0, %v3853_v44, 0.0 }
 0x918   : > { %8399 = vmatpush3.bf16.xpose.msk.msra.mxu0 %vm9989_vm2, %v8394_v14  ;;  %3878 = vadd.xlane.f32.xlu1 %v3877_v56 }
 0x919   : > { %3881 = vadd.xlane.f32.xlu0 %v3880_v36  ;;  %v7913_v12 = vpop.f32.mrb[76].mxu0 }
 0x91a   : > { %v3836_v18 = vmul.f32 %v7913_v12, %v3787_v48  ;;  %v3636_v29 = vpop.f32.mrb[77].mxu0  ;;  %v3817_v56 = vpop.permute.xlu1 %3816 }
 0x91b   : > { %v3835_v32 = vmul.f32 %v3782_v15, %v3636_v29  ;;  %v3812_v12 = vpop.permute.xlu0 %3811 }
 0x91c   : > { %v3856_v34 = vmul.f32 %v3836_v18, %v3836_v18 }
 0x91d   : > { %v3855_v33 = vmul.f32 %v3835_v32, %v3835_v32  ;;  %v8400_v43 = vpack.c.bf16 %v3836_v18, %v3835_v32 }
 0x91e   : > { %v3886_v13 = vsel %vm1048_vm0, %v3856_v34, 0.0 }
 0x91f   : > { %8402 = vmatprep.subr.msk.bf16.mxu0 %vm9989_vm2, %v8400_v43  ;;  %3887 = vadd.xlane.f32.xlu0 %v3886_v13  ;;  %v3883_v6 = vsel %vm1048_vm0, %v3855_v33, 0.0 }
 0x920   : > { %8405 = vmatpush3.bf16.xpose.msk.msra.mxu0 %vm9989_vm2, %v8400_v43  ;;  %3884 = vadd.xlane.f32.xlu1 %v3883_v6 }
 0x921   : > { %v7916_v37 = vpop.f32.mrb[78].mxu0 }
 0x922   : > { %v3838_v35 = vmul.f32 %v7916_v37, %v3797_v55  ;;  %v3646_v42 = vpop.f32.mrb[79].mxu0  ;;  %v3827_v6 = vpop.permute.xlu1 %3826 }
 0x923   : > { %v3837_v24 = vmul.f32 %v3792_v20, %v3646_v42  ;;  %v3822_v37 = vpop.permute.xlu0 %3821 }
 0x924   : > { %v3858_v62 = vmul.f32 %v3838_v35, %v3838_v35 }
 0x925   : > { %v3857_v21 = vmul.f32 %v3837_v24, %v3837_v24  ;;  %v8406_v49 = vpack.c.bf16 %v3838_v35, %v3837_v24 }
 0x926   : > { %v3892_v31 = vsel %vm1048_vm0, %v3858_v62, 0.0 }
 0x927   : > { %8408 = vmatprep.subr.msk.bf16.mxu0 %vm9989_vm2, %v8406_v49  ;;  %3893 = vadd.xlane.f32.xlu0 %v3892_v31  ;;  %v3889_v22 = vsel %vm1048_vm0, %v3857_v21, 0.0 }
 0x928   : > { %8411 = vmatpush3.bf16.xpose.msk.msra.mxu0 %vm9989_vm2, %v8406_v49  ;;  %3890 = vadd.xlane.f32.xlu1 %v3889_v22 }
 0x929   : > { %v7919_v38 = vpop.f32.mrb[80].mxu0 }
 0x92a   : > { %v3840_v16 = vmul.f32 %v7919_v38, %v3807_v10  ;;  %v3656_v7 = vpop.f32.mrb[81].mxu0 }
 0x92b   : > { %v3839_v8 = vmul.f32 %v3802_v11, %v3656_v7 }
 0x92c   : > { %v3860_v23 = vmul.f32 %v3840_v16, %v3840_v16 }
 0x92d   : > { %v3859_v27 = vmul.f32 %v3839_v8, %v3839_v8  ;;  %v8412_v44 = vpack.c.bf16 %v3840_v16, %v3839_v8 }
 0x92e   : > { %v3898_v14 = vsel %vm1048_vm0, %v3860_v23, 0.0 }
 0x92f   : > { %8414 = vmatprep.subr.msk.bf16.mxu0 %vm9989_vm2, %v8412_v44  ;;  %3899 = vadd.xlane.f32.xlu0 %v3898_v14  ;;  %v3895_v36 = vsel %vm1048_vm0, %v3859_v27, 0.0 }
 0x930   : > { %8417 = vmatpush3.bf16.xpose.msk.msra.mxu0 %vm9989_vm2, %v8412_v44  ;;  %3896 = vadd.xlane.f32.xlu1 %v3895_v36 }
 0x931   : > { %v7922_v48 = vpop.f32.mrb[82].mxu0 }
 0x932   : > { %v3842_v15 = vmul.f32 %v7922_v48, %v3817_v56  ;;  %v3666_v18 = vpop.f32.mrb[83].mxu0 }
 0x933   : > { %v3841_v29 = vmul.f32 %v3812_v12, %v3666_v18 }
 0x934   : > { %v3862_v32 = vmul.f32 %v3842_v15, %v3842_v15 }
 0x935   : > { %v3861_v34 = vmul.f32 %v3841_v29, %v3841_v29  ;;  %v8418_v33 = vpack.c.bf16 %v3842_v15, %v3841_v29 }
 0x936   : > { %v3904_v43 = vsel %vm1048_vm0, %v3862_v32, 0.0 }
 0x937   : > { %8420 = vmatprep.subr.msk.bf16.mxu0 %vm9989_vm2, %v8418_v33  ;;  %3905 = vadd.xlane.f32.xlu0 %v3904_v43  ;;  %v3901_v13 = vsel %vm1048_vm0, %v3861_v34, 0.0 }
 0x938   : > { %8423 = vmatpush3.bf16.xpose.msk.msra.mxu0 %vm9989_vm2, %v8418_v33  ;;  %3902 = vadd.xlane.f32.xlu1 %v3901_v13 }
 0x939   : > { %v7925_v55 = vpop.f32.mrb[84].mxu0 }
 0x93a   : > { %v3844_v20 = vmul.f32 %v7925_v55, %v3827_v6  ;;  %v3676_v35 = vpop.f32.mrb[85].mxu0 }
 0x93b   : > { %v3843_v42 = vmul.f32 %v3822_v37, %v3676_v35 }
 0x93c   : > { %v3864_v24 = vmul.f32 %v3844_v20, %v3844_v20 }
 0x93d   : > { %v3863_v62 = vmul.f32 %v3843_v42, %v3843_v42  ;;  %v8424_v21 = vpack.c.bf16 %v3844_v20, %v3843_v42 }
 0x93e   : > { %v3910_v49 = vsel %vm1048_vm0, %v3864_v24, 0.0 }
 0x93f   : > { %8426 = vmatprep.subr.msk.bf16.mxu0 %vm9989_vm2, %v8424_v21  ;;  %3911 = vadd.xlane.f32.xlu0 %v3910_v49  ;;  %v3907_v31 = vsel %vm1048_vm0, %v3863_v62, 0.0 }
 0x940   : > { %8429 = vmatpush3.bf16.xpose.msk.msra.mxu0 %vm9989_vm2, %v8424_v21  ;;  %3908 = vadd.xlane.f32.xlu1 %v3907_v31 }
 0x941   : > { %8499 = vmatprep.subr.bf16.mxu0 %v9718_v4 }
 0x947   : > { %7959 = vmatmul.mubr.msk.f32.vlgmr.msra.gmra.mrb[86].mxu0 %vm1048_vm0, %v9668_v57 }
 0x948   : > { %7961 = vmatprep.mubr.msk.f32.mxu0 %vm1048_vm0, %v9675_v58  ;;  %8501 = vmatpush3.bf16.msra.mxu0 %v9718_v4 }
 0x949   : > { %8503 = vmatprep.subr.bf16.mxu0 %v9770_v51 }
 0x94b   : > { %7962 = vmatmul.mubr.msk.f32.gmra.mrb[88].mxu0 %vm1048_vm0, %v9678_v59  ;;  %v3449_v22 = vpop.xlane.xlu0 %3448 }
 0x94c   : > { %v3450_v10 = vrot.slane %v3449_v22, 4  ;;  %7964 = vmatprep.mubr.msk.f32.mxu0 %vm1048_vm0, %v9681_v60  ;;  %8505 = vmatpush3.bf16.msra.mxu0 %v9770_v51 }
 0x94d   : > { %8507 = vmatprep.subr.bf16.mxu0 %v9843_v39 }
 0x94e   : > { %v3451_v38 = vadd.f32 %v3450_v10, %v3449_v22 }
 0x94f   : > { %7965 = vmatmul.mubr.msk.f32.gmra.mrb[90].mxu0 %vm1048_vm0, %v9684_v61 }
 0x950   : > { %7967 = vmatprep.mubr.msk.f32.mxu0 %vm1048_vm0, %v9697_v0  ;;  %8509 = vmatpush3.bf16.msra.mxu0 %v9843_v39  ;;  %v3452_v11 = vrot.slane %v3451_v38, 2 }
 0x951   : > { %8511 = vmatprep.subr.bf16.mxu0 %v9738_v5 }
 0x952   : > { %v3453_v16 = vadd.f32 %v3452_v11, %v3451_v38 }
 0x953   : > { %7968 = vmatmul.mubr.msk.f32.gmra.mrb[92].mxu0 %vm1048_vm0, %v9700_v1 }
 0x954   : > { %7970 = vmatprep.mubr.msk.f32.mxu0 %vm1048_vm0, %v9703_v2  ;;  %8513 = vmatpush3.bf16.msra.mxu0 %v9738_v5  ;;  %v3454_v7 = vrot.slane %v3453_v16, 1 }
 0x955   : > { %8515 = vmatprep.subr.bf16.mxu0 %v9778_v30 }
 0x956   : > { %v3455_v8 = vadd.f32 %v3454_v7, %v3453_v16 }
 0x957   : > { %7971 = vmatmul.mubr.msk.f32.gmra.mrb[94].mxu0 %vm1048_vm0, %v9706_v3 }
 0x958   : > { %8655 = vpush %v3455_v8  ;;  %8517 = vmatpush3.bf16.msra.mxu0 %v9778_v30 }
 0x989   : > { %s8656_s1 = spop %8655 }
 0x98a   : > { %v3457_v6 = vstv %s8656_s1 }
 0x98b   : > { %8898 = vrcp.f32 %v3457_v6 }
 0x994   : > { %v3870_v27 = vpop.xlane.xlu0 %3869 }
 0x995   : > { %v3867_v23 = vpop.xlane.xlu1 %3866  ;;  %v8899_v55 = vpop.eup %8898 }
 0x996   : > { %4076 = vxpose.xlu1.b32.start [1/16] (narrow) %v3867_v23, 8  ;;  %v3459_v37 = vmul.f32 %v8899_v55, %v10583_v46 }
 0x998   : > { %v3845_v20 = vmax.f32 %v3459_v37, 1e-30 }
 0x99a   : > { %4077 = vxpose.xlu1.b32.cont [2/16] (narrow) %v3870_v27, 8  ;;  %8900 = vlog2.f32 %v3845_v20 }
 0x99d   : > { %v3873_v44 = vpop.xlane.xlu0 %3872 }
 0x99e   : > { %4078 = vxpose.xlu1.b32.cont [3/16] (narrow) %v3873_v44, 8 }
 0x9a1   : > { %v3876_v14 = vpop.xlane.xlu0 %3875 }
 0x9a2   : > { %4079 = vxpose.xlu1.b32.cont [4/16] (narrow) %v3876_v14, 8 }
 0x9a4   : > { %v8901_v62 = vpop.eup %8900 }
 0x9a5   : > { %v3879_v36 = vpop.xlane.xlu1 %3878  ;;  %v3847_v11 = vmul.f32 0.6931472, %v8901_v62 }
 0x9a6   : > { %4080 = vxpose.xlu1.b32.cont [5/16] (narrow) %v3879_v36, 8  ;;  %v3882_v56 = vpop.xlane.xlu0 %3881 }
 0x9aa   : > { %4081 = vxpose.xlu1.b32.cont [6/16] (narrow) %v3882_v56, 8 }
 0x9ac   : > { %v3888_v12 = vpop.xlane.xlu0 %3887 }
 0x9ad   : > { %v3885_v48 = vpop.xlane.xlu1 %3884 }
 0x9ae   : > { %4082 = vxpose.xlu1.b32.cont [7/16] (narrow) %v3885_v48, 8 }
 0x9b2   : > { %4083 = vxpose.xlu1.b32.cont [8/16] (narrow) %v3888_v12, 8  ;;  %v3848_v12 = vsel %vm2095_vm3, %v3847_v11, -1e+30 }
 0x9b4   : > { %v3894_v18 = vpop.xlane.xlu0 %3893 }
 0x9b5   : > { %v3891_v15 = vpop.xlane.xlu1 %3890 }
 0x9b6   : > { %4084 = vxpose.xlu1.b32.cont [9/16] (narrow) %v3891_v15, 8 }
 0x9ba   : > { %4085 = vxpose.xlu1.b32.cont [10/16] (narrow) %v3894_v18, 8 }
 0x9bc   : > { %v3900_v32 = vpop.xlane.xlu0 %3899 }
 0x9bd   : > { %v3897_v29 = vpop.xlane.xlu1 %3896 }
 0x9be   : > { %4086 = vxpose.xlu1.b32.cont [11/16] (narrow) %v3897_v29, 8 }
 0x9c2   : > { %4087 = vxpose.xlu1.b32.cont [12/16] (narrow) %v3900_v32, 8 }
 0x9c4   : > { %v3906_v33 = vpop.xlane.xlu0 %3905 }
 0x9c5   : > { %v3903_v34 = vpop.xlane.xlu1 %3902 }
 0x9c6   : > { %4088 = vxpose.xlu1.b32.cont [13/16] (narrow) %v3903_v34, 8 }
 0x9ca   : > { %4089 = vxpose.xlu1.b32.cont [14/16] (narrow) %v3906_v33, 8 }
 0x9cc   : > { %v3912_v13 = vpop.xlane.xlu0 %3911 }
 0x9cd   : > { %v3909_v43 = vpop.xlane.xlu1 %3908 }
 0x9ce   : > { %4090 = vxpose.xlu1.b32.cont [15/16] (narrow) %v3909_v43, 8 }
 0x9d2   : > { %4091 = vxpose.xlu1.b32.end [16/16] (narrow) %v3912_v13, 8 }
 0xa16   : > { %v4092_v35 = vpop.trf.xlu1 }
 0xa17   : > { %v10684_v42 = vrot.slane %v4092_v35, %v10113_v28 }
 0xa19   : > { %v4113_v21 = vadd.f32 %v10684_v42, %v10393_v53  ;;  %v4112_v22 = vadd.f32 %v10684_v42, %v10362_v40  ;;  %v4115_v8 = vadd.f32 %v10684_v42, %v10399_v41  ;;  %v4114_v48 = vadd.f32 %v10684_v42, %v10369_v54 }
 0xa1a   : > { %v7960_v24 = vpop.f32.mrb[86].mxu0  ;;  %v4117_v13 = vadd.f32 %v10684_v42, %v10410_v63 }
 0xa1b   : > { %v4123_v49 = vmul.f32 2.0, %v7960_v24  ;;  %v4027_v31 = vpop.f32.mrb[87].mxu0 }
 0xa1c   : > { %v4122_v10 = vmul.f32 2.0, %v4027_v31 }
 0xa1d   : > { %v4133_v38 = vsub.f32 %v4113_v21, %v4123_v49  ;;  %v4116_v21 = vadd.f32 %v10684_v42, %v10378_v19 }
 0xa1e   : > { %v4132_v46 = vsub.f32 %v4112_v22, %v4122_v10  ;;  %v7963_v16 = vpop.f32.mrb[88].mxu0 }
 0xa1f   : > { %v4143_v7 = vmul.f32 -0.5, %v4133_v38  ;;  %v4125_v23 = vmul.f32 2.0, %v7963_v16  ;;  %v4037_v27 = vpop.f32.mrb[89].mxu0  ;;  %v4119_v16 = vadd.f32 %v10684_v42, %v10418_v45 }
 0xa20   : > { %v4142_v44 = vmul.f32 -0.5, %v4132_v46  ;;  %v4124_v14 = vmul.f32 2.0, %v4037_v27 }
 0xa21   : > { %v4153_v36 = vadd.f32 -58.812065, %v4143_v7  ;;  %v4135_v56 = vsub.f32 %v4115_v8, %v4125_v23 }
 0xa22   : > { %v4152_v15 = vadd.f32 -58.812065, %v4142_v44  ;;  %v7966_v18 = vpop.f32.mrb[90].mxu0  ;;  %v4134_v32 = vsub.f32 %v4114_v48, %v4124_v14  ;;  %v4118_v14 = vadd.f32 %v10684_v42, %v10386_v47 }
 0xa23   : > { %v4145_v29 = vmul.f32 -0.5, %v4135_v56  ;;  %v4127_v34 = vmul.f32 2.0, %v7966_v18  ;;  %v4047_v33 = vpop.f32.mrb[91].mxu0  ;;  %v4163_v43 = vadd.f32 %v4153_v36, %v3848_v12 }
 0xa24   : > { %v4126_v6 = vmul.f32 2.0, %v4047_v33  ;;  %v4144_v20 = vmul.f32 -0.5, %v4134_v32  ;;  %v4162_v62 = vadd.f32 %v4152_v15, %v3848_v12 }
 0xa25   : > { %4174 = vmax.xlane.f32.xlu0 %v4163_v43  ;;  %v4155_v37 = vadd.f32 -58.812065, %v4145_v29  ;;  %v4137_v35 = vsub.f32 %v4117_v13, %v4127_v34  ;;  %v4120_v29 = vadd.f32 %v10684_v42, %v10388_v9 }
 0xa26   : > { %v7969_v55 = vpop.f32.mrb[92].mxu0  ;;  %v4136_v49 = vsub.f32 %v4116_v21, %v4126_v6  ;;  %v4154_v22 = vadd.f32 -58.812065, %v4144_v20 }
 0xa27   : > { %v4057_v24 = vpop.f32.mrb[93].mxu0  ;;  %v4147_v10 = vmul.f32 -0.5, %v4137_v35  ;;  %v4129_v38 = vmul.f32 2.0, %v7969_v55  ;;  %v4165_v46 = vadd.f32 %v4155_v37, %v3848_v12  ;;  %v4121_v55 = vadd.f32 %v10684_v42, %v10429_v26 }
 0xa28   : > { %v4146_v7 = vmul.f32 -0.5, %v4136_v49  ;;  %v4128_v27 = vmul.f32 2.0, %v4057_v24  ;;  %v4164_v44 = vadd.f32 %v4154_v22, %v3848_v12 }
 0xa29   : > { %4172 = vmax.xlane.f32.xlu0 %v4162_v62  ;;  %v4157_v8 = vadd.f32 -58.812065, %v4147_v10  ;;  %v4139_v23 = vsub.f32 %v4119_v16, %v4129_v38 }
 0xa2a   : > { %v7972_v31 = vpop.f32.mrb[94].mxu0  ;;  %v4156_v36 = vadd.f32 -58.812065, %v4146_v7  ;;  %v4138_v48 = vsub.f32 %v4118_v14, %v4128_v27 }
 0xa2b   : > { %v4067_v11 = vpop.f32.mrb[95].mxu0  ;;  %v4149_v56 = vmul.f32 -0.5, %v4139_v23  ;;  %v4167_v18 = vadd.f32 %v4157_v8, %v3848_v12  ;;  %v4131_v32 = vmul.f32 2.0, %v7972_v31 }
 0xa2c   : > { %v4130_v15 = vmul.f32 2.0, %v4067_v11  ;;  %v4148_v33 = vmul.f32 -0.5, %v4138_v48  ;;  %v4166_v6 = vadd.f32 %v4156_v36, %v3848_v12 }
 0xa2d   : > { %4178 = vmax.xlane.f32.xlu0 %v4165_v46  ;;  %v4159_v34 = vadd.f32 -58.812065, %v4149_v56  ;;  %v4141_v20 = vsub.f32 %v4121_v55, %v4131_v32 }
 0xa2e   : > { %v4140_v13 = vsub.f32 %v4120_v29, %v4130_v15  ;;  %v4158_v37 = vadd.f32 -58.812065, %v4148_v33 }
 0xa2f   : > { %v4169_v24 = vadd.f32 %v4159_v34, %v3848_v12  ;;  %v4151_v21 = vmul.f32 -0.5, %v4141_v20 }
 0xa30   : > { %v4150_v35 = vmul.f32 -0.5, %v4140_v13  ;;  %v4168_v22 = vadd.f32 %v4158_v37, %v3848_v12 }
 0xa31   : > { %4176 = vmax.xlane.f32.xlu0 %v4164_v44  ;;  %v4161_v10 = vadd.f32 -58.812065, %v4151_v21 }
 0xa32   : > { %v4160_v49 = vadd.f32 -58.812065, %v4150_v35 }
 0xa33   : > { %v4171_v31 = vadd.f32 %v4161_v10, %v3848_v12 }
 0xa34   : > { %v4170_v38 = vadd.f32 %v4160_v49, %v3848_v12 }
 0xa35   : > { %4182 = vmax.xlane.f32.xlu0 %v4167_v18 }
 0xa39   : > { %4180 = vmax.xlane.f32.xlu0 %v4166_v6 }
 0xa3d   : > { %4186 = vmax.xlane.f32.xlu0 %v4169_v24 }
 0xa41   : > { %4184 = vmax.xlane.f32.xlu0 %v4168_v22 }
 0xa45   : > { %4188 = vmax.xlane.f32.xlu0 %v4170_v38 }
 0xa49   : > { %4190 = vmax.xlane.f32.xlu0 %v4171_v31 }
 0xab2   : > { %v4175_v11 = vpop.xlane.xlu0 %4174 }
 0xab3   : > { %v4193_v16 = vsub.f32 %v4163_v43, %v4175_v11 }
 0xab5   : > { %v4204_v7 = vmul.f32 1.442695, %v4193_v16 }
 0xab6   : > { %v4173_v8 = vpop.xlane.xlu0 %4172 }
 0xab7   : > { %8902 = vpow2.f32 %v4204_v7  ;;  %v4192_v42 = vsub.f32 %v4162_v62, %v4173_v8 }
 0xab9   : > { %v4202_v23 = vmul.f32 1.442695, %v4192_v42 }
 0xaba   : > { %v4179_v27 = vpop.xlane.xlu0 %4178 }
 0xabb   : > { %8904 = vpow2.f32 %v4202_v23  ;;  %v4195_v14 = vsub.f32 %v4165_v46, %v4179_v27 }
 0xabd   : > { %v4208_v36 = vmul.f32 1.442695, %v4195_v14 }
 0xabe   : > { %v4177_v56 = vpop.xlane.xlu0 %4176 }
 0xabf   : > { %8906 = vpow2.f32 %v4208_v36  ;;  %v4194_v48 = vsub.f32 %v4164_v44, %v4177_v56 }
 0xac1   : > { %v8903_v15 = vpop.eup %8902  ;;  %v4206_v29 = vmul.f32 1.442695, %v4194_v48 }
 0xac2   : > { %4224 = vadd.xlane.f32.xlu0 %v8903_v15  ;;  %v4183_v32 = vpop.xlane.xlu0 %4182 }
 0xac3   : > { %8908 = vpow2.f32 %v4206_v29  ;;  %v4197_v12 = vsub.f32 %v4167_v18, %v4183_v32 }
 0xac5   : > { %v8905_v34 = vpop.eup %8904  ;;  %v4212_v43 = vmul.f32 1.442695, %v4197_v12 }
 0xac6   : > { %4222 = vadd.xlane.f32.xlu0 %v8905_v34  ;;  %v4181_v33 = vpop.xlane.xlu0 %4180 }
 0xac7   : > { %8910 = vpow2.f32 %v4212_v43  ;;  %v4196_v62 = vsub.f32 %v4166_v6, %v4181_v33 }
 0xac9   : > { %v8907_v13 = vpop.eup %8906  ;;  %v4210_v55 = vmul.f32 1.442695, %v4196_v62 }
 0xaca   : > { %4228 = vadd.xlane.f32.xlu0 %v8907_v13  ;;  %v4187_v46 = vpop.xlane.xlu0 %4186 }
 0xacb   : > { %8912 = vpow2.f32 %v4210_v55  ;;  %v4199_v37 = vsub.f32 %v4169_v24, %v4187_v46 }
 0xacd   : > { %v8909_v20 = vpop.eup %8908  ;;  %v4216_v44 = vmul.f32 1.442695, %v4199_v37 }
 0xace   : > { %4226 = vadd.xlane.f32.xlu0 %v8909_v20  ;;  %v4185_v35 = vpop.xlane.xlu0 %4184 }
 0xacf   : > { %8914 = vpow2.f32 %v4216_v44  ;;  %v4198_v21 = vsub.f32 %v4168_v22, %v4185_v35 }
 0xad1   : > { %v8911_v49 = vpop.eup %8910  ;;  %v4214_v18 = vmul.f32 1.442695, %v4198_v21 }
 0xad2   : > { %4232 = vadd.xlane.f32.xlu0 %v8911_v49  ;;  %v4189_v10 = vpop.xlane.xlu0 %4188 }
 0xad3   : > { %8916 = vpow2.f32 %v4214_v18  ;;  %v4200_v11 = vsub.f32 %v4170_v38, %v4189_v10 }
 0xad5   : > { %v8913_v16 = vpop.eup %8912  ;;  %v4218_v6 = vmul.f32 1.442695, %v4200_v11 }
 0xad6   : > { %4230 = vadd.xlane.f32.xlu0 %v8913_v16  ;;  %v4191_v7 = vpop.xlane.xlu0 %4190 }
 0xad7   : > { %8918 = vpow2.f32 %v4218_v6  ;;  %v4201_v8 = vsub.f32 %v4171_v31, %v4191_v7 }
 0xad9   : > { %v8915_v42 = vpop.eup %8914  ;;  %v4220_v24 = vmul.f32 1.442695, %v4201_v8 }
 0xada   : > { %4236 = vadd.xlane.f32.xlu0 %v8915_v42 }
 0xadb   : > { %8920 = vpow2.f32 %v4220_v24 }
 0xadd   : > { %v8917_v23 = vpop.eup %8916 }
 0xade   : > { %4234 = vadd.xlane.f32.xlu0 %v8917_v23 }
 0xae1   : > { %v8919_v27 = vpop.eup %8918 }
 0xae2   : > { %4238 = vadd.xlane.f32.xlu0 %v8919_v27 }
 0xae5   : > { %v8921_v22 = vpop.eup %8920 }
 0xae6   : > { %4240 = vadd.xlane.f32.xlu0 %v8921_v22 }
 0xb4f   : > { %v4225_v14 = vpop.xlane.xlu0 %4224 }
 0xb53   : > { %v4223_v36 = vpop.xlane.xlu0 %4222 }
 0xb54   : > { %8922 = vrcp.f32 %v4223_v36 }
 0xb55   : > { %8924 = vrcp.f32 %v4225_v14 }
 0xb57   : > { %v4229_v38 = vpop.xlane.xlu0 %4228 }
 0xb5b   : > { %v4227_v56 = vpop.xlane.xlu0 %4226 }
 0xb5c   : > { %8926 = vrcp.f32 %v4227_v56 }
 0xb5d   : > { %8928 = vrcp.f32 %v4229_v38 }
 0xb5e   : > { %v8923_v48 = vpop.eup %8922 }
 0xb5f   : > { %v4252_v31 = vmul.f32 %v8923_v48, %v8905_v34  ;;  %v4233_v29 = vpop.xlane.xlu0 %4232  ;;  %v8925_v32 = vpop.eup %8924 }
 0xb60   : > { %v4253_v12 = vmul.f32 %v8925_v32, %v8903_v15 }
 0xb61   : > { %4290 = vxpose.xlu0.b32.start [1/10] (short) %v4252_v31, 128 }
 0xb62   : > { %v4262_v37 = vadd.f32 %v4253_v12, %v4252_v31 }
 0xb63   : > { %v4231_v43 = vpop.xlane.xlu0 %4230 }
 0xb64   : > { %8930 = vrcp.f32 %v4231_v43 }
 0xb65   : > { %4291 = vxpose.xlu0.b32.cont [2/10] (short) %v4253_v12, 128  ;;  %8932 = vrcp.f32 %v4233_v29 }
 0xb66   : > { %v8927_v33 = vpop.eup %8926 }
 0xb67   : > { %v4254_v62 = vmul.f32 %v8927_v33, %v8909_v20  ;;  %v4237_v55 = vpop.xlane.xlu0 %4236  ;;  %v8929_v46 = vpop.eup %8928 }
 0xb68   : > { %v4255_v44 = vmul.f32 %v8929_v46, %v8907_v13  ;;  %8934 = vrcp.f32 %v4237_v55 }
 0xb69   : > { %4292 = vxpose.xlu0.b32.cont [3/10] (short) %v4254_v62, 128  ;;  %v4263_v21 = vadd.f32 %v4262_v37, %v4254_v62 }
 0xb6b   : > { %v4235_v35 = vpop.xlane.xlu0 %4234  ;;  %v4264_v11 = vadd.f32 %v4263_v21, %v4255_v44 }
 0xb6c   : > { %8936 = vrcp.f32 %v4235_v35 }
 0xb6d   : > { %4293 = vxpose.xlu0.b32.cont [4/10] (short) %v4255_v44, 128 }
 0xb6e   : > { %v8931_v34 = vpop.eup %8930 }
 0xb6f   : > { %v4256_v18 = vmul.f32 %v8931_v34, %v8913_v16  ;;  %v4239_v10 = vpop.xlane.xlu0 %4238  ;;  %v8933_v15 = vpop.eup %8932 }
 0xb70   : > { %8938 = vrcp.f32 %v4239_v10  ;;  %v4257_v6 = vmul.f32 %v8933_v15, %v8911_v49 }
 0xb71   : > { %4294 = vxpose.xlu0.b32.cont [5/10] (short) %v4256_v18, 128  ;;  %v4265_v7 = vadd.f32 %v4264_v11, %v4256_v18 }
 0xb72   : > { %v8935_v8 = vpop.eup %8934 }
 0xb73   : > { %v4241_v20 = vpop.xlane.xlu0 %4240  ;;  %v4266_v13 = vadd.f32 %v4265_v7, %v4257_v6  ;;  %v4259_v36 = vmul.f32 %v8935_v8, %v8915_v42 }
 0xb74   : > { %8940 = vrcp.f32 %v4241_v20 }
 0xb75   : > { %4295 = vxpose.xlu0.b32.cont [6/10] (short) %v4257_v6, 128 }
 0xb76   : > { %v8937_v24 = vpop.eup %8936 }
 0xb77   : > { %v4258_v14 = vmul.f32 %v8937_v24, %v8917_v23 }
 0xb79   : > { %4296 = vxpose.xlu0.b32.cont [7/10] (short) %v4258_v14, 128  ;;  %v4267_v38 = vadd.f32 %v4266_v13, %v4258_v14 }
 0xb7a   : > { %v8939_v56 = vpop.eup %8938 }
 0xb7b   : > { %v4260_v48 = vmul.f32 %v8939_v56, %v8919_v27  ;;  %v4268_v16 = vadd.f32 %v4267_v38, %v4259_v36 }
 0xb7d   : > { %4297 = vxpose.xlu0.b32.cont [8/10] (short) %v4259_v36, 128  ;;  %v4269_v29 = vadd.f32 %v4268_v16, %v4260_v48 }
 0xb7e   : > { %v8941_v31 = vpop.eup %8940 }
 0xb7f   : > { %v4261_v32 = vmul.f32 %v8941_v31, %v8921_v22 }
 0xb81   : > { %4298 = vxpose.xlu0.b32.cont [9/10] (short) %v4260_v48, 128  ;;  %v4270_v49 = vadd.f32 %v4269_v29, %v4261_v32 }
 0xb83   : > { %v4271_v12 = vrot.slane %v4270_v49, 4 }
 0xb85   : > { %4299 = vxpose.xlu0.b32.end [10/10] (short) %v4261_v32, 128  ;;  %v4272_v43 = vadd.f32 %v4271_v12, %v4270_v49 }
 0xb87   : > { %v4273_v33 = vrot.slane %v4272_v43, 2 }
 0xb89   : > { %v4274_v62 = vadd.f32 %v4273_v33, %v4272_v43 }
 0xb8b   : > { %v4275_v55 = vrot.slane %v4274_v62, 1 }
 0xb8d   : > { %v10708_v46 = vadd.f32 %v4275_v55, %v4274_v62 }
 0xb8f   : > { %4515 = vxpose.xlu1.b32.start.end [1/1] (short) %v10708_v46, 128 }
 0xbe1   : > { %v4306_v42 = vpop.trf.xlu0 }
 0xbe2   : > { %7993 = vmatprep.mubr.msk.f32.mxu1 %vm2661_vm4, %v4306_v42 }
 0xbe5   : > { %v4307_v23 = vpop.trf.xlu0 }
 0xbe6   : > { %7994 = vmatmul.mubr.msk.f32.vlgmr.msra.gmra.mrb[62].mxu1 %vm2661_vm4, %v4307_v23 }
 0xbe9   : > { %v4308_v27 = vpop.trf.xlu0 }
 0xbea   : > { %7996 = vmatprep.mubr.msk.f32.mxu1 %vm2661_vm4, %v4308_v27 }
 0xbed   : > { %v4309_v22 = vpop.trf.xlu0 }
 0xbee   : > { %7997 = vmatmul.mubr.msk.f32.gmra.mrb[64].mxu1 %vm2661_vm4, %v4309_v22 }
 0xbf1   : > { %v4310_v37 = vpop.trf.xlu0 }
 0xbf2   : > { %7999 = vmatprep.mubr.msk.f32.mxu1 %vm2661_vm4, %v4310_v37 }
 0xbf5   : > { %v4311_v44 = vpop.trf.xlu0 }
 0xbf6   : > { %8000 = vmatmul.mubr.msk.f32.gmra.mrb[66].mxu1 %vm2661_vm4, %v4311_v44 }
 0xbf9   : > { %v4312_v35 = vpop.trf.xlu0 }
 0xbfa   : > { %8002 = vmatprep.mubr.msk.f32.mxu1 %vm2661_vm4, %v4312_v35 }
 0xbfd   : > { %v4313_v21 = vpop.trf.xlu0 }
 0xbfe   : > { %8003 = vmatmul.mubr.msk.f32.gmra.mrb[68].mxu1 %vm2661_vm4, %v4313_v21 }
 0xc01   : > { %v4314_v34 = vpop.trf.xlu0 }
 0xc02   : > { %8005 = vmatprep.mubr.msk.f32.mxu1 %vm2661_vm4, %v4314_v34 }
 0xc05   : > { %v4315_v18 = vpop.trf.xlu0 }
 0xc06   : > { %8006 = vmatmul.mubr.msk.f32.gmra.mrb[70].mxu1 %vm2661_vm4, %v4315_v18 }
 0xc09   : > { %v4316_v10 = vpop.trf.xlu0 }
 0xc0a   : > { %8008 = vmatprep.mubr.msk.f32.mxu1 %vm2661_vm4, %v4316_v10 }
 0xc0d   : > { %v4317_v15 = vpop.trf.xlu0 }
 0xc0e   : > { %8009 = vmatmul.mubr.msk.f32.gmra.mrb[72].mxu1 %vm2661_vm4, %v4317_v15 }
 0xc0f   : > { %v4531_v11 = vpop.trf.xlu1 }
 0xc10   : > { %v4547_v6 = vadd.f32 1e-10, %v4531_v11 }
 0xc11   : > { %v4318_v7 = vpop.trf.xlu0 }
 0xc12   : > { %8942 = vrcp.f32 %v4547_v6  ;;  %8011 = vmatprep.mubr.msk.f32.mxu1 %vm2661_vm4, %v4318_v7 }
 0xc13   : > { %v4532_v20 = vpop.trf.xlu1 }
 0xc14   : > { %v4548_v8 = vadd.f32 1e-10, %v4532_v20 }
 0xc15   : > { %v4319_v24 = vpop.trf.xlu0 }
 0xc16   : > { %8944 = vrcp.f32 %v4548_v8  ;;  %8012 = vmatmul.mubr.msk.f32.gmra.mrb[74].mxu1 %vm2661_vm4, %v4319_v24 }
 0xc17   : > { %v4533_v13 = vpop.trf.xlu1 }
 0xc18   : > { %v4549_v14 = vadd.f32 1e-10, %v4533_v13 }
 0xc19   : > { %v4320_v36 = vpop.trf.xlu0 }
 0xc1a   : > { %8946 = vrcp.f32 %v4549_v14  ;;  %8014 = vmatprep.mubr.msk.f32.mxu1 %vm2661_vm4, %v4320_v36 }
 0xc1b   : > { %v4534_v38 = vpop.trf.xlu1 }
 0xc1c   : > { %v8943_v56 = vpop.eup %8942  ;;  %v4550_v48 = vadd.f32 1e-10, %v4534_v38 }
 0xc1d   : > { %v4321_v16 = vpop.trf.xlu0  ;;  %4581 = vperm.xlu1 %8679, %v8943_v56  }
 0xc1e   : > { %8948 = vrcp.f32 %v4550_v48  ;;  %8015 = vmatmul.mubr.msk.f32.gmra.mrb[76].mxu1 %vm2661_vm4, %v4321_v16 }
 0xc1f   : > { %8049 = vmatprep.mubr.msk.f32.mxu1 %vm1048_vm0, %v9665_v52  ;;  %v4535_v31 = vpop.trf.xlu1 }
 0xc20   : > { %v8945_v29 = vpop.eup %8944  ;;  %v4551_v32 = vadd.f32 1e-10, %v4535_v31 }
 0xc21   : > { %4586 = vperm.xlu0 %8678, %v8945_v29  }
 0xc22   : > { %8950 = vrcp.f32 %v4551_v32 }
 0xc23   : > { %v4536_v49 = vpop.trf.xlu1 }
 0xc24   : > { %v8947_v12 = vpop.eup %8946  ;;  %v4552_v43 = vadd.f32 1e-10, %v4536_v49 }
 0xc25   : > { %4591 = vperm.xlu1 %8679, %v8947_v12  }
 0xc26   : > { %8952 = vrcp.f32 %v4552_v43  ;;  %v4277_v43 = vsel %vm2615_vm5, %v10708_v46, 0.0 }
 0xc27   : > { %v4537_v33 = vpop.trf.xlu1 }
 0xc28   : > { %v8949_v62 = vpop.eup %8948  ;;  %v4553_v55 = vadd.f32 1e-10, %v4537_v33 }
 0xc29   : > { %4596 = vperm.xlu1 %8679, %v8949_v62  }
 0xc2a   : > { %8954 = vrcp.f32 %v4553_v55 }
 0xc2b   : > { %v4538_v42 = vpop.trf.xlu1 }
 0xc2c   : > { %v8951_v23 = vpop.eup %8950  ;;  %v4554_v27 = vadd.f32 1e-10, %v4538_v42 }
 0xc2d   : > { %4601 = vperm.xlu1 %8679, %v8951_v23  }
 0xc2e   : > { %8956 = vrcp.f32 %v4554_v27 }
 0xc2f   : > { %v4539_v22 = vpop.trf.xlu1 }
 0xc30   : > { %v8953_v37 = vpop.eup %8952  ;;  %v4555_v44 = vadd.f32 1e-10, %v4539_v22 }
 0xc31   : > { %4606 = vperm.xlu1 %8679, %v8953_v37  }
 0xc32   : > { %8958 = vrcp.f32 %v4555_v44 }
 0xc33   : > { %v4540_v35 = vpop.trf.xlu1 }
 0xc34   : > { %v8955_v21 = vpop.eup %8954  ;;  %v4556_v34 = vadd.f32 1e-10, %v4540_v35 }
 0xc35   : > { %4611 = vperm.xlu1 %8679, %v8955_v21  }
 0xc36   : > { %8960 = vrcp.f32 %v4556_v34 }
 0xc37   : > { %v4541_v18 = vpop.trf.xlu1 }
 0xc38   : > { %v8957_v10 = vpop.eup %8956  ;;  %v4557_v15 = vadd.f32 1e-10, %v4541_v18 }
 0xc39   : > { %4616 = vperm.xlu1 %8679, %v8957_v10  }
 0xc3a   : > { %8962 = vrcp.f32 %v4557_v15 }
 0xc3b   : > { %v4542_v11 = vpop.trf.xlu1 }
 0xc3c   : > { %v8959_v6 = vpop.eup %8958  ;;  %v4558_v7 = vadd.f32 1e-10, %v4542_v11 }
 0xc3d   : > { %4621 = vperm.xlu1 %8679, %v8959_v6  }
 0xc3e   : > { %8964 = vrcp.f32 %v4558_v7 }
 0xc3f   : > { %v4543_v20 = vpop.trf.xlu1 }
 0xc40   : > { %v8961_v8 = vpop.eup %8960  ;;  %v4559_v24 = vadd.f32 1e-10, %v4543_v20 }
 0xc41   : > { %4626 = vperm.xlu0 %8678, %v8961_v8  }
 0xc42   : > { %8966 = vrcp.f32 %v4559_v24 }
 0xc43   : > { %v4544_v13 = vpop.trf.xlu1 }
 0xc44   : > { %v8963_v14 = vpop.eup %8962  ;;  %v4560_v36 = vadd.f32 1e-10, %v4544_v13 }
 0xc45   : > { %4631 = vperm.xlu1 %8679, %v8963_v14  }
 0xc46   : > { %8968 = vrcp.f32 %v4560_v36 }
 0xc47   : > { %v4545_v38 = vpop.trf.xlu1 }
 0xc48   : > { %v8965_v56 = vpop.eup %8964  ;;  %v4561_v48 = vadd.f32 1e-10, %v4545_v38 }
 0xc49   : > { %4636 = vperm.xlu0 %8678, %v8965_v56  }
 0xc4a   : > { %8970 = vrcp.f32 %v4561_v48 }
 0xc4b   : > { %v4546_v16 = vpop.trf.xlu1 }
 0xc4c   : > { %v8967_v31 = vpop.eup %8966  ;;  %v4562_v29 = vadd.f32 1e-10, %v4546_v16 }
 0xc4d   : > { %4641 = vperm.xlu1 %8679, %v8967_v31  }
 0xc4e   : > { %8972 = vrcp.f32 %v4562_v29 }
 0xc50   : > { %v8969_v32 = vpop.eup %8968 }
 0xc51   : > { %4646 = vperm.xlu0 %8678, %v8969_v32  }
 0xc54   : > { %v8971_v49 = vpop.eup %8970 }
 0xc55   : > { %4651 = vperm.xlu1 %8679, %v8971_v49  }
 0xc58   : > { %v8973_v12 = vpop.eup %8972 }
 0xc59   : > { %4656 = vperm.xlu0 %8678, %v8973_v12  }
 0xc79   : > { %4278 = vadd.xlane.f32.xlu1 %v4277_v43 }
 0xc9c   : > { %v4582_v33 = vpop.permute.xlu1 %4581 }
 0xca0   : > { %v4587_v55 = vpop.permute.xlu0 %4586 }
 0xca4   : > { %v4592_v62 = vpop.permute.xlu1 %4591 }
 0xca8   : > { %v4597_v42 = vpop.permute.xlu1 %4596 }
 0xcac   : > { %v4602_v18 = vpop.permute.xlu1 %4601 }
 0xcb0   : > { %v4607_v8 = vpop.permute.xlu1 %4606 }
 0xcb4   : > { %v4612_v16 = vpop.permute.xlu1 %4611 }
 0xcb9   : > { %v7995_v23 = vpop.f32.mrb[62].mxu1 }
 0xcba   : > { %v4660_v27 = vmul.f32 %v7995_v23, %v4587_v55  ;;  %v4436_v22 = vpop.f32.mrb[63].mxu1 }
 0xcbb   : > { %v4659_v37 = vmul.f32 %v4582_v33, %v4436_v22  ;;  %v4617_v33 = vpop.permute.xlu1 %4616 }
 0xcbc   : > { %v4680_v44 = vmul.f32 %v4660_v27, %v4660_v27 }
 0xcbd   : > { %v8450_v35 = vpack.c.bf16 %v4660_v27, %v4659_v37  ;;  %v4679_v21 = vmul.f32 %v4659_v37, %v4659_v37 }
 0xcbe   : > { %v4698_v34 = vsel %vm1048_vm0, %v4680_v44, 0.0 }
 0xcbf   : > { %4699 = vadd.xlane.f32.xlu0 %v4698_v34  ;;  %8452 = vmatprep.subr.msk.bf16.mxu1 %vm9989_vm2, %v8450_v35  ;;  %v4695_v6 = vsel %vm1048_vm0, %v4679_v21, 0.0 }
 0xcc0   : > { %8455 = vmatpush3.bf16.xpose.msk.msra.mxu1 %vm9989_vm2, %v8450_v35  ;;  %v4627_v21 = vpop.permute.xlu0 %4626 }
 0xcc1   : > { %v7998_v10 = vpop.f32.mrb[64].mxu1 }
 0xcc2   : > { %v4662_v15 = vmul.f32 %v7998_v10, %v4597_v42  ;;  %v4446_v11 = vpop.f32.mrb[65].mxu1 }
 0xcc3   : > { %v4661_v7 = vmul.f32 %v4592_v62, %v4446_v11  ;;  %4696 = vadd.xlane.f32.xlu0 %v4695_v6 }
 0xcc4   : > { %v4682_v20 = vmul.f32 %v4662_v15, %v4662_v15 }
 0xcc5   : > { %v4681_v24 = vmul.f32 %v4661_v7, %v4661_v7  ;;  %v8456_v13 = vpack.c.bf16 %v4662_v15, %v4661_v7 }
 0xcc6   : > { %v4704_v14 = vsel %vm1048_vm0, %v4682_v20, 0.0 }
 0xcc7   : > { %8458 = vmatprep.subr.msk.bf16.mxu1 %vm9989_vm2, %v8456_v13  ;;  %4705 = vadd.xlane.f32.xlu1 %v4704_v14  ;;  %v4701_v36 = vsel %vm1048_vm0, %v4681_v24, 0.0 }
 0xcc8   : > { %4702 = vadd.xlane.f32.xlu0 %v4701_v36  ;;  %8461 = vmatpush3.bf16.xpose.msk.msra.mxu1 %vm9989_vm2, %v8456_v13  ;;  %v4637_v13 = vpop.permute.xlu0 %4636 }
 0xcc9   : > { %v8001_v38 = vpop.f32.mrb[66].mxu1 }
 0xcca   : > { %v4664_v56 = vmul.f32 %v8001_v38, %v4607_v8  ;;  %v4456_v48 = vpop.f32.mrb[67].mxu1 }
 0xccb   : > { %v4663_v31 = vmul.f32 %v4602_v18, %v4456_v48  ;;  %v4622_v18 = vpop.permute.xlu1 %4621 }
 0xccc   : > { %v4684_v29 = vmul.f32 %v4664_v56, %v4664_v56 }
 0xccd   : > { %v4683_v32 = vmul.f32 %v4663_v31, %v4663_v31  ;;  %v8462_v49 = vpack.c.bf16 %v4664_v56, %v4663_v31 }
 0xcce   : > { %v4710_v12 = vsel %vm1048_vm0, %v4684_v29, 0.0 }
 0xccf   : > { %8464 = vmatprep.subr.msk.bf16.mxu1 %vm9989_vm2, %v8462_v49  ;;  %4711 = vadd.xlane.f32.xlu1 %v4710_v12  ;;  %v4707_v43 = vsel %vm1048_vm0, %v4683_v32, 0.0  ;;  %v4632_v36 = vpop.permute.xlu1 %4631 }
 0xcd0   : > { %4708 = vadd.xlane.f32.xlu0 %v4707_v43  ;;  %8467 = vmatpush3.bf16.xpose.msk.msra.mxu1 %vm9989_vm2, %v8462_v49  ;;  %v4647_v12 = vpop.permute.xlu0 %4646 }
 0xcd1   : > { %v8004_v62 = vpop.f32.mrb[68].mxu1 }
 0xcd2   : > { %v4666_v55 = vmul.f32 %v8004_v62, %v4617_v33  ;;  %v4466_v42 = vpop.f32.mrb[69].mxu1 }
 0xcd3   : > { %v4665_v23 = vmul.f32 %v4612_v16, %v4466_v42  ;;  %v4642_v33 = vpop.permute.xlu1 %4641 }
 0xcd4   : > { %v4686_v27 = vmul.f32 %v4666_v55, %v4666_v55 }
 0xcd5   : > { %v4685_v22 = vmul.f32 %v4665_v23, %v4665_v23  ;;  %v8468_v37 = vpack.c.bf16 %v4666_v55, %v4665_v23 }
 0xcd6   : > { %v4716_v44 = vsel %vm1048_vm0, %v4686_v27, 0.0 }
 0xcd7   : > { %8470 = vmatprep.subr.msk.bf16.mxu1 %vm9989_vm2, %v8468_v37  ;;  %4717 = vadd.xlane.f32.xlu1 %v4716_v44  ;;  %v4713_v35 = vsel %vm1048_vm0, %v4685_v22, 0.0 }
 0xcd8   : > { %4714 = vadd.xlane.f32.xlu0 %v4713_v35  ;;  %8473 = vmatpush3.bf16.xpose.msk.msra.mxu1 %vm9989_vm2, %v8468_v37  ;;  %v4657_v35 = vpop.permute.xlu0 %4656 }
 0xcd9   : > { %v8007_v34 = vpop.f32.mrb[70].mxu1 }
 0xcda   : > { %v4668_v10 = vmul.f32 %v8007_v34, %v4627_v21  ;;  %v4476_v15 = vpop.f32.mrb[71].mxu1  ;;  %v4652_v34 = vpop.permute.xlu1 %4651 }
 0xcdb   : > { %v4667_v11 = vmul.f32 %v4622_v18, %v4476_v15 }
 0xcdc   : > { %v4688_v6 = vmul.f32 %v4668_v10, %v4668_v10 }
 0xcdd   : > { %v4687_v7 = vmul.f32 %v4667_v11, %v4667_v11  ;;  %v8474_v20 = vpack.c.bf16 %v4668_v10, %v4667_v11 }
 0xcde   : > { %v4722_v8 = vsel %vm1048_vm0, %v4688_v6, 0.0 }
 0xcdf   : > { %8476 = vmatprep.subr.msk.bf16.mxu1 %vm9989_vm2, %v8474_v20  ;;  %4723 = vadd.xlane.f32.xlu1 %v4722_v8  ;;  %v4719_v24 = vsel %vm1048_vm0, %v4687_v7, 0.0 }
 0xce0   : > { %8479 = vmatpush3.bf16.xpose.msk.msra.mxu1 %vm9989_vm2, %v8474_v20  ;;  %4720 = vadd.xlane.f32.xlu0 %v4719_v24 }
 0xce1   : > { %v8010_v14 = vpop.f32.mrb[72].mxu1 }
 0xce2   : > { %v4670_v38 = vmul.f32 %v8010_v14, %v4637_v13  ;;  %v4486_v56 = vpop.f32.mrb[73].mxu1 }
 0xce3   : > { %v4669_v48 = vmul.f32 %v4632_v36, %v4486_v56 }
 0xce4   : > { %v4690_v16 = vmul.f32 %v4670_v38, %v4670_v38 }
 0xce5   : > { %v4689_v31 = vmul.f32 %v4669_v48, %v4669_v48  ;;  %v8480_v29 = vpack.c.bf16 %v4670_v38, %v4669_v48 }
 0xce6   : > { %v4728_v32 = vsel %vm1048_vm0, %v4690_v16, 0.0 }
 0xce7   : > { %8482 = vmatprep.subr.msk.bf16.mxu1 %vm9989_vm2, %v8480_v29  ;;  %4729 = vadd.xlane.f32.xlu1 %v4728_v32  ;;  %v4725_v49 = vsel %vm1048_vm0, %v4689_v31, 0.0 }
 0xce8   : > { %8485 = vmatpush3.bf16.xpose.msk.msra.mxu1 %vm9989_vm2, %v8480_v29  ;;  %4726 = vadd.xlane.f32.xlu0 %v4725_v49 }
 0xce9   : > { %v8013_v43 = vpop.f32.mrb[74].mxu1 }
 0xcea   : > { %v4672_v62 = vmul.f32 %v8013_v43, %v4647_v12  ;;  %v4496_v55 = vpop.f32.mrb[75].mxu1 }
 0xceb   : > { %v4671_v42 = vmul.f32 %v4642_v33, %v4496_v55 }
 0xcec   : > { %v4692_v23 = vmul.f32 %v4672_v62, %v4672_v62 }
 0xced   : > { %v4691_v27 = vmul.f32 %v4671_v42, %v4671_v42  ;;  %v8486_v22 = vpack.c.bf16 %v4672_v62, %v4671_v42 }
 0xcee   : > { %v4734_v37 = vsel %vm1048_vm0, %v4692_v23, 0.0 }
 0xcef   : > { %8488 = vmatprep.subr.msk.bf16.mxu1 %vm9989_vm2, %v8486_v22  ;;  %4735 = vadd.xlane.f32.xlu1 %v4734_v37  ;;  %v4731_v44 = vsel %vm1048_vm0, %v4691_v27, 0.0 }
 0xcf0   : > { %8491 = vmatpush3.bf16.xpose.msk.msra.mxu1 %vm9989_vm2, %v8486_v22  ;;  %4732 = vadd.xlane.f32.xlu0 %v4731_v44 }
 0xcf1   : > { %v8016_v21 = vpop.f32.mrb[76].mxu1 }
 0xcf2   : > { %v4674_v18 = vmul.f32 %v8016_v21, %v4657_v35  ;;  %v4506_v10 = vpop.f32.mrb[77].mxu1 }
 0xcf3   : > { %v4673_v15 = vmul.f32 %v4652_v34, %v4506_v10 }
 0xcf4   : > { %v4694_v11 = vmul.f32 %v4674_v18, %v4674_v18 }
 0xcf5   : > { %v4693_v6 = vmul.f32 %v4673_v15, %v4673_v15  ;;  %v8492_v7 = vpack.c.bf16 %v4674_v18, %v4673_v15 }
 0xcf6   : > { %v4740_v20 = vsel %vm1048_vm0, %v4694_v11, 0.0 }
 0xcf7   : > { %8494 = vmatprep.subr.msk.bf16.mxu1 %vm9989_vm2, %v8492_v7  ;;  %4741 = vadd.xlane.f32.xlu1 %v4740_v20  ;;  %v4737_v8 = vsel %vm1048_vm0, %v4693_v6, 0.0 }
 0xcf8   : > { %8497 = vmatpush3.bf16.xpose.msk.msra.mxu1 %vm9989_vm2, %v8492_v7  ;;  %4738 = vadd.xlane.f32.xlu0 %v4737_v8 }
 0xcf9   : > { %8567 = vmatprep.subr.bf16.mxu1 %v9718_v4 }
 0xcff   : > { %8050 = vmatmul.mubr.msk.f32.vlgmr.msra.gmra.mrb[78].mxu1 %vm1048_vm0, %v9668_v57 }
 0xd00   : > { %8052 = vmatprep.mubr.msk.f32.mxu1 %vm1048_vm0, %v9675_v58  ;;  %8569 = vmatpush3.bf16.msra.mxu1 %v9718_v4 }
 0xd01   : > { %8571 = vmatprep.subr.bf16.mxu1 %v9770_v51 }
 0xd03   : > { %8053 = vmatmul.mubr.msk.f32.gmra.mrb[80].mxu1 %vm1048_vm0, %v9678_v59 }
 0xd04   : > { %8055 = vmatprep.mubr.msk.f32.mxu1 %vm1048_vm0, %v9681_v60  ;;  %8573 = vmatpush3.bf16.msra.mxu1 %v9770_v51 }
 0xd05   : > { %8575 = vmatprep.subr.bf16.mxu1 %v9843_v39 }
 0xd06   : > { %v4279_v24 = vpop.xlane.xlu1 %4278 }
 0xd07   : > { %v4280_v13 = vrot.slane %v4279_v24, 4  ;;  %8056 = vmatmul.mubr.msk.f32.gmra.mrb[82].mxu1 %vm1048_vm0, %v9684_v61 }
 0xd08   : > { %8058 = vmatprep.mubr.msk.f32.mxu1 %vm1048_vm0, %v9697_v0  ;;  %8577 = vmatpush3.bf16.msra.mxu1 %v9843_v39 }
 0xd09   : > { %v4281_v4 = vadd.f32 %v4280_v13, %v4279_v24  ;;  %8579 = vmatprep.subr.bf16.mxu1 %v9738_v5 }
 0xd0b   : > { %8059 = vmatmul.mubr.msk.f32.gmra.mrb[84].mxu1 %vm1048_vm0, %v9700_v1  ;;  %v4282_v14 = vrot.slane %v4281_v4, 2 }
 0xd0c   : > { %8061 = vmatprep.mubr.msk.f32.mxu1 %vm1048_vm0, %v9703_v2  ;;  %8581 = vmatpush3.bf16.msra.mxu1 %v9738_v5 }
 0xd0d   : > { %8583 = vmatprep.subr.bf16.mxu1 %v9778_v30  ;;  %v4283_v51 = vadd.f32 %v4282_v14, %v4281_v4 }
 0xd0f   : > { %8062 = vmatmul.mubr.msk.f32.gmra.mrb[86].mxu1 %vm1048_vm0, %v9706_v3  ;;  %v4284_v36 = vrot.slane %v4283_v51, 1 }
 0xd10   : > { %8585 = vmatpush3.bf16.msra.mxu1 %v9778_v30 }
 0xd11   : > { %v4285_v39 = vadd.f32 %v4284_v36, %v4283_v51 }
 0xd13   : > { %8657 = vpush %v4285_v39 }
 0xd44   : > { %s8658_s23 = spop %8657 }
 0xd45   : > { %v4287_v23 = vstv %s8658_s23 }
 0xd46   : > { %8974 = vrcp.f32 %v4287_v23 }
 0xd4c   : > { %v4700_v38 = vpop.xlane.xlu0 %4699 }
 0xd50   : > { %v4697_v56 = vpop.xlane.xlu0 %4696  ;;  %v8975_v27 = vpop.eup %8974 }
 0xd51   : > { %4906 = vxpose.xlu0.b32.start [1/16] (narrow) %v4697_v56, 8  ;;  %v4289_v22 = vmul.f32 %v8975_v27, %v10708_v46 }
 0xd53   : > { %v4675_v37 = vmax.f32 %v4289_v22, 1e-30 }
 0xd54   : > { %v4706_v16 = vpop.xlane.xlu1 %4705 }
 0xd55   : > { %4907 = vxpose.xlu0.b32.cont [2/16] (narrow) %v4700_v38, 8  ;;  %v4703_v48 = vpop.xlane.xlu0 %4702  ;;  %8976 = vlog2.f32 %v4675_v37 }
 0xd59   : > { %4908 = vxpose.xlu0.b32.cont [3/16] (narrow) %v4703_v48, 8 }
 0xd5c   : > { %v4712_v31 = vpop.xlane.xlu1 %4711 }
 0xd5d   : > { %4909 = vxpose.xlu0.b32.cont [4/16] (narrow) %v4706_v16, 8  ;;  %v4709_v5 = vpop.xlane.xlu0 %4708 }
 0xd5f   : > { %v8977_v10 = vpop.eup %8976 }
 0xd60   : > { %v4677_v8 = vmul.f32 0.6931472, %v8977_v10 }
 0xd61   : > { %4910 = vxpose.xlu0.b32.cont [5/16] (narrow) %v4709_v5, 8 }
 0xd62   : > { %v4678_v16 = vsel %vm2095_vm3, %v4677_v8, -1e+30 }
 0xd64   : > { %v4718_v32 = vpop.xlane.xlu1 %4717 }
 0xd65   : > { %4911 = vxpose.xlu0.b32.cont [6/16] (narrow) %v4712_v31, 8  ;;  %v4715_v29 = vpop.xlane.xlu0 %4714 }
 0xd69   : > { %4912 = vxpose.xlu0.b32.cont [7/16] (narrow) %v4715_v29, 8 }
 0xd6c   : > { %v4724_v30 = vpop.xlane.xlu1 %4723 }
 0xd6d   : > { %4913 = vxpose.xlu0.b32.cont [8/16] (narrow) %v4718_v32, 8  ;;  %v4721_v49 = vpop.xlane.xlu0 %4720 }
 0xd71   : > { %4914 = vxpose.xlu0.b32.cont [9/16] (narrow) %v4721_v49, 8 }
 0xd74   : > { %v4730_v43 = vpop.xlane.xlu1 %4729 }
 0xd75   : > { %4915 = vxpose.xlu0.b32.cont [10/16] (narrow) %v4724_v30, 8  ;;  %v4727_v12 = vpop.xlane.xlu0 %4726 }
 0xd79   : > { %4916 = vxpose.xlu0.b32.cont [11/16] (narrow) %v4727_v12, 8 }
 0xd7c   : > { %v4736_v62 = vpop.xlane.xlu1 %4735 }
 0xd7d   : > { %4917 = vxpose.xlu0.b32.cont [12/16] (narrow) %v4730_v43, 8  ;;  %v4733_v33 = vpop.xlane.xlu0 %4732 }
 0xd81   : > { %4918 = vxpose.xlu0.b32.cont [13/16] (narrow) %v4733_v33, 8 }
 0xd84   : > { %v4742_v42 = vpop.xlane.xlu1 %4741 }
 0xd85   : > { %4919 = vxpose.xlu0.b32.cont [14/16] (narrow) %v4736_v62, 8  ;;  %v4739_v55 = vpop.xlane.xlu0 %4738 }
 0xd89   : > { %4920 = vxpose.xlu0.b32.cont [15/16] (narrow) %v4739_v55, 8 }
 0xd8d   : > { %4921 = vxpose.xlu0.b32.end [16/16] (narrow) %v4742_v42, 8 }
 0xdd1   : > { %v4922_v44 = vpop.trf.xlu0 }
 0xdd2   : > { %v10809_v35 = vrot.slane %v4922_v44, %v10113_v28  ;;  %v8051_v21 = vpop.f32.mrb[78].mxu1 }
 0xdd3   : > { %v4953_v34 = vmul.f32 2.0, %v8051_v21  ;;  %v4857_v18 = vpop.f32.mrb[79].mxu1 }
 0xdd4   : > { %v4943_v15 = vadd.f32 %v10809_v35, %v10393_v53  ;;  %v4942_v11 = vadd.f32 %v10809_v35, %v10362_v40  ;;  %v4952_v6 = vmul.f32 2.0, %v4857_v18  ;;  %v4945_v24 = vadd.f32 %v10809_v35, %v10399_v41 }
 0xdd5   : > { %v4944_v56 = vadd.f32 %v10809_v35, %v10369_v54  ;;  %v4947_v12 = vadd.f32 %v10809_v35, %v10410_v63  ;;  %v4946_v22 = vadd.f32 %v10809_v35, %v10378_v19 }
 0xdd6   : > { %v4963_v7 = vsub.f32 %v4943_v15, %v4953_v34  ;;  %v4962_v20 = vsub.f32 %v4942_v11, %v4952_v6  ;;  %v8054_v46 = vpop.f32.mrb[80].mxu1  ;;  %v4949_v11 = vadd.f32 %v10809_v35, %v10418_v45 }
 0xdd7   : > { %v4955_v13 = vmul.f32 2.0, %v8054_v46  ;;  %v4867_v4 = vpop.f32.mrb[81].mxu1 }
 0xdd8   : > { %v4973_v14 = vmul.f32 -0.5, %v4963_v7  ;;  %v4972_v51 = vmul.f32 -0.5, %v4962_v20  ;;  %v4954_v36 = vmul.f32 2.0, %v4867_v4 }
 0xdd9   : > { %v4965_v39 = vsub.f32 %v4945_v24, %v4955_v13  ;;  %v4948_v24 = vadd.f32 %v10809_v35, %v10386_v47 }
 0xdda   : > { %v4983_v38 = vadd.f32 -58.812065, %v4973_v14  ;;  %v8057_v48 = vpop.f32.mrb[82].mxu1  ;;  %v4982_v5 = vadd.f32 -58.812065, %v4972_v51  ;;  %v4964_v32 = vsub.f32 %v4944_v56, %v4954_v36 }
 0xddb   : > { %v4877_v31 = vpop.f32.mrb[83].mxu1  ;;  %v4975_v29 = vmul.f32 -0.5, %v4965_v39  ;;  %v4957_v49 = vmul.f32 2.0, %v8057_v48  ;;  %v4950_v39 = vadd.f32 %v10809_v35, %v10388_v9 }
 0xddc   : > { %v4993_v30 = vadd.f32 %v4983_v38, %v4678_v16  ;;  %v4956_v33 = vmul.f32 2.0, %v4877_v31  ;;  %v4974_v42 = vmul.f32 -0.5, %v4964_v32  ;;  %v4992_v27 = vadd.f32 %v4982_v5, %v4678_v16 }
 0xddd   : > { %v4985_v55 = vadd.f32 -58.812065, %v4975_v29  ;;  %v4967_v23 = vsub.f32 %v4947_v12, %v4957_v49  ;;  %v4951_v29 = vadd.f32 %v10809_v35, %v10429_v26 }
 0xdde   : > { %v8060_v43 = vpop.f32.mrb[84].mxu1  ;;  %5004 = vmax.xlane.f32.xlu1 %v4993_v30  ;;  %v4966_v44 = vsub.f32 %v4946_v22, %v4956_v33  ;;  %v4984_v34 = vadd.f32 -58.812065, %v4974_v42 }
 0xddf   : > { %v4887_v62 = vpop.f32.mrb[85].mxu1  ;;  %v4977_v18 = vmul.f32 -0.5, %v4967_v23  ;;  %v4959_v10 = vmul.f32 2.0, %v8060_v43  ;;  %v4995_v15 = vadd.f32 %v4985_v55, %v4678_v16 }
 0xde0   : > { %v4976_v6 = vmul.f32 -0.5, %v4966_v44  ;;  %v4958_v46 = vmul.f32 2.0, %v4887_v62  ;;  %v4994_v8 = vadd.f32 %v4984_v34, %v4678_v16 }
 0xde1   : > { %v4987_v7 = vadd.f32 -58.812065, %v4977_v18  ;;  %v4969_v20 = vsub.f32 %v4949_v11, %v4959_v10 }
 0xde2   : > { %v8063_v37 = vpop.f32.mrb[86].mxu1  ;;  %5002 = vmax.xlane.f32.xlu1 %v4992_v27  ;;  %v4986_v13 = vadd.f32 -58.812065, %v4976_v6  ;;  %v4968_v14 = vsub.f32 %v4948_v24, %v4958_v46 }
 0xde3   : > { %v4897_v21 = vpop.f32.mrb[87].mxu1  ;;  %v4979_v4 = vmul.f32 -0.5, %v4969_v20  ;;  %v4997_v36 = vadd.f32 %v4987_v7, %v4678_v16  ;;  %v4961_v38 = vmul.f32 2.0, %v8063_v37 }
 0xde4   : > { %v4960_v51 = vmul.f32 2.0, %v4897_v21  ;;  %v4978_v48 = vmul.f32 -0.5, %v4968_v14  ;;  %v4996_v31 = vadd.f32 %v4986_v13, %v4678_v16 }
 0xde5   : > { %v4989_v56 = vadd.f32 -58.812065, %v4979_v4  ;;  %v4971_v49 = vsub.f32 %v4951_v29, %v4961_v38 }
 0xde6   : > { %5008 = vmax.xlane.f32.xlu1 %v4995_v15  ;;  %v4970_v5 = vsub.f32 %v4950_v39, %v4960_v51  ;;  %v4988_v32 = vadd.f32 -58.812065, %v4978_v48 }
 0xde7   : > { %v4999_v43 = vadd.f32 %v4989_v56, %v4678_v16  ;;  %v4981_v33 = vmul.f32 -0.5, %v4971_v49 }
 0xde8   : > { %v4980_v12 = vmul.f32 -0.5, %v4970_v5  ;;  %v4998_v55 = vadd.f32 %v4988_v32, %v4678_v16 }
 0xde9   : > { %v4991_v42 = vadd.f32 -58.812065, %v4981_v33 }
 0xdea   : > { %5006 = vmax.xlane.f32.xlu1 %v4994_v8  ;;  %v4990_v62 = vadd.f32 -58.812065, %v4980_v12 }
 0xdeb   : > { %v5001_v22 = vadd.f32 %v4991_v42, %v4678_v16 }
 0xdec   : > { %v5000_v23 = vadd.f32 %v4990_v62, %v4678_v16 }
 0xdee   : > { %5012 = vmax.xlane.f32.xlu1 %v4997_v36 }
 0xdf2   : > { %5010 = vmax.xlane.f32.xlu1 %v4996_v31 }
 0xdf6   : > { %5016 = vmax.xlane.f32.xlu1 %v4999_v43 }
 0xdfa   : > { %5014 = vmax.xlane.f32.xlu1 %v4998_v55 }
 0xdfe   : > { %5018 = vmax.xlane.f32.xlu1 %v5000_v23 }
 0xe02   : > { %5020 = vmax.xlane.f32.xlu1 %v5001_v22 }
 0xe6b   : > { %v5005_v37 = vpop.xlane.xlu1 %5004 }
 0xe6c   : > { %v5023_v44 = vsub.f32 %v4993_v30, %v5005_v37 }
 0xe6e   : > { %v5034_v21 = vmul.f32 1.442695, %v5023_v44 }
 0xe6f   : > { %v5003_v34 = vpop.xlane.xlu1 %5002 }
 0xe70   : > { %8978 = vpow2.f32 %v5034_v21  ;;  %v5022_v35 = vsub.f32 %v4992_v27, %v5003_v34 }
 0xe72   : > { %v5032_v18 = vmul.f32 1.442695, %v5022_v35 }
 0xe73   : > { %v5009_v10 = vpop.xlane.xlu1 %5008 }
 0xe74   : > { %8980 = vpow2.f32 %v5032_v18  ;;  %v5025_v11 = vsub.f32 %v4995_v15, %v5009_v10 }
 0xe76   : > { %v5038_v6 = vmul.f32 1.442695, %v5025_v11 }
 0xe77   : > { %v5007_v7 = vpop.xlane.xlu1 %5006 }
 0xe78   : > { %8982 = vpow2.f32 %v5038_v6  ;;  %v5024_v20 = vsub.f32 %v4994_v8, %v5007_v7 }
 0xe7a   : > { %v8979_v46 = vpop.eup %8978  ;;  %v5036_v24 = vmul.f32 1.442695, %v5024_v20 }
 0xe7b   : > { %5054 = vadd.xlane.f32.xlu1 %v8979_v46  ;;  %v5013_v13 = vpop.xlane.xlu1 %5012 }
 0xe7c   : > { %8984 = vpow2.f32 %v5036_v24  ;;  %v5027_v16 = vsub.f32 %v4997_v36, %v5013_v13 }
 0xe7e   : > { %v8981_v4 = vpop.eup %8980  ;;  %v5042_v30 = vmul.f32 1.442695, %v5027_v16 }
 0xe7f   : > { %5052 = vadd.xlane.f32.xlu1 %v8981_v4  ;;  %v5011_v14 = vpop.xlane.xlu1 %5010 }
 0xe80   : > { %8986 = vpow2.f32 %v5042_v30  ;;  %v5026_v27 = vsub.f32 %v4996_v31, %v5011_v14 }
 0xe82   : > { %v8983_v51 = vpop.eup %8982  ;;  %v5040_v39 = vmul.f32 1.442695, %v5026_v27 }
 0xe83   : > { %5058 = vadd.xlane.f32.xlu1 %v8983_v51  ;;  %v5017_v15 = vpop.xlane.xlu1 %5016 }
 0xe84   : > { %8988 = vpow2.f32 %v5040_v39  ;;  %v5029_v38 = vsub.f32 %v4999_v43, %v5017_v15 }
 0xe86   : > { %v8985_v56 = vpop.eup %8984  ;;  %v5046_v8 = vmul.f32 1.442695, %v5029_v38 }
 0xe87   : > { %5056 = vadd.xlane.f32.xlu1 %v8985_v56  ;;  %v5015_v48 = vpop.xlane.xlu1 %5014 }
 0xe88   : > { %8990 = vpow2.f32 %v5046_v8  ;;  %v5028_v5 = vsub.f32 %v4998_v55, %v5015_v48 }
 0xe8a   : > { %v8987_v29 = vpop.eup %8986  ;;  %v5044_v36 = vmul.f32 1.442695, %v5028_v5 }
 0xe8b   : > { %5062 = vadd.xlane.f32.xlu1 %v8987_v29  ;;  %v5019_v32 = vpop.xlane.xlu1 %5018 }
 0xe8c   : > { %8992 = vpow2.f32 %v5044_v36  ;;  %v5030_v12 = vsub.f32 %v5000_v23, %v5019_v32 }
 0xe8e   : > { %v8989_v49 = vpop.eup %8988  ;;  %v5048_v43 = vmul.f32 1.442695, %v5030_v12 }
 0xe8f   : > { %5060 = vadd.xlane.f32.xlu1 %v8989_v49  ;;  %v5021_v31 = vpop.xlane.xlu1 %5020 }
 0xe90   : > { %v5031_v33 = vsub.f32 %v5001_v22, %v5021_v31 }
 0xe92   : > { %v8991_v62 = vpop.eup %8990  ;;  %v5050_v42 = vmul.f32 1.442695, %v5031_v33 }
 0xe93   : > { %5066 = vadd.xlane.f32.xlu1 %v8991_v62 }
 0xe94   : > { %8994 = vpow2.f32 %v5050_v42 }
 0xe95   : > { %8996 = vpow2.f32 %v5048_v43 }
 0xe96   : > { %v8993_v37 = vpop.eup %8992 }
 0xe97   : > { %5064 = vadd.xlane.f32.xlu1 %v8993_v37 }
 0xe9e   : > { %v8995_v44 = vpop.eup %8994 }
 0xe9f   : > { %5070 = vadd.xlane.f32.xlu1 %v8995_v44  ;;  %v8997_v55 = vpop.eup %8996 }
 0xea3   : > { %5068 = vadd.xlane.f32.xlu1 %v8997_v55 }
 0xf08   : > { %v5055_v21 = vpop.xlane.xlu1 %5054 }
 0xf0c   : > { %v5053_v34 = vpop.xlane.xlu1 %5052 }
 0xf0d   : > { %8998 = vrcp.f32 %v5053_v34 }
 0xf0e   : > { %9000 = vrcp.f32 %v5055_v21 }
 0xf10   : > { %v5059_v35 = vpop.xlane.xlu1 %5058 }
 0xf14   : > { %v5057_v18 = vpop.xlane.xlu1 %5056 }
 0xf15   : > { %9002 = vrcp.f32 %v5057_v18 }
 0xf16   : > { %9004 = vrcp.f32 %v5059_v35 }
 0xf17   : > { %v8999_v23 = vpop.eup %8998 }
 0xf18   : > { %v5082_v22 = vmul.f32 %v8999_v23, %v8981_v4  ;;  %v5063_v10 = vpop.xlane.xlu1 %5062  ;;  %v9001_v11 = vpop.eup %9000 }
 0xf19   : > { %v5083_v6 = vmul.f32 %v9001_v11, %v8979_v46 }
 0xf1a   : > { %5120 = vxpose.xlu1.b32.start [1/10] (short) %v5082_v22, 128 }
 0xf1b   : > { %v5092_v15 = vadd.f32 %v5083_v6, %v5082_v22 }
 0xf1c   : > { %v5061_v7 = vpop.xlane.xlu1 %5060 }
 0xf1d   : > { %9006 = vrcp.f32 %v5061_v7 }
 0xf1e   : > { %5121 = vxpose.xlu1.b32.cont [2/10] (short) %v5083_v6, 128  ;;  %9008 = vrcp.f32 %v5063_v10 }
 0xf1f   : > { %v9003_v20 = vpop.eup %9002 }
 0xf20   : > { %v5084_v24 = vmul.f32 %v9003_v20, %v8985_v56  ;;  %v5067_v13 = vpop.xlane.xlu1 %5066  ;;  %v9005_v16 = vpop.eup %9004 }
 0xf21   : > { %v5085_v30 = vmul.f32 %v9005_v16, %v8983_v51 }
 0xf22   : > { %5122 = vxpose.xlu1.b32.cont [3/10] (short) %v5084_v24, 128  ;;  %v5093_v46 = vadd.f32 %v5092_v15, %v5084_v24 }
 0xf24   : > { %v5065_v14 = vpop.xlane.xlu1 %5064  ;;  %v5094_v5 = vadd.f32 %v5093_v46, %v5085_v30 }
 0xf25   : > { %9010 = vrcp.f32 %v5065_v14 }
 0xf26   : > { %5123 = vxpose.xlu1.b32.cont [4/10] (short) %v5085_v30, 128  ;;  %9012 = vrcp.f32 %v5067_v13 }
 0xf27   : > { %v9007_v27 = vpop.eup %9006 }
 0xf28   : > { %v5086_v4 = vmul.f32 %v9007_v27, %v8989_v49  ;;  %v9009_v39 = vpop.eup %9008 }
 0xf29   : > { %v5087_v38 = vmul.f32 %v9009_v39, %v8987_v29 }
 0xf2a   : > { %5124 = vxpose.xlu1.b32.cont [5/10] (short) %v5086_v4, 128  ;;  %v5095_v51 = vadd.f32 %v5094_v5, %v5086_v4 }
 0xf2c   : > { %v5071_v8 = vpop.xlane.xlu1 %5070  ;;  %v5096_v12 = vadd.f32 %v5095_v51, %v5087_v38 }
 0xf2d   : > { %9014 = vrcp.f32 %v5071_v8 }
 0xf2e   : > { %5125 = vxpose.xlu1.b32.cont [6/10] (short) %v5087_v38, 128 }
 0xf2f   : > { %v9011_v48 = vpop.eup %9010 }
 0xf30   : > { %v5069_v56 = vpop.xlane.xlu1 %5068  ;;  %v5088_v36 = vmul.f32 %v9011_v48, %v8993_v37  ;;  %v9013_v32 = vpop.eup %9012 }
 0xf31   : > { %9016 = vrcp.f32 %v5069_v56  ;;  %v5089_v31 = vmul.f32 %v9013_v32, %v8991_v62 }
 0xf32   : > { %5126 = vxpose.xlu1.b32.cont [7/10] (short) %v5088_v36, 128  ;;  %v5097_v49 = vadd.f32 %v5096_v12, %v5088_v36 }
 0xf34   : > { %v5098_v21 = vadd.f32 %v5097_v49, %v5089_v31 }
 0xf36   : > { %5127 = vxpose.xlu1.b32.cont [8/10] (short) %v5089_v31, 128 }
 0xf37   : > { %v9015_v33 = vpop.eup %9014 }
 0xf38   : > { %v5091_v34 = vmul.f32 %v9015_v33, %v8995_v44 }
 0xf3b   : > { %v9017_v42 = vpop.eup %9016 }
 0xf3c   : > { %v5090_v43 = vmul.f32 %v9017_v42, %v8997_v55 }
 0xf3e   : > { %5128 = vxpose.xlu1.b32.cont [9/10] (short) %v5090_v43, 128  ;;  %v5099_v29 = vadd.f32 %v5098_v21, %v5090_v43 }
 0xf40   : > { %v5100_v35 = vadd.f32 %v5099_v29, %v5091_v34 }
 0xf42   : > { %5129 = vxpose.xlu1.b32.end [10/10] (short) %v5091_v34, 128  ;;  %v5101_v18 = vrot.slane %v5100_v35, 4 }
 0xf44   : > { %v5102_v23 = vadd.f32 %v5101_v18, %v5100_v35 }
 0xf46   : > { %v5103_v37 = vrot.slane %v5102_v23, 2 }
 0xf48   : > { %v5104_v22 = vadd.f32 %v5103_v37, %v5102_v23 }
 0xf4a   : > { %v5105_v10 = vrot.slane %v5104_v22, 1 }
 0xf4c   : > { %v10833_v11 = vadd.f32 %v5105_v10, %v5104_v22 }
 0xf4e   : > { %5345 = vxpose.xlu0.b32.start.end [1/1] (short) %v10833_v11, 128 }
 0xf9e   : > { %v5136_v62 = vpop.trf.xlu1 }
 0xf9f   : > { %8084 = vmatprep.mubr.msk.f32.mxu0 %vm2661_vm4, %v5136_v62 }
 0xfa2   : > { %v5137_v6 = vpop.trf.xlu1 }
 0xfa3   : > { %8085 = vmatmul.mubr.msk.f32.vlgmr.msra.gmra.mrb[96].mxu0 %vm2661_vm4, %v5137_v6 }
 0xfa6   : > { %v5138_v55 = vpop.trf.xlu1 }
 0xfa7   : > { %8087 = vmatprep.mubr.msk.f32.mxu0 %vm2661_vm4, %v5138_v55 }
 0xfaa   : > { %v5139_v44 = vpop.trf.xlu1 }
 0xfab   : > { %8088 = vmatmul.mubr.msk.f32.gmra.mrb[98].mxu0 %vm2661_vm4, %v5139_v44 }
 0xfae   : > { %v5140_v7 = vpop.trf.xlu1 }
 0xfaf   : > { %8090 = vmatprep.mubr.msk.f32.mxu0 %vm2661_vm4, %v5140_v7 }
 0xfb2   : > { %v5141_v20 = vpop.trf.xlu1 }
 0xfb3   : > { %8091 = vmatmul.mubr.msk.f32.gmra.mrb[100].mxu0 %vm2661_vm4, %v5141_v20 }
 0xfb6   : > { %v5142_v24 = vpop.trf.xlu1 }
 0xfb7   : > { %8093 = vmatprep.mubr.msk.f32.mxu0 %vm2661_vm4, %v5142_v24 }
 0xfba   : > { %v5143_v13 = vpop.trf.xlu1 }
 0xfbb   : > { %8094 = vmatmul.mubr.msk.f32.gmra.mrb[102].mxu0 %vm2661_vm4, %v5143_v13 }
 0xfbe   : > { %v5144_v16 = vpop.trf.xlu1 }
 0xfbf   : > { %8096 = vmatprep.mubr.msk.f32.mxu0 %vm2661_vm4, %v5144_v16 }
 0xfc2   : > { %v5145_v30 = vpop.trf.xlu1 }
 0xfc3   : > { %8097 = vmatmul.mubr.msk.f32.gmra.mrb[104].mxu0 %vm2661_vm4, %v5145_v30 }
 0xfc6   : > { %v5146_v14 = vpop.trf.xlu1 }
 0xfc7   : > { %8099 = vmatprep.mubr.msk.f32.mxu0 %vm2661_vm4, %v5146_v14 }
 0xfca   : > { %v5147_v27 = vpop.trf.xlu1 }
 0xfcb   : > { %8100 = vmatmul.mubr.msk.f32.gmra.mrb[106].mxu0 %vm2661_vm4, %v5147_v27 }
 0xfce   : > { %v5148_v4 = vpop.trf.xlu1  ;;  %v5361_v39 = vpop.trf.xlu0 }
 0xfcf   : > { %v5377_v15 = vadd.f32 1e-10, %v5361_v39  ;;  %8102 = vmatprep.mubr.msk.f32.mxu0 %vm2661_vm4, %v5148_v4 }
 0xfd1   : > { %9018 = vrcp.f32 %v5377_v15 }
 0xfd2   : > { %v5149_v46 = vpop.trf.xlu1  ;;  %v5362_v38 = vpop.trf.xlu0 }
 0xfd3   : > { %v5378_v8 = vadd.f32 1e-10, %v5362_v38  ;;  %8103 = vmatmul.mubr.msk.f32.gmra.mrb[108].mxu0 %vm2661_vm4, %v5149_v46 }
 0xfd5   : > { %9020 = vrcp.f32 %v5378_v8 }
 0xfd6   : > { %v5150_v48 = vpop.trf.xlu1  ;;  %v5363_v5 = vpop.trf.xlu0 }
 0xfd7   : > { %v5379_v56 = vadd.f32 1e-10, %v5363_v5  ;;  %8105 = vmatprep.mubr.msk.f32.mxu0 %vm2661_vm4, %v5150_v48 }
 0xfd9   : > { %9022 = vrcp.f32 %v5379_v56 }
 0xfda   : > { %v5151_v36 = vpop.trf.xlu1  ;;  %v5364_v32 = vpop.trf.xlu0 }
 0xfdb   : > { %v9019_v51 = vpop.eup %9018  ;;  %v5380_v31 = vadd.f32 1e-10, %v5364_v32  ;;  %8106 = vmatmul.mubr.msk.f32.gmra.mrb[110].mxu0 %vm2661_vm4, %v5151_v36 }
 0xfdc   : > { %8140 = vmatprep.mubr.msk.f32.mxu0 %vm1048_vm0, %v9665_v52  ;;  %5411 = vperm.xlu0 %8678, %v9019_v51  }
 0xfdd   : > { %9024 = vrcp.f32 %v5380_v31 }
 0xfde   : > { %v5365_v12 = vpop.trf.xlu0 }
 0xfdf   : > { %v9021_v49 = vpop.eup %9020  ;;  %v5381_v33 = vadd.f32 1e-10, %v5365_v12  ;;  %v5107_v12 = vsel %vm2615_vm5, %v10833_v11, 0.0 }
 0xfe0   : > { %5416 = vperm.xlu1 %8679, %v9021_v49  }
 0xfe1   : > { %9026 = vrcp.f32 %v5381_v33 }
 0xfe2   : > { %v5366_v42 = vpop.trf.xlu0 }
 0xfe3   : > { %v9023_v43 = vpop.eup %9022  ;;  %v5382_v21 = vadd.f32 1e-10, %v5366_v42 }
 0xfe4   : > { %5421 = vperm.xlu0 %8678, %v9023_v43  }
 0xfe5   : > { %9028 = vrcp.f32 %v5382_v21 }
 0xfe6   : > { %v5367_v29 = vpop.trf.xlu0 }
 0xfe7   : > { %v9025_v34 = vpop.eup %9024  ;;  %v5383_v35 = vadd.f32 1e-10, %v5367_v29 }
 0xfe8   : > { %5426 = vperm.xlu0 %8678, %v9025_v34  }
 0xfe9   : > { %9030 = vrcp.f32 %v5383_v35 }
 0xfea   : > { %v5368_v18 = vpop.trf.xlu0 }
 0xfeb   : > { %v9027_v23 = vpop.eup %9026  ;;  %v5384_v37 = vadd.f32 1e-10, %v5368_v18 }
 0xfec   : > { %5431 = vperm.xlu0 %8678, %v9027_v23  }
 0xfed   : > { %9032 = vrcp.f32 %v5384_v37 }
 0xfee   : > { %v5369_v22 = vpop.trf.xlu0 }
 0xfef   : > { %v9029_v10 = vpop.eup %9028  ;;  %v5385_v62 = vadd.f32 1e-10, %v5369_v22 }
 0xff0   : > { %5436 = vperm.xlu1 %8679, %v9029_v10  }
 0xff1   : > { %9034 = vrcp.f32 %v5385_v62 }
 0xff2   : > { %v5370_v6 = vpop.trf.xlu0 }
 0xff3   : > { %v9031_v55 = vpop.eup %9030  ;;  %v5386_v44 = vadd.f32 1e-10, %v5370_v6 }
 0xff4   : > { %5441 = vperm.xlu0 %8678, %v9031_v55  }
 0xff5   : > { %9036 = vrcp.f32 %v5386_v44 }
 0xff6   : > { %v5371_v7 = vpop.trf.xlu0 }
 0xff7   : > { %v9033_v20 = vpop.eup %9032  ;;  %v5387_v24 = vadd.f32 1e-10, %v5371_v7 }
 0xff8   : > { %5446 = vperm.xlu1 %8679, %v9033_v20  }
 0xff9   : > { %9038 = vrcp.f32 %v5387_v24 }
 0xffa   : > { %v5372_v13 = vpop.trf.xlu0 }
 0xffb   : > { %v9035_v16 = vpop.eup %9034  ;;  %v5388_v30 = vadd.f32 1e-10, %v5372_v13 }
 0xffc   : > { %5451 = vperm.xlu0 %8678, %v9035_v16  }
 0xffd   : > { %9040 = vrcp.f32 %v5388_v30 }
 0xffe   : > { %v5373_v14 = vpop.trf.xlu0 }
 0xfff   : > { %v9037_v27 = vpop.eup %9036  ;;  %v5389_v4 = vadd.f32 1e-10, %v5373_v14 }
0x1000   : > { %5456 = vperm.xlu1 %8679, %v9037_v27  }
0x1001   : > { %9042 = vrcp.f32 %v5389_v4 }
0x1002   : > { %v5374_v39 = vpop.trf.xlu0 }
0x1003   : > { %v9039_v15 = vpop.eup %9038  ;;  %v5390_v46 = vadd.f32 1e-10, %v5374_v39 }
0x1004   : > { %5461 = vperm.xlu0 %8678, %v9039_v15  }
0x1005   : > { %9044 = vrcp.f32 %v5390_v46 }
0x1006   : > { %v5375_v38 = vpop.trf.xlu0 }
0x1007   : > { %v9041_v8 = vpop.eup %9040  ;;  %v5391_v48 = vadd.f32 1e-10, %v5375_v38 }
0x1008   : > { %5466 = vperm.xlu1 %8679, %v9041_v8  }
0x1009   : > { %9046 = vrcp.f32 %v5391_v48 }
0x100a   : > { %v5376_v5 = vpop.trf.xlu0 }
0x100b   : > { %v9043_v56 = vpop.eup %9042  ;;  %v5392_v36 = vadd.f32 1e-10, %v5376_v5 }
0x100c   : > { %5471 = vperm.xlu0 %8678, %v9043_v56  }
0x100d   : > { %9048 = vrcp.f32 %v5392_v36 }
0x100f   : > { %v9045_v32 = vpop.eup %9044 }
0x1010   : > { %5476 = vperm.xlu1 %8679, %v9045_v32  }
0x1013   : > { %v9047_v51 = vpop.eup %9046 }
0x1014   : > { %5481 = vperm.xlu0 %8678, %v9047_v51  }
0x1017   : > { %v9049_v31 = vpop.eup %9048 }
0x1018   : > { %5486 = vperm.xlu1 %8679, %v9049_v31  }
0x1033   : > { %5108 = vadd.xlane.f32.xlu0 %v5107_v12 }
0x105b   : > { %v5412_v49 = vpop.permute.xlu0 %5411 }
0x105f   : > { %v5417_v33 = vpop.permute.xlu1 %5416 }
0x1063   : > { %v5422_v29 = vpop.permute.xlu0 %5421 }
0x1067   : > { %v5427_v10 = vpop.permute.xlu0 %5426 }
0x106b   : > { %v5432_v14 = vpop.permute.xlu0 %5431 }
0x106f   : > { %v5437_v16 = vpop.permute.xlu1 %5436 }
0x1073   : > { %v5442_v32 = vpop.permute.xlu0 %5441 }
0x1076   : > { %v8086_v42 = vpop.f32.mrb[96].mxu0 }
0x1077   : > { %v5490_v43 = vmul.f32 %v8086_v42, %v5417_v33  ;;  %v5266_v21 = vpop.f32.mrb[97].mxu0  ;;  %v5447_v56 = vpop.permute.xlu1 %5446 }
0x1078   : > { %v5489_v34 = vmul.f32 %v5412_v49, %v5266_v21 }
0x1079   : > { %v5510_v35 = vmul.f32 %v5490_v43, %v5490_v43 }
0x107a   : > { %v5509_v18 = vmul.f32 %v5489_v34, %v5489_v34  ;;  %v8518_v23 = vpack.c.bf16 %v5490_v43, %v5489_v34 }
0x107b   : > { %v5528_v37 = vsel %vm1048_vm0, %v5510_v35, 0.0  ;;  %v5452_v35 = vpop.permute.xlu0 %5451 }
0x107c   : > { %8520 = vmatprep.subr.msk.bf16.mxu0 %vm9989_vm2, %v8518_v23  ;;  %5529 = vadd.xlane.f32.xlu0 %v5528_v37  ;;  %v5525_v22 = vsel %vm1048_vm0, %v5509_v18, 0.0 }
0x107d   : > { %8523 = vmatpush3.bf16.xpose.msk.msra.mxu0 %vm9989_vm2, %v8518_v23  ;;  %5526 = vadd.xlane.f32.xlu1 %v5525_v22 }
0x107e   : > { %v8089_v62 = vpop.f32.mrb[98].mxu0 }
0x107f   : > { %v5492_v6 = vmul.f32 %v8089_v62, %v5427_v10  ;;  %v5276_v55 = vpop.f32.mrb[99].mxu0 }
0x1080   : > { %v5491_v44 = vmul.f32 %v5422_v29, %v5276_v55  ;;  %v5457_v29 = vpop.permute.xlu1 %5456 }
0x1081   : > { %v5512_v24 = vmul.f32 %v5492_v6, %v5492_v6 }
0x1082   : > { %v5511_v7 = vmul.f32 %v5491_v44, %v5491_v44  ;;  %v8524_v20 = vpack.c.bf16 %v5492_v6, %v5491_v44 }
0x1083   : > { %v5534_v15 = vsel %vm1048_vm0, %v5512_v24, 0.0 }
0x1084   : > { %8526 = vmatprep.subr.msk.bf16.mxu0 %vm9989_vm2, %v8524_v20  ;;  %v5531_v13 = vsel %vm1048_vm0, %v5511_v7, 0.0 }
0x1085   : > { %8529 = vmatpush3.bf16.xpose.msk.msra.mxu0 %vm9989_vm2, %v8524_v20  ;;  %5532 = vadd.xlane.f32.xlu0 %v5531_v13  ;;  %v5462_v20 = vpop.permute.xlu0 %5461 }
0x1086   : > { %v8092_v30 = vpop.f32.mrb[100].mxu0 }
0x1087   : > { %v5494_v27 = vmul.f32 %v8092_v30, %v5437_v16  ;;  %v5286_v4 = vpop.f32.mrb[101].mxu0  ;;  %v5467_v44 = vpop.permute.xlu1 %5466 }
0x1088   : > { %v5493_v39 = vmul.f32 %v5432_v14, %v5286_v4 }
0x1089   : > { %v5514_v46 = vmul.f32 %v5494_v27, %v5494_v27  ;;  %5535 = vadd.xlane.f32.xlu0 %v5534_v15 }
0x108a   : > { %v5513_v38 = vmul.f32 %v5493_v39, %v5493_v39  ;;  %v8530_v8 = vpack.c.bf16 %v5494_v27, %v5493_v39 }
0x108b   : > { %v5540_v48 = vsel %vm1048_vm0, %v5514_v46, 0.0 }
0x108c   : > { %8532 = vmatprep.subr.msk.bf16.mxu0 %vm9989_vm2, %v8530_v8  ;;  %v5537_v5 = vsel %vm1048_vm0, %v5513_v38, 0.0  ;;  %v5472_v38 = vpop.permute.xlu0 %5471 }
0x108d   : > { %8535 = vmatpush3.bf16.xpose.msk.msra.mxu0 %vm9989_vm2, %v8530_v8  ;;  %5538 = vadd.xlane.f32.xlu1 %v5537_v5 }
0x108e   : > { %5541 = vadd.xlane.f32.xlu0 %v5540_v48  ;;  %v8095_v36 = vpop.f32.mrb[102].mxu0 }
0x108f   : > { %v5496_v51 = vmul.f32 %v8095_v36, %v5447_v56  ;;  %v5296_v31 = vpop.f32.mrb[103].mxu0  ;;  %v5477_v15 = vpop.permute.xlu1 %5476 }
0x1090   : > { %v5495_v12 = vmul.f32 %v5442_v32, %v5296_v31 }
0x1091   : > { %v5516_v49 = vmul.f32 %v5496_v51, %v5496_v51 }
0x1092   : > { %v5515_v33 = vmul.f32 %v5495_v12, %v5495_v12  ;;  %v8536_v42 = vpack.c.bf16 %v5496_v51, %v5495_v12 }
0x1093   : > { %v5546_v43 = vsel %vm1048_vm0, %v5516_v49, 0.0 }
0x1094   : > { %8538 = vmatprep.subr.msk.bf16.mxu0 %vm9989_vm2, %v8536_v42  ;;  %5547 = vadd.xlane.f32.xlu0 %v5546_v43  ;;  %v5543_v21 = vsel %vm1048_vm0, %v5515_v33, 0.0  ;;  %v5482_v33 = vpop.permute.xlu0 %5481 }
0x1095   : > { %8541 = vmatpush3.bf16.xpose.msk.msra.mxu0 %vm9989_vm2, %v8536_v42  ;;  %5544 = vadd.xlane.f32.xlu1 %v5543_v21 }
0x1096   : > { %v8098_v34 = vpop.f32.mrb[104].mxu0 }
0x1097   : > { %v5498_v18 = vmul.f32 %v8098_v34, %v5457_v29  ;;  %v5306_v23 = vpop.f32.mrb[105].mxu0  ;;  %v5487_v12 = vpop.permute.xlu1 %5486 }
0x1098   : > { %v5497_v37 = vmul.f32 %v5452_v35, %v5306_v23 }
0x1099   : > { %v5518_v22 = vmul.f32 %v5498_v18, %v5498_v18 }
0x109a   : > { %v5517_v10 = vmul.f32 %v5497_v37, %v5497_v37  ;;  %v8542_v62 = vpack.c.bf16 %v5498_v18, %v5497_v37 }
0x109b   : > { %v5552_v6 = vsel %vm1048_vm0, %v5518_v22, 0.0 }
0x109c   : > { %8544 = vmatprep.subr.msk.bf16.mxu0 %vm9989_vm2, %v8542_v62  ;;  %5553 = vadd.xlane.f32.xlu0 %v5552_v6  ;;  %v5549_v55 = vsel %vm1048_vm0, %v5517_v10, 0.0 }
0x109d   : > { %8547 = vmatpush3.bf16.xpose.msk.msra.mxu0 %vm9989_vm2, %v8542_v62  ;;  %5550 = vadd.xlane.f32.xlu1 %v5549_v55 }
0x109e   : > { %v8101_v7 = vpop.f32.mrb[106].mxu0 }
0x109f   : > { %v5500_v24 = vmul.f32 %v8101_v7, %v5467_v44  ;;  %v5316_v13 = vpop.f32.mrb[107].mxu0 }
0x10a0   : > { %v5499_v16 = vmul.f32 %v5462_v20, %v5316_v13 }
0x10a1   : > { %v5520_v30 = vmul.f32 %v5500_v24, %v5500_v24 }
0x10a2   : > { %v5519_v14 = vmul.f32 %v5499_v16, %v5499_v16  ;;  %v8548_v27 = vpack.c.bf16 %v5500_v24, %v5499_v16 }
0x10a3   : > { %v5558_v4 = vsel %vm1048_vm0, %v5520_v30, 0.0 }
0x10a4   : > { %8550 = vmatprep.subr.msk.bf16.mxu0 %vm9989_vm2, %v8548_v27  ;;  %5559 = vadd.xlane.f32.xlu0 %v5558_v4  ;;  %v5555_v39 = vsel %vm1048_vm0, %v5519_v14, 0.0 }
0x10a5   : > { %8553 = vmatpush3.bf16.xpose.msk.msra.mxu0 %vm9989_vm2, %v8548_v27  ;;  %5556 = vadd.xlane.f32.xlu1 %v5555_v39 }
0x10a6   : > { %v8104_v46 = vpop.f32.mrb[108].mxu0 }
0x10a7   : > { %v5502_v8 = vmul.f32 %v8104_v46, %v5477_v15  ;;  %v5326_v48 = vpop.f32.mrb[109].mxu0 }
0x10a8   : > { %v5501_v5 = vmul.f32 %v5472_v38, %v5326_v48 }
0x10a9   : > { %v5522_v56 = vmul.f32 %v5502_v8, %v5502_v8 }
0x10aa   : > { %v5521_v36 = vmul.f32 %v5501_v5, %v5501_v5  ;;  %v8554_v32 = vpack.c.bf16 %v5502_v8, %v5501_v5 }
0x10ab   : > { %v5564_v51 = vsel %vm1048_vm0, %v5522_v56, 0.0 }
0x10ac   : > { %8556 = vmatprep.subr.msk.bf16.mxu0 %vm9989_vm2, %v8554_v32  ;;  %5565 = vadd.xlane.f32.xlu0 %v5564_v51  ;;  %v5561_v31 = vsel %vm1048_vm0, %v5521_v36, 0.0 }
0x10ad   : > { %8559 = vmatpush3.bf16.xpose.msk.msra.mxu0 %vm9989_vm2, %v8554_v32  ;;  %5562 = vadd.xlane.f32.xlu1 %v5561_v31 }
0x10ae   : > { %v8107_v49 = vpop.f32.mrb[110].mxu0 }
0x10af   : > { %v5504_v42 = vmul.f32 %v8107_v49, %v5487_v12  ;;  %v5336_v43 = vpop.f32.mrb[111].mxu0 }
0x10b0   : > { %v5503_v21 = vmul.f32 %v5482_v33, %v5336_v43 }
0x10b1   : > { %v5524_v29 = vmul.f32 %v5504_v42, %v5504_v42 }
0x10b2   : > { %v5523_v34 = vmul.f32 %v5503_v21, %v5503_v21  ;;  %v8560_v35 = vpack.c.bf16 %v5504_v42, %v5503_v21 }
0x10b3   : > { %v5570_v18 = vsel %vm1048_vm0, %v5524_v29, 0.0 }
0x10b4   : > { %8562 = vmatprep.subr.msk.bf16.mxu0 %vm9989_vm2, %v8560_v35  ;;  %5571 = vadd.xlane.f32.xlu0 %v5570_v18  ;;  %v5567_v23 = vsel %vm1048_vm0, %v5523_v34, 0.0 }
0x10b5   : > { %8565 = vmatpush3.bf16.xpose.msk.msra.mxu0 %vm9989_vm2, %v8560_v35  ;;  %5568 = vadd.xlane.f32.xlu1 %v5567_v23 }
0x10bc   : > { %8141 = vmatmul.mubr.msk.f32.vlgmr.msra.gmra.mrb[112].mxu0 %vm1048_vm0, %v9668_v57 }
0x10bd   : > { %8143 = vmatprep.mubr.msk.f32.mxu0 %vm1048_vm0, %v9675_v58 }
0x10c0   : > { %8144 = vmatmul.mubr.msk.f32.gmra.mrb[114].mxu0 %vm1048_vm0, %v9678_v59  ;;  %v5109_v37 = vpop.xlane.xlu0 %5108 }
0x10c1   : > { %v5110_v22 = vrot.slane %v5109_v37, 4  ;;  %8146 = vmatprep.mubr.msk.f32.mxu0 %vm1048_vm0, %v9681_v60 }
0x10c3   : > { %v5111_v10 = vadd.f32 %v5110_v22, %v5109_v37 }
0x10c4   : > { %8147 = vmatmul.mubr.msk.f32.gmra.mrb[116].mxu0 %vm1048_vm0, %v9684_v61 }
0x10c5   : > { %8149 = vmatprep.mubr.msk.f32.mxu0 %vm1048_vm0, %v9697_v0  ;;  %v5112_v62 = vrot.slane %v5111_v10, 2 }
0x10c7   : > { %v5113_v6 = vadd.f32 %v5112_v62, %v5111_v10 }
0x10c8   : > { %8150 = vmatmul.mubr.msk.f32.gmra.mrb[118].mxu0 %vm1048_vm0, %v9700_v1 }
0x10c9   : > { %8152 = vmatprep.mubr.msk.f32.mxu0 %vm1048_vm0, %v9703_v2  ;;  %v5114_v55 = vrot.slane %v5113_v6, 1 }
0x10cb   : > { %v5115_v44 = vadd.f32 %v5114_v55, %v5113_v6 }
0x10cc   : > { %8153 = vmatmul.mubr.msk.f32.gmra.mrb[120].mxu0 %vm1048_vm0, %v9706_v3 }
0x10cd   : > { %8659 = vpush %v5115_v44 }
0x10fe   : > { %s8660_s27 = spop %8659 }
0x10ff   : > { %v5117_v56 = vstv %s8660_s27 }
0x1100   : > { %9050 = vrcp.f32 %v5117_v56 }
0x1109   : > { %v5530_v20 = vpop.xlane.xlu0 %5529 }
0x110a   : > { %v5527_v7 = vpop.xlane.xlu1 %5526  ;;  %v9051_v36 = vpop.eup %9050 }
0x110b   : > { %5736 = vxpose.xlu1.b32.start [1/16] (narrow) %v5527_v7, 8  ;;  %v5119_v32 = vmul.f32 %v9051_v36, %v10833_v11 }
0x110d   : > { %v5505_v51 = vmax.f32 %v5119_v32, 1e-30 }
0x110f   : > { %5737 = vxpose.xlu1.b32.cont [2/16] (narrow) %v5530_v20, 8  ;;  %9052 = vlog2.f32 %v5505_v51 }
0x1112   : > { %v5533_v24 = vpop.xlane.xlu0 %5532 }
0x1113   : > { %5738 = vxpose.xlu1.b32.cont [3/16] (narrow) %v5533_v24, 8 }
0x1116   : > { %v5536_v13 = vpop.xlane.xlu0 %5535 }
0x1117   : > { %5739 = vxpose.xlu1.b32.cont [4/16] (narrow) %v5536_v13, 8 }
0x1119   : > { %v9053_v33 = vpop.eup %9052 }
0x111a   : > { %v5539_v16 = vpop.xlane.xlu1 %5538  ;;  %v5507_v18 = vmul.f32 0.6931472, %v9053_v33 }
0x111b   : > { %5740 = vxpose.xlu1.b32.cont [5/16] (narrow) %v5539_v16, 8  ;;  %v5542_v30 = vpop.xlane.xlu0 %5541 }
0x111c   : > { %v5508_v24 = vsel %vm2095_vm3, %v5507_v18, -1e+30 }
0x111f   : > { %5741 = vxpose.xlu1.b32.cont [6/16] (narrow) %v5542_v30, 8 }
0x1121   : > { %v5548_v27 = vpop.xlane.xlu0 %5547 }
0x1122   : > { %v5545_v14 = vpop.xlane.xlu1 %5544 }
0x1123   : > { %5742 = vxpose.xlu1.b32.cont [7/16] (narrow) %v5545_v14, 8 }
0x1127   : > { %5743 = vxpose.xlu1.b32.cont [8/16] (narrow) %v5548_v27, 8 }
0x1129   : > { %v5554_v39 = vpop.xlane.xlu0 %5553 }
0x112a   : > { %v5551_v4 = vpop.xlane.xlu1 %5550 }
0x112b   : > { %5744 = vxpose.xlu1.b32.cont [9/16] (narrow) %v5551_v4, 8 }
0x112f   : > { %5745 = vxpose.xlu1.b32.cont [10/16] (narrow) %v5554_v39, 8 }
0x1131   : > { %v5560_v46 = vpop.xlane.xlu0 %5559 }
0x1132   : > { %v5557_v15 = vpop.xlane.xlu1 %5556 }
0x1133   : > { %5746 = vxpose.xlu1.b32.cont [11/16] (narrow) %v5557_v15, 8 }
0x1137   : > { %5747 = vxpose.xlu1.b32.cont [12/16] (narrow) %v5560_v46, 8 }
0x1139   : > { %v5566_v8 = vpop.xlane.xlu0 %5565 }
0x113a   : > { %v5563_v38 = vpop.xlane.xlu1 %5562 }
0x113b   : > { %5748 = vxpose.xlu1.b32.cont [13/16] (narrow) %v5563_v38, 8 }
0x113f   : > { %5749 = vxpose.xlu1.b32.cont [14/16] (narrow) %v5566_v8, 8 }
0x1141   : > { %v5572_v5 = vpop.xlane.xlu0 %5571 }
0x1142   : > { %v5569_v48 = vpop.xlane.xlu1 %5568 }
0x1143   : > { %5750 = vxpose.xlu1.b32.cont [15/16] (narrow) %v5569_v48, 8 }
0x1147   : > { %5751 = vxpose.xlu1.b32.end [16/16] (narrow) %v5572_v5, 8 }
0x118b   : > { %v5752_v31 = vpop.trf.xlu1 }
0x118c   : > { %v10924_v12 = vrot.slane %v5752_v31, %v10113_v28 }
0x118e   : > { %v5773_v42 = vadd.f32 %v10924_v12, %v10393_v53  ;;  %v5772_v29 = vadd.f32 %v10924_v12, %v10362_v40  ;;  %v5775_v22 = vadd.f32 %v10924_v12, %v10399_v41  ;;  %v5774_v20 = vadd.f32 %v10924_v12, %v10369_v54 }
0x118f   : > { %v8142_v49 = vpop.f32.mrb[112].mxu0  ;;  %v5777_v15 = vadd.f32 %v10924_v12, %v10410_v63  ;;  %v5776_v32 = vadd.f32 %v10924_v12, %v10378_v19 }
0x1190   : > { %v5783_v43 = vmul.f32 2.0, %v8142_v49  ;;  %v5687_v21 = vpop.f32.mrb[113].mxu0 }
0x1191   : > { %v5782_v34 = vmul.f32 2.0, %v5687_v21 }
0x1192   : > { %v5793_v35 = vsub.f32 %v5773_v42, %v5783_v43 }
0x1193   : > { %v5792_v11 = vsub.f32 %v5772_v29, %v5782_v34  ;;  %v8145_v23 = vpop.f32.mrb[114].mxu0  ;;  %v5779_v29 = vadd.f32 %v10924_v12, %v10418_v45 }
0x1194   : > { %v5803_v37 = vmul.f32 -0.5, %v5793_v35  ;;  %v5785_v10 = vmul.f32 2.0, %v8145_v23  ;;  %v5697_v62 = vpop.f32.mrb[115].mxu0 }
0x1195   : > { %v5802_v6 = vmul.f32 -0.5, %v5792_v11  ;;  %v5784_v55 = vmul.f32 2.0, %v5697_v62 }
0x1196   : > { %v5813_v44 = vadd.f32 -58.812065, %v5803_v37  ;;  %v5795_v7 = vsub.f32 %v5775_v22, %v5785_v10  ;;  %v5778_v37 = vadd.f32 %v10924_v12, %v10386_v47 }
0x1197   : > { %v5812_v13 = vadd.f32 -58.812065, %v5802_v6  ;;  %v8148_v16 = vpop.f32.mrb[116].mxu0  ;;  %v5794_v14 = vsub.f32 %v5774_v20, %v5784_v55 }
0x1198   : > { %v5805_v30 = vmul.f32 -0.5, %v5795_v7  ;;  %v5787_v27 = vmul.f32 2.0, %v8148_v16  ;;  %v5707_v4 = vpop.f32.mrb[117].mxu0  ;;  %v5823_v39 = vadd.f32 %v5813_v44, %v5508_v24  ;;  %v5780_v44 = vadd.f32 %v10924_v12, %v10388_v9 }
0x1199   : > { %v5786_v46 = vmul.f32 2.0, %v5707_v4  ;;  %v5804_v48 = vmul.f32 -0.5, %v5794_v14  ;;  %v5822_v36 = vadd.f32 %v5812_v13, %v5508_v24  ;;  %v5781_v14 = vadd.f32 %v10924_v12, %v10429_v26 }
0x119a   : > { %5834 = vmax.xlane.f32.xlu0 %v5823_v39  ;;  %v5815_v8 = vadd.f32 -58.812065, %v5805_v30  ;;  %v5797_v5 = vsub.f32 %v5777_v15, %v5787_v27 }
0x119b   : > { %v8151_v38 = vpop.f32.mrb[118].mxu0  ;;  %v5796_v51 = vsub.f32 %v5776_v32, %v5786_v46  ;;  %v5814_v49 = vadd.f32 -58.812065, %v5804_v48 }
0x119c   : > { %v5717_v56 = vpop.f32.mrb[119].mxu0  ;;  %v5807_v33 = vmul.f32 -0.5, %v5797_v5  ;;  %v5789_v42 = vmul.f32 2.0, %v8151_v38  ;;  %v5825_v21 = vadd.f32 %v5815_v8, %v5508_v24 }
0x119d   : > { %v5806_v34 = vmul.f32 -0.5, %v5796_v51  ;;  %v5788_v11 = vmul.f32 2.0, %v5717_v56  ;;  %v5824_v23 = vadd.f32 %v5814_v49, %v5508_v24 }
0x119e   : > { %5832 = vmax.xlane.f32.xlu0 %v5822_v36  ;;  %v5817_v35 = vadd.f32 -58.812065, %v5807_v33  ;;  %v5799_v18 = vsub.f32 %v5779_v29, %v5789_v42 }
0x119f   : > { %v8154_v31 = vpop.f32.mrb[120].mxu0  ;;  %v5816_v22 = vadd.f32 -58.812065, %v5806_v34  ;;  %v5798_v62 = vsub.f32 %v5778_v37, %v5788_v11 }
0x11a0   : > { %v5727_v43 = vpop.f32.mrb[121].mxu0  ;;  %v5809_v10 = vmul.f32 -0.5, %v5799_v18  ;;  %v5827_v55 = vadd.f32 %v5817_v35, %v5508_v24  ;;  %v5791_v7 = vmul.f32 2.0, %v8154_v31 }
0x11a1   : > { %v5790_v6 = vmul.f32 2.0, %v5727_v43  ;;  %v5808_v13 = vmul.f32 -0.5, %v5798_v62  ;;  %v5826_v30 = vadd.f32 %v5816_v22, %v5508_v24 }
0x11a2   : > { %5838 = vmax.xlane.f32.xlu0 %v5825_v21  ;;  %v5819_v20 = vadd.f32 -58.812065, %v5809_v10  ;;  %v5801_v4 = vsub.f32 %v5781_v14, %v5791_v7 }
0x11a3   : > { %v5800_v16 = vsub.f32 %v5780_v44, %v5790_v6  ;;  %v5818_v27 = vadd.f32 -58.812065, %v5808_v13 }
0x11a4   : > { %v5829_v46 = vadd.f32 %v5819_v20, %v5508_v24  ;;  %v5811_v38 = vmul.f32 -0.5, %v5801_v4 }
0x11a5   : > { %v5810_v15 = vmul.f32 -0.5, %v5800_v16  ;;  %v5828_v48 = vadd.f32 %v5818_v27, %v5508_v24 }
0x11a6   : > { %5836 = vmax.xlane.f32.xlu0 %v5824_v23  ;;  %v5821_v5 = vadd.f32 -58.812065, %v5811_v38 }
0x11a7   : > { %v5820_v8 = vadd.f32 -58.812065, %v5810_v15 }
0x11a8   : > { %v5831_v32 = vadd.f32 %v5821_v5, %v5508_v24 }
0x11a9   : > { %v5830_v56 = vadd.f32 %v5820_v8, %v5508_v24 }
0x11aa   : > { %5842 = vmax.xlane.f32.xlu0 %v5827_v55 }
0x11ae   : > { %5840 = vmax.xlane.f32.xlu0 %v5826_v30 }
0x11b2   : > { %5846 = vmax.xlane.f32.xlu0 %v5829_v46 }
0x11b6   : > { %5844 = vmax.xlane.f32.xlu0 %v5828_v48 }
0x11ba   : > { %5848 = vmax.xlane.f32.xlu0 %v5830_v56 }
0x11be   : > { %5850 = vmax.xlane.f32.xlu0 %v5831_v32 }
0x1227   : > { %v5835_v51 = vpop.xlane.xlu0 %5834 }
0x1228   : > { %v5853_v31 = vsub.f32 %v5823_v39, %v5835_v51 }
0x122a   : > { %v5864_v49 = vmul.f32 1.442695, %v5853_v31 }
0x122b   : > { %v5833_v33 = vpop.xlane.xlu0 %5832 }
0x122c   : > { %9054 = vpow2.f32 %v5864_v49  ;;  %v5852_v12 = vsub.f32 %v5822_v36, %v5833_v33 }
0x122e   : > { %v5862_v42 = vmul.f32 1.442695, %v5852_v12 }
0x122f   : > { %v5839_v43 = vpop.xlane.xlu0 %5838 }
0x1230   : > { %9056 = vpow2.f32 %v5862_v42  ;;  %v5855_v29 = vsub.f32 %v5825_v21, %v5839_v43 }
0x1232   : > { %v5868_v34 = vmul.f32 1.442695, %v5855_v29 }
0x1233   : > { %v5837_v35 = vpop.xlane.xlu0 %5836 }
0x1234   : > { %9058 = vpow2.f32 %v5868_v34  ;;  %v5854_v18 = vsub.f32 %v5824_v23, %v5837_v35 }
0x1236   : > { %v9055_v11 = vpop.eup %9054  ;;  %v5866_v37 = vmul.f32 1.442695, %v5854_v18 }
0x1237   : > { %5884 = vadd.xlane.f32.xlu0 %v9055_v11  ;;  %v5843_v22 = vpop.xlane.xlu0 %5842 }
0x1238   : > { %9060 = vpow2.f32 %v5866_v37  ;;  %v5857_v24 = vsub.f32 %v5827_v55, %v5843_v22 }
0x123a   : > { %v9057_v10 = vpop.eup %9056  ;;  %v5872_v39 = vmul.f32 1.442695, %v5857_v24 }
0x123b   : > { %5882 = vadd.xlane.f32.xlu0 %v9057_v10  ;;  %v5841_v62 = vpop.xlane.xlu0 %5840 }
0x123c   : > { %9062 = vpow2.f32 %v5872_v39  ;;  %v5856_v36 = vsub.f32 %v5826_v30, %v5841_v62 }
0x123e   : > { %v9059_v6 = vpop.eup %9058  ;;  %v5870_v44 = vmul.f32 1.442695, %v5856_v36 }
0x123f   : > { %5888 = vadd.xlane.f32.xlu0 %v9059_v6  ;;  %v5847_v21 = vpop.xlane.xlu0 %5846 }
0x1240   : > { %9064 = vpow2.f32 %v5870_v44  ;;  %v5859_v7 = vsub.f32 %v5829_v46, %v5847_v21 }
0x1242   : > { %v9061_v20 = vpop.eup %9060  ;;  %v5876_v23 = vmul.f32 1.442695, %v5859_v7 }
0x1243   : > { %5886 = vadd.xlane.f32.xlu0 %v9061_v20  ;;  %v5845_v13 = vpop.xlane.xlu0 %5844 }
0x1244   : > { %9066 = vpow2.f32 %v5876_v23  ;;  %v5858_v16 = vsub.f32 %v5828_v48, %v5845_v13 }
0x1246   : > { %v9063_v14 = vpop.eup %9062  ;;  %v5874_v55 = vmul.f32 1.442695, %v5858_v16 }
0x1247   : > { %5892 = vadd.xlane.f32.xlu0 %v9063_v14  ;;  %v5849_v27 = vpop.xlane.xlu0 %5848 }
0x1248   : > { %9068 = vpow2.f32 %v5874_v55  ;;  %v5860_v4 = vsub.f32 %v5830_v56, %v5849_v27 }
0x124a   : > { %v9065_v15 = vpop.eup %9064  ;;  %v5878_v30 = vmul.f32 1.442695, %v5860_v4 }
0x124b   : > { %5890 = vadd.xlane.f32.xlu0 %v9065_v15  ;;  %v5851_v38 = vpop.xlane.xlu0 %5850 }
0x124c   : > { %9070 = vpow2.f32 %v5878_v30  ;;  %v5861_v8 = vsub.f32 %v5831_v32, %v5851_v38 }
0x124e   : > { %v9067_v5 = vpop.eup %9066  ;;  %v5880_v46 = vmul.f32 1.442695, %v5861_v8 }
0x124f   : > { %5896 = vadd.xlane.f32.xlu0 %v9067_v5 }
0x1250   : > { %9072 = vpow2.f32 %v5880_v46 }
0x1252   : > { %v9069_v51 = vpop.eup %9068 }
0x1253   : > { %5894 = vadd.xlane.f32.xlu0 %v9069_v51 }
0x1256   : > { %v9071_v31 = vpop.eup %9070 }
0x1257   : > { %5898 = vadd.xlane.f32.xlu0 %v9071_v31 }
0x125a   : > { %v9073_v48 = vpop.eup %9072 }
0x125b   : > { %5900 = vadd.xlane.f32.xlu0 %v9073_v48 }
0x12c4   : > { %v5885_v49 = vpop.xlane.xlu0 %5884 }
0x12c8   : > { %v5883_v33 = vpop.xlane.xlu0 %5882 }
0x12c9   : > { %9074 = vrcp.f32 %v5883_v33 }
0x12ca   : > { %9076 = vrcp.f32 %v5885_v49 }
0x12cc   : > { %v5889_v56 = vpop.xlane.xlu0 %5888 }
0x12d0   : > { %v5887_v12 = vpop.xlane.xlu0 %5886 }
0x12d1   : > { %9078 = vrcp.f32 %v5887_v12 }
0x12d2   : > { %9080 = vrcp.f32 %v5889_v56 }
0x12d3   : > { %v9075_v42 = vpop.eup %9074 }
0x12d4   : > { %v5912_v32 = vmul.f32 %v9075_v42, %v9057_v10  ;;  %v5893_v43 = vpop.xlane.xlu0 %5892  ;;  %v9077_v29 = vpop.eup %9076 }
0x12d5   : > { %v5913_v34 = vmul.f32 %v9077_v29, %v9055_v11 }
0x12d6   : > { %5950 = vxpose.xlu0.b32.start [1/10] (short) %v5912_v32, 128 }
0x12d7   : > { %v5922_v39 = vadd.f32 %v5913_v34, %v5912_v32 }
0x12d8   : > { %v5891_v35 = vpop.xlane.xlu0 %5890 }
0x12d9   : > { %9082 = vrcp.f32 %v5891_v35 }
0x12da   : > { %5951 = vxpose.xlu0.b32.cont [2/10] (short) %v5913_v34, 128  ;;  %9084 = vrcp.f32 %v5893_v43 }
0x12db   : > { %v9079_v18 = vpop.eup %9078 }
0x12dc   : > { %v5914_v37 = vmul.f32 %v9079_v18, %v9061_v20  ;;  %v5897_v22 = vpop.xlane.xlu0 %5896  ;;  %v9081_v24 = vpop.eup %9080 }
0x12dd   : > { %v5915_v62 = vmul.f32 %v9081_v24, %v9059_v6  ;;  %9086 = vrcp.f32 %v5897_v22 }
0x12de   : > { %5952 = vxpose.xlu0.b32.cont [3/10] (short) %v5914_v37, 128  ;;  %v5923_v44 = vadd.f32 %v5922_v39, %v5914_v37 }
0x12e0   : > { %v5895_v36 = vpop.xlane.xlu0 %5894  ;;  %v5924_v23 = vadd.f32 %v5923_v44, %v5915_v62 }
0x12e1   : > { %9088 = vrcp.f32 %v5895_v36 }
0x12e2   : > { %5953 = vxpose.xlu0.b32.cont [4/10] (short) %v5915_v62, 128 }
0x12e3   : > { %v9083_v10 = vpop.eup %9082 }
0x12e4   : > { %v5916_v21 = vmul.f32 %v9083_v10, %v9065_v15  ;;  %v5899_v7 = vpop.xlane.xlu0 %5898  ;;  %v9085_v11 = vpop.eup %9084 }
0x12e5   : > { %9090 = vrcp.f32 %v5899_v7  ;;  %v5917_v13 = vmul.f32 %v9085_v11, %v9063_v14 }
0x12e6   : > { %5954 = vxpose.xlu0.b32.cont [5/10] (short) %v5916_v21, 128  ;;  %v5925_v16 = vadd.f32 %v5924_v23, %v5916_v21 }
0x12e7   : > { %v9087_v55 = vpop.eup %9086 }
0x12e8   : > { %v5901_v20 = vpop.xlane.xlu0 %5900  ;;  %v5926_v6 = vadd.f32 %v5925_v16, %v5917_v13  ;;  %v5919_v30 = vmul.f32 %v9087_v55, %v9067_v5 }
0x12e9   : > { %9092 = vrcp.f32 %v5901_v20 }
0x12ea   : > { %5955 = vxpose.xlu0.b32.cont [6/10] (short) %v5917_v13, 128 }
0x12eb   : > { %v9089_v27 = vpop.eup %9088 }
0x12ec   : > { %v5918_v4 = vmul.f32 %v9089_v27, %v9069_v51 }
0x12ee   : > { %v5927_v38 = vadd.f32 %v5926_v6, %v5918_v4  ;;  %5956 = vxpose.xlu0.b32.cont [7/10] (short) %v5918_v4, 128 }
0x12ef   : > { %v9091_v8 = vpop.eup %9090 }
0x12f0   : > { %v5928_v46 = vadd.f32 %v5927_v38, %v5919_v30  ;;  %v5920_v15 = vmul.f32 %v9091_v8, %v9071_v31 }
0x12f2   : > { %5957 = vxpose.xlu0.b32.cont [8/10] (short) %v5919_v30, 128  ;;  %v5929_v33 = vadd.f32 %v5928_v46, %v5920_v15 }
0x12f3   : > { %v9093_v49 = vpop.eup %9092 }
0x12f4   : > { %v5921_v56 = vmul.f32 %v9093_v49, %v9073_v48 }
0x12f6   : > { %5958 = vxpose.xlu0.b32.cont [9/10] (short) %v5920_v15, 128  ;;  %v5930_v14 = vadd.f32 %v5929_v33, %v5921_v56 }
0x12f8   : > { %v5931_v12 = vrot.slane %v5930_v14, 4 }
0x12fa   : > { %5959 = vxpose.xlu0.b32.end [10/10] (short) %v5921_v56, 128  ;;  %v5932_v42 = vadd.f32 %v5931_v12, %v5930_v14 }
0x12fc   : > { %v5933_v32 = vrot.slane %v5932_v42, 2 }
0x12fe   : > { %v5934_v43 = vadd.f32 %v5933_v32, %v5932_v42 }
0x1300   : > { %v5935_v29 = vrot.slane %v5934_v43, 1 }
0x1302   : > { %v10948_v34 = vadd.f32 %v5935_v29, %v5934_v43 }
0x1304   : > { %6175 = vxpose.xlu1.b32.start.end [1/1] (short) %v10948_v34, 128 }
0x1356   : > { %v5966_v5 = vpop.trf.xlu0 }
0x1357   : > { %8175 = vmatprep.mubr.msk.f32.mxu1 %vm2661_vm4, %v5966_v5 }
0x135a   : > { %v5967_v51 = vpop.trf.xlu0 }
0x135b   : > { %8176 = vmatmul.mubr.msk.f32.vlgmr.msra.gmra.mrb[88].mxu1 %vm2661_vm4, %v5967_v51 }
0x135e   : > { %v5968_v31 = vpop.trf.xlu0 }
0x135f   : > { %8178 = vmatprep.mubr.msk.f32.mxu1 %vm2661_vm4, %v5968_v31 }
0x1362   : > { %v5969_v48 = vpop.trf.xlu0 }
0x1363   : > { %8179 = vmatmul.mubr.msk.f32.gmra.mrb[90].mxu1 %vm2661_vm4, %v5969_v48 }
0x1366   : > { %v5970_v35 = vpop.trf.xlu0 }
0x1367   : > { %8181 = vmatprep.mubr.msk.f32.mxu1 %vm2661_vm4, %v5970_v35 }
0x136a   : > { %v5971_v18 = vpop.trf.xlu0 }
0x136b   : > { %8182 = vmatmul.mubr.msk.f32.gmra.mrb[92].mxu1 %vm2661_vm4, %v5971_v18 }
0x136e   : > { %v5972_v37 = vpop.trf.xlu0 }
0x136f   : > { %8184 = vmatprep.mubr.msk.f32.mxu1 %vm2661_vm4, %v5972_v37 }
0x1372   : > { %v5973_v22 = vpop.trf.xlu0 }
0x1373   : > { %8185 = vmatmul.mubr.msk.f32.gmra.mrb[94].mxu1 %vm2661_vm4, %v5973_v22 }
0x1376   : > { %v5974_v24 = vpop.trf.xlu0 }
0x1377   : > { %8187 = vmatprep.mubr.msk.f32.mxu1 %vm2661_vm4, %v5974_v24 }
0x137a   : > { %v5975_v39 = vpop.trf.xlu0 }
0x137b   : > { %8188 = vmatmul.mubr.msk.f32.gmra.mrb[96].mxu1 %vm2661_vm4, %v5975_v39 }
0x137e   : > { %v5976_v62 = vpop.trf.xlu0 }
0x137f   : > { %8190 = vmatprep.mubr.msk.f32.mxu1 %vm2661_vm4, %v5976_v62 }
0x1382   : > { %v5977_v36 = vpop.trf.xlu0 }
0x1383   : > { %8191 = vmatmul.mubr.msk.f32.gmra.mrb[98].mxu1 %vm2661_vm4, %v5977_v36 }
0x1384   : > { %v6191_v44 = vpop.trf.xlu1 }
0x1385   : > { %v6207_v10 = vadd.f32 1e-10, %v6191_v44 }
0x1386   : > { %v5978_v21 = vpop.trf.xlu0 }
0x1387   : > { %9094 = vrcp.f32 %v6207_v10  ;;  %8193 = vmatprep.mubr.msk.f32.mxu1 %vm2661_vm4, %v5978_v21 }
0x1388   : > { %v6192_v7 = vpop.trf.xlu1 }
0x1389   : > { %v6208_v11 = vadd.f32 1e-10, %v6192_v7 }
0x138a   : > { %v5979_v23 = vpop.trf.xlu0 }
0x138b   : > { %9096 = vrcp.f32 %v6208_v11  ;;  %8194 = vmatmul.mubr.msk.f32.gmra.mrb[100].mxu1 %vm2661_vm4, %v5979_v23 }
0x138c   : > { %v6193_v13 = vpop.trf.xlu1 }
0x138d   : > { %v6209_v16 = vadd.f32 1e-10, %v6193_v13 }
0x138e   : > { %v5980_v20 = vpop.trf.xlu0 }
0x138f   : > { %9098 = vrcp.f32 %v6209_v16  ;;  %8196 = vmatprep.mubr.msk.f32.mxu1 %vm2661_vm4, %v5980_v20 }
0x1390   : > { %v6194_v55 = vpop.trf.xlu1 }
0x1391   : > { %v9095_v27 = vpop.eup %9094  ;;  %v6210_v6 = vadd.f32 1e-10, %v6194_v55 }
0x1392   : > { %v5981_v4 = vpop.trf.xlu0  ;;  %6241 = vperm.xlu1 %8679, %v9095_v27  }
0x1393   : > { %9100 = vrcp.f32 %v6210_v6  ;;  %8197 = vmatmul.mubr.msk.f32.gmra.mrb[102].mxu1 %vm2661_vm4, %v5981_v4 }
0x1394   : > { %8231 = vmatprep.mubr.msk.f32.mxu1 %vm1048_vm0, %v9665_v52  ;;  %v6195_v30 = vpop.trf.xlu1 }
0x1395   : > { %v9097_v38 = vpop.eup %9096  ;;  %v6211_v8 = vadd.f32 1e-10, %v6195_v30  ;;  %v5937_v30 = vsel %vm2615_vm5, %v10948_v34, 0.0 }
0x1396   : > { %6246 = vperm.xlu0 %8678, %v9097_v38  }
0x1397   : > { %9102 = vrcp.f32 %v6211_v8 }
0x1398   : > { %v6196_v46 = vpop.trf.xlu1 }
0x1399   : > { %v9099_v15 = vpop.eup %9098  ;;  %v6212_v49 = vadd.f32 1e-10, %v6196_v46 }
0x139a   : > { %6251 = vperm.xlu1 %8679, %v9099_v15  }
0x139b   : > { %9104 = vrcp.f32 %v6212_v49 }
0x139c   : > { %v6197_v33 = vpop.trf.xlu1 }
0x139d   : > { %v9101_v56 = vpop.eup %9100  ;;  %v6213_v14 = vadd.f32 1e-10, %v6197_v33 }
0x139e   : > { %6256 = vperm.xlu1 %8679, %v9101_v56  }
0x139f   : > { %9106 = vrcp.f32 %v6213_v14 }
0x13a0   : > { %v6198_v12 = vpop.trf.xlu1 }
0x13a1   : > { %v9103_v42 = vpop.eup %9102  ;;  %v6214_v32 = vadd.f32 1e-10, %v6198_v12 }
0x13a2   : > { %6261 = vperm.xlu1 %8679, %v9103_v42  }
0x13a3   : > { %9108 = vrcp.f32 %v6214_v32 }
0x13a4   : > { %v6199_v43 = vpop.trf.xlu1 }
0x13a5   : > { %v9105_v29 = vpop.eup %9104  ;;  %v6215_v5 = vadd.f32 1e-10, %v6199_v43 }
0x13a6   : > { %6266 = vperm.xlu1 %8679, %v9105_v29  }
0x13a7   : > { %9110 = vrcp.f32 %v6215_v5 }
0x13a8   : > { %v6200_v51 = vpop.trf.xlu1 }
0x13a9   : > { %v9107_v31 = vpop.eup %9106  ;;  %v6216_v48 = vadd.f32 1e-10, %v6200_v51 }
0x13aa   : > { %6271 = vperm.xlu1 %8679, %v9107_v31  }
0x13ab   : > { %9112 = vrcp.f32 %v6216_v48 }
0x13ac   : > { %v6201_v35 = vpop.trf.xlu1 }
0x13ad   : > { %v9109_v18 = vpop.eup %9108  ;;  %v6217_v37 = vadd.f32 1e-10, %v6201_v35 }
0x13ae   : > { %6276 = vperm.xlu1 %8679, %v9109_v18  }
0x13af   : > { %9114 = vrcp.f32 %v6217_v37 }
0x13b0   : > { %v6202_v22 = vpop.trf.xlu1 }
0x13b1   : > { %v9111_v24 = vpop.eup %9110  ;;  %v6218_v39 = vadd.f32 1e-10, %v6202_v22 }
0x13b2   : > { %6281 = vperm.xlu1 %8679, %v9111_v24  }
0x13b3   : > { %9116 = vrcp.f32 %v6218_v39 }
0x13b4   : > { %v6203_v62 = vpop.trf.xlu1 }
0x13b5   : > { %v9113_v36 = vpop.eup %9112  ;;  %v6219_v44 = vadd.f32 1e-10, %v6203_v62 }
0x13b6   : > { %6286 = vperm.xlu0 %8678, %v9113_v36  }
0x13b7   : > { %9118 = vrcp.f32 %v6219_v44 }
0x13b8   : > { %v6204_v10 = vpop.trf.xlu1 }
0x13b9   : > { %v9115_v21 = vpop.eup %9114  ;;  %v6220_v7 = vadd.f32 1e-10, %v6204_v10 }
0x13ba   : > { %6291 = vperm.xlu1 %8679, %v9115_v21  }
0x13bb   : > { %9120 = vrcp.f32 %v6220_v7 }
0x13bc   : > { %v6205_v11 = vpop.trf.xlu1 }
0x13bd   : > { %v9117_v23 = vpop.eup %9116  ;;  %v6221_v13 = vadd.f32 1e-10, %v6205_v11 }
0x13be   : > { %6296 = vperm.xlu0 %8678, %v9117_v23  }
0x13bf   : > { %9122 = vrcp.f32 %v6221_v13 }
0x13c0   : > { %v6206_v16 = vpop.trf.xlu1 }
0x13c1   : > { %v9119_v20 = vpop.eup %9118  ;;  %v6222_v55 = vadd.f32 1e-10, %v6206_v16 }
0x13c2   : > { %6301 = vperm.xlu1 %8679, %v9119_v20  }
0x13c3   : > { %9124 = vrcp.f32 %v6222_v55 }
0x13c5   : > { %v9121_v27 = vpop.eup %9120 }
0x13c6   : > { %6306 = vperm.xlu0 %8678, %v9121_v27  }
0x13c9   : > { %v9123_v6 = vpop.eup %9122 }
0x13ca   : > { %6311 = vperm.xlu1 %8679, %v9123_v6  }
0x13cd   : > { %v9125_v4 = vpop.eup %9124 }
0x13ce   : > { %6316 = vperm.xlu0 %8678, %v9125_v4  }
0x13ee   : > { %5938 = vadd.xlane.f32.xlu1 %v5937_v30 }
0x1411   : > { %v6242_v38 = vpop.permute.xlu1 %6241 }
0x1415   : > { %v6247_v46 = vpop.permute.xlu0 %6246 }
0x1419   : > { %v6252_v8 = vpop.permute.xlu1 %6251 }
0x141d   : > { %v6257_v15 = vpop.permute.xlu1 %6256 }
0x1421   : > { %v6262_v29 = vpop.permute.xlu1 %6261 }
0x1425   : > { %v6267_v37 = vpop.permute.xlu1 %6266 }
0x1429   : > { %v6272_v21 = vpop.permute.xlu1 %6271 }
0x142d   : > { %v6277_v55 = vpop.permute.xlu1 %6276 }
0x142e   : > { %v8177_v49 = vpop.f32.mrb[88].mxu1 }
0x142f   : > { %v6320_v33 = vmul.f32 %v8177_v49, %v6247_v46  ;;  %v6096_v56 = vpop.f32.mrb[89].mxu1 }
0x1430   : > { %v6319_v14 = vmul.f32 %v6242_v38, %v6096_v56 }
0x1431   : > { %v6422_v12 = vmul.f32 %v6320_v33, %v6320_v33 }
0x1432   : > { %v8586_v42 = vpack.c.bf16 %v6320_v33, %v6319_v14  ;;  %v6421_v32 = vmul.f32 %v6319_v14, %v6319_v14  ;;  %v6282_v14 = vpop.permute.xlu1 %6281 }
0x1433   : > { %v6440_v43 = vsel %vm1048_vm0, %v6422_v12, 0.0 }
0x1434   : > { %6441 = vadd.xlane.f32.xlu0 %v6440_v43  ;;  %8588 = vmatprep.subr.msk.bf16.mxu1 %vm9989_vm2, %v8586_v42  ;;  %v6437_v48 = vsel %vm1048_vm0, %v6421_v32, 0.0 }
0x1435   : > { %8591 = vmatpush3.bf16.xpose.msk.msra.mxu1 %vm9989_vm2, %v8586_v42  ;;  %v6287_v33 = vpop.permute.xlu0 %6286 }
0x1436   : > { %v8180_v5 = vpop.f32.mrb[90].mxu1 }
0x1437   : > { %v6322_v51 = vmul.f32 %v8180_v5, %v6257_v15  ;;  %v6106_v31 = vpop.f32.mrb[91].mxu1 }
0x1438   : > { %v6321_v35 = vmul.f32 %v6252_v8, %v6106_v31  ;;  %6438 = vadd.xlane.f32.xlu0 %v6437_v48 }
0x1439   : > { %v6424_v18 = vmul.f32 %v6322_v51, %v6322_v51 }
0x143a   : > { %v6423_v22 = vmul.f32 %v6321_v35, %v6321_v35  ;;  %v8592_v24 = vpack.c.bf16 %v6322_v51, %v6321_v35 }
0x143b   : > { %v6446_v39 = vsel %vm1048_vm0, %v6424_v18, 0.0  ;;  %v6292_v18 = vpop.permute.xlu1 %6291 }
0x143c   : > { %8594 = vmatprep.subr.msk.bf16.mxu1 %vm9989_vm2, %v8592_v24  ;;  %6447 = vadd.xlane.f32.xlu1 %v6446_v39  ;;  %v6443_v62 = vsel %vm1048_vm0, %v6423_v22, 0.0 }
0x143d   : > { %6444 = vadd.xlane.f32.xlu0 %v6443_v62  ;;  %8597 = vmatpush3.bf16.xpose.msk.msra.mxu1 %vm9989_vm2, %v8592_v24  ;;  %v6297_v48 = vpop.permute.xlu0 %6296 }
0x143e   : > { %v8183_v36 = vpop.f32.mrb[92].mxu1 }
0x143f   : > { %v6324_v44 = vmul.f32 %v8183_v36, %v6267_v37  ;;  %v6116_v10 = vpop.f32.mrb[93].mxu1 }
0x1440   : > { %v6323_v7 = vmul.f32 %v6262_v29, %v6116_v10 }
0x1441   : > { %v6426_v11 = vmul.f32 %v6324_v44, %v6324_v44 }
0x1442   : > { %v6425_v23 = vmul.f32 %v6323_v7, %v6323_v7  ;;  %v8598_v13 = vpack.c.bf16 %v6324_v44, %v6323_v7 }
0x1443   : > { %v6452_v16 = vsel %vm1048_vm0, %v6426_v11, 0.0  ;;  %v6302_v11 = vpop.permute.xlu1 %6301 }
0x1444   : > { %8600 = vmatprep.subr.msk.bf16.mxu1 %vm9989_vm2, %v8598_v13  ;;  %6453 = vadd.xlane.f32.xlu1 %v6452_v16  ;;  %v6449_v20 = vsel %vm1048_vm0, %v6425_v23, 0.0 }
0x1445   : > { %6450 = vadd.xlane.f32.xlu0 %v6449_v20  ;;  %8603 = vmatpush3.bf16.xpose.msk.msra.mxu1 %vm9989_vm2, %v8598_v13 }
0x1446   : > { %v8186_v27 = vpop.f32.mrb[94].mxu1 }
0x1447   : > { %v6326_v6 = vmul.f32 %v8186_v27, %v6277_v55  ;;  %v6126_v4 = vpop.f32.mrb[95].mxu1 }
0x1448   : > { %v6325_v30 = vmul.f32 %v6272_v21, %v6126_v4  ;;  %v6307_v21 = vpop.permute.xlu0 %6306 }
0x1449   : > { %v6428_v38 = vmul.f32 %v6326_v6, %v6326_v6 }
0x144a   : > { %v6427_v8 = vmul.f32 %v6325_v30, %v6325_v30  ;;  %v8604_v46 = vpack.c.bf16 %v6326_v6, %v6325_v30 }
0x144b   : > { %v6458_v15 = vsel %vm1048_vm0, %v6428_v38, 0.0 }
0x144c   : > { %8606 = vmatprep.subr.msk.bf16.mxu1 %vm9989_vm2, %v8604_v46  ;;  %6459 = vadd.xlane.f32.xlu1 %v6458_v15  ;;  %v6455_v49 = vsel %vm1048_vm0, %v6427_v8, 0.0  ;;  %v6312_v8 = vpop.permute.xlu1 %6311 }
0x144d   : > { %6456 = vadd.xlane.f32.xlu0 %v6455_v49  ;;  %8609 = vmatpush3.bf16.xpose.msk.msra.mxu1 %vm9989_vm2, %v8604_v46  ;;  %v6317_v30 = vpop.permute.xlu0 %6316 }
0x144e   : > { %v8189_v56 = vpop.f32.mrb[96].mxu1 }
0x144f   : > { %v6328_v12 = vmul.f32 %v8189_v56, %v6287_v33  ;;  %v6136_v42 = vpop.f32.mrb[97].mxu1 }
0x1450   : > { %v6327_v32 = vmul.f32 %v6282_v14, %v6136_v42 }
0x1451   : > { %v6430_v43 = vmul.f32 %v6328_v12, %v6328_v12 }
0x1452   : > { %v6429_v29 = vmul.f32 %v6327_v32, %v6327_v32  ;;  %v8610_v5 = vpack.c.bf16 %v6328_v12, %v6327_v32 }
0x1453   : > { %v6464_v51 = vsel %vm1048_vm0, %v6430_v43, 0.0 }
0x1454   : > { %8612 = vmatprep.subr.msk.bf16.mxu1 %vm9989_vm2, %v8610_v5  ;;  %6465 = vadd.xlane.f32.xlu1 %v6464_v51  ;;  %v6461_v31 = vsel %vm1048_vm0, %v6429_v29, 0.0 }
0x1455   : > { %8615 = vmatpush3.bf16.xpose.msk.msra.mxu1 %vm9989_vm2, %v8610_v5  ;;  %6462 = vadd.xlane.f32.xlu0 %v6461_v31 }
0x1456   : > { %v8192_v35 = vpop.f32.mrb[98].mxu1 }
0x1457   : > { %v6330_v37 = vmul.f32 %v8192_v35, %v6297_v48  ;;  %v6146_v22 = vpop.f32.mrb[99].mxu1 }
0x1458   : > { %v6329_v24 = vmul.f32 %v6292_v18, %v6146_v22 }
0x1459   : > { %v6432_v39 = vmul.f32 %v6330_v37, %v6330_v37 }
0x145a   : > { %v6431_v62 = vmul.f32 %v6329_v24, %v6329_v24  ;;  %v8616_v36 = vpack.c.bf16 %v6330_v37, %v6329_v24 }
0x145b   : > { %v6470_v44 = vsel %vm1048_vm0, %v6432_v39, 0.0 }
0x145c   : > { %8618 = vmatprep.subr.msk.bf16.mxu1 %vm9989_vm2, %v8616_v36  ;;  %6471 = vadd.xlane.f32.xlu1 %v6470_v44  ;;  %v6467_v10 = vsel %vm1048_vm0, %v6431_v62, 0.0 }
0x145d   : > { %8621 = vmatpush3.bf16.xpose.msk.msra.mxu1 %vm9989_vm2, %v8616_v36  ;;  %6468 = vadd.xlane.f32.xlu0 %v6467_v10 }
0x145e   : > { %v8195_v7 = vpop.f32.mrb[100].mxu1 }
0x145f   : > { %v6332_v23 = vmul.f32 %v8195_v7, %v6307_v21  ;;  %v6156_v13 = vpop.f32.mrb[101].mxu1 }
0x1460   : > { %v6331_v16 = vmul.f32 %v6302_v11, %v6156_v13 }
0x1461   : > { %v6434_v20 = vmul.f32 %v6332_v23, %v6332_v23 }
0x1462   : > { %v6433_v55 = vmul.f32 %v6331_v16, %v6331_v16  ;;  %v8622_v27 = vpack.c.bf16 %v6332_v23, %v6331_v16 }
0x1463   : > { %v6476_v6 = vsel %vm1048_vm0, %v6434_v20, 0.0 }
0x1464   : > { %8624 = vmatprep.subr.msk.bf16.mxu1 %vm9989_vm2, %v8622_v27  ;;  %6477 = vadd.xlane.f32.xlu1 %v6476_v6  ;;  %v6473_v4 = vsel %vm1048_vm0, %v6433_v55, 0.0 }
0x1465   : > { %8627 = vmatpush3.bf16.xpose.msk.msra.mxu1 %vm9989_vm2, %v8622_v27  ;;  %6474 = vadd.xlane.f32.xlu0 %v6473_v4 }
0x1466   : > { %v8198_v38 = vpop.f32.mrb[102].mxu1 }
0x1467   : > { %v6334_v46 = vmul.f32 %v8198_v38, %v6317_v30  ;;  %v6166_v15 = vpop.f32.mrb[103].mxu1 }
0x1468   : > { %v6333_v49 = vmul.f32 %v6312_v8, %v6166_v15 }
0x1469   : > { %v6436_v33 = vmul.f32 %v6334_v46, %v6334_v46 }
0x146a   : > { %v6435_v56 = vmul.f32 %v6333_v49, %v6333_v49  ;;  %v8628_v14 = vpack.c.bf16 %v6334_v46, %v6333_v49 }
0x146b   : > { %v6482_v12 = vsel %vm1048_vm0, %v6436_v33, 0.0 }
0x146c   : > { %8630 = vmatprep.subr.msk.bf16.mxu1 %vm9989_vm2, %v8628_v14  ;;  %6483 = vadd.xlane.f32.xlu1 %v6482_v12  ;;  %v6479_v42 = vsel %vm1048_vm0, %v6435_v56, 0.0 }
0x146d   : > { %8633 = vmatpush3.bf16.xpose.msk.msra.mxu1 %vm9989_vm2, %v8628_v14  ;;  %6480 = vadd.xlane.f32.xlu0 %v6479_v42 }
0x1474   : > { %8232 = vmatmul.mubr.msk.f32.vlgmr.msra.gmra.mrb[104].mxu1 %vm1048_vm0, %v9668_v57 }
0x1475   : > { %8234 = vmatprep.mubr.msk.f32.mxu1 %vm1048_vm0, %v9675_v58 }
0x1478   : > { %8235 = vmatmul.mubr.msk.f32.gmra.mrb[106].mxu1 %vm1048_vm0, %v9678_v59 }
0x1479   : > { %8237 = vmatprep.mubr.msk.f32.mxu1 %vm1048_vm0, %v9681_v60 }
0x147b   : > { %v5939_v32 = vpop.xlane.xlu1 %5938 }
0x147c   : > { %v5940_v43 = vrot.slane %v5939_v32, 4  ;;  %8238 = vmatmul.mubr.msk.f32.gmra.mrb[108].mxu1 %vm1048_vm0, %v9684_v61 }
0x147d   : > { %8240 = vmatprep.mubr.msk.f32.mxu1 %vm1048_vm0, %v9697_v0 }
0x147e   : > { %v5941_v25 = vadd.f32 %v5940_v43, %v5939_v32 }
0x1480   : > { %v5942_v29 = vrot.slane %v5941_v25, 2  ;;  %8241 = vmatmul.mubr.msk.f32.gmra.mrb[110].mxu1 %vm1048_vm0, %v9700_v1 }
0x1481   : > { %8243 = vmatprep.mubr.msk.f32.mxu1 %vm1048_vm0, %v9703_v2 }
0x1482   : > { %v5943_v5 = vadd.f32 %v5942_v29, %v5941_v25 }
0x1484   : > { %8244 = vmatmul.mubr.msk.f32.gmra.mrb[112].mxu1 %vm1048_vm0, %v9706_v3  ;;  %v5944_v51 = vrot.slane %v5943_v5, 1 }
0x1486   : > { %v5945_v31 = vadd.f32 %v5944_v51, %v5943_v5 }
0x1488   : > { %8661 = vpush %v5945_v31 }
0x14b9   : > { %s8662_s13 = spop %8661 }
0x14ba   : > { %v5947_v16 = vstv %s8662_s13 }
0x14bb   : > { %9126 = vrcp.f32 %v5947_v16 }
0x14c1   : > { %v6442_v48 = vpop.xlane.xlu0 %6441 }
0x14c5   : > { %v6439_v35 = vpop.xlane.xlu0 %6438  ;;  %v9127_v20 = vpop.eup %9126 }
0x14c6   : > { %6648 = vxpose.xlu0.b32.start [1/16] (narrow) %v6439_v35, 8  ;;  %v5949_v55 = vmul.f32 %v9127_v20, %v10948_v34 }
0x14c8   : > { %v6417_v27 = vmax.f32 %v5949_v55, 1e-30 }
0x14c9   : > { %v6448_v37 = vpop.xlane.xlu1 %6447 }
0x14ca   : > { %6649 = vxpose.xlu0.b32.cont [2/16] (narrow) %v6442_v48, 8  ;;  %v6445_v18 = vpop.xlane.xlu0 %6444  ;;  %9128 = vlog2.f32 %v6417_v27 }
0x14ce   : > { %6650 = vxpose.xlu0.b32.cont [3/16] (narrow) %v6445_v18, 8 }
0x14d1   : > { %v6454_v24 = vpop.xlane.xlu1 %6453 }
0x14d2   : > { %6651 = vxpose.xlu0.b32.cont [4/16] (narrow) %v6448_v37, 8  ;;  %v6451_v22 = vpop.xlane.xlu0 %6450 }
0x14d4   : > { %v9129_v46 = vpop.eup %9128 }
0x14d5   : > { %v6419_v12 = vmul.f32 0.6931472, %v9129_v46 }
0x14d6   : > { %6652 = vxpose.xlu0.b32.cont [5/16] (narrow) %v6451_v22, 8 }
0x14d9   : > { %v6460_v62 = vpop.xlane.xlu1 %6459 }
0x14da   : > { %6653 = vxpose.xlu0.b32.cont [6/16] (narrow) %v6454_v24, 8  ;;  %v6457_v39 = vpop.xlane.xlu0 %6456 }
0x14de   : > { %6654 = vxpose.xlu0.b32.cont [7/16] (narrow) %v6457_v39, 8 }
0x14e1   : > { %v6466_v44 = vpop.xlane.xlu1 %6465 }
0x14e2   : > { %6655 = vxpose.xlu0.b32.cont [8/16] (narrow) %v6460_v62, 8  ;;  %v6463_v36 = vpop.xlane.xlu0 %6462 }
0x14e6   : > { %6656 = vxpose.xlu0.b32.cont [9/16] (narrow) %v6463_v36, 8 }
0x14e9   : > { %v6472_v21 = vpop.xlane.xlu1 %6471 }
0x14ea   : > { %6657 = vxpose.xlu0.b32.cont [10/16] (narrow) %v6466_v44, 8  ;;  %v6469_v10 = vpop.xlane.xlu0 %6468 }
0x14ee   : > { %6658 = vxpose.xlu0.b32.cont [11/16] (narrow) %v6469_v10, 8 }
0x14f1   : > { %v6478_v11 = vpop.xlane.xlu1 %6477 }
0x14f2   : > { %6659 = vxpose.xlu0.b32.cont [12/16] (narrow) %v6472_v21, 8  ;;  %v6475_v7 = vpop.xlane.xlu0 %6474 }
0x14f6   : > { %6660 = vxpose.xlu0.b32.cont [13/16] (narrow) %v6475_v7, 8 }
0x14f9   : > { %v6484_v13 = vpop.xlane.xlu1 %6483 }
0x14fa   : > { %6661 = vxpose.xlu0.b32.cont [14/16] (narrow) %v6478_v11, 8  ;;  %v6481_v23 = vpop.xlane.xlu0 %6480 }
0x14fe   : > { %6662 = vxpose.xlu0.b32.cont [15/16] (narrow) %v6481_v23, 8 }
0x1502   : > { %6663 = vxpose.xlu0.b32.end [16/16] (narrow) %v6484_v13, 8 }
0x1546   : > { %v6664_v6 = vpop.trf.xlu0 }
0x1547   : > { %v11039_v4 = vrot.slane %v6664_v6, %v10113_v28  ;;  %v8233_v30 = vpop.f32.mrb[104].mxu1 }
0x1548   : > { %v6695_v38 = vmul.f32 2.0, %v8233_v30  ;;  %v6599_v8 = vpop.f32.mrb[105].mxu1 }
0x1549   : > { %v6685_v15 = vadd.f32 %v11039_v4, %v10393_v53  ;;  %v6684_v49 = vadd.f32 %v11039_v4, %v10362_v40  ;;  %v6694_v33 = vmul.f32 2.0, %v6599_v8  ;;  %v6687_v42 = vadd.f32 %v11039_v4, %v10399_v41 }
0x154a   : > { %v6686_v53 = vadd.f32 %v11039_v4, %v10369_v54  ;;  %v6420_v40 = vsel %vm2095_vm3, %v6419_v12, -1e+30  ;;  %v6689_v24 = vadd.f32 %v11039_v4, %v10410_v63  ;;  %v6688_v21 = vadd.f32 %v11039_v4, %v10378_v19 }
0x154b   : > { %v6705_v56 = vsub.f32 %v6685_v15, %v6695_v38  ;;  %v6704_v14 = vsub.f32 %v6684_v49, %v6694_v33  ;;  %v8236_v34 = vpop.f32.mrb[106].mxu1  ;;  %v6691_v55 = vadd.f32 %v11039_v4, %v10418_v45  ;;  %v6690_v19 = vadd.f32 %v11039_v4, %v10386_v47 }
0x154c   : > { %v6697_v28 = vmul.f32 2.0, %v8236_v34  ;;  %v6609_v32 = vpop.f32.mrb[107].mxu1  ;;  %v6692_v45 = vadd.f32 %v11039_v4, %v10388_v9  ;;  %v6693_v47 = vadd.f32 %v11039_v4, %v10429_v26  ;;  %v6355_v4 = vsub.f32 0.0, %v9615_v17 }
0x154d   : > { %v6715_v43 = vmul.f32 -0.5, %v6705_v56  ;;  %v6714_v25 = vmul.f32 -0.5, %v6704_v14  ;;  %v6696_v29 = vmul.f32 2.0, %v6609_v32 }
0x154e   : > { %v6707_v5 = vsub.f32 %v6687_v42, %v6697_v28 }
0x154f   : > { %v6725_v51 = vadd.f32 -58.812065, %v6715_v43  ;;  %v8239_v31 = vpop.f32.mrb[108].mxu1  ;;  %v6724_v48 = vadd.f32 -58.812065, %v6714_v25  ;;  %v6706_v37 = vsub.f32 %v6686_v53, %v6696_v29 }
0x1550   : > { %v6619_v35 = vpop.f32.mrb[109].mxu1  ;;  %v6717_v18 = vmul.f32 -0.5, %v6707_v5  ;;  %v6699_v22 = vmul.f32 2.0, %v8239_v31 }
0x1551   : > { %v11051_v41 = vadd.f32 %v6725_v51, %v6420_v40  ;;  %v6698_v62 = vmul.f32 2.0, %v6619_v35  ;;  %v6716_v44 = vmul.f32 -0.5, %v6706_v37  ;;  %v6734_v50 = vadd.f32 %v6724_v48, %v6420_v40 }
0x1552   : > { %v6727_v54 = vadd.f32 -58.812065, %v6717_v18  ;;  %v6709_v10 = vsub.f32 %v6689_v24, %v6699_v22  ;;  %v6356_v48 = vmul.f32 1.442695, %v6355_v4  ;;  %v6335_v35 = vsub.f32 %v9665_v52, %v9615_v17 }
0x1553   : > { %v8242_v39 = vpop.f32.mrb[110].mxu1  ;;  %6746 = vmax.xlane.f32.xlu1 %v11051_v41  ;;  %v6708_v11 = vsub.f32 %v6688_v21, %v6698_v62  ;;  %v6726_v13 = vadd.f32 -58.812065, %v6716_v44  ;;  %v6336_v18 = vsub.f32 %v9668_v57, %v9615_v17 }
0x1554   : > { %v6629_v36 = vpop.f32.mrb[111].mxu1  ;;  %v6719_v16 = vmul.f32 -0.5, %v6709_v10  ;;  %v6701_v20 = vmul.f32 2.0, %v8242_v39  ;;  %v6737_v63 = vadd.f32 %v6727_v54, %v6420_v40  ;;  %9130 = vpow2.f32 %v6356_v48 }
0x1555   : > { %v6718_v27 = vmul.f32 -0.5, %v6708_v11  ;;  %v6700_v38 = vmul.f32 2.0, %v6629_v36  ;;  %v11060_v8 = vadd.f32 %v6726_v13, %v6420_v40  ;;  %v6346_v39 = vmul.f32 %v6336_v18, %v6336_v18 }
0x1556   : > { %v6729_v6 = vadd.f32 -58.812065, %v6719_v16  ;;  %v6711_v30 = vsub.f32 %v6691_v55, %v6701_v20  ;;  %v6337_v54 = vsub.f32 %v9675_v58, %v9615_v17  ;;  %v6339_v16 = vsub.f32 %v9681_v60, %v9615_v17 }
0x1557   : > { %v8245_v7 = vpop.f32.mrb[112].mxu1  ;;  %6744 = vmax.xlane.f32.xlu1 %v6734_v50  ;;  %v6728_v46 = vadd.f32 -58.812065, %v6718_v27  ;;  %v6710_v49 = vsub.f32 %v6690_v19, %v6700_v38  ;;  %v6340_v19 = vsub.f32 %v9684_v61, %v9615_v17  ;;  %v6341_v61 = vsub.f32 %v9697_v0, %v9615_v17 }
0x1558   : > { %v6639_v23 = vpop.f32.mrb[113].mxu1  ;;  %v6721_v15 = vmul.f32 -0.5, %v6711_v30  ;;  %v11065_v56 = vadd.f32 %v6729_v6, %v6420_v40  ;;  %v6703_v14 = vmul.f32 2.0, %v8245_v7  ;;  %v6338_v7 = vsub.f32 %v9678_v59, %v9615_v17 }
0x1559   : > { %v6702_v33 = vmul.f32 2.0, %v6639_v23  ;;  %v6720_v12 = vmul.f32 -0.5, %v6710_v49  ;;  %v11070_v28 = vadd.f32 %v6728_v46, %v6420_v40  ;;  %v6347_v11 = vmul.f32 %v6337_v54, %v6337_v54 }
0x155a   : > { %v6731_v34 = vadd.f32 -58.812065, %v6721_v15  ;;  %v6713_v43 = vsub.f32 %v6693_v47, %v6703_v14  ;;  %v6348_v55 = vmul.f32 %v6338_v7, %v6338_v7  ;;  %v6349_v46 = vmul.f32 %v6339_v16, %v6339_v16 }
0x155b   : > { %6750 = vmax.xlane.f32.xlu1 %v6737_v63  ;;  %v6712_v42 = vsub.f32 %v6692_v45, %v6702_v33  ;;  %v6730_v32 = vadd.f32 -58.812065, %v6720_v12  ;;  %v6350_v12 = vmul.f32 %v6340_v19, %v6340_v19  ;;  %v6351_v0 = vmul.f32 %v6341_v61, %v6341_v61 }
0x155c   : > { %v11075_v29 = vadd.f32 %v6731_v34, %v6420_v40  ;;  %v6723_v9 = vmul.f32 -0.5, %v6713_v43 }
0x155d   : > { %v6722_v25 = vmul.f32 -0.5, %v6712_v42  ;;  %v11078_v51 = vadd.f32 %v6730_v32, %v6420_v40 }
0x155e   : > { %v6733_v53 = vadd.f32 -58.812065, %v6723_v9  ;;  %v11101_v52 = vpop.eup %9130 }
0x155f   : > { %6748 = vmax.xlane.f32.xlu1 %v11060_v8  ;;  %v6732_v5 = vadd.f32 -58.812065, %v6722_v25  ;;  %v6359_v10 = vmul.f32 %v11101_v52, %v6346_v39  ;;  %v6362_v42 = vmul.f32 %v11101_v52, %v6349_v46  ;;  %v6363_v4 = vmul.f32 %v11101_v52, %v6350_v12 }
0x1560   : > { %v11084_v26 = vadd.f32 %v6733_v53, %v6420_v40  ;;  %v6342_v53 = vsub.f32 %v9700_v1, %v9615_v17  ;;  %v6343_v1 = vsub.f32 %v9703_v2, %v9615_v17  ;;  %v6364_v54 = vmul.f32 %v11101_v52, %v6351_v0 }
0x1561   : > { %v11081_v31 = vadd.f32 %v6732_v5, %v6420_v40  ;;  %v6345_v40 = vmul.f32 %v6335_v35, %v6335_v35  ;;  %v6369_v58 = vadd.f32 %v6359_v10, %v9615_v17  ;;  %v6372_v48 = vadd.f32 %v6362_v42, %v9615_v17 }
0x1562   : > { %v6344_v2 = vsub.f32 %v9706_v3, %v9615_v17  ;;  %v6374_v16 = vadd.f32 %v6364_v54, %v9615_v17 }
0x1563   : > { %6754 = vmax.xlane.f32.xlu1 %v11065_v56  ;;  %v6358_v57 = vmul.f32 %v11101_v52, %v6345_v40  ;;  %v6379_v30 = vmul.f32 -0.5, %v6369_v58 }
0x1565   : > { %v6368_v23 = vadd.f32 %v6358_v57, %v9615_v17  ;;  %v6389_v14 = vsel %vm1048_vm0, %v6379_v30, 0.0  ;;  %v6382_v57 = vmul.f32 -0.5, %v6372_v48  ;;  %v6354_v30 = vmul.f32 %v6344_v2, %v6344_v2 }
0x1567   : > { %6752 = vmax.xlane.f32.xlu1 %v11070_v28  ;;  %v6378_v6 = vmul.f32 -0.5, %v6368_v23  ;;  %v6353_v23 = vmul.f32 %v6343_v1, %v6343_v1 }
0x1569   : > { %v6388_v45 = vsel %vm1048_vm0, %v6378_v6, 0.0  ;;  %v6366_v3 = vmul.f32 %v11101_v52, %v6353_v23 }
0x156a   : > { %v6390_v43 = vadd.f32 %v6389_v14, %v6388_v45 }
0x156b   : > { %6758 = vmax.xlane.f32.xlu1 %v11075_v29  ;;  %v6376_v45 = vadd.f32 %v6366_v3, %v9615_v17 }
0x156f   : > { %6756 = vmax.xlane.f32.xlu1 %v11078_v51 }
0x1573   : > { %6760 = vmax.xlane.f32.xlu1 %v11081_v31 }
0x1577   : > { %6762 = vmax.xlane.f32.xlu1 %v11084_v26 }
0x15e0   : > { %v11092_v37 = vpop.xlane.xlu1 %6746 }
0x15e1   : > { %v6765_v22 = vsub.f32 %v11051_v41, %v11092_v37 }
0x15e3   : > { %v6776_v24 = vmul.f32 1.442695, %v6765_v22 }
0x15e4   : > { %v11096_v62 = vpop.xlane.xlu1 %6744 }
0x15e5   : > { %9132 = vpow2.f32 %v6776_v24  ;;  %v6764_v36 = vsub.f32 %v6734_v50, %v11096_v62 }
0x15e7   : > { %v6774_v44 = vmul.f32 1.442695, %v6764_v36  ;;  %v6352_v36 = vmul.f32 %v6342_v53, %v6342_v53 }
0x15e8   : > { %v11105_v21 = vpop.xlane.xlu1 %6750 }
0x15e9   : > { %9134 = vpow2.f32 %v6774_v44  ;;  %v6767_v41 = vsub.f32 %v6737_v63, %v11105_v21  ;;  %v6360_v63 = vmul.f32 %v11101_v52, %v6347_v11  ;;  %v6373_v44 = vadd.f32 %v6363_v4, %v9615_v17 }
0x15ea   : > { %v6365_v58 = vmul.f32 %v11101_v52, %v6352_v36 }
0x15eb   : > { %v6780_v50 = vmul.f32 1.442695, %v6767_v41  ;;  %v6370_v15 = vadd.f32 %v6360_v63, %v9615_v17 }
0x15ec   : > { %v11112_v13 = vpop.xlane.xlu1 %6748  ;;  %v6375_v19 = vadd.f32 %v6365_v58, %v9615_v17 }
0x15ed   : > { %9136 = vpow2.f32 %v6780_v50  ;;  %v6766_v20 = vsub.f32 %v11060_v8, %v11112_v13  ;;  %v6361_v8 = vmul.f32 %v11101_v52, %v6348_v55  ;;  %v6380_v32 = vmul.f32 -0.5, %v6370_v15 }
0x15ee   : > { %v6395_v55 = vsel %vm1048_vm0, %v6382_v57, 0.0  ;;  %v6385_v14 = vmul.f32 -0.5, %v6375_v19 }
0x15ef   : > { %v9133_v27 = vpop.eup %9132  ;;  %v6778_v59 = vmul.f32 1.442695, %v6766_v20  ;;  %v6371_v47 = vadd.f32 %v6361_v8, %v9615_v17  ;;  %v6391_v18 = vsel %vm1048_vm0, %v6380_v32, 0.0  ;;  %v6383_v20 = vmul.f32 -0.5, %v6373_v44 }
0x15f0   : > { %6796 = vadd.xlane.f32.xlu1 %v9133_v27  ;;  %v11119_v38 = vpop.xlane.xlu1 %6754  ;;  %v6392_v22 = vadd.f32 %v6391_v18, %v6390_v43 }
0x15f1   : > { %9138 = vpow2.f32 %v6778_v59  ;;  %v6769_v60 = vsub.f32 %v11065_v56, %v11119_v38  ;;  %v6381_v35 = vmul.f32 -0.5, %v6371_v47  ;;  %v6401_v47 = vsel %vm1048_vm0, %v6385_v14, 0.0 }
0x15f3   : > { %v9135_v49 = vpop.eup %9134  ;;  %v6784_v33 = vmul.f32 1.442695, %v6769_v60  ;;  %v6393_v10 = vsel %vm1048_vm0, %v6381_v35, 0.0  ;;  %v6384_v60 = vmul.f32 -0.5, %v6374_v16 }
0x15f4   : > { %6794 = vadd.xlane.f32.xlu1 %v9135_v49  ;;  %v11129_v34 = vpop.xlane.xlu1 %6752  ;;  %v6394_v41 = vadd.f32 %v6393_v10, %v6392_v22 }
0x15f5   : > { %9140 = vpow2.f32 %v6784_v33  ;;  %v6768_v56 = vsub.f32 %v11070_v28, %v11129_v34  ;;  %v6367_v33 = vmul.f32 %v11101_v52, %v6354_v30  ;;  %v6399_v61 = vsel %vm1048_vm0, %v6384_v60, 0.0 }
0x15f6   : > { %v6396_v63 = vadd.f32 %v6395_v55, %v6394_v41 }
0x15f7   : > { %v9137_v25 = vpop.eup %9136  ;;  %v6782_v9 = vmul.f32 1.442695, %v6768_v56  ;;  %v6386_v56 = vmul.f32 -0.5, %v6376_v45 }
0x15f8   : > { %6800 = vadd.xlane.f32.xlu1 %v9137_v25  ;;  %v11137_v5 = vpop.xlane.xlu1 %6758 }
0x15f9   : > { %9142 = vpow2.f32 %v6782_v9  ;;  %v6771_v28 = vsub.f32 %v11075_v29, %v11137_v5  ;;  %v6403_v52 = vsel %vm1048_vm0, %v6386_v56, 0.0 }
0x15fb   : > { %v9139_v24 = vpop.eup %9138  ;;  %v6788_v40 = vmul.f32 1.442695, %v6771_v28 }
0x15fc   : > { %6798 = vadd.xlane.f32.xlu1 %v9139_v24  ;;  %v11146_v39 = vpop.xlane.xlu1 %6756 }
0x15fd   : > { %9144 = vpow2.f32 %v6788_v40  ;;  %v6770_v29 = vsub.f32 %v11078_v51, %v11146_v39 }
0x15ff   : > { %v9141_v7 = vpop.eup %9140  ;;  %v6786_v11 = vmul.f32 1.442695, %v6770_v29 }
0x1600   : > { %6804 = vadd.xlane.f32.xlu1 %v9141_v7  ;;  %v11155_v50 = vpop.xlane.xlu1 %6760 }
0x1601   : > { %9146 = vpow2.f32 %v6786_v11  ;;  %v6772_v51 = vsub.f32 %v11081_v31, %v11155_v50  ;;  %v6397_v31 = vsel %vm1048_vm0, %v6383_v20, 0.0 }
0x1602   : > { %v6398_v8 = vadd.f32 %v6397_v31, %v6396_v63 }
0x1603   : > { %v9143_v27 = vpop.eup %9142  ;;  %v6790_v59 = vmul.f32 1.442695, %v6772_v51 }
0x1604   : > { %6802 = vadd.xlane.f32.xlu1 %v9143_v27  ;;  %v11164_v6 = vpop.xlane.xlu1 %6762  ;;  %v6400_v12 = vadd.f32 %v6399_v61, %v6398_v8 }
0x1605   : > { %9148 = vpow2.f32 %v6790_v59  ;;  %v6773_v46 = vsub.f32 %v11084_v26, %v11164_v6  ;;  %v6377_v26 = vadd.f32 %v6367_v33, %v9615_v17 }
0x1606   : > { %v6402_v32 = vadd.f32 %v6401_v47, %v6400_v12 }
0x1607   : > { %v9145_v15 = vpop.eup %9144  ;;  %v6792_v49 = vmul.f32 1.442695, %v6773_v46  ;;  %v6387_v25 = vmul.f32 -0.5, %v6377_v26 }
0x1608   : > { %6808 = vadd.xlane.f32.xlu1 %v9145_v15  ;;  %v6404_v9 = vadd.f32 %v6403_v52, %v6402_v32 }
0x1609   : > { %9150 = vpow2.f32 %v6792_v49  ;;  %v6405_v0 = vsel %vm1048_vm0, %v6387_v25, 0.0 }
0x160a   : > { %v6406_v4 = vadd.f32 %v6405_v0, %v6404_v9 }
0x160b   : > { %v9147_v42 = vpop.eup %9146 }
0x160c   : > { %6806 = vadd.xlane.f32.xlu1 %v9147_v42 }
0x160f   : > { %v9149_v43 = vpop.eup %9148 }
0x1610   : > { %6810 = vadd.xlane.f32.xlu1 %v9149_v43 }
0x1613   : > { %v9151_v53 = vpop.eup %9150 }
0x1614   : > { %6812 = vadd.xlane.f32.xlu1 %v9151_v53 }
0x1618   : > { %6407 = vadd.xlane.f32.xlu1 %v6406_v4 }
0x167d   : > { %v6797_v48 = vpop.xlane.xlu1 %6796 }
0x1681   : > { %v6795_v28 = vpop.xlane.xlu1 %6794 }
0x1682   : > { %9152 = vlog2.f32 %v6795_v28 }
0x1683   : > { %9154 = vlog2.f32 %v6797_v48 }
0x1685   : > { %v6801_v17 = vpop.xlane.xlu1 %6800 }
0x1689   : > { %v6799_v35 = vpop.xlane.xlu1 %6798 }
0x168a   : > { %9156 = vlog2.f32 %v6799_v35 }
0x168b   : > { %9158 = vlog2.f32 %v6801_v17 }
0x168c   : > { %v9153_v22 = vpop.eup %9152 }
0x168d   : > { %v6805_v18 = vpop.xlane.xlu1 %6804  ;;  %v9155_v24 = vpop.eup %9154  ;;  %v6815_v40 = vmul.f32 0.6931472, %v9153_v22 }
0x168e   : > { %9160 = vlog2.f32 %v6805_v18  ;;  %v6817_v36 = vmul.f32 0.6931472, %v9155_v24 }
0x168f   : > { %v6834_v44 = vadd.f32 %v6815_v40, %v11096_v62 }
0x1690   : > { %v6835_v41 = vadd.f32 %v6817_v36, %v11092_v37 }
0x1691   : > { %v6803_v1 = vpop.xlane.xlu1 %6802  ;;  %v6845_v11 = vsel %vm6844_vm7, %v6834_v44, 0.0 }
0x1692   : > { %9162 = vlog2.f32 %v6803_v1  ;;  %v6846_v16 = vsel %vm6844_vm7, %v6835_v41, 0.0 }
0x1693   : > { %v6847_v20 = vadd.f32 %v6846_v16, %v6845_v11 }
0x1694   : > { %v9157_v54 = vpop.eup %9156 }
0x1695   : > { %v6819_v29 = vmul.f32 0.6931472, %v9157_v54  ;;  %v6809_v57 = vpop.xlane.xlu1 %6808  ;;  %v9159_v10 = vpop.eup %9158 }
0x1696   : > { %9164 = vlog2.f32 %v6809_v57  ;;  %v6821_v2 = vmul.f32 0.6931472, %v9159_v10 }
0x1697   : > { %v6836_v7 = vadd.f32 %v6819_v29, %v11112_v13 }
0x1698   : > { %v9161_v58 = vpop.eup %9160  ;;  %v6837_v55 = vadd.f32 %v6821_v2, %v11105_v21 }
0x1699   : > { %v6807_v23 = vpop.xlane.xlu1 %6806  ;;  %v6848_v51 = vsel %vm6844_vm7, %v6836_v7, 0.0  ;;  %v6825_v13 = vmul.f32 0.6931472, %v9161_v58 }
0x169a   : > { %9166 = vlog2.f32 %v6807_v23  ;;  %v6849_v37 = vadd.f32 %v6848_v51, %v6847_v20  ;;  %v6850_v3 = vsel %vm6844_vm7, %v6837_v55, 0.0 }
0x169b   : > { %v6839_v31 = vadd.f32 %v6825_v13, %v11119_v38 }
0x169c   : > { %v9163_v62 = vpop.eup %9162  ;;  %v6851_v60 = vadd.f32 %v6850_v3, %v6849_v37 }
0x169d   : > { %v6823_v63 = vmul.f32 0.6931472, %v9163_v62  ;;  %v6811_v27 = vpop.xlane.xlu1 %6810  ;;  %v6854_v14 = vsel %vm6844_vm7, %v6839_v31, 0.0 }
0x169e   : > { %9168 = vlog2.f32 %v6811_v27 }
0x169f   : > { %v6838_v59 = vadd.f32 %v6823_v63, %v11129_v34 }
0x16a0   : > { %v9165_v30 = vpop.eup %9164 }
0x16a1   : > { %v6852_v19 = vsel %vm6844_vm7, %v6838_v59, 0.0  ;;  %v6813_v46 = vpop.xlane.xlu1 %6812  ;;  %v6829_v8 = vmul.f32 0.6931472, %v9165_v30 }
0x16a2   : > { %9170 = vlog2.f32 %v6813_v46  ;;  %v6853_v21 = vadd.f32 %v6852_v19, %v6851_v60 }
0x16a3   : > { %v6841_v34 = vadd.f32 %v6829_v8, %v11137_v5 }
0x16a4   : > { %v9167_v15 = vpop.eup %9166  ;;  %v6855_v42 = vadd.f32 %v6854_v14, %v6853_v21 }
0x16a5   : > { %v6827_v49 = vmul.f32 0.6931472, %v9167_v15  ;;  %v6408_v33 = vpop.xlane.xlu1 %6407  ;;  %v6858_v43 = vsel %vm6844_vm7, %v6841_v34, 0.0 }
0x16a6   : > { %v6409_v45 = vrot.slane %v6408_v33, 4 }
0x16a7   : > { %v6840_v61 = vadd.f32 %v6827_v49, %v11146_v39 }
0x16a8   : > { %v9169_v12 = vpop.eup %9168  ;;  %v6410_v26 = vadd.f32 %v6409_v45, %v6408_v33 }
0x16a9   : > { %v6856_v56 = vsel %vm6844_vm7, %v6840_v61, 0.0  ;;  %v6831_v47 = vmul.f32 0.6931472, %v9169_v12 }
0x16aa   : > { %v6857_v32 = vadd.f32 %v6856_v56, %v6855_v42  ;;  %v6411_v38 = vrot.slane %v6410_v26, 2 }
0x16ab   : > { %v6842_v25 = vadd.f32 %v6831_v47, %v11155_v50 }
0x16ac   : > { %v9171_v52 = vpop.eup %9170  ;;  %v6412_v9 = vadd.f32 %v6411_v38, %v6410_v26  ;;  %v6859_v53 = vadd.f32 %v6858_v43, %v6857_v32 }
0x16ad   : > { %v6833_v0 = vmul.f32 0.6931472, %v9171_v52  ;;  %v6860_v5 = vsel %vm6844_vm7, %v6842_v25, 0.0 }
0x16ae   : > { %v6413_v4 = vrot.slane %v6412_v9, 1  ;;  %v6861_v28 = vadd.f32 %v6860_v5, %v6859_v53 }
0x16af   : > { %v6843_v39 = vadd.f32 %v6833_v0, %v11164_v6 }
0x16b0   : > { %v6414_v48 = vadd.f32 %v6413_v4, %v6412_v9 }
0x16b1   : > { %v6862_v17 = vsel %vm6844_vm7, %v6843_v39, 0.0 }
0x16b2   : > { %8663 = vpush %v6414_v48  ;;  %v6863_v35 = vadd.f32 %v6862_v17, %v6861_v28 }
0x16b4   : > { %6864 = vadd.xlane.f32.xlu1 %v6863_v35 }
0x16e3   : > { %s8664_s15 = spop %8663 }
0x16e4   : > { %s6416_s30 = sadd.f32 -4704.9653, %s8664_s15 }
0x1741   : > { %v6865_v18 = vpop.xlane.xlu1 %6864 }
0x1742   : > { %v6866_v22 = vrot.slane %v6865_v18, 4 }
0x1744   : > { %v6867_v50 = vadd.f32 %v6866_v22, %v6865_v18 }
0x1746   : > { %v6868_v24 = vrot.slane %v6867_v50, 2 }
0x1748   : > { %v6869_v40 = vadd.f32 %v6868_v24, %v6867_v50 }
0x174a   : > { %v6870_v1 = vrot.slane %v6869_v40, 1 }
0x174c   : > { %v6871_v36 = vadd.f32 %v6870_v1, %v6869_v40 }
0x174e   : > { %8665 = vpush %v6871_v36 }
0x177f   : > { %s8666_s16 = spop %8665 }
0x1780   : > { %s6873_s28 = ssub.f32 %s6416_s30, %s8666_s16 }
0x1782   : > { %v6874_v6 = vstv %s6873_s28 }
0x1783   : > { %6875 = vst.msk [vmem:[%s345_s19] sm:$0x1] %vm1061_vm6, %v6874_v6 }
0x1784 PF: > { %s11237_s29 = sld [smem:[#allocation7_spill]] }
0x178a   : > { %s26_s14 = sadd.s32 1, %s11237_s29  }
0x178b   : > { %p23_p9 = scmp.ge.s32.totalorder %s26_s14, 4  }
0x178d   :  { %25 = sbr.rel (!%p23_p9) target bundleno = 18 (0x12), region = 121 }

</bundles_post_ra>
